<compile_context>
chip_gen: v5e
topology: v5e:2x2
jax: 0.10.0
libtpu: 0.0.40
codegen_flags: <defaults>
</compile_context>

<pallas_src>
import functools
import math

import jax
import jax.numpy as jnp
from jax.experimental import pallas as pl
from jax.experimental.pallas import tpu as pltpu


# ----------------------------------------------------------------------------
# Fused 4-layer MLP kernel.  Grid is 1-D over layer-4 N tiles; everything else
# (x, W1..W3, biases) is VMEM-resident (constant index_map -> DMA'd once).
# ----------------------------------------------------------------------------
def _netg_fused_kernel(x_ref, w1_ref, b1_ref, w2_ref, b2_ref,
                       w3_ref, b3_ref, w4_ref, s4_ref, b4_ref, o_ref):
    # Layers 1-3 recomputed every grid step: ~4.5 MFLOP, free relative to the
    # W4 HBM stream, and keeps the N axis embarrassingly parallel.
    h = x_ref[...].astype(jnp.bfloat16)

    h = jnp.dot(h, w1_ref[...], preferred_element_type=jnp.float32) + b1_ref[...]
    h = jnp.maximum(h, 0.0).astype(jnp.bfloat16)          # ReLU (f32) -> bf16 for MXU

    h = jnp.dot(h, w2_ref[...], preferred_element_type=jnp.float32) + b2_ref[...]
    h = jnp.maximum(h, 0.0).astype(jnp.bfloat16)

    h = jnp.dot(h, w3_ref[...], preferred_element_type=jnp.float32) + b3_ref[...]
    h = jnp.maximum(h, 0.0).astype(jnp.bfloat16)

    # Layer 4: int8 weight tile, dequantized via per-output-channel scale
    # folded into the f32 epilogue.  int8 values are exact in bf16, so the
    # cast loses nothing; the MXU dot accumulates in f32.
    w4 = w4_ref[0].astype(jnp.bfloat16)                    # (N3, tn4)
    y = jnp.dot(h, w4, preferred_element_type=jnp.float32)
    y = y * s4_ref[...] + b4_ref[...]                      # dequant + bias (f32)
    o_ref[...] = jnp.tanh(y).astype(o_ref.dtype)           # Tanh epilogue in f32


def _pick_n_tile(n4):
    """Layer-4 output tile width.

    v7x (2 TensorCores): 768 -> 4 grid steps, 2 per core, so each core
    double-buffers its W4 DMA against compute.  v5e/v6e (1 TC): 1536 -> 2
    steps; smaller tiles only add per-step overhead on a serial grid."""
    try:
        kind = jax.devices()[0].device_kind.lower()
    except Exception:  # pragma: no cover - defensive
        kind = ""
    is_v7 = ("v7" in kind) or ("7x" in kind)
    prefer = (768,) if is_v7 else (1536,)
    for t in prefer + (1536, 1024, 768, 512, 384, 256, 128):
        if n4 % t == 0:
            return t
    return n4


# ----------------------------------------------------------------------------
# Parameters
# ----------------------------------------------------------------------------
def init_params(key, nz, ngf):
    """PyTorch-Linear-style init: U(-1/sqrt(fan_in), 1/sqrt(fan_in)).

    Returns raw f32 weights stored (in_features, out_features) and f32 biases
    (the PyTorch-equivalent model).  Use pack_params() to build the
    kernel-ready (bf16 / int8+scale, pre-tiled) parameter set."""
    dims = [nz, ngf * 4, ngf * 16, ngf * 16 * 4, ngf * 64 * 3]
    params = []
    for i in range(4):
        fan_in, fan_out = dims[i], dims[i + 1]
        key, kw, kb = jax.random.split(key, 3)
        bound = 1.0 / math.sqrt(fan_in)
        w = jax.random.uniform(kw, (fan_in, fan_out), jnp.float32, -bound, bound)
        b = jax.random.uniform(kb, (fan_out,), jnp.float32, -bound, bound)
        params.append((w, b))
    return params


def pack_params(raw_params):
    """One-time prep (hoisted out of the per-call path):
       * W1-3 -> bf16, biases -> (1, N) f32.
       * W4   -> per-output-channel int8 + f32 scale, pre-tiled into a
                 contiguous (num_tiles, N3, tn4) layout so each grid step's
                 weight DMA is one contiguous block."""
    (w1, b1), (w2, b2), (w3, b3), (w4, b4) = raw_params
    N3, N4 = w4.shape
    tn4 = _pick_n_tile(N4)
    num_tiles = N4 // tn4

    # Symmetric per-output-channel int8 quantization of W4.
    absmax = jnp.max(jnp.abs(w4), axis=0)                       # (N4,)
    s4 = (jnp.maximum(absmax, 1e-12) / 127.0).astype(jnp.float32)
    w4_q = jnp.clip(jnp.round(w4 / s4), -127.0, 127.0).astype(jnp.int8)
    # (N3, N4) -> (num_tiles, N3, tn4) with tile j == columns [j*tn4,(j+1)*tn4)
    w4_tiled = w4_q.reshape(N3, num_tiles, tn4).transpose(1, 0, 2)

    return dict(
        w1=w1.astype(jnp.bfloat16), b1=b1.reshape(1, -1).astype(jnp.float32),
        w2=w2.astype(jnp.bfloat16), b2=b2.reshape(1, -1).astype(jnp.float32),
        w3=w3.astype(jnp.bfloat16), b3=b3.reshape(1, -1).astype(jnp.float32),
        w4=w4_tiled,                                            # int8, pre-tiled
        s4=s4.reshape(1, N4),                                   # f32 dequant scale
        b4=b4.reshape(1, N4).astype(jnp.float32),
    )


# ----------------------------------------------------------------------------
# Fused forward: x2d (M, nz) f32 -> (M, N4) f32
# ----------------------------------------------------------------------------
def netg_fused(x2d, p):
    M, K1 = x2d.shape
    w1, w2, w3 = p["w1"], p["w2"], p["w3"]
    N1, N2, N3 = w1.shape[1], w2.shape[1], w3.shape[1]
    num_tiles, n3_chk, tn4 = p["w4"].shape
    N4 = num_tiles * tn4
    assert w1.shape[0] == K1 and w2.shape[0] == N1
    assert w3.shape[0] == N2 and n3_chk == N3

    resident = lambda j: (0, 0)      # same block every step -> DMA'd once

    # Advisory cost estimate (layers 1-3 recomputed per grid step).
    flops = 2 * M * (K1 * N1 + N1 * N2 + N2 * N3) * num_tiles + 2 * M * N3 * N4
    bytes_accessed = (x2d.size * 4
                      + (w1.size + w2.size + w3.size) * 2      # bf16 weights
                      + p["w4"].size                           # int8 W4
                      + (N1 + N2 + N3 + 2 * N4) * 4            # biases + scale
                      + M * N4 * 4)                            # output

    return pl.pallas_call(
        _netg_fused_kernel,
        out_shape=jax.ShapeDtypeStruct((M, N4), jnp.float32),
        grid_spec=pltpu.PrefetchScalarGridSpec(
            num_scalar_prefetch=0,
            grid=(num_tiles,),
            in_specs=[
                pl.BlockSpec((M, K1), resident),                # x
                pl.BlockSpec((K1, N1), resident),               # W1 (bf16)
                pl.BlockSpec((1, N1), resident),                # b1
                pl.BlockSpec((N1, N2), resident),               # W2 (bf16)
                pl.BlockSpec((1, N2), resident),                # b2
                pl.BlockSpec((N2, N3), resident),               # W3 (bf16)
                pl.BlockSpec((1, N3), resident),                # b3
                pl.BlockSpec((1, N3, tn4), lambda j: (j, 0, 0)),  # W4 tile (int8, contiguous)
                pl.BlockSpec((1, tn4), lambda j: (0, j)),       # s4 tile (dequant scale)
                pl.BlockSpec((1, tn4), lambda j: (0, j)),       # b4 tile
            ],
            out_specs=pl.BlockSpec((M, tn4), lambda j: (0, j)),
        ),
        compiler_params=pltpu.CompilerParams(
            # v7x: the N axis is independent across steps -> megacore-shardable.
            # If profiling shows the 2nd TC idle, switch to pltpu.CORE_PARALLEL.
            dimension_semantics=("parallel",),
        ),
        cost_estimate=pl.CostEstimate(
            flops=int(flops),
            transcendentals=int(M * N4),
            bytes_accessed=int(bytes_accessed)),
    )(x2d, w1, p["b1"], w2, p["b2"], w3, p["b3"], p["w4"], p["s4"], p["b4"])


@functools.partial(jax.jit, static_argnames=("nz",))
def netG_forward(x, packed, nz):
    # x.view(-1, nz)
    h = x.reshape(-1, nz).astype(jnp.float32)
    # TODO(synk): Dropout(0.5) layers are treated as identity (eval mode);
    # training-mode random dropout masks are not reproduced.
    y = netg_fused(h, packed)
    # x.view(-1, 3, 64, 64)  (NCHW)
    return y.reshape(-1, 3, 64, 64)


# ----------------------------------------------------------------------------
if __name__ == "__main__":
    # Small config consistent with the module: nz=32, ngf=16, nc=3.
    # Final layer width = ngf*64*3 = 3072; batch=8 rows -> 8*3072 elements
    # reshape to (2, 3, 64, 64), exactly as torch's .view would.
    nz, nc, ngf = 32, 3, 16
    batch = 8

    key = jax.random.PRNGKey(0)
    k_in, k_par = jax.random.split(key)
    x = jax.random.normal(k_in, (batch, nz, 1, 1), jnp.float32)  # GAN noise shape

    raw_params = init_params(k_par, nz, ngf)
    packed = pack_params(raw_params)

    out = netG_forward(x, packed, nz=nz)
    jax.block_until_ready(out)

    # Sanity: shape + tanh range.
    assert out.shape == (2, 3, 64, 64), out.shape
    assert bool(jnp.all(jnp.abs(out) <= 1.0 + 1e-6))

    # --- Reference 1: same math as the kernel (bf16 activations/weights,
    #     int8 W4 dequantized with the per-channel scale) -> tight tolerance.
    num_tiles, N3, tn4 = packed["w4"].shape
    w4_q_full = packed["w4"].transpose(1, 0, 2).reshape(N3, num_tiles * tn4)
    ref = x.reshape(-1, nz).astype(jnp.float32)
    for w, b in ((packed["w1"], packed["b1"]),
                 (packed["w2"], packed["b2"]),
                 (packed["w3"], packed["b3"])):
        ref = jnp.dot(ref.astype(jnp.bfloat16), w,
                      preferred_element_type=jnp.float32) + b
        ref = jnp.maximum(ref, 0.0)
    ref = jnp.dot(ref.astype(jnp.bfloat16), w4_q_full.astype(jnp.bfloat16),
                  preferred_element_type=jnp.float32) * packed["s4"] + packed["b4"]
    ref = jnp.tanh(ref).reshape(-1, 3, 64, 64)
    assert bool(jnp.allclose(out, ref, atol=5e-3, rtol=5e-3)), (
        float(jnp.max(jnp.abs(out - ref))))

    # --- Reference 2: full-f32 PyTorch-equivalent model (detects bf16/int8
    #     drift vs the true model) -> loose tolerance.
    r32 = x.reshape(-1, nz).astype(jnp.float32)
    for i, (w, b) in enumerate(raw_params):
        r32 = jnp.dot(r32, w) + b
        r32 = jnp.tanh(r32) if i == 3 else jnp.maximum(r32, 0.0)
    r32 = r32.reshape(-1, 3, 64, 64)
    assert bool(jnp.allclose(out, r32, atol=3e-2, rtol=0.0)), (
        float(jnp.max(jnp.abs(out - r32))))

    print("KERNEL_OK")
</pallas_src>

<mosaic_0001>
module attributes {stable_mosaic.version = 11 : i64} {
  func.func @_netg_fused_kernel(%arg0: i32, %arg1: memref<8x32xf32, #tpu.memory_space<vmem>>, %arg2: memref<32x64xbf16, #tpu.memory_space<vmem>>, %arg3: memref<1x64xf32, #tpu.memory_space<vmem>>, %arg4: memref<64x256xbf16, #tpu.memory_space<vmem>>, %arg5: memref<1x256xf32, #tpu.memory_space<vmem>>, %arg6: memref<256x1024xbf16, #tpu.memory_space<vmem>>, %arg7: memref<1x1024xf32, #tpu.memory_space<vmem>>, %arg8: memref<1x1024x1536xi8, #tpu.memory_space<vmem>>, %arg9: memref<1x1536xf32, #tpu.memory_space<vmem>>, %arg10: memref<1x1536xf32, #tpu.memory_space<vmem>>, %arg11: memref<8x1536xf32, #tpu.memory_space<vmem>>) attributes {dimension_semantics = [#tpu.dimension_semantics<parallel>], iteration_bounds = array<i64: 2>, scalar_prefetch = 0 : i64, scratch_operands = 0 : i64, tpu.core_type = #tpu.core_type<tc>, window_params = [{pipeline_mode = #tpu.pipeline_mode<synchronous>, transform_indices = @transform_0, window_bounds = array<i64: 8, 32>}, {pipeline_mode = #tpu.pipeline_mode<synchronous>, transform_indices = @transform_1, window_bounds = array<i64: 32, 64>}, {pipeline_mode = #tpu.pipeline_mode<synchronous>, transform_indices = @transform_2, window_bounds = array<i64: 1, 64>}, {pipeline_mode = #tpu.pipeline_mode<synchronous>, transform_indices = @transform_3, window_bounds = array<i64: 64, 256>}, {pipeline_mode = #tpu.pipeline_mode<synchronous>, transform_indices = @transform_4, window_bounds = array<i64: 1, 256>}, {pipeline_mode = #tpu.pipeline_mode<synchronous>, transform_indices = @transform_5, window_bounds = array<i64: 256, 1024>}, {pipeline_mode = #tpu.pipeline_mode<synchronous>, transform_indices = @transform_6, window_bounds = array<i64: 1, 1024>}, {transform_indices = @transform_7, window_bounds = array<i64: 1, 1024, 1536>}, {transform_indices = @transform_8, window_bounds = array<i64: 1, 1536>}, {transform_indices = @transform_9, window_bounds = array<i64: 1, 1536>}, {transform_indices = @transform_10, window_bounds = array<i64: 8, 1536>}]} {
    %c0 = arith.constant 0 : index
    %c0_0 = arith.constant 0 : index
    %0 = vector.load %arg1[%c0, %c0_0] : memref<8x32xf32, #tpu.memory_space<vmem>>, vector<8x32xf32>
    %1 = arith.truncf %0 : vector<8x32xf32> to vector<8x32xbf16>
    %c0_1 = arith.constant 0 : index
    %c0_2 = arith.constant 0 : index
    %2 = vector.load %arg2[%c0_1, %c0_2] : memref<32x64xbf16, #tpu.memory_space<vmem>>, vector<32x64xbf16>
    %cst = arith.constant dense<0.000000e+00> : vector<8x64xf32>
    %3 = tpu.matmul %1, %2, %cst {dimension_numbers = #tpu.dot_dimension_numbers<[1], [0], [0], [1], [0, 0, 1, 1], [], []>} : vector<8x32xbf16>, vector<32x64xbf16>, vector<8x64xf32> -> vector<8x64xf32>
    %c0_3 = arith.constant 0 : index
    %c0_4 = arith.constant 0 : index
    %4 = vector.load %arg3[%c0_3, %c0_4] : memref<1x64xf32, #tpu.memory_space<vmem>>, vector<1x64xf32>
    %5 = vector.broadcast %4 : vector<1x64xf32> to vector<8x64xf32>
    %6 = arith.addf %3, %5 : vector<8x64xf32>
    %cst_5 = arith.constant 0.000000e+00 : f32
    %7 = vector.broadcast %cst_5 : f32 to vector<8x64xf32>
    %8 = arith.maximumf %6, %7 : vector<8x64xf32>
    %9 = arith.truncf %8 : vector<8x64xf32> to vector<8x64xbf16>
    %c0_6 = arith.constant 0 : index
    %c0_7 = arith.constant 0 : index
    %10 = vector.load %arg4[%c0_6, %c0_7] : memref<64x256xbf16, #tpu.memory_space<vmem>>, vector<64x256xbf16>
    %cst_8 = arith.constant dense<0.000000e+00> : vector<8x256xf32>
    %11 = tpu.matmul %9, %10, %cst_8 {dimension_numbers = #tpu.dot_dimension_numbers<[1], [0], [0], [1], [0, 0, 1, 1], [], []>} : vector<8x64xbf16>, vector<64x256xbf16>, vector<8x256xf32> -> vector<8x256xf32>
    %c0_9 = arith.constant 0 : index
    %c0_10 = arith.constant 0 : index
    %12 = vector.load %arg5[%c0_9, %c0_10] : memref<1x256xf32, #tpu.memory_space<vmem>>, vector<1x256xf32>
    %13 = vector.broadcast %12 : vector<1x256xf32> to vector<8x256xf32>
    %14 = arith.addf %11, %13 : vector<8x256xf32>
    %cst_11 = arith.constant 0.000000e+00 : f32
    %15 = vector.broadcast %cst_11 : f32 to vector<8x256xf32>
    %16 = arith.maximumf %14, %15 : vector<8x256xf32>
    %17 = arith.truncf %16 : vector<8x256xf32> to vector<8x256xbf16>
    %c0_12 = arith.constant 0 : index
    %c0_13 = arith.constant 0 : index
    %18 = vector.load %arg6[%c0_12, %c0_13] : memref<256x1024xbf16, #tpu.memory_space<vmem>>, vector<256x1024xbf16>
    %cst_14 = arith.constant dense<0.000000e+00> : vector<8x1024xf32>
    %19 = tpu.matmul %17, %18, %cst_14 {dimension_numbers = #tpu.dot_dimension_numbers<[1], [0], [0], [1], [0, 0, 1, 1], [], []>} : vector<8x256xbf16>, vector<256x1024xbf16>, vector<8x1024xf32> -> vector<8x1024xf32>
    %c0_15 = arith.constant 0 : index
    %c0_16 = arith.constant 0 : index
    %20 = vector.load %arg7[%c0_15, %c0_16] : memref<1x1024xf32, #tpu.memory_space<vmem>>, vector<1x1024xf32>
    %21 = vector.broadcast %20 : vector<1x1024xf32> to vector<8x1024xf32>
    %22 = arith.addf %19, %21 : vector<8x1024xf32>
    %cst_17 = arith.constant 0.000000e+00 : f32
    %23 = vector.broadcast %cst_17 : f32 to vector<8x1024xf32>
    %24 = arith.maximumf %22, %23 : vector<8x1024xf32>
    %25 = arith.truncf %24 : vector<8x1024xf32> to vector<8x1024xbf16>
    %c0_18 = arith.constant 0 : index
    %c0_19 = arith.constant 0 : index
    %c0_20 = arith.constant 0 : index
    %26 = vector.load %arg8[%c0_18, %c0_19, %c0_20] : memref<1x1024x1536xi8, #tpu.memory_space<vmem>>, vector<1x1024x1536xi8>
    %27 = vector.shape_cast %26 : vector<1x1024x1536xi8> to vector<1024x1536xi8>
    %28 = arith.sitofp %27 : vector<1024x1536xi8> to vector<1024x1536xbf16>
    %cst_21 = arith.constant dense<0.000000e+00> : vector<8x1536xf32>
    %29 = tpu.matmul %25, %28, %cst_21 {dimension_numbers = #tpu.dot_dimension_numbers<[1], [0], [0], [1], [0, 0, 1, 1], [], []>} : vector<8x1024xbf16>, vector<1024x1536xbf16>, vector<8x1536xf32> -> vector<8x1536xf32>
    %c0_22 = arith.constant 0 : index
    %c0_23 = arith.constant 0 : index
    %30 = vector.load %arg9[%c0_22, %c0_23] : memref<1x1536xf32, #tpu.memory_space<vmem>>, vector<1x1536xf32>
    %31 = vector.broadcast %30 : vector<1x1536xf32> to vector<8x1536xf32>
    %32 = arith.mulf %29, %31 : vector<8x1536xf32>
    %c0_24 = arith.constant 0 : index
    %c0_25 = arith.constant 0 : index
    %33 = vector.load %arg10[%c0_24, %c0_25] : memref<1x1536xf32, #tpu.memory_space<vmem>>, vector<1x1536xf32>
    %34 = vector.broadcast %33 : vector<1x1536xf32> to vector<8x1536xf32>
    %35 = arith.addf %32, %34 : vector<8x1536xf32>
    %36 = math.tanh %35 : vector<8x1536xf32>
    %c0_26 = arith.constant 0 : index
    %c0_27 = arith.constant 0 : index
    %37 = vector.load %arg11[%c0_26, %c0_27] : memref<8x1536xf32, #tpu.memory_space<vmem>>, vector<8x1536xf32>
    tpu.vector_store %arg11[%c0_26, %c0_27], %36 {strides = array<i32>} : memref<8x1536xf32, #tpu.memory_space<vmem>>, vector<8x1536xf32>,
    return
  }
  func.func @transform_0(%arg0: i32) -> (i32, i32) {
    %c0_i32 = arith.constant 0 : i32
    %c0_i32_0 = arith.constant 0 : i32
    %c0_i32_1 = arith.constant 0 : i32
    return %c0_i32, %c0_i32_0 : i32, i32
  }
  func.func @transform_1(%arg0: i32) -> (i32, i32) {
    %c0_i32 = arith.constant 0 : i32
    %c0_i32_0 = arith.constant 0 : i32
    %c0_i32_1 = arith.constant 0 : i32
    return %c0_i32, %c0_i32_0 : i32, i32
  }
  func.func @transform_2(%arg0: i32) -> (i32, i32) {
    %c0_i32 = arith.constant 0 : i32
    %c0_i32_0 = arith.constant 0 : i32
    %c0_i32_1 = arith.constant 0 : i32
    return %c0_i32, %c0_i32_0 : i32, i32
  }
  func.func @transform_3(%arg0: i32) -> (i32, i32) {
    %c0_i32 = arith.constant 0 : i32
    %c0_i32_0 = arith.constant 0 : i32
    %c0_i32_1 = arith.constant 0 : i32
    return %c0_i32, %c0_i32_0 : i32, i32
  }
  func.func @transform_4(%arg0: i32) -> (i32, i32) {
    %c0_i32 = arith.constant 0 : i32
    %c0_i32_0 = arith.constant 0 : i32
    %c0_i32_1 = arith.constant 0 : i32
    return %c0_i32, %c0_i32_0 : i32, i32
  }
  func.func @transform_5(%arg0: i32) -> (i32, i32) {
    %c0_i32 = arith.constant 0 : i32
    %c0_i32_0 = arith.constant 0 : i32
    %c0_i32_1 = arith.constant 0 : i32
    return %c0_i32, %c0_i32_0 : i32, i32
  }
  func.func @transform_6(%arg0: i32) -> (i32, i32) {
    %c0_i32 = arith.constant 0 : i32
    %c0_i32_0 = arith.constant 0 : i32
    %c0_i32_1 = arith.constant 0 : i32
    return %c0_i32, %c0_i32_0 : i32, i32
  }
  func.func @transform_7(%arg0: i32) -> (i32, i32, i32) {
    %c0_i32 = arith.constant 0 : i32
    %c0_i32_0 = arith.constant 0 : i32
    %c0_i32_1 = arith.constant 0 : i32
    return %arg0, %c0_i32, %c0_i32_0 : i32, i32, i32
  }
  func.func @transform_8(%arg0: i32) -> (i32, i32) {
    %c0_i32 = arith.constant 0 : i32
    %c0_i32_0 = arith.constant 0 : i32
    return %c0_i32, %arg0 : i32, i32
  }
  func.func @transform_9(%arg0: i32) -> (i32, i32) {
    %c0_i32 = arith.constant 0 : i32
    %c0_i32_0 = arith.constant 0 : i32
    return %c0_i32, %arg0 : i32, i32
  }
  func.func @transform_10(%arg0: i32) -> (i32, i32) {
    %c0_i32 = arith.constant 0 : i32
    %c0_i32_0 = arith.constant 0 : i32
    return %c0_i32, %arg0 : i32, i32
  }
}

</mosaic_0001>

<bundles_post_ra>
// kernel: netG_forward.1
= control target key start
LH: loop header
LB: loop body
LE: loop exit
PB: predicated region body
PF: predicated region fallthrough
CT: control target
= control target key end

     0   :  { %s10485_s0 = inlined_call_operand.hbm [shape: f32[8,32], index: 0, kind: input, shape index: {}]   ;;  %s10486_s1 = inlined_call_operand.hbm [shape: bf16[32,64], index: 1, kind: input, shape index: {}]   ;;  %s10487_s2 = inlined_call_operand.hbm [shape: f32[1,64], index: 2, kind: input, shape index: {}]   ;;  %s10488_s3 = inlined_call_operand.hbm [shape: bf16[64,256], index: 3, kind: input, shape index: {}]   ;;  %s10489_s4 = inlined_call_operand.hbm [shape: f32[1,256], index: 4, kind: input, shape index: {}]   ;;  %s10490_s5 = inlined_call_operand.hbm [shape: bf16[256,1024], index: 5, kind: input, shape index: {}]   ;;  %s10491_s6 = inlined_call_operand.hbm [shape: f32[1,1024], index: 6, kind: input, shape index: {}]   ;;  %s10492_s7 = inlined_call_operand.hbm [shape: s8[2,1024,1536], index: 7, kind: input, shape index: {}]   ;;  %s10493_s8 = inlined_call_operand.hbm [shape: f32[1,3072], index: 8, kind: input, shape index: {}]   ;;  %s10494_s9 = inlined_call_operand.hbm [shape: f32[1,3072], index: 9, kind: input, shape index: {}]   ;;  %s10495_s10 = inlined_call_operand.vmem [shape: f32[8,3072], index: 10, kind: output, shape index: {}]  }
   0x1   :  { %10497 = sst [smem:[#allocation26_spill]] %s10485_s0 }
   0x2   :  { %10498 = sst [smem:[#allocation27_spill]] %s10486_s1 }
   0x3   :  { %10499 = sst [smem:[#allocation28_spill]] %s10488_s3 }
   0x4   :  { %10500 = sst [smem:[#allocation29_spill]] %s10490_s5 }
   0x5   :  { %15 = vsyncpa [#allocation3], 0 }
   0x6   :  { %16 = vsyncpa [#allocation5], 0 }
   0x7   :  { %17 = vsyncpa [#allocation8], 0 }
   0x8   :  { %18 = vsyncpa [#allocation11], 0 }
   0x9   :  { %19 = vsyncpa [#allocation14], 0 }
   0xa   :  { %21 = vsyncpa [#allocation14 + $0x1], 0 }
   0xb   :  { %22 = vsyncpa [#allocation17], 0 }
   0xc   :  { %24 = vsyncpa [#allocation17 + $0x1], 0  ;;  %s8771_s13 = smov 0   ;;  %s8773_s14 = smov 0  }
   0xd   :  { %s8775_s15 = smov 0   ;;  %s8777_s16 = smov 0  }
   0xe LB: > { %10501 = sst [smem:[#allocation24_spill]] %s8695_s15  ;;  %s8795_s20 = sadd.s32 4294967295, %s8699_s16   ;;  %s8699_s16 = sphi %s8777_s16, %s10517_s16   ;;  %s8695_s15 = sphi %s8775_s15, %s10516_s15   ;;  %s8691_s14 = sphi %s8773_s14, %s10515_s14   ;;  %s8687_s13 = sphi %s8771_s13, %s10514_s13  }
   0xf   : > { %s10502_s1 = sld [smem:[#allocation27_spill]]  ;;  %p7465_p0 = scmp.ge.s32.totalorder %s8699_s16, 1 }
  0x10   : > { %p198_p1 = scmp.eq.s32.totalorder %s8795_s20, 0  ;;  %p286_p2 = scmp.lt.s32.totalorder %s8699_s16, 3 }
  0x11   : > { %s8701_s22 = smov [#allocation4]   ;;  %s10504_s3 = sld [smem:[#allocation28_spill]] }
  0x12   : > { %p8800_p3 = pnand %p7465_p0, %p286_p2  ;;  %s311_s23 = sshll.u32 %s8701_s22, 4  ;;  %s312_s23 = int_to_ptr.vmem [resolvable:$true] %s311_s23 }
  0x13   : > { %s8702_s28 = smov [#allocation7]   ;;  %s8703_s30 = smov 64  }
  0x14   : > { %p8219_p4 = pneg %p8800_p3  ;;  %s337_s29 = sshll.u32 %s8702_s28, 4  ;;  %s338_s29 = int_to_ptr.vmem [resolvable:$true] %s337_s29 }
  0x15   : > { %s309_s19 = sshll.u32 %s10502_s1, 4  ;;  %s8704_s11 = smov 4   ;;  %s310_s19 = int_to_ptr.hbm [resolvable:$true] %s309_s19 }
  0x16   : > { %p8811_p5 = pnand %p8219_p4, %p198_p1  ;;  %s8705_s12 = smov 128  }
  0x17   : > { %s335_s26 = sshll.u32 %s10504_s3, 4  ;;  %s8706_s17 = smov 8   ;;  %s336_s26 = int_to_ptr.hbm [resolvable:$true] %s335_s26 }
  0x18   : > { %8225 = dma.hbm_to_vmem [thread:$0]  (!%p8811_p5), %s310_s19, 256, %s312_s23, [#allocation5], %s8703_s30, %s8703_s30, %s8704_s11  }
  0x19   : > { %8231 = dma.hbm_to_vmem [thread:$0]  (!%p8811_p5), %s336_s26, 1024, %s338_s29, [#allocation8], %s8705_s12, %s8705_s12, %s8706_s17  }
  0x1a   : > { %s10506_s5 = sld [smem:[#allocation29_spill]]  ;;  %s8707_s25 = smov [#allocation10]  }
  0x1b   : > { %s363_s19 = sshll.u32 %s8707_s25, 4  ;;  %s8708_s23 = smov 512   ;;  %s364_s19 = int_to_ptr.vmem [resolvable:$true] %s363_s19 }
  0x1c   : > { %s8709_s28 = smov 32   ;;  %s8825_s30 = sadd.s32 1, %s8699_s16  }
  0x1d   : > { %s181_s26 = ssub.s32 %s8699_s16, %s8825_s30  ;;  %s184_s29 = sadd.s32 1, %s8695_s15 }
  0x1e   : > { %p182_p6 = scmp.eq.s32.totalorder %s181_s26, 0  ;;  %p191_p7 = scmp.ne.s32.totalorder %s8695_s15, %s8691_s14 }
  0x1f   : > { %p192_p8 = scmp.eq.s32.totalorder %s8699_s16, 0  ;;  %p197_p9 = scmp.ne.s32.totalorder %s8691_s14, %s8687_s13 }
  0x20   : > { %s361_s24 = sshll.u32 %s10506_s5, 4  ;;  %p8258_p12 = scmp.lt.s32.totalorder %s8699_s16, 2  ;;  %s362_s24 = int_to_ptr.hbm [resolvable:$true] %s361_s24 }
  0x21   : > { %8237 = dma.hbm_to_vmem [thread:$0]  (!%p8811_p5), %s362_s24, 16384, %s364_s19, [#allocation11], %s8708_s23, %s8708_s23, %s8709_s28  }
  0x22   : > { %s8836_s11 = scalar_select %p182_p6, %s8695_s15, %s184_s29  }
  0x23   : > { %p193_p10 = por %p192_p8, %p191_p7  ;;  %p8840_p11 = por %p198_p1, %p197_p9 }
  0x24   : > { %10507 = sst [smem:[#allocation25_spill]] %s8836_s11  ;;  %s389_s17 = sand.u32 1, %s8699_s16  }
  0x25   : > { %s8847_s18 = sand.u32 1, %s8695_s15   ;;  %p8850_p13 = pnand %p8258_p12, %p193_p10 }
  0x26   : > { %s8179_s22 = smul.u32 3072, %s8847_s18  ;;  %s8858_s1 = scalar_lea.sflag [#allocation14], %s389_s17 }
  0x27   : > { %s8180_s13 = smul.u32 3072, %s8699_s16  ;;  %p8439_p2 = pneg %p8850_p13 }
  0x28   : > { %s393_s28 = scalar_lea.vmem [#allocation13], %s8179_s22  ;;  %s8442_s22 = scalar_lea.hbm %s10492_s7, 6144 }
  0x29   : > { %s398_s23 = scalar_lea.hbm %s10492_s7, %s8180_s13  ;;  %s401_s26 = sshll.u32 %s393_s28, 4  ;;  %s402_s26 = int_to_ptr.vmem [resolvable:$true] %s401_s26 }
  0x2a   : > { %s399_s29 = sshll.u32 %s398_s23, 4  ;;  %s400_s29 = int_to_ptr.hbm [resolvable:$true] %s399_s29 }
  0x2b   : > { %s8435_s3 = sshra.s32 %s400_s29, 4  ;;  %s8436_s3 = int_to_ptr.hbm [resolvable:$true] %s8435_s3 }
  0x2c   : > { %s8437_s5 = scalar_lea.hbm %s8436_s3, 3072  ;;  %p8443_p7 = scmp.lt.s32.totalorder %s8436_s3, %s10492_s7 }
  0x2d   : > { %p8438_p0 = scmp.ne.s32.totalorder %s8436_s3, %s8437_s5  ;;  %p8444_p8 = scmp.lt.s32.totalorder %s8442_s22, %s8437_s5 }
  0x2f   : > { %p8440_p4 = pnand %p8439_p2, %p8438_p0  ;;  %p8445_p9 = por %p8444_p8, %p8443_p7 }
  0x31   : > { %p8441_p6 = pneg %p8440_p4 }
  0x33   : > { %p8446_p10 = pnand %p8445_p9, %p8441_p6 }
  0x35   : > { %8449 = shalt.err (!%p8446_p10)
}
  0x36   : > { %s8710_s17 = smov 1536   ;;  %s8711_s23 = smov 96  }
  0x37   : > { %8244 = dma.hbm_to_vmem [thread:$0]  (!%p8850_p13), %s400_s29, 49152, %s402_s26, %s8858_s1, %s8710_s17, %s8710_s17, %s8711_s23  }
  0x38   : > { %s10510_s0 = sld [smem:[#allocation26_spill]]  ;;  %s8712_s25 = smov [#allocation2]  }
  0x39   : > { %s300_s13 = sshll.u32 %s8712_s25, 4  ;;  %s324_s22 = sshll.u32 %s10487_s2, 4  ;;  %s301_s13 = int_to_ptr.vmem [resolvable:$true] %s300_s13  ;;  %s325_s22 = int_to_ptr.hbm [resolvable:$true] %s324_s22 }
  0x3a   : > { %s8713_s19 = smov [#allocation6]   ;;  %s350_s15 = sshll.u32 %s10489_s4, 4  ;;  %s351_s15 = int_to_ptr.hbm [resolvable:$true] %s350_s15 }
  0x3b   : > { %s326_s26 = sshll.u32 %s8713_s19, 4  ;;  %s376_s25 = sshll.u32 %s10491_s6, 4  ;;  %s327_s26 = int_to_ptr.vmem [resolvable:$true] %s326_s26  ;;  %s377_s25 = int_to_ptr.hbm [resolvable:$true] %s376_s25 }
  0x3c   : > { %8228 = dma.hbm_to_vmem [thread:$0]  (!%p8811_p5), %s325_s22, 16, %s327_s26, [#allocation5]  }
  0x3d   : > { %s8714_s3 = smov [#allocation9]   ;;  %s8181_s19 = smul.u32 12, %s8847_s18 }
  0x3e   : > { %s298_s11 = sshll.u32 %s10510_s0, 4  ;;  %s416_s29 = smul.u32 12, %s8699_s16  ;;  %s299_s11 = int_to_ptr.hbm [resolvable:$true] %s298_s11 }
  0x3f   : > { %8222 = dma.hbm_to_vmem [thread:$0]  (!%p8811_p5), %s299_s11, 128, %s301_s13, [#allocation3]  }
  0x40   : > { %s352_s11 = sshll.u32 %s8714_s3, 4  ;;  %s8715_s13 = smov [#allocation12]   ;;  %s353_s11 = int_to_ptr.vmem [resolvable:$true] %s352_s11 }
  0x41   : > { %8234 = dma.hbm_to_vmem [thread:$0]  (!%p8811_p5), %s351_s15, 32, %s353_s11, [#allocation8]  }
  0x42   : > { %s378_s5 = sshll.u32 %s8715_s13, 4  ;;  %s419_s26 = scalar_lea.hbm %s10493_s8, %s416_s29  ;;  %s379_s5 = int_to_ptr.vmem [resolvable:$true] %s378_s5 }
  0x43   : > { %8240 = dma.hbm_to_vmem [thread:$0]  (!%p8811_p5), %s377_s25, 128, %s379_s5, [#allocation11]  }
  0x44   : > { %s421_s23 = sshll.u32 %s419_s26, 4  ;;  %s415_s28 = scalar_lea.vmem [#allocation15], %s8181_s19  ;;  %s422_s23 = int_to_ptr.hbm [resolvable:$true] %s421_s23 }
  0x45   : > { %s423_s0 = sshll.u32 %s415_s28, 4  ;;  %s8585_s3 = sshra.s32 %s422_s23, 4  ;;  %s424_s0 = int_to_ptr.vmem [resolvable:$true] %s423_s0  ;;  %s8586_s3 = int_to_ptr.hbm [resolvable:$true] %s8585_s3 }
  0x46   : > { %s8587_s15 = scalar_lea.hbm %s8586_s3, 12  ;;  %s8592_s25 = scalar_lea.hbm %s10493_s8, 24 }
  0x47   : > { %p8588_p12 = scmp.ne.s32.totalorder %s8586_s3, %s8587_s15  ;;  %p8593_p5 = scmp.lt.s32.totalorder %s8586_s3, %s10493_s8 }
  0x48   : > { %p8594_p6 = scmp.lt.s32.totalorder %s8592_s25, %s8587_s15 }
  0x49   : > { %p8590_p0 = pnand %p8588_p12, %p8439_p2 }
  0x4a   : > { %p8595_p7 = por %p8594_p6, %p8593_p5 }
  0x4b   : > { %p8591_p4 = pneg %p8590_p0 }
  0x4d   : > { %p8596_p8 = pnand %p8595_p7, %p8591_p4 }
  0x4f   : > { %8599 = shalt.err (!%p8596_p8)
}
  0x50   : > { %8247 = dma.hbm_to_vmem [thread:$0]  (!%p8850_p13), %s422_s23, 192, %s424_s0, %s8858_s1  }
  0x51   : > { %s438_s22 = scalar_lea.hbm %s10494_s9, %s416_s29  ;;  %s434_s26 = scalar_lea.vmem [#allocation16], %s8181_s19 }
  0x52   : > { %s442_s28 = sshll.u32 %s434_s26, 4  ;;  %s440_s16 = sshll.u32 %s438_s22, 4  ;;  %s443_s28 = int_to_ptr.vmem [resolvable:$true] %s442_s28  ;;  %s441_s16 = int_to_ptr.hbm [resolvable:$true] %s440_s16 }
  0x53   : > { %s431_s3 = scalar_lea.sflag [#allocation17], %s8847_s18  ;;  %s8615_s15 = sshra.s32 %s441_s16, 4  ;;  %s8616_s15 = int_to_ptr.hbm [resolvable:$true] %s8615_s15 }
  0x54   : > { %s8617_s27 = scalar_lea.hbm %s8616_s15, 12  ;;  %s8622_s1 = scalar_lea.hbm %s10494_s9, 24 }
  0x55   : > { %p8618_p9 = scmp.ne.s32.totalorder %s8616_s15, %s8617_s27  ;;  %p8623_p0 = scmp.lt.s32.totalorder %s8616_s15, %s10494_s9 }
  0x56   : > { %p8624_p4 = scmp.lt.s32.totalorder %s8622_s1, %s8617_s27 }
  0x57   : > { %p8620_p10 = pnand %p8618_p9, %p8439_p2 }
  0x58   : > { %p8625_p5 = por %p8624_p4, %p8623_p0 }
  0x59   : > { %p8621_p12 = pneg %p8620_p10 }
  0x5b   : > { %p8626_p6 = pnand %p8625_p5, %p8621_p12 }
  0x5d   : > { %8629 = shalt.err (!%p8626_p6)
}
  0x5e   : > { %8250 = dma.hbm_to_vmem [thread:$0]  (!%p8850_p13), %s441_s16, 192, %s443_s28, %s431_s3  }
  0x5f   : > { %451 = sbr.rel (%p8800_p3) target bundleno = 1599 (0x63f), region = 60 }
  0x64   : > { %8662 = dma.done.wait (%p198_p1), [#allocation3], 128  }
  0x65   : > { %8664 = vsyncadd (%p198_p1), [#allocation3], 4294967168 }
  0x66   : > { %8666 = dma.done.wait (%p198_p1), [#allocation5], 272  }
  0x67   : > { %8668 = vsyncadd (%p198_p1), [#allocation5], 4294967024 }
  0x68   : > { %8670 = dma.done.wait (%p198_p1), [#allocation8], 1056  }
  0x69   : > { %8672 = vsyncadd (%p198_p1), [#allocation8], 4294966240 }
  0x6a   : > { %8674 = dma.done.wait (%p198_p1), [#allocation11], 16512  }
  0x6b   : > { %8676 = vsyncadd (%p198_p1), [#allocation11], 4294950784  ;;  %s488_s21 = sand.u32 1, %s8795_s20   ;;  %s490_s18 = sand.u32 1, %s8691_s14  }
  0x6c   : > { %s8183_s24 = smul.u32 3072, %s490_s18  ;;  %s489_s19 = scalar_lea.sflag [#allocation14], %s488_s21 }
  0x6e   : > { %s8946_s11 = scalar_lea.vmem [#allocation13], %s8183_s24 }
  0x6f   : > { %8678 = dma.done.wait (%p8840_p11), %s489_s19, 49344  }
  0x70   : > { %8680 = vsyncadd (%p8840_p11), %s489_s19, 4294917952  ;;  %s8184_s13 = smul.u32 12, %s490_s18  ;;  %s509_s17 = scalar_lea.sflag [#allocation17], %s490_s18 }
  0x72   : > { %s8952_s5 = scalar_lea.vmem [#allocation15], %s8184_s13  ;;  %s8954_s22 = scalar_lea.vmem [#allocation16], %s8184_s13 }
  0x73   : > { %8682 = dma.done.wait (%p8840_p11), %s509_s17, 192  }
  0x74   : > { %8684 = vsyncadd (%p8840_p11), %s509_s17, 4294967104  ;;  %v8042_v0 = vld [vmem:[#allocation4 + $0x8] sm:$0xff]  ;;  %v8041_v1 = vld [vmem:[#allocation4] sm:$0xff]  ;;  %vm591_vm0 = vcmask 261120   ;;  %vm664_vm1 = vcmask 523264   ;;  %s562_s12 = smul.u32 12, %s8795_s20 }
  0x75   : > { %v569_v2 = vld [vmem:[#allocation2] sm:$0xff]  ;;  %v7519_v3 = vld [vmem:[#allocation7 + $0x30] sm:$0xf]  ;;  %v8050_v4 = vld [vmem:[#allocation7 + $0x34] sm:$0xf0]  ;;  %601 = vmatpush.bf16.msra.mxu0 %v8042_v0 }
  0x76   : > { %v8049_v5 = vld [vmem:[#allocation7 + $0x34] sm:$0xf]  ;;  %v7520_v6 = vor.u32 %v8050_v4, %v7519_v3  ;;  %v7521_v7 = vld [vmem:[#allocation7 + $0x38] sm:$0xf0]  ;;  %v7511_v8 = vld [vmem:[#allocation7 + $0x20] sm:$0xf]  ;;  %v570_v14 = vpack.c.bf16 %v569_v2, %v569_v2 }
  0x77   : > { %v8048_v9 = vld [vmem:[#allocation7 + $0x24] sm:$0xf0]  ;;  %v7524_v10 = vor.u32 %v8049_v5, %v7521_v7  ;;  %v8047_v11 = vld [vmem:[#allocation7 + $0x24] sm:$0xf]  ;;  %v7513_v12 = vld [vmem:[#allocation7 + $0x28] sm:$0xf0] }
  0x78   : > { %672 = vmatpush.bf16.msra.mxu1 %v7520_v6  ;;  %v7512_v13 = vor.u32 %v8048_v9, %v7511_v8  ;;  %v7516_v15 = vor.u32 %v8047_v11, %v7513_v12  ;;  %v7503_v16 = vld [vmem:[#allocation7 + $0x10] sm:$0xf]  ;;  %v8046_v17 = vld [vmem:[#allocation7 + $0x14] sm:$0xf0]  ;;  %v8045_v18 = vld [vmem:[#allocation7 + $0x14] sm:$0xf] }
  0x79   : > { %685 = vmatpush.bf16.msra.mxu2 %v7524_v10  ;;  %602 = vmatpush.bf16.msra.mxu0 %v8041_v1  ;;  %v7504_v19 = vor.u32 %v8046_v17, %v7503_v16  ;;  %v7505_v20 = vld [vmem:[#allocation7 + $0x18] sm:$0xf0]  ;;  %v7495_v22 = vld [vmem:[#allocation7] sm:$0xf]  ;;  %v8044_v23 = vld [vmem:[#allocation7 + $0x4] sm:$0xf0] }
  0x7a   : > { %v7508_v21 = vor.u32 %v8045_v18, %v7505_v20  ;;  %v8043_v24 = vld [vmem:[#allocation7 + $0x4] sm:$0xf]  ;;  %v7496_v25 = vor.u32 %v8044_v23, %v7495_v22  ;;  %v7497_v26 = vld [vmem:[#allocation7 + $0x8] sm:$0xf0]  ;;  %p9595_p1 = scmp.lt.s32.totalorder %s562_s12, 23 }
  0x7b   : > { %v7500_v27 = vor.u32 %v8043_v24, %v7497_v26  ;;  %v7753_v28 = vld [vmem:[#allocation10 + $0x1c0] sm:$0xf]  ;;  %v8107_v30 = vld [vmem:[#allocation10 + $0x1c4] sm:$0xf] }
  0x7c   : > { %673 = vmatpush.bf16.msra.mxu1 %v7512_v13  ;;  %7492 = vmatmul.msk.bf16.vlgmr.msra.gmra.mxu0 %vm591_vm0, %v570_v14  ;;  %v8111_v29 = vld [vmem:[#allocation10 + $0x1dc] sm:$0xf0]  ;;  %v7755_v32 = vld [vmem:[#allocation10 + $0x1e0] sm:$0xf0]  ;;  %s10519_s12 = smov (!%p9595_p1, %s562_s12), 23 }
  0x7d   : > { %686 = vmatpush.bf16.msra.mxu2 %v7516_v15  ;;  %v7754_v31 = vor.u32 %v8111_v29, %v7753_v28  ;;  %v7721_v33 = vld [vmem:[#allocation10 + $0x180] sm:$0xf]  ;;  %v7758_v35 = vor.u32 %v8107_v30, %v7755_v32  ;;  %v8099_v36 = vld [vmem:[#allocation10 + $0x184] sm:$0xf]  ;;  %s7483_s20 = sshll.u32 %s10519_s12, 3 }
  0x7e   : > { %v8103_v34 = vld [vmem:[#allocation10 + $0x19c] sm:$0xf0]  ;;  %v7723_v37 = vld [vmem:[#allocation10 + $0x1a0] sm:$0xf0]  ;;  %s9629_s3 = scalar_lea.vmem %s10495_s10, %s7483_s20 }
  0x7f   : > { %v8009_v38 = vld [vmem:[#allocation10 + $0x3c0] sm:$0xf]  ;;  %1484 = vmatpush.bf16.msra.mxu3 %v7754_v31  ;;  %v7722_v39 = vor.u32 %v8103_v34, %v7721_v33  ;;  %v8171_v41 = vld [vmem:[#allocation10 + $0x3c4] sm:$0xf]  ;;  %v7726_v43 = vor.u32 %v8099_v36, %v7723_v37  ;;  %v8313_v36 = vld [vmem:[#allocation6] ss:$0 sm:$0xff] }
  0x80   : > { %674 = vmatpush.bf16.msra.mxu1 %v7504_v19  ;;  %v8175_v40 = vld [vmem:[#allocation10 + $0x3dc] sm:$0xf0]  ;;  %v8011_v42 = vld [vmem:[#allocation10 + $0x3e0] sm:$0xf0] }
  0x81   : > { %687 = vmatpush.bf16.msra.mxu2 %v7508_v21  ;;  %v8010_v44 = vor.u32 %v8175_v40, %v8009_v38  ;;  %v8014_v45 = vor.u32 %v8171_v41, %v8011_v42  ;;  %v7689_v46 = vld [vmem:[#allocation10 + $0x140] sm:$0xf]  ;;  %v8091_v48 = vld [vmem:[#allocation10 + $0x144] sm:$0xf] }
  0x82   : > { %v8095_v47 = vld [vmem:[#allocation10 + $0x15c] sm:$0xf0]  ;;  %v7691_v49 = vld [vmem:[#allocation10 + $0x160] sm:$0xf0] }
  0x83   : > { %v7977_v50 = vld [vmem:[#allocation10 + $0x380] sm:$0xf]  ;;  %1497 = vmatpush.bf16.msrb.mxu0 %v8010_v44  ;;  %v8163_v53 = vld [vmem:[#allocation10 + $0x384] sm:$0xf]  ;;  %1485 = vmatpush.bf16.msra.mxu3 %v7722_v39  ;;  %v7690_v55 = vor.u32 %v8095_v47, %v7689_v46  ;;  %v7694_v59 = vor.u32 %v8091_v48, %v7691_v49 }
  0x84   : > { %675 = vmatpush.bf16.msra.mxu1 %v7496_v25  ;;  %v8167_v51 = vld [vmem:[#allocation10 + $0x39c] sm:$0xf0]  ;;  %v7979_v54 = vld [vmem:[#allocation10 + $0x3a0] sm:$0xf0] }
  0x85   : > { %688 = vmatpush.bf16.msra.mxu2 %v7500_v27  ;;  %v7978_v52 = vor.u32 %v8167_v51, %v7977_v50  ;;  %v7982_v56 = vor.u32 %v8163_v53, %v7979_v54  ;;  %v7657_v57 = vld [vmem:[#allocation10 + $0x100] sm:$0xf]  ;;  %v8155_v62 = vld [vmem:[#allocation10 + $0x344] sm:$0xf]  ;;  %v8112_v54 = vld [vmem:[#allocation10 + $0x1e4] sm:$0xf0] }
  0x86   : > { %v8087_v58 = vld [vmem:[#allocation10 + $0x11c] sm:$0xf0]  ;;  %v8083_v63 = vld [vmem:[#allocation10 + $0x104] sm:$0xf] }
  0x87   : > { %v7945_v60 = vld [vmem:[#allocation10 + $0x340] sm:$0xf]  ;;  %v7659_v0 = vld [vmem:[#allocation10 + $0x120] sm:$0xf0]  ;;  %1498 = vmatpush.bf16.msrb.mxu0 %v7978_v52  ;;  %1486 = vmatpush.bf16.msra.mxu3 %v7690_v55  ;;  %v7658_v5 = vor.u32 %v8087_v58, %v7657_v57  ;;  %v7761_v52 = vld [vmem:[#allocation10 + $0x1c8] sm:$0xf] }
  0x88   : > { %1510 = vmatpush.bf16.msrb.mxu1 %v7758_v35  ;;  %v8159_v61 = vld [vmem:[#allocation10 + $0x35c] sm:$0xf0]  ;;  %v7947_v1 = vld [vmem:[#allocation10 + $0x360] sm:$0xf0]  ;;  %v7662_v9 = vor.u32 %v8083_v63, %v7659_v0  ;;  %v8108_v55 = vld [vmem:[#allocation10 + $0x1cc] sm:$0xf] }
  0x89   : > { %1523 = vmatpush.bf16.msrb.mxu2 %v8014_v45  ;;  %v7946_v2 = vor.u32 %v8159_v61, %v7945_v60  ;;  %v7950_v3 = vor.u32 %v8155_v62, %v7947_v1  ;;  %v7913_v4 = vld [vmem:[#allocation10 + $0x300] sm:$0xf]  ;;  %v8147_v7 = vld [vmem:[#allocation10 + $0x304] sm:$0xf]  ;;  %v8017_v0 = vld [vmem:[#allocation10 + $0x3c8] sm:$0xf] }
  0x8a   : > { %v8151_v6 = vld [vmem:[#allocation10 + $0x31c] sm:$0xf0]  ;;  %v7915_v8 = vld [vmem:[#allocation10 + $0x320] sm:$0xf0] }
  0x8b   : > { %v7625_v10 = vld [vmem:[#allocation10 + $0xc0] sm:$0xf]  ;;  %v8075_v12 = vld [vmem:[#allocation10 + $0xc4] sm:$0xf]  ;;  %1499 = vmatpush.bf16.msrb.mxu0 %v7946_v2  ;;  %v7914_v14 = vor.u32 %v8151_v6, %v7913_v4  ;;  %v7918_v15 = vor.u32 %v8147_v7, %v7915_v8  ;;  %1487 = vmatpush.bf16.msra.mxu3 %v7658_v5  ;;  %v8172_v4 = vld [vmem:[#allocation10 + $0x3cc] sm:$0xf]  ;;  %v7762_v7 = vor.u32 %v8112_v54, %v7761_v52 }
  0x8c   : > { %1511 = vmatpush.bf16.msrb.mxu1 %v7726_v43  ;;  %v8079_v11 = vld [vmem:[#allocation10 + $0xdc] sm:$0xf0]  ;;  %v7627_v13 = vld [vmem:[#allocation10 + $0xe0] sm:$0xf0]  ;;  %v8019_v5 = vld [vmem:[#allocation10 + $0x3e8] sm:$0xf0] }
  0x8d   : > { %1524 = vmatpush.bf16.msrb.mxu2 %v7982_v56  ;;  %v7881_v16 = vld [vmem:[#allocation10 + $0x2c0] sm:$0xf]  ;;  %v7626_v17 = vor.u32 %v8079_v11, %v7625_v10  ;;  %v8139_v19 = vld [vmem:[#allocation10 + $0x2c4] sm:$0xf]  ;;  %v7630_v21 = vor.u32 %v8075_v12, %v7627_v13  ;;  %v7763_v56 = vld [vmem:[#allocation10 + $0x1e8] sm:$0xf0] }
  0x8e   : > { %v8143_v18 = vld [vmem:[#allocation10 + $0x2dc] sm:$0xf0]  ;;  %v7883_v20 = vld [vmem:[#allocation10 + $0x2e0] sm:$0xf0]  ;;  %v7766_v8 = vor.u32 %v8108_v55, %v7763_v56  ;;  %v8104_v10 = vld [vmem:[#allocation10 + $0x1a4] sm:$0xf0] }
  0x8f   : > { %v7593_v22 = vld [vmem:[#allocation10 + $0x80] sm:$0xf]  ;;  %v8067_v24 = vld [vmem:[#allocation10 + $0x84] sm:$0xf]  ;;  %1500 = vmatpush.bf16.msrb.mxu0 %v7914_v14  ;;  %v7882_v26 = vor.u32 %v8143_v18, %v7881_v16  ;;  %v7886_v27 = vor.u32 %v8139_v19, %v7883_v20  ;;  %1488 = vmatpush.bf16.msra.mxu3 %v7626_v17  ;;  %v8100_v11 = vld [vmem:[#allocation10 + $0x18c] sm:$0xf]  ;;  %v8022_v16 = vor.u32 %v8172_v4, %v8019_v5 }
  0x90   : > { %1512 = vmatpush.bf16.msrb.mxu1 %v7694_v59  ;;  %v8071_v23 = vld [vmem:[#allocation10 + $0x9c] sm:$0xf0]  ;;  %v7595_v25 = vld [vmem:[#allocation10 + $0xa0] sm:$0xf0]  ;;  %v7731_v12 = vld [vmem:[#allocation10 + $0x1a8] sm:$0xf0] }
  0x91   : > { %1525 = vmatpush.bf16.msrb.mxu2 %v7950_v3  ;;  %v7849_v28 = vld [vmem:[#allocation10 + $0x280] sm:$0xf]  ;;  %v7594_v29 = vor.u32 %v8071_v23, %v7593_v22  ;;  %v8131_v31 = vld [vmem:[#allocation10 + $0x284] sm:$0xf]  ;;  %v7598_v33 = vor.u32 %v8067_v24, %v7595_v25  ;;  %v8176_v3 = vld [vmem:[#allocation10 + $0x3e4] sm:$0xf0]  ;;  %v7734_v23 = vor.u32 %v8100_v11, %v7731_v12 }
  0x92   : > { %v8135_v30 = vld [vmem:[#allocation10 + $0x29c] sm:$0xf0]  ;;  %v7851_v32 = vld [vmem:[#allocation10 + $0x2a0] sm:$0xf0]  ;;  %v7985_v17 = vld [vmem:[#allocation10 + $0x388] sm:$0xf] }
  0x93   : > { %v7561_v34 = vld [vmem:[#allocation10 + $0x40] sm:$0xf]  ;;  %v8059_v37 = vld [vmem:[#allocation10 + $0x44] sm:$0xf]  ;;  %1501 = vmatpush.bf16.msrb.mxu0 %v7882_v26  ;;  %v7850_v39 = vor.u32 %v8135_v30, %v7849_v28  ;;  %v7854_v40 = vor.u32 %v8131_v31, %v7851_v32  ;;  %1489 = vmatpush.bf16.msra.mxu3 %v7594_v29  ;;  %v8168_v19 = vld [vmem:[#allocation10 + $0x3a4] sm:$0xf0] }
  0x94   : > { %1513 = vmatpush.bf16.msrb.mxu1 %v7662_v9  ;;  %v8063_v35 = vld [vmem:[#allocation10 + $0x5c] sm:$0xf0]  ;;  %v7563_v38 = vld [vmem:[#allocation10 + $0x60] sm:$0xf0]  ;;  %v7729_v9 = vld [vmem:[#allocation10 + $0x188] sm:$0xf]  ;;  %v7986_v28 = vor.u32 %v8168_v19, %v7985_v17 }
  0x95   : > { %1526 = vmatpush.bf16.msrb.mxu2 %v7918_v15  ;;  %v7817_v41 = vld [vmem:[#allocation10 + $0x240] sm:$0xf]  ;;  %v7562_v42 = vor.u32 %v8063_v35, %v7561_v34  ;;  %v8123_v46 = vld [vmem:[#allocation10 + $0x244] sm:$0xf]  ;;  %v7566_v49 = vor.u32 %v8059_v37, %v7563_v38  ;;  %v8018_v15 = vor.u32 %v8176_v3, %v8017_v0  ;;  %v8164_v20 = vld [vmem:[#allocation10 + $0x38c] sm:$0xf]  ;;  %v7730_v22 = vor.u32 %v8104_v10, %v7729_v9 }
  0x96   : > { %v7529_v43 = vld [vmem:[#allocation10] sm:$0xf]  ;;  %v7819_v47 = vld [vmem:[#allocation10 + $0x260] sm:$0xf0]  ;;  %v7697_v24 = vld [vmem:[#allocation10 + $0x148] sm:$0xf] }
  0x97   : > { %v8055_v44 = vld [vmem:[#allocation10 + $0x1c] sm:$0xf0]  ;;  %v8051_v50 = vld [vmem:[#allocation10 + $0x4] sm:$0xf]  ;;  %1502 = vmatpush.bf16.msrb.mxu0 %v7850_v39  ;;  %v7822_v58 = vor.u32 %v8123_v46, %v7819_v47  ;;  %1490 = vmatpush.bf16.msra.mxu3 %v7562_v42  ;;  %v8096_v25 = vld [vmem:[#allocation10 + $0x164] sm:$0xf0] }
  0x98   : > { %1514 = vmatpush.bf16.msrb.mxu1 %v7630_v21  ;;  %v8127_v45 = vld [vmem:[#allocation10 + $0x25c] sm:$0xf0]  ;;  %v7531_v51 = vld [vmem:[#allocation10 + $0x20] sm:$0xf0]  ;;  %v7530_v1 = vor.u32 %v8055_v44, %v7529_v43  ;;  %v7987_v21 = vld [vmem:[#allocation10 + $0x3a8] sm:$0xf0]  ;;  %v7698_v34 = vor.u32 %v8096_v25, %v7697_v24 }
  0x99   : > { %1527 = vmatpush.bf16.msrb.mxu2 %v7886_v27  ;;  %v7818_v57 = vor.u32 %v8127_v45, %v7817_v41  ;;  %v7785_v59 = vld [vmem:[#allocation10 + $0x200] sm:$0xf]  ;;  %v8115_v61 = vld [vmem:[#allocation10 + $0x204] sm:$0xf]  ;;  %v7534_v2 = vor.u32 %v8051_v50, %v7531_v51  ;;  %v8092_v26 = vld [vmem:[#allocation10 + $0x14c] sm:$0xf]  ;;  %v7990_v29 = vor.u32 %v8164_v20, %v7987_v21 }
  0x9a   : > { %v8119_v60 = vld [vmem:[#allocation10 + $0x21c] sm:$0xf0]  ;;  %v7787_v63 = vld [vmem:[#allocation10 + $0x220] sm:$0xf0]  ;;  %v7699_v27 = vld [vmem:[#allocation10 + $0x168] sm:$0xf0] }
  0x9b   : > { %1503 = vmatpush.bf16.msrb.mxu0 %v7818_v57  ;;  %v7786_v13 = vor.u32 %v8119_v60, %v7785_v59  ;;  %v7790_v14 = vor.u32 %v8115_v61, %v7787_v63  ;;  %1491 = vmatpush.bf16.msra.mxu3 %v7530_v1  ;;  %v7953_v30 = vld [vmem:[#allocation10 + $0x348] sm:$0xf]  ;;  %v8156_v32 = vld [vmem:[#allocation10 + $0x34c] sm:$0xf]  ;;  %v7702_v35 = vor.u32 %v8092_v26, %v7699_v27 }
  0x9c   : > { %1515 = vmatpush.bf16.msrb.mxu1 %v7598_v33  ;;  %v8160_v31 = vld [vmem:[#allocation10 + $0x364] sm:$0xf0]  ;;  %v7955_v33 = vld [vmem:[#allocation10 + $0x368] sm:$0xf0] }
  0x9d   : > { %1528 = vmatpush.bf16.msrb.mxu2 %v7854_v40  ;;  %v8088_v37 = vld [vmem:[#allocation10 + $0x124] sm:$0xf0]  ;;  %v8084_v38 = vld [vmem:[#allocation10 + $0x10c] sm:$0xf]  ;;  %v7954_v40 = vor.u32 %v8160_v31, %v7953_v30  ;;  %v7958_v41 = vor.u32 %v8156_v32, %v7955_v33 }
  0x9e   : > { %v7667_v39 = vld [vmem:[#allocation10 + $0x128] sm:$0xf0]  ;;  %v7921_v42 = vld [vmem:[#allocation10 + $0x308] sm:$0xf] }
  0x9f   : > { %1536 = vmatpush.bf16.msrb.mxu3 %v7762_v7  ;;  %1504 = vmatpush.bf16.msrb.mxu0 %v7786_v13  ;;  %v8152_v43 = vld [vmem:[#allocation10 + $0x324] sm:$0xf0]  ;;  %v8148_v44 = vld [vmem:[#allocation10 + $0x30c] sm:$0xf]  ;;  %v7670_v47 = vor.u32 %v8084_v38, %v7667_v39  ;;  %v8113_v39 = vld [vmem:[#allocation10 + $0x1ec] sm:$0xf0] }
  0xa0   : > { %1516 = vmatpush.bf16.msrb.mxu1 %v7566_v49  ;;  %v7923_v45 = vld [vmem:[#allocation10 + $0x328] sm:$0xf0]  ;;  %v8080_v49 = vld [vmem:[#allocation10 + $0xe4] sm:$0xf0]  ;;  %v7922_v52 = vor.u32 %v8152_v43, %v7921_v42 }
  0xa1   : > { %1529 = vmatpush.bf16.msrb.mxu2 %v7822_v58  ;;  %v8076_v50 = vld [vmem:[#allocation10 + $0xcc] sm:$0xf]  ;;  %v7601_v56 = vld [vmem:[#allocation10 + $0x88] sm:$0xf] }
  0xa2   : > { %v7635_v51 = vld [vmem:[#allocation10 + $0xe8] sm:$0xf0]  ;;  %v8072_v57 = vld [vmem:[#allocation10 + $0xa4] sm:$0xf0] }
  0xa3   : > { %1549 = vmatpush.bf16.msra.mxu0 %v8018_v15  ;;  %1537 = vmatpush.bf16.msrb.mxu3 %v7730_v22  ;;  %v7638_v55 = vor.u32 %v8076_v50, %v7635_v51  ;;  %v8068_v58 = vld [vmem:[#allocation10 + $0x8c] sm:$0xf]  ;;  %v7602_v60 = vor.u32 %v8072_v57, %v7601_v56  ;;  %v8144_v63 = vld [vmem:[#allocation10 + $0x2e4] sm:$0xf0]  ;;  %v7739_v50 = vld [vmem:[#allocation10 + $0x1b0] sm:$0xf0] }
  0xa4   : > { %1517 = vmatpush.bf16.msrb.mxu1 %v7534_v2  ;;  %v7603_v59 = vld [vmem:[#allocation10 + $0xa8] sm:$0xf0]  ;;  %v7569_v4 = vld [vmem:[#allocation10 + $0x48] sm:$0xf]  ;;  %v8027_v56 = vld [vmem:[#allocation10 + $0x3f0] sm:$0xf0] }
  0xa5   : > { %1530 = vmatpush.bf16.msrb.mxu2 %v7790_v14  ;;  %v7606_v61 = vor.u32 %v8068_v58, %v7603_v59  ;;  %v8140_v0 = vld [vmem:[#allocation10 + $0x2cc] sm:$0xf]  ;;  %v8064_v5 = vld [vmem:[#allocation10 + $0x64] sm:$0xf0] }
  0xa6   : > { %v7891_v2 = vld [vmem:[#allocation10 + $0x2e8] sm:$0xf0]  ;;  %v7570_v7 = vor.u32 %v8064_v5, %v7569_v4  ;;  %v7857_v10 = vld [vmem:[#allocation10 + $0x288] sm:$0xf]  ;;  %v8169_v5 = vld [vmem:[#allocation10 + $0x3ac] sm:$0xf0] }
  0xa7   : > { %1550 = vmatpush.bf16.msra.mxu0 %v7986_v28  ;;  %1538 = vmatpush.bf16.msrb.mxu3 %v7698_v34  ;;  %v7894_v3 = vor.u32 %v8140_v0, %v7891_v2  ;;  %v8136_v11 = vld [vmem:[#allocation10 + $0x2a4] sm:$0xf0]  ;;  %v8132_v12 = vld [vmem:[#allocation10 + $0x28c] sm:$0xf]  ;;  %v618_v34 = vld [vmem:[#allocation9] sm:$0x3] }
  0xa8   : > { %v7858_v13 = vor.u32 %v8136_v11, %v7857_v10  ;;  %v7859_v14 = vld [vmem:[#allocation10 + $0x2a8] sm:$0xf0]  ;;  %v8056_v17 = vld [vmem:[#allocation10 + $0x24] sm:$0xf0]  ;;  %v621_v43 = vperm.slane %v618_v34, 1 }
  0xa9   : > { %v7862_v15 = vor.u32 %v8132_v12, %v7859_v14  ;;  %v7539_v20 = vld [vmem:[#allocation10 + $0x28] sm:$0xf0]  ;;  %v7825_v22 = vld [vmem:[#allocation10 + $0x248] sm:$0xf]  ;;  %v7707_v0 = vld [vmem:[#allocation10 + $0x170] sm:$0xf0] }
  0xaa   : > { %v8124_v24 = vld [vmem:[#allocation10 + $0x24c] sm:$0xf]  ;;  %v7793_v28 = vld [vmem:[#allocation10 + $0x208] sm:$0xf]  ;;  %v7673_v10 = vld [vmem:[#allocation10 + $0x110] sm:$0xf] }
  0xab   : > { %1551 = vmatpush.bf16.msra.mxu0 %v7954_v40  ;;  %v7827_v26 = vld [vmem:[#allocation10 + $0x268] sm:$0xf0]  ;;  %v8109_v40 = vld [vmem:[#allocation10 + $0x1d4] sm:$0xf]  ;;  %v8089_v11 = vld [vmem:[#allocation10 + $0x12c] sm:$0xf0] }
  0xac   : > { %v7830_v27 = vor.u32 %v8124_v24, %v7827_v26  ;;  %v8116_v31 = vld [vmem:[#allocation10 + $0x20c] sm:$0xf]  ;;  %v8085_v12 = vld [vmem:[#allocation10 + $0x114] sm:$0xf]  ;;  %v8081_v24 = vld [vmem:[#allocation10 + $0xec] sm:$0xf0] }
  0xad   : > { %v7795_v32 = vld [vmem:[#allocation10 + $0x228] sm:$0xf0]  ;;  %v7643_v26 = vld [vmem:[#allocation10 + $0xf0] sm:$0xf0] }
  0xae   : > { %v7798_v33 = vor.u32 %v8116_v31, %v7795_v32  ;;  %v8149_v31 = vld [vmem:[#allocation10 + $0x314] sm:$0xf] }
  0xaf   : > { %1552 = vmatpush.bf16.msra.mxu0 %v7922_v52  ;;  %v8025_v52 = vld [vmem:[#allocation10 + $0x3d0] sm:$0xf]  ;;  %v7931_v32 = vld [vmem:[#allocation10 + $0x330] sm:$0xf0] }
  0xf9   : > { %v604_v48 = vpop.f32.mrf.mxu0 }
  0xfa   : > { %v605_v53 = vadd.f32 %v8313_v36, %v604_v48  ;;  %v7665_v36 = vld [vmem:[#allocation10 + $0x108] sm:$0xf] }
  0xfb   : > { %v7666_v46 = vor.u32 %v8088_v37, %v7665_v36  ;;  %v7633_v48 = vld [vmem:[#allocation10 + $0xc8] sm:$0xf]  ;;  %v7769_v37 = vld [vmem:[#allocation10 + $0x1d0] sm:$0xf] }
  0xfc   : > { %v608_v62 = vmax.f32 %v605_v53, 0.0  ;;  %v7926_v53 = vor.u32 %v8148_v44, %v7923_v45  ;;  %v7634_v54 = vor.u32 %v8080_v49, %v7633_v48  ;;  %v7770_v44 = vor.u32 %v8113_v39, %v7769_v37  ;;  %v8105_v48 = vld [vmem:[#allocation10 + $0x1ac] sm:$0xf0]  ;;  %v8101_v49 = vld [vmem:[#allocation10 + $0x194] sm:$0xf] }
  0xfd   : > { %1539 = vmatpush.bf16.msrb.mxu3 %v7666_v46  ;;  %v7737_v46 = vld [vmem:[#allocation10 + $0x190] sm:$0xf]  ;;  %v7742_v59 = vor.u32 %v8101_v49, %v7739_v50  ;;  %v8069_v37 = vld [vmem:[#allocation10 + $0x94] sm:$0xf] }
  0xfe   : > { %v609_v6 = vpack.c.bf16 %v608_v62, %v608_v62  ;;  %v7889_v62 = vld [vmem:[#allocation10 + $0x2c8] sm:$0xf]  ;;  %v7738_v58 = vor.u32 %v8105_v48, %v7737_v46  ;;  %v7577_v48 = vld [vmem:[#allocation10 + $0x50] sm:$0xf]  ;;  %v8061_v50 = vld [vmem:[#allocation10 + $0x54] sm:$0xf] }
  0xff   : > { %v7890_v1 = vor.u32 %v8144_v63, %v7889_v62  ;;  %v8093_v63 = vld [vmem:[#allocation10 + $0x154] sm:$0xf]  ;;  %v8065_v49 = vld [vmem:[#allocation10 + $0x6c] sm:$0xf0] }
 0x100   : > { %7525 = vmatmul.msk.bf16.vlgmr.msra.gmra.mxu1 %vm664_vm1, %v609_v6  ;;  %7526 = vmatmul.msk.bf16.vlgmr.msra.gmra.mxu2 %vm664_vm1, %v609_v6  ;;  %v8060_v6 = vld [vmem:[#allocation10 + $0x4c] sm:$0xf] }
 0x101   : > { %v606_v18 = vpop.f32.mrf.mxu0  ;;  %1562 = vmatpush.bf16.msra.mxu1 %v7766_v8  ;;  %1575 = vmatpush.bf16.msra.mxu2 %v8022_v16  ;;  %v7571_v8 = vld [vmem:[#allocation10 + $0x68] sm:$0xf0]  ;;  %v7537_v16 = vld [vmem:[#allocation10 + $0x8] sm:$0xf] }
 0x102   : > { %1540 = vmatpush.bf16.msrb.mxu3 %v7634_v54  ;;  %1553 = vmatpush.bf16.msra.mxu0 %v7890_v1  ;;  %v7574_v9 = vor.u32 %v8060_v6, %v7571_v8  ;;  %v8052_v18 = vld [vmem:[#allocation10 + $0xc] sm:$0xf]  ;;  %v7538_v19 = vor.u32 %v8056_v17, %v7537_v16  ;;  %v8177_v54 = vld [vmem:[#allocation10 + $0x3ec] sm:$0xf0]  ;;  %v8165_v6 = vld [vmem:[#allocation10 + $0x394] sm:$0xf] }
 0x103   : > { %v7542_v21 = vor.u32 %v8052_v18, %v7539_v20  ;;  %v8026_v1 = vor.u32 %v8177_v54, %v8025_v52  ;;  %v7961_v17 = vld [vmem:[#allocation10 + $0x350] sm:$0xf]  ;;  %v7963_v20 = vld [vmem:[#allocation10 + $0x370] sm:$0xf0] }
 0x104   : > { %v8161_v18 = vld [vmem:[#allocation10 + $0x36c] sm:$0xf0] }
 0x105   : > { %1563 = vmatpush.bf16.msra.mxu1 %v7734_v23  ;;  %1576 = vmatpush.bf16.msra.mxu2 %v7990_v29  ;;  %v8128_v23 = vld [vmem:[#allocation10 + $0x264] sm:$0xf0]  ;;  %v7865_v54 = vld [vmem:[#allocation10 + $0x290] sm:$0xf] }
 0x106   : > { %1541 = vmatpush.bf16.msrb.mxu3 %v7602_v60  ;;  %1554 = vmatpush.bf16.msra.mxu0 %v7858_v13  ;;  %v7826_v25 = vor.u32 %v8128_v23, %v7825_v22  ;;  %v8120_v29 = vld [vmem:[#allocation10 + $0x224] sm:$0xf0]  ;;  %v7705_v60 = vld [vmem:[#allocation10 + $0x150] sm:$0xf]  ;;  %v7675_v13 = vld [vmem:[#allocation10 + $0x130] sm:$0xf0] }
 0x107   : > { %v7794_v30 = vor.u32 %v8120_v29, %v7793_v28  ;;  %v7678_v22 = vor.u32 %v8085_v12, %v7675_v13  ;;  %v7641_v23 = vld [vmem:[#allocation10 + $0xd0] sm:$0xf] }
 0x108   : > { %v7929_v29 = vld [vmem:[#allocation10 + $0x310] sm:$0xf] }
 0x109   : > { %1564 = vmatpush.bf16.msra.mxu1 %v7702_v35  ;;  %1577 = vmatpush.bf16.msra.mxu2 %v7958_v41  ;;  %v620_v35 = vperm.slane %v618_v34, 0  ;;  %v7771_v41 = vld [vmem:[#allocation10 + $0x1f0] sm:$0xf0] }
 0x10a   : > { %1542 = vmatpush.bf16.msrb.mxu3 %v7570_v7  ;;  %1555 = vmatpush.bf16.msra.mxu0 %v7826_v25  ;;  %v7774_v45 = vor.u32 %v8109_v40, %v7771_v41  ;;  %v7995_v7 = vld [vmem:[#allocation10 + $0x3b0] sm:$0xf0]  ;;  %v7934_v40 = vor.u32 %v8149_v31, %v7931_v32  ;;  %v7897_v41 = vld [vmem:[#allocation10 + $0x2d0] sm:$0xf]  ;;  %v7713_v31 = vld [vmem:[#allocation10 + $0x158] sm:$0xf] }
 0x10b   : > { %v7998_v16 = vor.u32 %v8165_v6, %v7995_v7  ;;  %v8077_v25 = vld [vmem:[#allocation10 + $0xd4] sm:$0xf]  ;;  %v7779_v6 = vld [vmem:[#allocation10 + $0x1f8] sm:$0xf0]  ;;  %v7833_v7 = vld [vmem:[#allocation10 + $0x250] sm:$0xf] }
 0x10c   : > { %v7646_v34 = vor.u32 %v8077_v25, %v7643_v26  ;;  %v8033_v25 = vld [vmem:[#allocation10 + $0x3d8] sm:$0xf] }
 0x10d   : > { %1565 = vmatpush.bf16.msra.mxu1 %v7670_v47  ;;  %1578 = vmatpush.bf16.msra.mxu2 %v7926_v53  ;;  %v8178_v26 = vld [vmem:[#allocation10 + $0x3f4] sm:$0xf0] }
 0x10e   : > { %1543 = vmatpush.bf16.msrb.mxu3 %v7538_v19  ;;  %1556 = vmatpush.bf16.msra.mxu0 %v7794_v30  ;;  %v8157_v19 = vld [vmem:[#allocation10 + $0x354] sm:$0xf]  ;;  %v8153_v30 = vld [vmem:[#allocation10 + $0x32c] sm:$0xf0] }
 0x10f   : > { %v7966_v28 = vor.u32 %v8157_v19, %v7963_v20  ;;  %v7930_v39 = vor.u32 %v8153_v30, %v7929_v29  ;;  %v7747_v20 = vld [vmem:[#allocation10 + $0x1b8] sm:$0xf0] }
 0x111   : > { %1566 = vmatpush.bf16.msra.mxu1 %v7638_v55  ;;  %1579 = vmatpush.bf16.msra.mxu2 %v7894_v3  ;;  %v8173_v55 = vld [vmem:[#allocation10 + $0x3d4] sm:$0xf]  ;;  %v7993_v3 = vld [vmem:[#allocation10 + $0x390] sm:$0xf] }
 0x112   : > { %v8030_v2 = vor.u32 %v8173_v55, %v8027_v56  ;;  %v8137_v55 = vld [vmem:[#allocation10 + $0x2ac] sm:$0xf0]  ;;  %v8133_v56 = vld [vmem:[#allocation10 + $0x294] sm:$0xf] }
 0x115   : > { %1567 = vmatpush.bf16.msra.mxu1 %v7606_v61  ;;  %1580 = vmatpush.bf16.msra.mxu2 %v7862_v15  ;;  %v8097_v61 = vld [vmem:[#allocation10 + $0x16c] sm:$0xf0]  ;;  %v7994_v15 = vor.u32 %v8169_v5, %v7993_v3  ;;  %v8110_v5 = vld [vmem:[#allocation10 + $0x1dc] sm:$0xf] }
 0x116   : > { %v7706_v8 = vor.u32 %v8097_v61, %v7705_v60  ;;  %v7545_v60 = vld [vmem:[#allocation10 + $0x10] sm:$0xf] }
 0x117   : > { %v8057_v61 = vld [vmem:[#allocation10 + $0x2c] sm:$0xf0] }
 0x119   : > { %1568 = vmatpush.bf16.msra.mxu1 %v7574_v9  ;;  %1581 = vmatpush.bf16.msra.mxu2 %v7830_v27  ;;  %v7710_v9 = vor.u32 %v8093_v63, %v7707_v0  ;;  %v7962_v27 = vor.u32 %v8161_v18, %v7961_v17  ;;  %v7547_v63 = vld [vmem:[#allocation10 + $0x30] sm:$0xf0]  ;;  %v7777_v0 = vld [vmem:[#allocation10 + $0x1d8] sm:$0xf]  ;;  %v8102_v17 = vld [vmem:[#allocation10 + $0x19c] sm:$0xf] }
 0x11a   : > { %v7750_v30 = vor.u32 %v8102_v17, %v7747_v20  ;;  %v7907_v17 = vld [vmem:[#allocation10 + $0x2f8] sm:$0xf0] }
 0x11d   : > { %1569 = vmatpush.bf16.msra.mxu1 %v7542_v21  ;;  %1582 = vmatpush.bf16.msra.mxu2 %v7798_v33  ;;  %v7674_v21 = vor.u32 %v8089_v11, %v7673_v10  ;;  %v7642_v33 = vor.u32 %v8081_v24, %v7641_v23  ;;  %v7835_v10 = vld [vmem:[#allocation10 + $0x270] sm:$0xf0]  ;;  %v7546_v11 = vor.u32 %v8057_v61, %v7545_v60  ;;  %v8078_v60 = vld [vmem:[#allocation10 + $0xdc] sm:$0xf] }
 0x11e   : > { %v8117_v23 = vld [vmem:[#allocation10 + $0x214] sm:$0xf]  ;;  %v7651_v61 = vld [vmem:[#allocation10 + $0xf8] sm:$0xf0] }
 0x11f   : > { %v7803_v24 = vld [vmem:[#allocation10 + $0x230] sm:$0xf0] }
 0x17d   : > { %v677_v36 = vpop.f32.mrf.mxu1 }
 0x17e   : > { %v678_v38 = vadd.f32 %v677_v36, %v620_v35  ;;  %v7609_v35 = vld [vmem:[#allocation10 + $0x90] sm:$0xf] }
 0x17f   : > { %v8073_v36 = vld [vmem:[#allocation10 + $0xac] sm:$0xf0] }
 0x180   : > { %v694_v42 = vmax.f32 %v678_v38, 0.0  ;;  %v7611_v38 = vld [vmem:[#allocation10 + $0xb0] sm:$0xf0] }
 0x181   : > { %v7614_v46 = vor.u32 %v8069_v37, %v7611_v38  ;;  %v8034_v37 = vor.u32 %v8178_v26, %v8033_v25  ;;  %v1792_v26 = vld [vmem:[%s8946_s11 + $0x2a0] sm:$0xff] }
 0x182   : > { %v8962_v47 = vpack.c.bf16 %v694_v42, %v694_v42  ;;  %v8145_v42 = vld [vmem:[#allocation10 + $0x2ec] sm:$0xf0] }
 0x183   : > { %v690_v51 = vpop.f32.mrf.mxu2  ;;  %v7898_v52 = vor.u32 %v8145_v42, %v7897_v41  ;;  %v8166_v41 = vld [vmem:[#allocation10 + $0x39c] sm:$0xf] }
 0x184   : > { %v691_v53 = vadd.f32 %v690_v51, %v621_v43  ;;  %1492 = vmatmul.bf16.vlgmr.msra.gmra.mxu3 %v8962_v47  ;;  %1518 = vmatmul.bf16.vlgmr.msrb.gmra.mxu1 %v8962_v47  ;;  %v8141_v43 = vld [vmem:[#allocation10 + $0x2d4] sm:$0xf]  ;;  %v8003_v42 = vld [vmem:[#allocation10 + $0x3b8] sm:$0xf0] }
 0x185   : > { %1588 = vmatpush.bf16.msra.mxu3 %v7770_v44  ;;  %1614 = vmatpush.bf16.msrb.mxu1 %v7774_v45  ;;  %v679_v57 = vpop.f32.mrf.mxu1  ;;  %v7899_v44 = vld [vmem:[#allocation10 + $0x2f0] sm:$0xf0]  ;;  %v7610_v45 = vor.u32 %v8073_v36, %v7609_v35  ;;  %v8094_v35 = vld [vmem:[#allocation10 + $0x15c] sm:$0xf] }
 0x186   : > { %v695_v62 = vmax.f32 %v691_v53, 0.0  ;;  %v7579_v51 = vld [vmem:[#allocation10 + $0x70] sm:$0xf0]  ;;  %v7902_v53 = vor.u32 %v8141_v43, %v7899_v44  ;;  %v7715_v36 = vld [vmem:[#allocation10 + $0x178] sm:$0xf0] }
 0x187   : > { %v7867_v57 = vld [vmem:[#allocation10 + $0x2b0] sm:$0xf0]  ;;  %v7718_v44 = vor.u32 %v8094_v35, %v7715_v36  ;;  %v7875_v35 = vld [vmem:[#allocation10 + $0x2b8] sm:$0xf0]  ;;  %v7553_v36 = vld [vmem:[#allocation10 + $0x18] sm:$0xf] }
 0x188   : > { %v8966_v4 = vpack.c.bf16 %v695_v62, %v695_v62  ;;  %v8053_v62 = vld [vmem:[#allocation10 + $0x14] sm:$0xf]  ;;  %v7870_v3 = vor.u32 %v8133_v56, %v7867_v57 }
 0x189   : > { %1589 = vmatpush.bf16.msra.mxu3 %v7738_v58  ;;  %1615 = vmatpush.bf16.msrb.mxu1 %v7742_v59  ;;  %v7578_v58 = vor.u32 %v8065_v49, %v7577_v48  ;;  %v7582_v59 = vor.u32 %v8061_v50, %v7579_v51  ;;  %v7550_v12 = vor.u32 %v8053_v62, %v7547_v63  ;;  %v8086_v48 = vld [vmem:[#allocation10 + $0x11c] sm:$0xf] }
 0x18a   : > { %1505 = vmatmul.bf16.vlgmr.msrb.gmra.mxu0 %v8966_v4  ;;  %1531 = vmatmul.bf16.vlgmr.msrb.gmra.mxu2 %v8966_v4  ;;  %v7683_v49 = vld [vmem:[#allocation10 + $0x138] sm:$0xf0]  ;;  %v8006_v51 = vor.u32 %v8166_v41, %v8003_v42  ;;  %v2452_v42 = vunpack.c.2.s8 %v1792_v26 }
 0x18b   : > { %1601 = vmatpush.bf16.msrb.mxu0 %v8026_v1  ;;  %1627 = vmatpush.bf16.msrb.mxu2 %v8030_v2  ;;  %v692_v14 = vpop.f32.mrf.mxu2  ;;  %v8114_v1 = vld [vmem:[#allocation10 + $0x1f4] sm:$0xf0]  ;;  %v7866_v2 = vor.u32 %v8137_v55, %v7865_v54  ;;  %v8158_v54 = vld [vmem:[#allocation10 + $0x35c] sm:$0xf]  ;;  %v7686_v57 = vor.u32 %v8086_v48, %v7683_v49 }
 0x18c   : > { %v7778_v13 = vor.u32 %v8114_v1, %v7777_v0  ;;  %v7782_v14 = vor.u32 %v8110_v5, %v7779_v6  ;;  %v7971_v55 = vld [vmem:[#allocation10 + $0x378] sm:$0xf0]  ;;  %v7937_v0 = vld [vmem:[#allocation10 + $0x318] sm:$0xf]  ;;  %v7654_v6 = vor.u32 %v8078_v60, %v7651_v61 }
 0x18d   : > { %1590 = vmatpush.bf16.msra.mxu3 %v7706_v8  ;;  %1616 = vmatpush.bf16.msrb.mxu1 %v7710_v9  ;;  %v8129_v8 = vld [vmem:[#allocation10 + $0x26c] sm:$0xf0]  ;;  %v8125_v9 = vld [vmem:[#allocation10 + $0x254] sm:$0xf]  ;;  %v7974_v63 = vor.u32 %v8158_v54, %v7971_v55  ;;  %v8154_v1 = vld [vmem:[#allocation10 + $0x334] sm:$0xf0]  ;;  %v2428_v54 = vunpack.c.0.s8 %v1792_v26  ;;  %v2440_v55 = vunpack.c.1.s8 %v1792_v26 }
 0x18e   : > { %v7834_v18 = vor.u32 %v8129_v8, %v7833_v7  ;;  %v7838_v19 = vor.u32 %v8125_v9, %v7835_v10  ;;  %v7617_v7 = vld [vmem:[#allocation10 + $0x98] sm:$0xf]  ;;  %v8070_v9 = vld [vmem:[#allocation10 + $0x9c] sm:$0xf] }
 0x18f   : > { %1602 = vmatpush.bf16.msrb.mxu0 %v7994_v15  ;;  %1628 = vmatpush.bf16.msrb.mxu2 %v7998_v16  ;;  %v7745_v15 = vld [vmem:[#allocation10 + $0x198] sm:$0xf]  ;;  %v7619_v10 = vld [vmem:[#allocation10 + $0xb8] sm:$0xf0] }
 0x190   : > { %v8106_v16 = vld [vmem:[#allocation10 + $0x1b4] sm:$0xf0]  ;;  %v7622_v20 = vor.u32 %v8070_v9, %v7619_v10 }
 0x191   : > { %1591 = vmatpush.bf16.msra.mxu3 %v7674_v21  ;;  %1617 = vmatpush.bf16.msrb.mxu1 %v7678_v22  ;;  %v7801_v21 = vld [vmem:[#allocation10 + $0x210] sm:$0xf]  ;;  %v7746_v29 = vor.u32 %v8106_v16, %v7745_v15  ;;  %v8074_v8 = vld [vmem:[#allocation10 + $0xb4] sm:$0xf0]  ;;  %v1744_v15 = vld [vmem:[%s8946_s11 + $0x120] sm:$0xff] }
 0x192   : > { %v8121_v22 = vld [vmem:[#allocation10 + $0x22c] sm:$0xf0]  ;;  %v8142_v16 = vld [vmem:[#allocation10 + $0x2dc] sm:$0xf]  ;;  %v2272_v25 = vunpack.c.3.s8 %v1744_v15  ;;  %v2248_v41 = vunpack.c.1.s8 %v1744_v15  ;;  %v8987_v60 = vld [vmem:[#allocation10 + $0x234] sm:$0xf0] }
 0x193   : > { %1603 = vmatpush.bf16.msrb.mxu0 %v7962_v27  ;;  %1629 = vmatpush.bf16.msrb.mxu2 %v7966_v28  ;;  %v8174_v27 = vld [vmem:[#allocation10 + $0x3dc] sm:$0xf]  ;;  %v7802_v32 = vor.u32 %v8121_v22, %v7801_v21  ;;  %v8066_v21 = vld [vmem:[#allocation10 + $0x74] sm:$0xf0] }
 0x194   : > { %1544 = vmatmul.bf16.vlgmr.msrb.gmra.mxu3 %v8962_v47  ;;  %1570 = vmatmul.bf16.vlgmr.msra.gmra.mxu1 %v8962_v47  ;;  %v8035_v28 = vld [vmem:[#allocation10 + $0x3f8] sm:$0xf0] }
 0x195   : > { %1592 = vmatpush.bf16.msra.mxu3 %v7642_v33  ;;  %1618 = vmatpush.bf16.msrb.mxu1 %v7646_v34  ;;  %v7806_v33 = vor.u32 %v8117_v23, %v7803_v24  ;;  %v8098_v34 = vld [vmem:[#allocation10 + $0x174] sm:$0xf0]  ;;  %v8038_v38 = vor.u32 %v8174_v27, %v8035_v28  ;;  %v8062_v22 = vld [vmem:[#allocation10 + $0x5c] sm:$0xf]  ;;  %v2260_v24 = vunpack.c.2.s8 %v1744_v15  ;;  %v8981_v27 = vld [vmem:[%s8946_s11 + $0xc0] sm:$0xff] }
 0x196   : > { %v7714_v43 = vor.u32 %v8098_v34, %v7713_v31  ;;  %v7587_v23 = vld [vmem:[#allocation10 + $0x78] sm:$0xf0]  ;;  %v8138_v31 = vld [vmem:[#allocation10 + $0x2b4] sm:$0xf0]  ;;  %v2224_v48 = vunpack.c.3.s8 %v8981_v27  ;;  %v2200_v9 = vunpack.c.1.s8 %v8981_v27 }
 0x197   : > { %1604 = vmatpush.bf16.msrb.mxu0 %v7930_v39  ;;  %1630 = vmatpush.bf16.msrb.mxu2 %v7934_v40  ;;  %v8001_v39 = vld [vmem:[#allocation10 + $0x398] sm:$0xf]  ;;  %v8134_v34 = vld [vmem:[#allocation10 + $0x29c] sm:$0xf] }
 0x198   : > { %v8170_v40 = vld [vmem:[#allocation10 + $0x3b4] sm:$0xf0] }
 0x199   : > { %1593 = vmatpush.bf16.msra.mxu3 %v7610_v45  ;;  %1619 = vmatpush.bf16.msrb.mxu1 %v7614_v46  ;;  %v7681_v45 = vld [vmem:[#allocation10 + $0x118] sm:$0xf]  ;;  %v8002_v50 = vor.u32 %v8170_v40, %v8001_v39  ;;  %v8054_v39 = vld [vmem:[#allocation10 + $0x1c] sm:$0xf] }
 0x19a   : > { %1557 = vmatmul.bf16.vlgmr.msra.gmra.mxu0 %v8966_v4  ;;  %1583 = vmatmul.bf16.vlgmr.msra.gmra.mxu2 %v8966_v4  ;;  %v8090_v46 = vld [vmem:[#allocation10 + $0x134] sm:$0xf0]  ;;  %v7555_v40 = vld [vmem:[#allocation10 + $0x38] sm:$0xf0] }
 0x19b   : > { %1605 = vmatpush.bf16.msrb.mxu0 %v7898_v52  ;;  %1631 = vmatpush.bf16.msrb.mxu2 %v7902_v53  ;;  %v7969_v52 = vld [vmem:[#allocation10 + $0x358] sm:$0xf]  ;;  %v7682_v56 = vor.u32 %v8090_v46, %v7681_v45  ;;  %v3796_v45 = vcvt.s32.f32 %v2260_v24  ;;  %v3808_v46 = vcvt.s32.f32 %v2272_v25 }
 0x19c   : > { %v8162_v53 = vld [vmem:[#allocation10 + $0x374] sm:$0xf0] }
 0x19d   : > { %1594 = vmatpush.bf16.msra.mxu3 %v7578_v58  ;;  %1620 = vmatpush.bf16.msrb.mxu1 %v7582_v59  ;;  %v7649_v58 = vld [vmem:[#allocation10 + $0xd8] sm:$0xf]  ;;  %v7970_v62 = vor.u32 %v8162_v53, %v7969_v52  ;;  %v8126_v53 = vld [vmem:[#allocation10 + $0x25c] sm:$0xf] }
 0x19e   : > { %v8082_v59 = vld [vmem:[#allocation10 + $0xf4] sm:$0xf0] }
 0x19f   : > { %1606 = vmatpush.bf16.msrb.mxu0 %v7866_v2  ;;  %1632 = vmatpush.bf16.msrb.mxu2 %v7870_v3  ;;  %v8150_v2 = vld [vmem:[#allocation10 + $0x31c] sm:$0xf]  ;;  %v7650_v5 = vor.u32 %v8082_v59, %v7649_v58  ;;  %v8130_v52 = vld [vmem:[#allocation10 + $0x274] sm:$0xf0] }
 0x1a0   : > { %v7939_v3 = vld [vmem:[#allocation10 + $0x338] sm:$0xf0]  ;;  %v8985_v59 = vld [vmem:[#allocation10 + $0x218] sm:$0xf] }
 0x1a1   : > { %1595 = vmatpush.bf16.msra.mxu3 %v7546_v11  ;;  %1621 = vmatpush.bf16.msrb.mxu1 %v7550_v12  ;;  %v7938_v11 = vor.u32 %v8154_v1, %v7937_v0  ;;  %v7942_v12 = vor.u32 %v8150_v2, %v7939_v3  ;;  %v7843_v58 = vld [vmem:[#allocation10 + $0x278] sm:$0xf0]  ;;  %v3784_v0 = vcvt.s32.f32 %v2248_v41  ;;  %v3988_v1 = vcvt.s32.f32 %v2452_v42  ;;  %v9030_v42 = vld [vmem:[%s8946_s11 + $0x3c0] sm:$0xff] }
 0x1a3   : > { %1607 = vmatpush.bf16.msrb.mxu0 %v7834_v18  ;;  %1633 = vmatpush.bf16.msrb.mxu2 %v7838_v19  ;;  %v7585_v18 = vld [vmem:[#allocation10 + $0x58] sm:$0xf]  ;;  %v7618_v19 = vor.u32 %v8074_v8, %v7617_v7  ;;  %v8994_v7 = vcvt.s32.f32 %v2224_v48  ;;  %v2188_v8 = vunpack.c.0.s8 %v8981_v27 }
 0x1a4   : > { %1596 = vmatmul.bf16.vlgmr.msra.gmra.mxu3 %v8962_v47  ;;  %1622 = vmatmul.bf16.vlgmr.msrb.gmra.mxu1 %v8962_v47 }
 0x1a5   : > { %1640 = vmatpush.bf16.msrb.mxu3 %v7778_v13  ;;  %1666 = vmatpush.bf16.msra.mxu1 %v7782_v14  ;;  %v7905_v13 = vld [vmem:[#allocation10 + $0x2d8] sm:$0xf]  ;;  %v9012_v25 = vcvt.s32.f32 %v2188_v8 }
 0x1a6   : > { %v8146_v14 = vld [vmem:[#allocation10 + $0x2f4] sm:$0xf0] }
 0x1a7   : > { %1608 = vmatpush.bf16.msrb.mxu0 %v7802_v32  ;;  %1634 = vmatpush.bf16.msrb.mxu2 %v7806_v33  ;;  %v7906_v28 = vor.u32 %v8146_v14, %v7905_v13  ;;  %v7586_v32 = vor.u32 %v8066_v21, %v7585_v18  ;;  %v7590_v33 = vor.u32 %v8062_v22, %v7587_v23  ;;  %v9000_v13 = vcvt.s32.f32 %v2440_v55  ;;  %v9003_v14 = vld [vmem:[%s8946_s11 + $0x60] sm:$0xff] }
 0x1a8   : > { %v2596_v55 = vunpack.c.2.s8 %v9030_v42 }
 0x1a9   : > { %1641 = vmatpush.bf16.msrb.mxu3 %v7746_v29  ;;  %1667 = vmatpush.bf16.msra.mxu1 %v7750_v30  ;;  %v7910_v29 = vor.u32 %v8142_v16, %v7907_v17  ;;  %v7873_v30 = vld [vmem:[#allocation10 + $0x298] sm:$0xf] }
 0x1aa   : > { %1609 = vmatmul.bf16.vlgmr.msrb.gmra.mxu0 %v8966_v4  ;;  %1635 = vmatmul.bf16.vlgmr.msrb.gmra.mxu2 %v8966_v4  ;;  %v7874_v49 = vor.u32 %v8138_v31, %v7873_v30 }
 0x1ab   : > { %1653 = vmatpush.bf16.msra.mxu0 %v8034_v37  ;;  %1679 = vmatpush.bf16.msra.mxu2 %v8038_v38  ;;  %v2236_v37 = vunpack.c.0.s8 %v1744_v15  ;;  %v8058_v38 = vld [vmem:[#allocation10 + $0x34] sm:$0xf0]  ;;  %v7810_v15 = vor.u32 %v8987_v60, %v8985_v59  ;;  %v2608_v59 = vunpack.c.3.s8 %v9030_v42 }
 0x1ad   : > { %1642 = vmatpush.bf16.msrb.mxu3 %v7714_v43  ;;  %1668 = vmatpush.bf16.msra.mxu1 %v7718_v44  ;;  %v2464_v43 = vunpack.c.3.s8 %v1792_v26  ;;  %v2212_v44 = vunpack.c.2.s8 %v8981_v27  ;;  %v3772_v61 = vcvt.s32.f32 %v2236_v37  ;;  %v9014_v26 = vcvt.s32.f32 %v2200_v9 }
 0x1ae   : > { %v2164_v27 = vunpack.c.2.s8 %v9003_v14 }
 0x1af   : > { %1654 = vmatpush.bf16.msra.mxu0 %v8002_v50  ;;  %1680 = vmatpush.bf16.msra.mxu2 %v8006_v51  ;;  %v7878_v50 = vor.u32 %v8134_v34, %v7875_v35  ;;  %v7841_v51 = vld [vmem:[#allocation10 + $0x258] sm:$0xf]  ;;  %v4000_v2 = vcvt.s32.f32 %v2464_v43  ;;  %v8989_v3 = vcvt.s32.f32 %v2212_v44  ;;  %v5212_v43 = vpack.c.bf16 %v9014_v26, %v9012_v25  ;;  %v9035_v44 = vld [vmem:[%s8946_s11] sm:$0xff] }
 0x1b0   : > { %v7842_v10 = vor.u32 %v8130_v52, %v7841_v51  ;;  %v2152_v52 = vunpack.c.1.s8 %v9003_v14  ;;  %v2128_v60 = vunpack.c.3.s8 %v9035_v44  ;;  %v2104_v26 = vunpack.c.1.s8 %v9035_v44 }
 0x1b1   : > { %1643 = vmatpush.bf16.msrb.mxu3 %v7682_v56  ;;  %1669 = vmatpush.bf16.msra.mxu1 %v7686_v57  ;;  %v7554_v56 = vor.u32 %v8058_v38, %v7553_v36  ;;  %v7558_v57 = vor.u32 %v8054_v39, %v7555_v40  ;;  %v5344_v21 = vpack.c.bf16 %v4000_v2, %v3988_v1  ;;  %v1888_v36 = vld [vmem:[%s8946_s11 + $0x5a0] sm:$0xff] }
 0x1b2   : > { %v5224_v24 = vpack.c.bf16 %v8994_v7, %v8989_v3  ;;  %v9027_v38 = vld [vmem:[%s8946_s11 + $0x1e0] sm:$0xff]  ;;  %v2836_v40 = vunpack.c.2.s8 %v1888_v36  ;;  %v2848_v41 = vunpack.c.3.s8 %v1888_v36  ;;  %v4144_v3 = vcvt.s32.f32 %v2608_v59 }
 0x1b3   : > { %1655 = vmatpush.bf16.msra.mxu0 %v7970_v62  ;;  %1681 = vmatpush.bf16.msra.mxu2 %v7974_v63  ;;  %v8118_v62 = vld [vmem:[#allocation10 + $0x21c] sm:$0xf] }
 0x1b4   : > { %v7811_v63 = vld [vmem:[#allocation10 + $0x238] sm:$0xf0]  ;;  %v4384_v51 = vcvt.s32.f32 %v2848_v41 }
 0x1b5   : > { %1644 = vmatpush.bf16.msrb.mxu3 %v7650_v5  ;;  %1670 = vmatpush.bf16.msra.mxu1 %v7654_v6  ;;  %v8992_v5 = vld [vmem:[%s8946_s11 + $0x240] sm:$0xff]  ;;  %v5248_v6 = vpack.c.bf16 %v3808_v46, %v3796_v45  ;;  %v7814_v16 = vor.u32 %v8118_v62, %v7811_v63  ;;  %v2812_v62 = vunpack.c.0.s8 %v1888_v36  ;;  %v2824_v63 = vunpack.c.1.s8 %v1888_v36 }
 0x1b6   : > { %v2404_v17 = vunpack.c.2.s8 %v8992_v5  ;;  %v2416_v18 = vunpack.c.3.s8 %v8992_v5  ;;  %v2380_v37 = vunpack.c.0.s8 %v8992_v5  ;;  %v2392_v48 = vunpack.c.1.s8 %v8992_v5 }
 0x1b7   : > { %1656 = vmatpush.bf16.msra.mxu0 %v7938_v11  ;;  %1682 = vmatpush.bf16.msra.mxu2 %v7942_v12  ;;  %v7846_v11 = vor.u32 %v8126_v53, %v7843_v58  ;;  %v8998_v12 = vcvt.s32.f32 %v2428_v54  ;;  %v2356_v53 = vunpack.c.2.s8 %v9027_v38  ;;  %v4348_v7 = vcvt.s32.f32 %v2812_v62 }
 0x1b8   : > { %v3916_v2 = vcvt.s32.f32 %v2380_v37  ;;  %v3928_v5 = vcvt.s32.f32 %v2392_v48  ;;  %v4360_v8 = vcvt.s32.f32 %v2824_v63  ;;  %v9065_v63 = vld [vmem:[#allocation12] sm:$0xff] }
 0x1b9   : > { %1645 = vmatpush.bf16.msrb.mxu3 %v7618_v19  ;;  %1671 = vmatpush.bf16.msra.mxu1 %v7622_v20  ;;  %v1840_v19 = vld [vmem:[%s8946_s11 + $0x420] sm:$0xff]  ;;  %v5236_v20 = vpack.c.bf16 %v3784_v0, %v3772_v61  ;;  %v4132_v61 = vcvt.s32.f32 %v2596_v55  ;;  %v3892_v9 = vcvt.s32.f32 %v2356_v53 }
 0x1ba   : > { %v2644_v22 = vunpack.c.2.s8 %v1840_v19  ;;  %v2656_v23 = vunpack.c.3.s8 %v1840_v19  ;;  %v2620_v34 = vunpack.c.0.s8 %v1840_v19  ;;  %v2632_v35 = vunpack.c.1.s8 %v1840_v19 }
 0x1bb   : > { %1657 = vmatpush.bf16.msra.mxu0 %v7906_v28  ;;  %1683 = vmatpush.bf16.msra.mxu2 %v7910_v29  ;;  %v5332_v28 = vpack.c.bf16 %v9000_v13, %v8998_v12  ;;  %v2176_v29 = vunpack.c.3.s8 %v9003_v14  ;;  %v3664_v13 = vcvt.s32.f32 %v2128_v60  ;;  %v5308_v19 = vpack.c.bf16 %v3928_v5, %v3916_v2 }
 0x1bc   : > { %v4180_v30 = vcvt.s32.f32 %v2644_v22  ;;  %v4192_v31 = vcvt.s32.f32 %v2656_v23  ;;  %v4156_v45 = vcvt.s32.f32 %v2620_v34  ;;  %v4168_v46 = vcvt.s32.f32 %v2632_v35  ;;  %v1936_v22 = vld [vmem:[%s8946_s11 + $0x720] sm:$0xff] }
 0x1bd   : > { %1646 = vmatpush.bf16.msrb.mxu3 %v7586_v32  ;;  %1672 = vmatpush.bf16.msra.mxu1 %v7590_v33  ;;  %v9022_v32 = vcvt.s32.f32 %v2404_v17  ;;  %v3952_v33 = vcvt.s32.f32 %v2416_v18  ;;  %v3712_v1 = vcvt.s32.f32 %v2176_v29  ;;  %v2344_v17 = vunpack.c.1.s8 %v9027_v38 }
 0x1be   : > { %v5440_v39 = vpack.c.bf16 %v4192_v31, %v4180_v30  ;;  %v5428_v54 = vpack.c.bf16 %v4168_v46, %v4156_v45  ;;  %v2092_v18 = vunpack.c.0.s8 %v9035_v44  ;;  %v3040_v34 = vunpack.c.3.s8 %v1936_v22 }
 0x1bf   : > { %1658 = vmatpush.bf16.msra.mxu0 %v7874_v49  ;;  %1684 = vmatpush.bf16.msra.mxu2 %v7878_v50  ;;  %v2140_v49 = vunpack.c.0.s8 %v9003_v14  ;;  %v4372_v50 = vcvt.s32.f32 %v2836_v40  ;;  %v5320_v0 = vpack.c.bf16 %v3952_v33, %v9022_v32  ;;  %v2332_v14 = vunpack.c.0.s8 %v9027_v38  ;;  %v1924_v32 = vld [vmem:[%s8946_s11 + $0x6c0] sm:$0xff] }
 0x1c0   : > { %v3628_v29 = vcvt.s32.f32 %v2092_v18  ;;  %v3028_v33 = vunpack.c.2.s8 %v1936_v22  ;;  %v3004_v37 = vunpack.c.0.s8 %v1936_v22  ;;  %v2980_v41 = vunpack.c.2.s8 %v1924_v32 }
 0x1c1   : > { %1647 = vmatpush.bf16.msrb.mxu3 %v7554_v56  ;;  %1673 = vmatpush.bf16.msra.mxu1 %v7558_v57  ;;  %v2368_v56 = vunpack.c.3.s8 %v9027_v38  ;;  %v2116_v57 = vunpack.c.2.s8 %v9035_v44  ;;  %v5536_v58 = vpack.c.bf16 %v4384_v51, %v4372_v50  ;;  %v3868_v25 = vcvt.s32.f32 %v2332_v14 }
 0x1c2   : > { %v3016_v38 = vunpack.c.1.s8 %v1936_v22  ;;  %v3640_v46 = vcvt.s32.f32 %v2104_v26  ;;  %v4564_v50 = vcvt.s32.f32 %v3028_v33  ;;  %v4576_v51 = vcvt.s32.f32 %v3040_v34 }
 0x1c3   : > { %1659 = vmatpush.bf16.msra.mxu0 %v7842_v10  ;;  %1685 = vmatpush.bf16.msra.mxu2 %v7846_v11  ;;  %v3904_v10 = vcvt.s32.f32 %v2368_v56  ;;  %v5416_v11 = vpack.c.bf16 %v4144_v3, %v4132_v61  ;;  %v3652_v12 = vcvt.s32.f32 %v2116_v57  ;;  %v2956_v14 = vunpack.c.0.s8 %v1924_v32 }
 0x1c4   : > { %1648 = vmatmul.bf16.vlgmr.msrb.gmra.mxu3 %v8962_v47  ;;  %1674 = vmatmul.bf16.vlgmr.msra.gmra.mxu1 %v8962_v47  ;;  %v3700_v47 = vcvt.s32.f32 %v2164_v27  ;;  %v1984_v27 = vld [vmem:[%s8946_s11 + $0x8a0] sm:$0xff]  ;;  %v4552_v55 = vcvt.s32.f32 %v3016_v38  ;;  %v5164_v62 = vpack.c.bf16 %v3640_v46, %v3628_v29 }
 0x1c5   : > { %5932 = vmatpush.bf16.msra.mxu3 %v5248_v6  ;;  %5958 = vmatpush.bf16.msrb.mxu1 %v5440_v39  ;;  %v3676_v6 = vcvt.s32.f32 %v2140_v49  ;;  %v5296_v23 = vpack.c.bf16 %v3904_v10, %v3892_v9  ;;  %v3220_v39 = vunpack.c.2.s8 %v1984_v27  ;;  %v3232_v40 = vunpack.c.3.s8 %v1984_v27 }
 0x1c6   : > { %v3208_v44 = vunpack.c.1.s8 %v1984_v27  ;;  %v2572_v9 = vunpack.c.0.s8 %v9030_v42  ;;  %v2584_v10 = vunpack.c.1.s8 %v9030_v42  ;;  %v4492_v22 = vcvt.s32.f32 %v2956_v14  ;;  %v1816_v42 = vld [vmem:[%s8946_s11 + $0x360] sm:$0xff] }
 0x1c7   : > { %1660 = vmatpush.bf16.msra.mxu0 %v7810_v15  ;;  %1686 = vmatpush.bf16.msra.mxu2 %v7814_v16  ;;  %v5524_v15 = vpack.c.bf16 %v4360_v8, %v4348_v7  ;;  %v5200_v16 = vpack.c.bf16 %v3712_v1, %v3700_v47  ;;  %v3196_v47 = vunpack.c.0.s8 %v1984_v27  ;;  %v4756_v56 = vcvt.s32.f32 %v3220_v39 }
 0x1c8   : > { %v4768_v57 = vcvt.s32.f32 %v3232_v40  ;;  %v9063_v61 = vcvt.s32.f32 %v3208_v44  ;;  %v5632_v1 = vpack.c.bf16 %v4576_v51, %v4564_v50  ;;  %v829_v8 = vperm.slane %v9065_v63, 1 }
 0x1c9   : > { %5933 = vmatpush.bf16.msra.mxu3 %v5236_v20  ;;  %5959 = vmatpush.bf16.msrb.mxu1 %v5428_v54  ;;  %v1756_v20 = vld [vmem:[%s8946_s11 + $0x180] sm:$0xff]  ;;  %v4540_v54 = vcvt.s32.f32 %v3004_v37  ;;  %v9061_v60 = vcvt.s32.f32 %v3196_v47  ;;  %v4108_v18 = vcvt.s32.f32 %v2572_v9  ;;  %v2560_v29 = vunpack.c.3.s8 %v1816_v42 }
 0x1ca   : > { %1661 = vmatmul.bf16.vlgmr.msra.gmra.mxu0 %v8966_v4  ;;  %1687 = vmatmul.bf16.vlgmr.msra.gmra.mxu2 %v8966_v4  ;;  %v3688_v4 = vcvt.s32.f32 %v2152_v52  ;;  %v2308_v30 = vunpack.c.2.s8 %v1756_v20  ;;  %v2320_v31 = vunpack.c.3.s8 %v1756_v20  ;;  %v2284_v35 = vunpack.c.0.s8 %v1756_v20  ;;  %v1864_v47 = vld [vmem:[%s8946_s11 + $0x4e0] sm:$0xff] }
 0x1cb   : > { %5945 = vmatpush.bf16.msrb.mxu0 %v5344_v21  ;;  %5971 = vmatpush.bf16.msrb.mxu2 %v5536_v58  ;;  %v2296_v36 = vunpack.c.1.s8 %v1756_v20  ;;  %v9057_v58 = vcvt.s32.f32 %v2980_v41  ;;  %v5620_v3 = vpack.c.bf16 %v4552_v55, %v4540_v54  ;;  %v5728_v5 = vpack.c.bf16 %v4768_v57, %v4756_v56  ;;  %v1900_v9 = vld [vmem:[%s8946_s11 + $0x600] sm:$0xff] }
 0x1cc   : > { %v5188_v21 = vpack.c.bf16 %v3688_v4, %v3676_v6  ;;  %v3844_v48 = vcvt.s32.f32 %v2308_v30  ;;  %v3856_v49 = vcvt.s32.f32 %v2320_v31  ;;  %v3820_v52 = vcvt.s32.f32 %v2284_v35  ;;  %v1876_v4 = vld [vmem:[%s8946_s11 + $0x540] sm:$0xff] }
 0x1cd   : > { %5934 = vmatpush.bf16.msra.mxu3 %v5224_v24  ;;  %5960 = vmatpush.bf16.msrb.mxu1 %v5416_v11  ;;  %v5176_v24 = vpack.c.bf16 %v3664_v13, %v3652_v12  ;;  %v3832_v53 = vcvt.s32.f32 %v2296_v36  ;;  %v5716_v7 = vpack.c.bf16 %v9063_v61, %v9061_v60  ;;  %v2788_v11 = vunpack.c.2.s8 %v1876_v4  ;;  %v1972_v13 = vld [vmem:[%s8946_s11 + $0x840] sm:$0xff] }
 0x1ce   : > { %v2800_v12 = vunpack.c.3.s8 %v1876_v4  ;;  %v1912_v30 = vld [vmem:[%s8946_s11 + $0x660] sm:$0xff]  ;;  %v2764_v33 = vunpack.c.0.s8 %v1876_v4  ;;  %v2776_v34 = vunpack.c.1.s8 %v1876_v4  ;;  %v4096_v36 = vcvt.s32.f32 %v2560_v29 }
 0x1cf   : > { %5946 = vmatpush.bf16.msrb.mxu0 %v5332_v28  ;;  %5972 = vmatpush.bf16.msrb.mxu2 %v5524_v15  ;;  %v3880_v28 = vcvt.s32.f32 %v2344_v17  ;;  %v5260_v2 = vpack.c.bf16 %v3832_v53, %v3820_v52  ;;  %v2968_v15 = vunpack.c.1.s8 %v1924_v32  ;;  %v3184_v17 = vunpack.c.3.s8 %v1972_v13  ;;  %v1960_v53 = vld [vmem:[%s8946_s11 + $0x7e0] sm:$0xff] }
 0x1d0   : > { %v4324_v20 = vcvt.s32.f32 %v2788_v11  ;;  %v2932_v37 = vunpack.c.2.s8 %v1912_v30  ;;  %v2944_v38 = vunpack.c.3.s8 %v1912_v30  ;;  %v4300_v39 = vcvt.s32.f32 %v2764_v33 }
 0x1d1   : > { %5935 = vmatpush.bf16.msra.mxu3 %v5212_v43  ;;  %v2992_v43 = vunpack.c.3.s8 %v1924_v32  ;;  %v5284_v45 = vpack.c.bf16 %v3880_v28, %v3868_v25  ;;  %v4720_v25 = vcvt.s32.f32 %v3184_v17  ;;  %v2548_v28 = vunpack.c.2.s8 %v1816_v42 }
 0x1d2   : > { %v4312_v40 = vcvt.s32.f32 %v2776_v34  ;;  %v3148_v41 = vunpack.c.0.s8 %v1972_v13  ;;  %v4480_v46 = vcvt.s32.f32 %v2944_v38  ;;  %v2524_v52 = vunpack.c.0.s8 %v1816_v42  ;;  %v1948_v38 = vld [vmem:[%s8946_s11 + $0x780] sm:$0xff] }
 0x1d3   : > { %5947 = vmatpush.bf16.msrb.mxu0 %v5320_v0  ;;  %v9059_v59 = vcvt.s32.f32 %v2992_v43  ;;  %v5272_v0 = vpack.c.bf16 %v3856_v49, %v3844_v48  ;;  %v4084_v35 = vcvt.s32.f32 %v2548_v28  ;;  %v3160_v43 = vunpack.c.1.s8 %v1972_v13 }
 0x1d4   : > { %v828_v48 = vperm.slane %v9065_v63, 0  ;;  %v5500_v49 = vpack.c.bf16 %v4312_v40, %v4300_v39  ;;  %v4684_v50 = vcvt.s32.f32 %v3148_v41  ;;  %v2536_v55 = vunpack.c.1.s8 %v1816_v42  ;;  %v1852_v42 = vld [vmem:[%s8946_s11 + $0x480] sm:$0xff] }
 0x1d5   : > { %5936 = vmatpush.bf16.msra.mxu3 %v5200_v16  ;;  %v5608_v6 = vpack.c.bf16 %v9059_v59, %v9057_v58  ;;  %v3172_v16 = vunpack.c.2.s8 %v1972_v13  ;;  %v5392_v44 = vpack.c.bf16 %v4096_v36, %v4084_v35  ;;  %v4696_v51 = vcvt.s32.f32 %v3160_v43  ;;  %v2032_v39 = vld [vmem:[%s8946_s11 + $0xa20] sm:$0xff] }
 0x1d6   : > { %v2740_v56 = vunpack.c.2.s8 %v1864_v47  ;;  %v2752_v57 = vunpack.c.3.s8 %v1864_v47  ;;  %v4060_v59 = vcvt.s32.f32 %v2524_v52  ;;  %v2908_v60 = vunpack.c.0.s8 %v1912_v30 }
 0x1d7   : > { %5948 = vmatpush.bf16.msrb.mxu0 %v5308_v19  ;;  %v4120_v19 = vcvt.s32.f32 %v2584_v10  ;;  %v5692_v58 = vpack.c.bf16 %v4696_v51, %v4684_v50  ;;  %v2920_v61 = vunpack.c.1.s8 %v1912_v30  ;;  %v2716_v17 = vunpack.c.0.s8 %v1864_v47  ;;  %v9088_v50 = vld [vmem:[%s8946_s11 + $0x128] sm:$0xff] }
 0x1d8   : > { %v2692_v36 = vunpack.c.2.s8 %v1852_v42  ;;  %v831_v41 = vperm.slane %v9065_v63, 3  ;;  %v3076_v52 = vunpack.c.2.s8 %v1948_v38 }
 0x1d9   : > { %5937 = vmatpush.bf16.msra.mxu3 %v5188_v21  ;;  %v4336_v21 = vcvt.s32.f32 %v2800_v12  ;;  %v5404_v26 = vpack.c.bf16 %v4120_v19, %v4108_v18  ;;  %v2728_v19 = vunpack.c.1.s8 %v1864_v47 }
 0x1db   : > { %5949 = vmatpush.bf16.msrb.mxu0 %v5296_v23  ;;  %v4504_v23 = vcvt.s32.f32 %v2968_v15  ;;  %v5512_v27 = vpack.c.bf16 %v4336_v21, %v4324_v20  ;;  %5961 = vmatpush.bf16.msrb.mxu1 %v5404_v26  ;;  %v2884_v20 = vunpack.c.2.s8 %v1900_v9  ;;  %v2896_v21 = vunpack.c.3.s8 %v1900_v9 }
 0x1dd   : > { %5938 = vmatpush.bf16.msra.mxu3 %v5176_v24  ;;  %v4708_v24 = vcvt.s32.f32 %v3172_v16  ;;  %v5596_v31 = vpack.c.bf16 %v4504_v23, %v4492_v22  ;;  %5973 = vmatpush.bf16.msrb.mxu2 %v5512_v27  ;;  %v4252_v23 = vcvt.s32.f32 %v2716_v17  ;;  %v4264_v27 = vcvt.s32.f32 %v2728_v19 }
 0x1de   : > { %v4420_v28 = vcvt.s32.f32 %v2884_v20  ;;  %v4432_v29 = vcvt.s32.f32 %v2896_v21  ;;  %v3400_v17 = vunpack.c.1.s8 %v2032_v39 }
 0x1df   : > { %5950 = vmatpush.bf16.msrb.mxu0 %v5284_v45  ;;  %v5704_v32 = vpack.c.bf16 %v4720_v25, %v4708_v24  ;;  %v4468_v45 = vcvt.s32.f32 %v2932_v37  ;;  %5962 = vmatpush.bf16.msrb.mxu1 %v5392_v44  ;;  %v3100_v24 = vunpack.c.0.s8 %v1960_v53  ;;  %v3112_v25 = vunpack.c.1.s8 %v1960_v53 }
 0x1e0   : > { %v5476_v34 = vpack.c.bf16 %v4264_v27, %v4252_v23  ;;  %v5560_v35 = vpack.c.bf16 %v4432_v29, %v4420_v28  ;;  %v2704_v37 = vunpack.c.3.s8 %v1852_v42  ;;  %v4228_v44 = vcvt.s32.f32 %v2692_v36 }
 0x1e1   : > { %5939 = vmatpush.bf16.msra.mxu3 %v5164_v62  ;;  %v5584_v54 = vpack.c.bf16 %v4480_v46, %v4468_v45  ;;  %5974 = vmatpush.bf16.msrb.mxu2 %v5500_v49  ;;  %v1804_v62 = vld [vmem:[%s8946_s11 + $0x300] sm:$0xff]  ;;  %v4636_v30 = vcvt.s32.f32 %v3100_v24  ;;  %v2860_v46 = vunpack.c.0.s8 %v1900_v9  ;;  %v2872_v49 = vunpack.c.1.s8 %v1900_v9 }
 0x1e2   : > { %v2500_v4 = vunpack.c.2.s8 %v1804_v62  ;;  %v2512_v13 = vunpack.c.3.s8 %v1804_v62  ;;  %v2488_v33 = vunpack.c.1.s8 %v1804_v62  ;;  %v4240_v45 = vcvt.s32.f32 %v2704_v37  ;;  %v2080_v9 = vld [vmem:[%s8946_s11 + $0xba0] sm:$0xff] }
 0x1e3   : > { %5951 = vmatpush.bf16.msrb.mxu0 %v5272_v0  ;;  %v4072_v0 = vcvt.s32.f32 %v2536_v55  ;;  %v3604_v20 = vunpack.c.2.s8 %v2080_v9  ;;  %v3616_v21 = vunpack.c.3.s8 %v2080_v9 }
 0x1e4   : > { %v4036_v16 = vcvt.s32.f32 %v2500_v4  ;;  %v4048_v18 = vcvt.s32.f32 %v2512_v13  ;;  %v4024_v47 = vcvt.s32.f32 %v2488_v33  ;;  %v5464_v55 = vpack.c.bf16 %v4240_v45, %v4228_v44 }
 0x1e5   : > { %5984 = vmatpush.bf16.msrb.mxu3 %v5632_v1  ;;  %v4276_v1 = vcvt.s32.f32 %v2740_v56  ;;  %v5380_v10 = vpack.c.bf16 %v4072_v0, %v4060_v59  ;;  %v4396_v56 = vcvt.s32.f32 %v2860_v46  ;;  %v4612_v59 = vcvt.s32.f32 %v3076_v52 }
 0x1e6   : > { %v5368_v26 = vpack.c.bf16 %v4048_v18, %v4036_v16  ;;  %v3052_v4 = vunpack.c.0.s8 %v1948_v38  ;;  %v3064_v13 = vunpack.c.1.s8 %v1948_v38  ;;  %v3388_v16 = vunpack.c.0.s8 %v2032_v39 }
 0x1e7   : > { %5952 = vmatpush.bf16.msrb.mxu0 %v5260_v2  ;;  %v4288_v2 = vcvt.s32.f32 %v2752_v57  ;;  %5963 = vmatpush.bf16.msrb.mxu1 %v5380_v10  ;;  %v4408_v57 = vcvt.s32.f32 %v2872_v49  ;;  %v5140_v28 = vcvt.s32.f32 %v3604_v20  ;;  %v5152_v29 = vcvt.s32.f32 %v3616_v21 }
 0x1e8   : > { %v4600_v19 = vcvt.s32.f32 %v3064_v13  ;;  %v4924_v24 = vcvt.s32.f32 %v3388_v16  ;;  %v3580_v44 = vunpack.c.0.s8 %v2080_v9  ;;  %v3592_v49 = vunpack.c.1.s8 %v2080_v9 }
 0x1e9   : > { %5985 = vmatpush.bf16.msrb.mxu3 %v5620_v3  ;;  %v3124_v3 = vunpack.c.2.s8 %v1960_v53  ;;  %v5488_v11 = vpack.c.bf16 %v4288_v2, %v4276_v1  ;;  %v5548_v0 = vpack.c.bf16 %v4408_v57, %v4396_v56  ;;  %v2273_v2 = vunpack.c.3.s8 %v9088_v50  ;;  %v2068_v56 = vld [vmem:[%s8946_s11 + $0xb40] sm:$0xff] }
 0x1ea   : > { %v5920_v36 = vpack.c.bf16 %v5152_v29, %v5140_v28  ;;  %v9139_v29 = vld [vmem:[%s8946_s11 + $0x68] sm:$0xff] }
 0x1eb   : > { %5997 = vmatpush.bf16.msra.mxu0 %v5728_v5  ;;  %v4444_v5 = vcvt.s32.f32 %v2908_v60  ;;  %v4660_v12 = vcvt.s32.f32 %v3124_v3  ;;  %5975 = vmatpush.bf16.msrb.mxu2 %v5488_v11  ;;  %v2668_v3 = vunpack.c.0.s8 %v1852_v42  ;;  %v9095_v11 = vcvt.s32.f32 %v2273_v2 }
 0x1ec   : > { %5964 = vmatpush.bf16.msrb.mxu1 %v5368_v26  ;;  %v2020_v26 = vld [vmem:[%s8946_s11 + $0x9c0] sm:$0xff] }
 0x1ed   : > { %5986 = vmatpush.bf16.msrb.mxu3 %v5608_v6  ;;  %v4456_v6 = vcvt.s32.f32 %v2920_v61 }
 0x1ef   : > { %5998 = vmatpush.bf16.msra.mxu0 %v5716_v7  ;;  %v3136_v7 = vunpack.c.3.s8 %v1960_v53  ;;  %v5572_v14 = vpack.c.bf16 %v4456_v6, %v4444_v5  ;;  %5976 = vmatpush.bf16.msrb.mxu2 %v5476_v34  ;;  %v3088_v53 = vunpack.c.3.s8 %v1948_v38  ;;  %v3364_v38 = vunpack.c.2.s8 %v2020_v26 }
 0x1f1   : > { %5987 = vmatpush.bf16.msrb.mxu3 %v5596_v31  ;;  %v4672_v15 = vcvt.s32.f32 %v3136_v7  ;;  %v4648_v31 = vcvt.s32.f32 %v3112_v25  ;;  %v4624_v60 = vcvt.s32.f32 %v3088_v53  ;;  %v2680_v7 = vunpack.c.1.s8 %v1852_v42 }
 0x1f2   : > { %v4936_v25 = vcvt.s32.f32 %v3400_v17  ;;  %v830_v42 = vperm.slane %v9065_v63, 2  ;;  %v4900_v45 = vcvt.s32.f32 %v3364_v38  ;;  %v3532_v38 = vunpack.c.0.s8 %v2068_v56 }
 0x1f3   : > { %5999 = vmatpush.bf16.msra.mxu0 %v5704_v32  ;;  %v5680_v22 = vpack.c.bf16 %v4672_v15, %v4660_v12  ;;  %v2476_v32 = vunpack.c.0.s8 %v1804_v62  ;;  %v5668_v40 = vpack.c.bf16 %v4648_v31, %v4636_v30  ;;  %v2261_v62 = vunpack.c.2.s8 %v9088_v50  ;;  %5977 = vmatpush.bf16.msrb.mxu2 %v5464_v55 }
 0x1f4   : > { %v5656_v5 = vpack.c.bf16 %v4624_v60, %v4612_v59  ;;  %v4204_v12 = vcvt.s32.f32 %v2668_v3  ;;  %v4588_v15 = vcvt.s32.f32 %v3052_v4  ;;  %v2237_v30 = vunpack.c.0.s8 %v9088_v50  ;;  %v1781_v4 = vld [vmem:[%s8946_s11 + $0x248] sm:$0xff] }
 0x1f5   : > { %5988 = vmatpush.bf16.msrb.mxu3 %v5584_v54  ;;  %v4012_v43 = vcvt.s32.f32 %v2476_v32  ;;  %v3412_v54 = vunpack.c.2.s8 %v2032_v39  ;;  %v9092_v6 = vcvt.s32.f32 %v2261_v62  ;;  %v5812_v31 = vpack.c.bf16 %v4936_v25, %v4924_v24  ;;  %v2008_v24 = vld [vmem:[%s8946_s11 + $0x960] sm:$0xff] }
 0x1f6   : > { %v5644_v27 = vpack.c.bf16 %v4600_v19, %v4588_v15  ;;  %v2249_v32 = vunpack.c.1.s8 %v9088_v50  ;;  %v9105_v37 = vcvt.s32.f32 %v2237_v30  ;;  %v5128_v59 = vcvt.s32.f32 %v3592_v49 }
 0x1f7   : > { %6000 = vmatpush.bf16.msra.mxu0 %v5692_v58  ;;  %v5356_v51 = vpack.c.bf16 %v4024_v47, %v4012_v43  ;;  %v3424_v58 = vunpack.c.3.s8 %v2032_v39  ;;  %v4948_v61 = vcvt.s32.f32 %v3412_v54  ;;  %v5249_v18 = vpack.c.bf16 %v9095_v11, %v9092_v6 }
 0x1f8   : > { %v3376_v39 = vunpack.c.3.s8 %v2020_v26  ;;  %v5116_v54 = vcvt.s32.f32 %v3580_v44  ;;  %v3352_v3 = vunpack.c.1.s8 %v2020_v26 }
 0x1f9   : > { %5989 = vmatpush.bf16.msrb.mxu3 %v5572_v14  ;;  %5965 = vmatpush.bf16.msrb.mxu1 %v5356_v51  ;;  %v4960_v1 = vcvt.s32.f32 %v3424_v58  ;;  %v4216_v14 = vcvt.s32.f32 %v2680_v7  ;;  %v3568_v7 = vunpack.c.3.s8 %v2068_v56 }
 0x1fa   : > { %v4912_v46 = vcvt.s32.f32 %v3376_v39  ;;  %v5908_v2 = vpack.c.bf16 %v5128_v59, %v5116_v54  ;;  %v4888_v13 = vcvt.s32.f32 %v3352_v3  ;;  %v5068_v54 = vcvt.s32.f32 %v3532_v38 }
 0x1fb   : > { %6001 = vmatpush.bf16.msra.mxu0 %v5680_v22  ;;  %v5824_v10 = vpack.c.bf16 %v4960_v1, %v4948_v61  ;;  %v1793_v22 = vld [vmem:[%s8946_s11 + $0x2a8] sm:$0xff]  ;;  %v5452_v23 = vpack.c.bf16 %v4216_v14, %v4204_v12  ;;  %v3340_v1 = vunpack.c.0.s8 %v2020_v26  ;;  %v5104_v15 = vcvt.s32.f32 %v3568_v7 }
 0x1fc   : > { %v2453_v33 = vunpack.c.2.s8 %v1793_v22  ;;  %v2465_v34 = vunpack.c.3.s8 %v1793_v22  ;;  %v5800_v58 = vpack.c.bf16 %v4912_v46, %v4900_v45  ;;  %v2429_v62 = vunpack.c.0.s8 %v1793_v22 }
 0x1fd   : > { %5990 = vmatpush.bf16.msrb.mxu3 %v5560_v35  ;;  %6010 = vmatpush.bf16.msra.mxu1 %v5824_v10  ;;  %v1733_v35 = vld [vmem:[%s8946_s11 + $0xc8] sm:$0xff]  ;;  %v4876_v12 = vcvt.s32.f32 %v3340_v1  ;;  %v3544_v45 = vunpack.c.1.s8 %v2068_v56  ;;  %v2165_v46 = vunpack.c.2.s8 %v9139_v29  ;;  %v2177_v59 = vunpack.c.3.s8 %v9139_v29  ;;  %v9157_v1 = vld [vmem:[%s8946_s11 + $0xae0] sm:$0xff] }
 0x1fe   : > { %5978 = vmatpush.bf16.msrb.mxu2 %v5452_v23  ;;  %v9109_v43 = vcvt.s32.f32 %v2453_v33  ;;  %v9111_v47 = vcvt.s32.f32 %v2465_v34  ;;  %v2213_v50 = vunpack.c.2.s8 %v1733_v35  ;;  %v2225_v55 = vunpack.c.3.s8 %v1733_v35 }
 0x1ff   : > { %6002 = vmatpush.bf16.msra.mxu0 %v5668_v40  ;;  %v9107_v40 = vcvt.s32.f32 %v2249_v32  ;;  %v2189_v16 = vunpack.c.0.s8 %v1733_v35  ;;  %v2201_v21 = vunpack.c.1.s8 %v1733_v35  ;;  %v2417_v23 = vunpack.c.3.s8 %v1781_v4 }
 0x200   : > { %v5345_v53 = vpack.c.bf16 %v9111_v47, %v9109_v43  ;;  %v9120_v60 = vcvt.s32.f32 %v2213_v50  ;;  %v9122_v61 = vcvt.s32.f32 %v2225_v55  ;;  %v5788_v26 = vpack.c.bf16 %v4888_v13, %v4876_v12 }
 0x201   : > { %5991 = vmatpush.bf16.msrb.mxu3 %v5548_v0  ;;  %6011 = vmatpush.bf16.msra.mxu1 %v5812_v31  ;;  %v1519_v51 = vpop.f32.mrf.mxu1  ;;  %v5237_v52 = vpack.c.bf16 %v9107_v40, %v9105_v37  ;;  %v2441_v0 = vunpack.c.1.s8 %v1793_v22  ;;  %v2405_v22 = vunpack.c.2.s8 %v1781_v4  ;;  %v9136_v28 = vcvt.s32.f32 %v2189_v16 }
 0x202   : > { %6023 = vmatpush.bf16.msra.mxu2 %v5920_v36  ;;  %v1520_v57 = vadd.f32 %v1519_v51, %v829_v8  ;;  %v5225_v9 = vpack.c.bf16 %v9122_v61, %v9120_v60  ;;  %v9127_v8 = vcvt.s32.f32 %v2429_v62  ;;  %v9141_v31 = vcvt.s32.f32 %v2201_v21 }
 0x203   : > { %6003 = vmatpush.bf16.msra.mxu0 %v5656_v5  ;;  %v3556_v5 = vunpack.c.2.s8 %v2068_v56  ;;  %v9129_v10 = vcvt.s32.f32 %v2441_v0  ;;  %v9143_v32 = vcvt.s32.f32 %v2405_v22  ;;  %v9145_v33 = vcvt.s32.f32 %v2417_v23 }
 0x204   : > { %v833_v34 = vperm.slane %v9065_v63, 5  ;;  %v3316_v36 = vunpack.c.2.s8 %v2008_v24  ;;  %v5213_v39 = vpack.c.bf16 %v9141_v31, %v9136_v28  ;;  %v9154_v62 = vcvt.s32.f32 %v2165_v46 }
 0x205   : > { %6012 = vmatpush.bf16.msra.mxu1 %v5800_v58  ;;  %v5092_v14 = vcvt.s32.f32 %v3556_v5  ;;  %v5333_v20 = vpack.c.bf16 %v9129_v10, %v9127_v8  ;;  %v5321_v44 = vpack.c.bf16 %v9145_v33, %v9143_v32  ;;  %v5080_v58 = vcvt.s32.f32 %v3544_v45 }
 0x206   : > { %6024 = vmatpush.bf16.msra.mxu2 %v5908_v2  ;;  %v4852_v50 = vcvt.s32.f32 %v3316_v36  ;;  %v2381_v0 = vunpack.c.0.s8 %v1781_v4  ;;  %v2393_v56 = vunpack.c.1.s8 %v1781_v4  ;;  %v3292_v16 = vunpack.c.0.s8 %v2008_v24 }
 0x207   : > { %6004 = vmatpush.bf16.msra.mxu0 %v5644_v27  ;;  %v1493_v17 = vpop.f32.mrf.mxu3  ;;  %v1506_v19 = vpop.f32.mrf.mxu0  ;;  %v5896_v27 = vpack.c.bf16 %v5104_v15, %v5092_v14  ;;  %v5884_v13 = vpack.c.bf16 %v5080_v58, %v5068_v54  ;;  %v9161_v14 = vcvt.s32.f32 %v2177_v59  ;;  %v3304_v21 = vunpack.c.1.s8 %v2008_v24 }
 0x208   : > { %v1494_v25 = vadd.f32 %v1493_v17, %v828_v48  ;;  %v3328_v48 = vunpack.c.3.s8 %v2008_v24  ;;  %v9163_v15 = vcvt.s32.f32 %v2381_v0  ;;  %v4828_v23 = vcvt.s32.f32 %v3292_v16  ;;  %v9221_v16 = vld [vmem:[%s8946_s11 + $0xa80] sm:$0xff] }
 0x209   : > { %v1521_v30 = vpop.f32.mrf.mxu1  ;;  %6013 = vmatpush.bf16.msra.mxu1 %v5788_v26  ;;  %v5201_v22 = vpack.c.bf16 %v9161_v14, %v9154_v62  ;;  %v832_v26 = vperm.slane %v9065_v63, 4  ;;  %v4840_v11 = vcvt.s32.f32 %v3304_v21  ;;  %v2153_v38 = vunpack.c.1.s8 %v9139_v29 }
 0x20a   : > { %v1507_v35 = vadd.f32 %v1506_v19, %v1494_v25  ;;  %6025 = vmatpush.bf16.msra.mxu2 %v5896_v27  ;;  %v4864_v51 = vcvt.s32.f32 %v3328_v48  ;;  %v9166_v19 = vcvt.s32.f32 %v2393_v56  ;;  %v3520_v25 = vunpack.c.3.s8 %v9157_v1  ;;  %v1769_v27 = vld [vmem:[%s8946_s11 + $0x1e8] sm:$0xff]  ;;  %v9178_v30 = vld [vmem:[%s8946_s11 + $0x900] sm:$0xff] }
 0x20b   : > { %v2141_v48 = vunpack.c.0.s8 %v9139_v29  ;;  %v5764_v45 = vpack.c.bf16 %v4840_v11, %v4828_v23  ;;  %v2357_v46 = vunpack.c.2.s8 %v1769_v27  ;;  %v3280_v58 = vunpack.c.3.s8 %v9178_v30 }
 0x20c   : > { %v1692_v49 = vmax.f32 %v1507_v35, 0.0  ;;  %v5776_v5 = vpack.c.bf16 %v4864_v51, %v4852_v50  ;;  %v5309_v6 = vpack.c.bf16 %v9166_v19, %v9163_v15  ;;  %v5056_v36 = vcvt.s32.f32 %v3520_v25  ;;  %v9193_v51 = vld [vmem:[%s8946_s11 + $0x8] sm:$0xff] }
 0x20d   : > { %v1532_v55 = vpop.f32.mrf.mxu2  ;;  %v3268_v50 = vunpack.c.2.s8 %v9178_v30  ;;  %v9201_v29 = vcvt.s32.f32 %v2141_v48  ;;  %v9206_v59 = vcvt.s32.f32 %v2357_v46  ;;  %v3484_v37 = vunpack.c.0.s8 %v9157_v1 }
 0x20e   : > { %v9159_v2 = vpack.c.bf16 %v1692_v49, %v1692_v49  ;;  %v1533_v3 = vadd.f32 %v1532_v55, %v1520_v57  ;;  %6014 = vmatpush.bf16.msra.mxu1 %v5776_v5  ;;  %v3508_v57 = vunpack.c.2.s8 %v9157_v1  ;;  %6026 = vmatpush.bf16.msra.mxu2 %v5884_v13  ;;  %v2369_v49 = vunpack.c.3.s8 %v1769_v27 }
 0x20f   : > { %v1495_v7 = vpop.f32.mrf.mxu3  ;;  %v1508_v12 = vpop.f32.mrf.mxu0  ;;  %v9203_v55 = vcvt.s32.f32 %v2153_v38  ;;  %v4816_v47 = vcvt.s32.f32 %v3280_v58  ;;  %v2117_v5 = vunpack.c.2.s8 %v9193_v51  ;;  %v2129_v13 = vunpack.c.3.s8 %v9193_v51 }
 0x210   : > { %v1693_v17 = vmax.f32 %v1533_v3, 0.0  ;;  %5940 = vmatmul.bf16.vlgmr.msra.gmra.mxu3 %v9159_v2  ;;  %v9208_v0 = vcvt.s32.f32 %v2369_v49  ;;  %v4804_v3 = vcvt.s32.f32 %v3268_v50  ;;  %v5020_v12 = vcvt.s32.f32 %v3484_v37  ;;  %v1841_v49 = vld [vmem:[%s8946_s11 + $0x428] sm:$0xff] }
 0x211   : > { %v1571_v4 = vpop.f32.mrf.mxu1  ;;  %6036 = vmatpush.bf16.msra.mxu3 %v5249_v18  ;;  %v5044_v18 = vcvt.s32.f32 %v3508_v57  ;;  %v5189_v43 = vpack.c.bf16 %v9203_v55, %v9201_v29  ;;  %v2333_v57 = vunpack.c.0.s8 %v1769_v27  ;;  %v9231_v23 = vcvt.s32.f32 %v2129_v13 }
 0x212   : > { %v9180_v24 = vpack.c.bf16 %v1693_v17, %v1693_v17  ;;  %v9184_v35 = vadd.f32 %v1571_v4, %v831_v41  ;;  %6015 = vmatpush.bf16.msra.mxu1 %v5764_v45  ;;  %v5297_v7 = vpack.c.bf16 %v9208_v0, %v9206_v59  ;;  %v2345_v25 = vunpack.c.1.s8 %v1769_v27  ;;  %v9243_v27 = vld [vmem:[%s8946_s11 + $0x188] sm:$0xff] }
 0x213   : > { %v5872_v54 = vpack.c.bf16 %v5056_v36, %v5044_v18  ;;  %v3244_v11 = vunpack.c.0.s8 %v9178_v30  ;;  %v9234_v60 = vcvt.s32.f32 %v2333_v57  ;;  %v3256_v61 = vunpack.c.1.s8 %v9178_v30  ;;  %v9296_v57 = vld [vmem:[%s8946_s11 + $0x5a8] sm:$0xff] }
 0x214   : > { %5953 = vmatmul.bf16.vlgmr.msrb.gmra.mxu0 %v9180_v24  ;;  %v3472_v38 = vunpack.c.3.s8 %v9221_v16  ;;  %v2093_v46 = vunpack.c.0.s8 %v9193_v51  ;;  %v2105_v31 = vunpack.c.1.s8 %v9193_v51  ;;  %v2837_v0 = vunpack.c.2.s8 %v9296_v57 }
 0x215   : > { %v1534_v41 = vpop.f32.mrf.mxu2  ;;  %6037 = vmatpush.bf16.msra.mxu3 %v5237_v52  ;;  %6049 = vmatpush.bf16.msrb.mxu0 %v5345_v53  ;;  %v3496_v53 = vunpack.c.1.s8 %v9157_v1  ;;  %v5752_v1 = vpack.c.bf16 %v4816_v47, %v4804_v3  ;;  %v4780_v36 = vcvt.s32.f32 %v3244_v11  ;;  %v4792_v30 = vcvt.s32.f32 %v3256_v61 }
 0x216   : > { %6027 = vmatpush.bf16.msra.mxu2 %v5872_v54  ;;  %v5008_v54 = vcvt.s32.f32 %v3472_v38  ;;  %v9263_v58 = vcvt.s32.f32 %v2093_v46  ;;  %v2309_v3 = vunpack.c.2.s8 %v9243_v27  ;;  %v9319_v38 = vld [vmem:[%s8946_s11 + $0x3c8] sm:$0xff] }
 0x217   : > { %v1545_v40 = vpop.f32.mrf.mxu3  ;;  %v1558_v52 = vpop.f32.mrf.mxu0  ;;  %v5032_v21 = vcvt.s32.f32 %v3496_v53  ;;  %6016 = vmatpush.bf16.msra.mxu1 %v5752_v1  ;;  %v3436_v1 = vunpack.c.0.s8 %v9221_v16 }
 0x218   : > { %v1546_v56 = vadd.f32 %v1545_v40, %v830_v42  ;;  %v9229_v42 = vcvt.s32.f32 %v2117_v5  ;;  %v2321_v40 = vunpack.c.3.s8 %v9243_v27  ;;  %v9276_v53 = vcvt.s32.f32 %v2309_v3 }
 0x219   : > { %v1573_v17 = vpop.f32.mrf.mxu1  ;;  %6038 = vmatpush.bf16.msra.mxu3 %v5225_v9  ;;  %6050 = vmatpush.bf16.msrb.mxu0 %v5333_v20  ;;  %v5860_v18 = vpack.c.bf16 %v5032_v21, %v5020_v12  ;;  %v3460_v9 = vunpack.c.2.s8 %v9221_v16  ;;  %v9240_v20 = vcvt.s32.f32 %v2345_v25  ;;  %v2657_v5 = vunpack.c.3.s8 %v1841_v49 }
 0x21a   : > { %v1559_v4 = vadd.f32 %v1558_v52, %v1546_v56  ;;  %v5177_v10 = vpack.c.bf16 %v9231_v23, %v9229_v42  ;;  %v2645_v52 = vunpack.c.2.s8 %v1841_v49  ;;  %v3857_v14 = vcvt.s32.f32 %v2321_v40 }
 0x21b   : > { %v4996_v45 = vcvt.s32.f32 %v3460_v9  ;;  %6028 = vmatpush.bf16.msra.mxu2 %v5860_v18  ;;  %v5285_v28 = vpack.c.bf16 %v9240_v20, %v9234_v60  ;;  %v4193_v19 = vcvt.s32.f32 %v2657_v5  ;;  %v2285_v21 = vunpack.c.0.s8 %v9243_v27 }
 0x21c   : > { %v1694_v8 = vmax.f32 %v1559_v4, 0.0  ;;  %v4181_v15 = vcvt.s32.f32 %v2645_v52  ;;  %v5273_v17 = vpack.c.bf16 %v3857_v14, %v9276_v53  ;;  %v2297_v18 = vunpack.c.1.s8 %v9243_v27 }
 0x21d   : > { %v1584_v48 = vpop.f32.mrf.mxu2  ;;  %6039 = vmatpush.bf16.msra.mxu3 %v5213_v39  ;;  %6051 = vmatpush.bf16.msrb.mxu0 %v5321_v44  ;;  %v9261_v39 = vld [vmem:[%s8946_s11 + $0x728] sm:$0xff]  ;;  %v5740_v44 = vpack.c.bf16 %v4792_v30, %v4780_v36  ;;  %v5848_v51 = vpack.c.bf16 %v5008_v54, %v4996_v45  ;;  %v4972_v60 = vcvt.s32.f32 %v3436_v1  ;;  %v9307_v9 = vcvt.s32.f32 %v2285_v21 }
 0x21e   : > { %v9254_v50 = vpack.c.bf16 %v1694_v8, %v1694_v8  ;;  %v1585_v41 = vadd.f32 %v1584_v48, %v9184_v35  ;;  %v9267_v35 = vcvt.s32.f32 %v2105_v31  ;;  %v3029_v56 = vunpack.c.2.s8 %v9261_v39 }
 0x21f   : > { %v1547_v32 = vpop.f32.mrf.mxu3  ;;  %v1560_v33 = vpop.f32.mrf.mxu0  ;;  %6017 = vmatpush.bf16.msra.mxu1 %v5740_v44  ;;  %6029 = vmatpush.bf16.msra.mxu2 %v5848_v51  ;;  %v5441_v25 = vpack.c.bf16 %v4193_v19, %v4181_v15  ;;  %v2633_v8 = vunpack.c.1.s8 %v1841_v49  ;;  %v3833_v55 = vcvt.s32.f32 %v2297_v18  ;;  %v2849_v30 = vunpack.c.3.s8 %v9296_v57 }
 0x220   : > { %v1695_v37 = vmax.f32 %v1585_v41, 0.0  ;;  %5966 = vmatmul.bf16.vlgmr.msrb.gmra.mxu1 %v9254_v50  ;;  %v5165_v62 = vpack.c.bf16 %v9267_v35, %v9263_v58  ;;  %v3005_v41 = vunpack.c.0.s8 %v9261_v39  ;;  %v2597_v23 = vunpack.c.2.s8 %v9319_v38 }
 0x221   : > { %v1623_v47 = vpop.f32.mrf.mxu1  ;;  %6040 = vmatpush.bf16.msra.mxu3 %v5201_v22  ;;  %6052 = vmatpush.bf16.msrb.mxu0 %v5309_v6  ;;  %v3041_v22 = vunpack.c.3.s8 %v9261_v39  ;;  %v9288_v6 = vcvt.s32.f32 %v3029_v56  ;;  %v4169_v48 = vcvt.s32.f32 %v2633_v8  ;;  %v5261_v46 = vpack.c.bf16 %v3833_v55, %v9307_v9  ;;  %v1973_v8 = vld [vmem:[%s8946_s11 + $0x848] sm:$0xff] }
 0x222   : > { %v9279_v12 = vpack.c.bf16 %v1695_v37, %v1695_v37  ;;  %v9283_v13 = vadd.f32 %v1623_v47, %v833_v34  ;;  %v3448_v34 = vunpack.c.1.s8 %v9221_v16  ;;  %v2621_v16 = vunpack.c.0.s8 %v1841_v49 }
 0x223   : > { %v9304_v11 = vcvt.s32.f32 %v3041_v22  ;;  %6062 = vmatpush.bf16.msrb.mxu1 %v5441_v25  ;;  %v4373_v49 = vcvt.s32.f32 %v2837_v0  ;;  %v4385_v33 = vcvt.s32.f32 %v2849_v30  ;;  %v4541_v54 = vcvt.s32.f32 %v3005_v41 }
 0x224   : > { %5979 = vmatmul.bf16.vlgmr.msrb.gmra.mxu2 %v9279_v12  ;;  %v4984_v61 = vcvt.s32.f32 %v3448_v34  ;;  %v4157_v59 = vcvt.s32.f32 %v2621_v16  ;;  %v4133_v52 = vcvt.s32.f32 %v2597_v23  ;;  %v2813_v47 = vunpack.c.0.s8 %v9296_v57 }
 0x225   : > { %v1586_v4 = vpop.f32.mrf.mxu2  ;;  %6041 = vmatpush.bf16.msra.mxu3 %v5189_v43  ;;  %6053 = vmatpush.bf16.msrb.mxu0 %v5297_v7  ;;  %v5633_v29 = vpack.c.bf16 %v9304_v11, %v9288_v6  ;;  %v9313_v43 = vld [vmem:[%s8946_s11 + $0x8a8] sm:$0xff]  ;;  %v5537_v3 = vpack.c.bf16 %v4385_v33, %v4373_v49  ;;  %v2825_v56 = vunpack.c.1.s8 %v9296_v57  ;;  %v2573_v18 = vunpack.c.0.s8 %v9319_v38 }
 0x226   : > { %v5836_v27 = vpack.c.bf16 %v4984_v61, %v4972_v60  ;;  %v5429_v32 = vpack.c.bf16 %v4169_v48, %v4157_v59  ;;  %v3221_v44 = vunpack.c.2.s8 %v9313_v43  ;;  %v3233_v42 = vunpack.c.3.s8 %v9313_v43 }
 0x227   : > { %v1597_v20 = vpop.f32.mrf.mxu3  ;;  %v1610_v36 = vpop.f32.mrf.mxu0  ;;  %v4349_v22 = vcvt.s32.f32 %v2813_v47  ;;  %v4361_v21 = vcvt.s32.f32 %v2825_v56  ;;  %v3197_v25 = vunpack.c.0.s8 %v9313_v43  ;;  %v2585_v61 = vunpack.c.1.s8 %v9319_v38 }
 0x228   : > { %v1598_v7 = vadd.f32 %v1597_v20, %v832_v26  ;;  %v3017_v26 = vunpack.c.1.s8 %v9261_v39  ;;  %6030 = vmatpush.bf16.msra.mxu2 %v5836_v27  ;;  %6063 = vmatpush.bf16.msrb.mxu1 %v5429_v32  ;;  %v4757_v37 = vcvt.s32.f32 %v3221_v44  ;;  %v2609_v39 = vunpack.c.3.s8 %v9319_v38  ;;  %v1817_v27 = vld [vmem:[%s8946_s11 + $0x368] sm:$0xff] }
 0x229   : > { %v1625_v45 = vpop.f32.mrf.mxu1  ;;  %6042 = vmatpush.bf16.msra.mxu3 %v5177_v10  ;;  %6054 = vmatpush.bf16.msrb.mxu0 %v5285_v28  ;;  %v9331_v10 = vld [vmem:[%s8946_s11 + $0x6c8] sm:$0xff]  ;;  %v4769_v40 = vcvt.s32.f32 %v3233_v42  ;;  %v5525_v16 = vpack.c.bf16 %v4361_v21, %v4349_v22  ;;  %v4733_v60 = vcvt.s32.f32 %v3197_v25  ;;  %v4109_v0 = vcvt.s32.f32 %v2573_v18 }
 0x22a   : > { %v1611_v31 = vadd.f32 %v1610_v36, %v1598_v7  ;;  %v4553_v58 = vcvt.s32.f32 %v3017_v26  ;;  %v4145_v5 = vcvt.s32.f32 %v2609_v39  ;;  %v2981_v14 = vunpack.c.2.s8 %v9331_v10  ;;  %v9356_v32 = vld [vmem:[%s8946_s11 + $0x668] sm:$0xff] }
 0x22b   : > { %v2993_v6 = vunpack.c.3.s8 %v9331_v10  ;;  %v2957_v36 = vunpack.c.0.s8 %v9331_v10  ;;  %v2969_v30 = vunpack.c.1.s8 %v9331_v10  ;;  %v3173_v38 = vunpack.c.2.s8 %v1973_v8  ;;  %v1961_v25 = vld [vmem:[%s8946_s11 + $0x7e8] sm:$0xff] }
 0x22c   : > { %v1696_v28 = vmax.f32 %v1611_v31, 0.0  ;;  %v5621_v35 = vpack.c.bf16 %v4553_v58, %v4541_v54  ;;  %6075 = vmatpush.bf16.msrb.mxu2 %v5537_v3  ;;  %v5417_v34 = vpack.c.bf16 %v4145_v5, %v4133_v52  ;;  %v4517_v4 = vcvt.s32.f32 %v2981_v14 }
 0x22d   : > { %6043 = vmatpush.bf16.msra.mxu3 %v5165_v62  ;;  %6055 = vmatpush.bf16.msrb.mxu0 %v5273_v17  ;;  %v1636_v53 = vpop.f32.mrf.mxu2  ;;  %v5729_v62 = vpack.c.bf16 %v4769_v40, %v4757_v37  ;;  %v1877_v17 = vld [vmem:[%s8946_s11 + $0x548] sm:$0xff]  ;;  %v4529_v11 = vcvt.s32.f32 %v2993_v6  ;;  %v3185_v45 = vunpack.c.3.s8 %v1973_v8  ;;  %v4493_v26 = vcvt.s32.f32 %v2957_v36 }
 0x22e   : > { %v9335_v51 = vpack.c.bf16 %v1696_v28, %v1696_v28  ;;  %v1637_v15 = vadd.f32 %v1636_v53, %v9283_v13  ;;  %v3209_v13 = vunpack.c.1.s8 %v9313_v43  ;;  %6064 = vmatpush.bf16.msrb.mxu1 %v5417_v34  ;;  %v2789_v9 = vunpack.c.2.s8 %v1877_v17  ;;  %v1865_v53 = vld [vmem:[%s8946_s11 + $0x4e8] sm:$0xff] }
 0x22f   : > { %v1599_v19 = vpop.f32.mrf.mxu3  ;;  %v1612_v1 = vpop.f32.mrf.mxu0  ;;  %v5609_v55 = vpack.c.bf16 %v4529_v11, %v4517_v4  ;;  %v2801_v7 = vunpack.c.3.s8 %v1877_v17  ;;  %v835_v31 = vperm.slane %v9065_v63, 7  ;;  %v4505_v33 = vcvt.s32.f32 %v2969_v30  ;;  %v1901_v30 = vld [vmem:[%s8946_s11 + $0x608] sm:$0xff] }
 0x230   : > { %5992 = vmatmul.bf16.vlgmr.msrb.gmra.mxu3 %v9335_v51  ;;  %v1697_v57 = vmax.f32 %v1637_v15, 0.0  ;;  %v4745_v59 = vcvt.s32.f32 %v3209_v13  ;;  %6076 = vmatpush.bf16.msrb.mxu2 %v5525_v16  ;;  %v4325_v43 = vcvt.s32.f32 %v2789_v9  ;;  %v4709_v44 = vcvt.s32.f32 %v3173_v38  ;;  %v8338_v15 = vld [vmem:[#allocation12] sm:$0xff] }
 0x231   : > { %6088 = vmatpush.bf16.msrb.mxu3 %v5633_v29  ;;  %6056 = vmatpush.bf16.msrb.mxu0 %v5261_v46  ;;  %v4121_v29 = vcvt.s32.f32 %v2585_v61  ;;  %v4337_v41 = vcvt.s32.f32 %v2801_v7  ;;  %v4721_v54 = vcvt.s32.f32 %v3185_v45  ;;  %v2549_v58 = vunpack.c.2.s8 %v1817_v27 }
 0x232   : > { %v9348_v20 = vpack.c.bf16 %v1697_v57, %v1697_v57  ;;  %v5717_v48 = vpack.c.bf16 %v4745_v59, %v4733_v60  ;;  %v2561_v23 = vunpack.c.3.s8 %v1817_v27  ;;  %v2765_v10 = vunpack.c.0.s8 %v1877_v17  ;;  %v1805_v60 = vld [vmem:[%s8946_s11 + $0x308] sm:$0xff] }
 0x233   : > { %v5405_v49 = vpack.c.bf16 %v4121_v29, %v4109_v0  ;;  %v5513_v42 = vpack.c.bf16 %v4337_v41, %v4325_v43  ;;  %v2777_v28 = vunpack.c.1.s8 %v1877_v17  ;;  %v5597_v3 = vpack.c.bf16 %v4505_v33, %v4493_v26 }
 0x234   : > { %6005 = vmatmul.bf16.vlgmr.msra.gmra.mxu0 %v9348_v20  ;;  %v5705_v37 = vpack.c.bf16 %v4721_v54, %v4709_v44  ;;  %v4085_v39 = vcvt.s32.f32 %v2549_v58  ;;  %v4097_v63 = vcvt.s32.f32 %v2561_v23  ;;  %v4301_v40 = vcvt.s32.f32 %v2765_v10 }
 0x235   : > { %6089 = vmatpush.bf16.msrb.mxu3 %v5621_v35  ;;  %6101 = vmatpush.bf16.msra.mxu0 %v5729_v62  ;;  %v1638_v46 = vpop.f32.mrf.mxu2  ;;  %v2933_v35 = vunpack.c.2.s8 %v9356_v32  ;;  %v4313_v52 = vcvt.s32.f32 %v2777_v28  ;;  %v2945_v47 = vunpack.c.3.s8 %v9356_v32  ;;  %v3149_v56 = vunpack.c.0.s8 %v1973_v8 }
 0x236   : > { %6065 = vmatpush.bf16.msrb.mxu1 %v5405_v49  ;;  %6077 = vmatpush.bf16.msrb.mxu2 %v5513_v42  ;;  %v3161_v14 = vunpack.c.1.s8 %v1973_v8  ;;  %v834_v19 = vperm.slane %v8338_v15, 6  ;;  %v5393_v62 = vpack.c.bf16 %v4097_v63, %v4085_v39  ;;  %v2525_v17 = vunpack.c.0.s8 %v1817_v27  ;;  %v9371_v39 = vld [vmem:[%s8946_s11 + $0x488] sm:$0xff] }
 0x237   : > { %v4469_v5 = vcvt.s32.f32 %v2933_v35  ;;  %v5501_v22 = vpack.c.bf16 %v4313_v52, %v4301_v40  ;;  %v4481_v6 = vcvt.s32.f32 %v2945_v47  ;;  %v4685_v1 = vcvt.s32.f32 %v3149_v56 }
 0x238   : > { %v4697_v34 = vcvt.s32.f32 %v3161_v14  ;;  %v2537_v21 = vunpack.c.1.s8 %v1817_v27  ;;  %v2741_v4 = vunpack.c.2.s8 %v1865_v53  ;;  %v4061_v13 = vcvt.s32.f32 %v2525_v17 }
 0x239   : > { %6090 = vmatpush.bf16.msrb.mxu3 %v5609_v55  ;;  %6102 = vmatpush.bf16.msra.mxu0 %v5717_v48  ;;  %v5585_v11 = vpack.c.bf16 %v4481_v6, %v4469_v5  ;;  %v2753_v18 = vunpack.c.3.s8 %v1865_v53  ;;  %v2909_v16 = vunpack.c.0.s8 %v9356_v32  ;;  %v2921_v0 = vunpack.c.1.s8 %v9356_v32 }
 0x23a   : > { %6066 = vmatpush.bf16.msrb.mxu1 %v5393_v62  ;;  %6078 = vmatpush.bf16.msrb.mxu2 %v5501_v22  ;;  %v5693_v9 = vpack.c.bf16 %v4697_v34, %v4685_v1  ;;  %v4073_v8 = vcvt.s32.f32 %v2537_v21  ;;  %v4277_v55 = vcvt.s32.f32 %v2741_v4  ;;  %v3125_v7 = vunpack.c.2.s8 %v1961_v25  ;;  %v1949_v21 = vld [vmem:[%s8946_s11 + $0x788] sm:$0xff] }
 0x23b   : > { %v4289_v59 = vcvt.s32.f32 %v2753_v18  ;;  %v4445_v29 = vcvt.s32.f32 %v2909_v16  ;;  %v3137_v36 = vunpack.c.3.s8 %v1961_v25  ;;  %v2501_v27 = vunpack.c.2.s8 %v1805_v60  ;;  %v2033_v18 = vld [vmem:[%s8946_s11 + $0xa28] sm:$0xff] }
 0x23c   : > { %v5381_v43 = vpack.c.bf16 %v4073_v8, %v4061_v13  ;;  %v2513_v48 = vunpack.c.3.s8 %v1805_v60  ;;  %v4457_v45 = vcvt.s32.f32 %v2921_v0  ;;  %v4661_v46 = vcvt.s32.f32 %v3125_v7 }
 0x23d   : > { %6091 = vmatpush.bf16.msrb.mxu3 %v5597_v3  ;;  %6103 = vmatpush.bf16.msra.mxu0 %v5705_v37  ;;  %v5489_v38 = vpack.c.bf16 %v4289_v59, %v4277_v55  ;;  %v2717_v49 = vunpack.c.0.s8 %v1865_v53  ;;  %v4673_v41 = vcvt.s32.f32 %v3137_v36  ;;  %v4037_v26 = vcvt.s32.f32 %v2501_v27  ;;  %v9381_v55 = vld [vmem:[%s8946_s11 + $0x130] sm:$0xff] }
 0x23e   : > { %6067 = vmatpush.bf16.msrb.mxu1 %v5381_v43  ;;  %v2729_v33 = vunpack.c.1.s8 %v1865_v53  ;;  %v5573_v54 = vpack.c.bf16 %v4457_v45, %v4445_v29  ;;  %v2885_v42 = vunpack.c.2.s8 %v1901_v30  ;;  %v2897_v23 = vunpack.c.3.s8 %v1901_v30 }
 0x23f   : > { %6079 = vmatpush.bf16.msrb.mxu2 %v5489_v38  ;;  %v4253_v58 = vcvt.s32.f32 %v2717_v49  ;;  %v5681_v28 = vpack.c.bf16 %v4673_v41, %v4661_v46  ;;  %v3101_v52 = vunpack.c.0.s8 %v1961_v25  ;;  %v3113_v47 = vunpack.c.1.s8 %v1961_v25 }
 0x240   : > { %6044 = vmatmul.bf16.vlgmr.msra.gmra.mxu3 %v9159_v2  ;;  %v4265_v37 = vcvt.s32.f32 %v2729_v33  ;;  %v4421_v63 = vcvt.s32.f32 %v2885_v42  ;;  %v4433_v40 = vcvt.s32.f32 %v2897_v23  ;;  %v2477_v56 = vunpack.c.0.s8 %v1805_v60  ;;  %v2081_v42 = vld [vmem:[%s8946_s11 + $0xba8] sm:$0xff] }
 0x241   : > { %v1675_v57 = vpop.f32.mrf.mxu1  ;;  %6092 = vmatpush.bf16.msrb.mxu3 %v5585_v11  ;;  %6104 = vmatpush.bf16.msra.mxu0 %v5693_v9  ;;  %v2489_v14 = vunpack.c.1.s8 %v1805_v60  ;;  %v4649_v62 = vcvt.s32.f32 %v3113_v47  ;;  %v2693_v22 = vunpack.c.2.s8 %v9371_v39  ;;  %v2705_v34 = vunpack.c.3.s8 %v9371_v39 }
 0x242   : > { %v9364_v61 = vadd.f32 %v1675_v57, %v835_v31  ;;  %v4049_v31 = vcvt.s32.f32 %v2513_v48  ;;  %v5477_v5 = vpack.c.bf16 %v4265_v37, %v4253_v58  ;;  %v5561_v15 = vpack.c.bf16 %v4433_v40, %v4421_v63 }
 0x243   : > { %v4013_v17 = vcvt.s32.f32 %v2477_v56  ;;  %v4025_v1 = vcvt.s32.f32 %v2489_v14  ;;  %v4229_v57 = vcvt.s32.f32 %v2693_v22  ;;  %v2861_v11 = vunpack.c.0.s8 %v1901_v30  ;;  %v1794_v56 = vld [vmem:[%s8946_s11 + $0x2b0] sm:$0xff]  ;;  %v2021_v22 = vld [vmem:[%s8946_s11 + $0x9c8] sm:$0xff] }
 0x244   : > { %6057 = vmatmul.bf16.vlgmr.msrb.gmra.mxu0 %v9180_v24  ;;  %v5369_v3 = vpack.c.bf16 %v4049_v31, %v4037_v26  ;;  %6080 = vmatpush.bf16.msrb.mxu2 %v5477_v5  ;;  %v2873_v13 = vunpack.c.1.s8 %v1901_v30  ;;  %v4241_v8 = vcvt.s32.f32 %v2705_v34  ;;  %v3077_v43 = vunpack.c.2.s8 %v1949_v21 }
 0x245   : > { %6093 = vmatpush.bf16.msrb.mxu3 %v5573_v54  ;;  %6105 = vmatpush.bf16.msra.mxu0 %v5681_v28  ;;  %v5357_v9 = vpack.c.bf16 %v4025_v1, %v4013_v17  ;;  %v4397_v29 = vcvt.s32.f32 %v2861_v11  ;;  %v3089_v36 = vunpack.c.3.s8 %v1949_v21  ;;  %v3413_v30 = vunpack.c.2.s8 %v2033_v18 }
 0x246   : > { %6068 = vmatpush.bf16.msrb.mxu1 %v5369_v3  ;;  %v4409_v7 = vcvt.s32.f32 %v2873_v13  ;;  %v5465_v48 = vpack.c.bf16 %v4241_v8, %v4229_v57  ;;  %v3425_v38 = vunpack.c.3.s8 %v2033_v18  ;;  %v4613_v45 = vcvt.s32.f32 %v3077_v43 }
 0x247   : > { %v1649_v32 = vpop.f32.mrf.mxu3  ;;  %v1662_v44 = vpop.f32.mrf.mxu0  ;;  %v4625_v46 = vcvt.s32.f32 %v3089_v36  ;;  %v2262_v49 = vunpack.c.2.s8 %v9381_v55  ;;  %v4949_v26 = vcvt.s32.f32 %v3413_v30  ;;  %v2274_v33 = vunpack.c.3.s8 %v9381_v55 }
 0x248   : > { %v1650_v10 = vadd.f32 %v1649_v32, %v834_v19  ;;  %v4637_v19 = vcvt.s32.f32 %v3101_v52  ;;  %6081 = vmatpush.bf16.msrb.mxu2 %v5465_v48  ;;  %v4961_v31 = vcvt.s32.f32 %v3425_v38  ;;  %v2669_v54 = vunpack.c.0.s8 %v9371_v39 }
 0x249   : > { %v1677_v35 = vpop.f32.mrf.mxu1  ;;  %6094 = vmatpush.bf16.msrb.mxu3 %v5561_v15  ;;  %v5657_v32 = vpack.c.bf16 %v4625_v46, %v4613_v45  ;;  %v2681_v58 = vunpack.c.1.s8 %v9371_v39  ;;  %v3053_v28 = vunpack.c.0.s8 %v1949_v21  ;;  %v3065_v3 = vunpack.c.1.s8 %v1949_v21 }
 0x24a   : > { %v1663_v53 = vadd.f32 %v1662_v44, %v1650_v10  ;;  %v5669_v4 = vpack.c.bf16 %v4649_v62, %v4637_v19  ;;  %6069 = vmatpush.bf16.msrb.mxu1 %v5357_v9  ;;  %v3798_v44 = vcvt.s32.f32 %v2262_v49  ;;  %v5825_v23 = vpack.c.bf16 %v4961_v31, %v4949_v26  ;;  %v1734_v9 = vld [vmem:[%s8946_s11 + $0xd0] sm:$0xff] }
 0x24b   : > { %v3810_v10 = vcvt.s32.f32 %v2274_v33  ;;  %v4205_v37 = vcvt.s32.f32 %v2669_v54  ;;  %v4217_v35 = vcvt.s32.f32 %v2681_v58  ;;  %v3389_v63 = vunpack.c.0.s8 %v2033_v18 }
 0x24c   : > { %v1698_v6 = vmax.f32 %v1663_v53, 0.0  ;;  %6106 = vmatpush.bf16.msra.mxu0 %v5669_v4  ;;  %v3401_v40 = vunpack.c.1.s8 %v2033_v18  ;;  %v4589_v39 = vcvt.s32.f32 %v3053_v28  ;;  %v4601_v53 = vcvt.s32.f32 %v3065_v3 }
 0x24d   : > { %v1688_v25 = vpop.f32.mrf.mxu2  ;;  %v5250_v47 = vpack.c.bf16 %v3810_v10, %v3798_v44  ;;  %v3605_v5 = vunpack.c.2.s8 %v2081_v42  ;;  %v5453_v14 = vpack.c.bf16 %v4217_v35, %v4205_v37  ;;  %v4925_v15 = vcvt.s32.f32 %v3389_v63  ;;  %v1782_v10 = vld [vmem:[%s8946_s11 + $0x250] sm:$0xff]  ;;  %v2009_v63 = vld [vmem:[%s8946_s11 + $0x968] sm:$0xff] }
 0x24e   : > { %v9377_v16 = vpack.c.bf16 %v1698_v6, %v1698_v6  ;;  %v1689_v60 = vadd.f32 %v1688_v25, %v9364_v61  ;;  %v5549_v61 = vpack.c.bf16 %v4409_v7, %v4397_v29  ;;  %v4937_v19 = vcvt.s32.f32 %v3401_v40 }
 0x24f   : > { %v1651_v59 = vpop.f32.mrf.mxu3  ;;  %v1664_v0 = vpop.f32.mrf.mxu0  ;;  %v3617_v62 = vunpack.c.3.s8 %v2081_v42  ;;  %v5645_v6 = vpack.c.bf16 %v4601_v53, %v4589_v39  ;;  %v5141_v17 = vcvt.s32.f32 %v3605_v5  ;;  %v2238_v1 = vunpack.c.0.s8 %v9381_v55  ;;  %6082 = vmatpush.bf16.msrb.mxu2 %v5453_v14 }
 0x250   : > { %v1699_v27 = vmax.f32 %v1689_v60, 0.0  ;;  %6018 = vmatmul.bf16.vlgmr.msra.gmra.mxu1 %v9377_v16  ;;  %6095 = vmatpush.bf16.msrb.mxu3 %v5549_v61  ;;  %v2250_v34 = vunpack.c.1.s8 %v9381_v55  ;;  %v5813_v21 = vpack.c.bf16 %v4937_v19, %v4925_v15  ;;  %v2454_v25 = vunpack.c.2.s8 %v1794_v56  ;;  %v2069_v61 = vld [vmem:[%s8946_s11 + $0xb48] sm:$0xff] }
 0x251   : > { %6107 = vmatpush.bf16.msra.mxu0 %v5657_v32  ;;  %6114 = vmatpush.bf16.msra.mxu1 %v5825_v23  ;;  %v5153_v4 = vcvt.s32.f32 %v3617_v62  ;;  %v2466_v57 = vunpack.c.3.s8 %v1794_v56  ;;  %v3774_v11 = vcvt.s32.f32 %v2238_v1  ;;  %v3365_v18 = vunpack.c.2.s8 %v2021_v22 }
 0x252   : > { %v9385_v41 = vpack.c.bf16 %v1699_v27, %v1699_v27  ;;  %v3786_v13 = vcvt.s32.f32 %v2250_v34  ;;  %v3377_v60 = vunpack.c.3.s8 %v2021_v22  ;;  %v3990_v59 = vcvt.s32.f32 %v2454_v25 }
 0x253   : > { %6096 = vmatmul.bf16.vlgmr.msrb.gmra.mxu3 %v9335_v51  ;;  %v5921_v8 = vpack.c.bf16 %v5153_v4, %v5141_v17  ;;  %v4002_v0 = vcvt.s32.f32 %v2466_v57  ;;  %v3581_v29 = vunpack.c.0.s8 %v2081_v42  ;;  %v4901_v43 = vcvt.s32.f32 %v3365_v18 }
 0x254   : > { %6031 = vmatmul.bf16.vlgmr.msra.gmra.mxu2 %v9385_v41  ;;  %6140 = vmatpush.bf16.msra.mxu3 %v5250_v47  ;;  %v5238_v7 = vpack.c.bf16 %v3786_v13, %v3774_v11  ;;  %v4913_v55 = vcvt.s32.f32 %v3377_v60  ;;  %v3593_v36 = vunpack.c.1.s8 %v2081_v42  ;;  %v2214_v30 = vunpack.c.2.s8 %v1734_v9 }
 0x255   : > { %v1690_v52 = vpop.f32.mrf.mxu2  ;;  %6108 = vmatpush.bf16.msra.mxu0 %v5645_v6  ;;  %6115 = vmatpush.bf16.msra.mxu1 %v5813_v21  ;;  %v5346_v27 = vpack.c.bf16 %v4002_v0, %v3990_v59  ;;  %v5117_v48 = vcvt.s32.f32 %v3581_v29  ;;  %v2226_v38 = vunpack.c.3.s8 %v1734_v9  ;;  %v2430_v49 = vunpack.c.0.s8 %v1794_v56  ;;  %v1722_v6 = vld [vmem:[%s8946_s11 + $0x70] sm:$0xff] }
 0x256   : > { %6127 = vmatpush.bf16.msra.mxu2 %v5921_v8  ;;  %v5801_v45 = vpack.c.bf16 %v4913_v55, %v4901_v43  ;;  %v5129_v46 = vcvt.s32.f32 %v3593_v36  ;;  %v2442_v26 = vunpack.c.1.s8 %v1794_v56  ;;  %v3750_v31 = vcvt.s32.f32 %v2214_v30  ;;  %v2057_v8 = vld [vmem:[%s8946_s11 + $0xae8] sm:$0xff] }
 0x257   : > { %v3762_v33 = vcvt.s32.f32 %v2226_v38  ;;  %v3341_v32 = vunpack.c.0.s8 %v2021_v22  ;;  %v3353_v44 = vunpack.c.1.s8 %v2021_v22  ;;  %v3966_v58 = vcvt.s32.f32 %v2430_v49 }
 0x258   : > { %6109 = vmatmul.bf16.vlgmr.msra.gmra.mxu0 %v9348_v20  ;;  %6141 = vmatpush.bf16.msra.mxu3 %v5238_v7  ;;  %v5909_v54 = vpack.c.bf16 %v5129_v46, %v5117_v48  ;;  %v3978_v42 = vcvt.s32.f32 %v2442_v26  ;;  %v3557_v23 = vunpack.c.2.s8 %v2069_v61  ;;  %v3569_v35 = vunpack.c.3.s8 %v2069_v61 }
 0x259   : > { %6153 = vmatpush.bf16.msrb.mxu0 %v5346_v27  ;;  %6116 = vmatpush.bf16.msra.mxu1 %v5801_v45  ;;  %v5226_v28 = vpack.c.bf16 %v3762_v33, %v3750_v31  ;;  %v4877_v3 = vcvt.s32.f32 %v3341_v32  ;;  %v4889_v37 = vcvt.s32.f32 %v3353_v44  ;;  %v2190_v47 = vunpack.c.0.s8 %v1734_v9  ;;  %v1770_v45 = vld [vmem:[%s8946_s11 + $0x1f0] sm:$0xff]  ;;  %v1997_v33 = vld [vmem:[%s8946_s11 + $0x908] sm:$0xff] }
 0x25a   : > { %6128 = vmatpush.bf16.msra.mxu2 %v5909_v54  ;;  %v5334_v40 = vpack.c.bf16 %v3978_v42, %v3966_v58  ;;  %v5093_v52 = vcvt.s32.f32 %v3557_v23  ;;  %v2202_v39 = vunpack.c.1.s8 %v1734_v9  ;;  %v5105_v5 = vcvt.s32.f32 %v3569_v35 }
 0x25b   : > { %v5789_v53 = vpack.c.bf16 %v4889_v37, %v4877_v3  ;;  %v2406_v56 = vunpack.c.2.s8 %v1782_v10  ;;  %v2418_v14 = vunpack.c.3.s8 %v1782_v10  ;;  %v3726_v15 = vcvt.s32.f32 %v2190_v47 }
 0x25c   : > { %6142 = vmatpush.bf16.msra.mxu3 %v5226_v28  ;;  %v3738_v19 = vcvt.s32.f32 %v2202_v39  ;;  %v3317_v62 = vunpack.c.2.s8 %v2009_v63  ;;  %v3329_v22 = vunpack.c.3.s8 %v2009_v63  ;;  %v5897_v17 = vpack.c.bf16 %v5105_v5, %v5093_v52 }
 0x25d   : > { %6154 = vmatpush.bf16.msrb.mxu0 %v5334_v40  ;;  %6117 = vmatpush.bf16.msra.mxu1 %v5789_v53  ;;  %v3942_v1 = vcvt.s32.f32 %v2406_v56  ;;  %v3954_v34 = vcvt.s32.f32 %v2418_v14  ;;  %v3533_v21 = vunpack.c.0.s8 %v2069_v61  ;;  %v3545_v11 = vunpack.c.1.s8 %v2069_v61  ;;  %v1710_v40 = vld [vmem:[%s8946_s11 + $0x10] sm:$0xff] }
 0x25e   : > { %v5214_v4 = vpack.c.bf16 %v3738_v19, %v3726_v15  ;;  %v4853_v25 = vcvt.s32.f32 %v3317_v62  ;;  %v4865_v57 = vcvt.s32.f32 %v3329_v22  ;;  %6129 = vmatpush.bf16.msra.mxu2 %v5897_v17  ;;  %v2166_v60 = vunpack.c.2.s8 %v1722_v6  ;;  %v2045_v17 = vld [vmem:[%s8946_s11 + $0xa88] sm:$0xff] }
 0x25f   : > { %v5322_v13 = vpack.c.bf16 %v3954_v34, %v3942_v1  ;;  %v5069_v18 = vcvt.s32.f32 %v3533_v21  ;;  %v2178_v9 = vunpack.c.3.s8 %v1722_v6  ;;  %v5081_v0 = vcvt.s32.f32 %v3545_v11 }
 0x260   : > { %6070 = vmatmul.bf16.vlgmr.msrb.gmra.mxu1 %v9254_v50  ;;  %6143 = vmatpush.bf16.msra.mxu3 %v5214_v4  ;;  %v5777_v59 = vpack.c.bf16 %v4865_v57, %v4853_v25  ;;  %v2382_v29 = vunpack.c.0.s8 %v1782_v10  ;;  %v2394_v7 = vunpack.c.1.s8 %v1782_v10  ;;  %v3702_v43 = vcvt.s32.f32 %v2166_v60 }
 0x261   : > { %6155 = vmatpush.bf16.msrb.mxu0 %v5322_v13  ;;  %v3714_v55 = vcvt.s32.f32 %v2178_v9  ;;  %v3293_v36 = vunpack.c.0.s8 %v2009_v63  ;;  %v3305_v27 = vunpack.c.1.s8 %v2009_v63  ;;  %v5885_v48 = vpack.c.bf16 %v5081_v0, %v5069_v18 }
 0x262   : > { %6118 = vmatpush.bf16.msra.mxu1 %v5777_v59  ;;  %v3918_v30 = vcvt.s32.f32 %v2382_v29  ;;  %v3930_v38 = vcvt.s32.f32 %v2394_v7  ;;  %v3509_v61 = vunpack.c.2.s8 %v2057_v8  ;;  %v3521_v31 = vunpack.c.3.s8 %v2057_v8  ;;  %v1758_v59 = vld [vmem:[%s8946_s11 + $0x190] sm:$0xff] }
 0x263   : > { %v5202_v46 = vpack.c.bf16 %v3714_v55, %v3702_v43  ;;  %v4829_v49 = vcvt.s32.f32 %v3293_v36  ;;  %v4841_v26 = vcvt.s32.f32 %v3305_v27  ;;  %6130 = vmatpush.bf16.msra.mxu2 %v5885_v48  ;;  %v2142_v54 = vunpack.c.0.s8 %v1722_v6  ;;  %v1842_v55 = vld [vmem:[%s8946_s11 + $0x430] sm:$0xff] }
 0x264   : > { %6083 = vmatmul.bf16.vlgmr.msrb.gmra.mxu2 %v9279_v12  ;;  %v5310_v32 = vpack.c.bf16 %v3930_v38, %v3918_v30  ;;  %v5045_v44 = vcvt.s32.f32 %v3509_v61  ;;  %v2154_v58 = vunpack.c.1.s8 %v1722_v6  ;;  %v5057_v23 = vcvt.s32.f32 %v3521_v31  ;;  %v1938_v38 = vld [vmem:[%s8946_s11 + $0x730] sm:$0xff] }
 0x265   : > { %6144 = vmatpush.bf16.msra.mxu3 %v5202_v46  ;;  %v5765_v42 = vpack.c.bf16 %v4841_v26, %v4829_v49  ;;  %v2358_v10 = vunpack.c.2.s8 %v1770_v45  ;;  %v2370_v28 = vunpack.c.3.s8 %v1770_v45  ;;  %v3678_v3 = vcvt.s32.f32 %v2142_v54 }
 0x266   : > { %6156 = vmatpush.bf16.msrb.mxu0 %v5310_v32  ;;  %v3690_v37 = vcvt.s32.f32 %v2154_v58  ;;  %v3269_v35 = vunpack.c.2.s8 %v1997_v33  ;;  %v3281_v63 = vunpack.c.3.s8 %v1997_v33  ;;  %v5873_v52 = vpack.c.bf16 %v5057_v23, %v5045_v44 }
 0x267   : > { %6119 = vmatpush.bf16.msra.mxu1 %v5765_v42  ;;  %v3894_v47 = vcvt.s32.f32 %v2358_v10  ;;  %v3906_v39 = vcvt.s32.f32 %v2370_v28  ;;  %v3485_v53 = vunpack.c.0.s8 %v2057_v8  ;;  %v3497_v15 = vunpack.c.1.s8 %v2057_v8 }
 0x268   : > { %v5190_v5 = vpack.c.bf16 %v3690_v37, %v3678_v3  ;;  %v4805_v56 = vcvt.s32.f32 %v3269_v35  ;;  %v4817_v14 = vcvt.s32.f32 %v3281_v63  ;;  %6131 = vmatpush.bf16.msra.mxu2 %v5873_v52  ;;  %v2118_v22 = vunpack.c.2.s8 %v1710_v40  ;;  %v1890_v52 = vld [vmem:[%s8946_s11 + $0x5b0] sm:$0xff] }
 0x269   : > { %v5298_v19 = vpack.c.bf16 %v3906_v39, %v3894_v47  ;;  %v5021_v62 = vcvt.s32.f32 %v3485_v53  ;;  %v2130_v6 = vunpack.c.3.s8 %v1710_v40  ;;  %v5033_v34 = vcvt.s32.f32 %v3497_v15 }
 0x26a   : > { %6145 = vmatpush.bf16.msra.mxu3 %v5190_v5  ;;  %v5753_v1 = vpack.c.bf16 %v4817_v14, %v4805_v56  ;;  %v2334_v21 = vunpack.c.0.s8 %v1770_v45  ;;  %v2346_v4 = vunpack.c.1.s8 %v1770_v45  ;;  %v3654_v25 = vcvt.s32.f32 %v2118_v22 }
 0x26b   : > { %6157 = vmatpush.bf16.msrb.mxu0 %v5298_v19  ;;  %v3666_v57 = vcvt.s32.f32 %v2130_v6  ;;  %v3245_v11 = vunpack.c.0.s8 %v1997_v33  ;;  %v3257_v13 = vunpack.c.1.s8 %v1997_v33  ;;  %v5861_v18 = vpack.c.bf16 %v5033_v34, %v5021_v62 }
 0x26c   : > { %6120 = vmatpush.bf16.msra.mxu1 %v5753_v1  ;;  %v3870_v60 = vcvt.s32.f32 %v2334_v21  ;;  %v3882_v9 = vcvt.s32.f32 %v2346_v4  ;;  %v3461_v8 = vunpack.c.2.s8 %v2045_v17  ;;  %v3473_v43 = vunpack.c.3.s8 %v2045_v17  ;;  %v1986_v1 = vld [vmem:[%s8946_s11 + $0x8b0] sm:$0xff] }
 0x26d   : > { %v5178_v0 = vpack.c.bf16 %v3666_v57, %v3654_v25  ;;  %v4781_v29 = vcvt.s32.f32 %v3245_v11  ;;  %v4793_v7 = vcvt.s32.f32 %v3257_v13  ;;  %6132 = vmatpush.bf16.msra.mxu2 %v5861_v18  ;;  %v2094_v48 = vunpack.c.0.s8 %v1710_v40  ;;  %v1830_v57 = vld [vmem:[%s8946_s11 + $0x3d0] sm:$0xff] }
 0x26e   : > { %v5286_v36 = vpack.c.bf16 %v3882_v9, %v3870_v60  ;;  %v4997_v27 = vcvt.s32.f32 %v3461_v8  ;;  %v2106_v30 = vunpack.c.1.s8 %v1710_v40  ;;  %v5009_v45 = vcvt.s32.f32 %v3473_v43 }
 0x26f   : > { %6146 = vmatpush.bf16.msra.mxu3 %v5178_v0  ;;  %v5741_v61 = vpack.c.bf16 %v4793_v7, %v4781_v29  ;;  %v2310_v46 = vunpack.c.2.s8 %v1758_v59  ;;  %v2322_v49 = vunpack.c.3.s8 %v1758_v59  ;;  %v3630_v26 = vcvt.s32.f32 %v2094_v48 }
 0x270   : > { %6158 = vmatpush.bf16.msrb.mxu0 %v5286_v36  ;;  %v3642_v31 = vcvt.s32.f32 %v2106_v30  ;;  %v2646_v33 = vunpack.c.2.s8 %v1842_v55  ;;  %v2658_v32 = vunpack.c.3.s8 %v1842_v55  ;;  %v5849_v44 = vpack.c.bf16 %v5009_v45, %v4997_v27  ;;  %v1926_v36 = vld [vmem:[%s8946_s11 + $0x6d0] sm:$0xff] }
 0x271   : > { %6121 = vmatpush.bf16.msra.mxu1 %v5741_v61  ;;  %v3846_v54 = vcvt.s32.f32 %v2310_v46  ;;  %v3858_v58 = vcvt.s32.f32 %v2322_v49  ;;  %v3030_v42 = vunpack.c.2.s8 %v1938_v38  ;;  %v3042_v3 = vunpack.c.3.s8 %v1938_v38 }
 0x272   : > { %v5166_v23 = vpack.c.bf16 %v3642_v31, %v3630_v26  ;;  %v4182_v10 = vcvt.s32.f32 %v2646_v33  ;;  %v4194_v28 = vcvt.s32.f32 %v2658_v32  ;;  %6133 = vmatpush.bf16.msra.mxu2 %v5849_v44  ;;  %v3437_v63 = vunpack.c.0.s8 %v2045_v17  ;;  %v1878_v44 = vld [vmem:[%s8946_s11 + $0x550] sm:$0xff] }
 0x273   : > { %v5274_v37 = vpack.c.bf16 %v3858_v58, %v3846_v54  ;;  %v4566_v35 = vcvt.s32.f32 %v3030_v42  ;;  %v3449_v40 = vunpack.c.1.s8 %v2045_v17  ;;  %v4578_v39 = vcvt.s32.f32 %v3042_v3 }
 0x274   : > { %6147 = vmatpush.bf16.msra.mxu3 %v5166_v23  ;;  %v5442_v47 = vpack.c.bf16 %v4194_v28, %v4182_v10  ;;  %6122 = vmatmul.bf16.vlgmr.msra.gmra.mxu1 %v9377_v16  ;;  %v2286_v53 = vunpack.c.0.s8 %v1758_v59  ;;  %v2298_v5 = vunpack.c.1.s8 %v1758_v59  ;;  %v4973_v56 = vcvt.s32.f32 %v3437_v63 }
 0x275   : > { %6159 = vmatpush.bf16.msrb.mxu0 %v5274_v37  ;;  %v4985_v14 = vcvt.s32.f32 %v3449_v40  ;;  %v2622_v15 = vunpack.c.0.s8 %v1842_v55  ;;  %v2634_v19 = vunpack.c.1.s8 %v1842_v55  ;;  %v5634_v62 = vpack.c.bf16 %v4578_v39, %v4566_v35 }
 0x276   : > { %6166 = vmatpush.bf16.msrb.mxu1 %v5442_v47  ;;  %v3822_v22 = vcvt.s32.f32 %v2286_v53  ;;  %v3834_v6 = vcvt.s32.f32 %v2298_v5  ;;  %v2838_v17 = vunpack.c.2.s8 %v1890_v52  ;;  %v2850_v25 = vunpack.c.3.s8 %v1890_v52  ;;  %v1974_v47 = vld [vmem:[%s8946_s11 + $0x850] sm:$0xff] }
 0x277   : > { %v5837_v34 = vpack.c.bf16 %v4985_v14, %v4973_v56  ;;  %6148 = vmatmul.bf16.vlgmr.msra.gmra.mxu3 %v9159_v2  ;;  %v4158_v21 = vcvt.s32.f32 %v2622_v15  ;;  %v4170_v4 = vcvt.s32.f32 %v2634_v19  ;;  %v3006_v18 = vunpack.c.0.s8 %v1938_v38  ;;  %v1818_v14 = vld [vmem:[%s8946_s11 + $0x370] sm:$0xff] }
 0x278   : > { %6192 = vmatpush.bf16.msrb.mxu3 %v5634_v62  ;;  %v5262_v11 = vpack.c.bf16 %v3834_v6, %v3822_v22  ;;  %v4374_v13 = vcvt.s32.f32 %v2838_v17  ;;  %v3018_v60 = vunpack.c.1.s8 %v1938_v38  ;;  %v4386_v8 = vcvt.s32.f32 %v2850_v25 }
 0x279   : > { %6134 = vmatpush.bf16.msra.mxu2 %v5837_v34  ;;  %v5430_v9 = vpack.c.bf16 %v4170_v4, %v4158_v21  ;;  %v3222_v59 = vunpack.c.2.s8 %v1986_v1  ;;  %v3234_v0 = vunpack.c.3.s8 %v1986_v1  ;;  %v4542_v29 = vcvt.s32.f32 %v3006_v18 }
 0x27a   : > { %6160 = vmatpush.bf16.msrb.mxu0 %v5262_v11  ;;  %v4554_v7 = vcvt.s32.f32 %v3018_v60  ;;  %v2598_v43 = vunpack.c.2.s8 %v1830_v57  ;;  %v2610_v55 = vunpack.c.3.s8 %v1830_v57  ;;  %v5538_v27 = vpack.c.bf16 %v4386_v8, %v4374_v13  ;;  %v1914_v11 = vld [vmem:[%s8946_s11 + $0x670] sm:$0xff] }
 0x27b   : > { %6167 = vmatpush.bf16.msrb.mxu1 %v5430_v9  ;;  %v4758_v48 = vcvt.s32.f32 %v3222_v59  ;;  %v4770_v30 = vcvt.s32.f32 %v3234_v0  ;;  %v2814_v61 = vunpack.c.0.s8 %v1890_v52  ;;  %v2826_v49 = vunpack.c.1.s8 %v1890_v52 }
 0x27c   : > { %v5622_v45 = vpack.c.bf16 %v4554_v7, %v4542_v29  ;;  %6135 = vmatmul.bf16.vlgmr.msra.gmra.mxu2 %v9385_v41  ;;  %v4134_v38 = vcvt.s32.f32 %v2598_v43  ;;  %v4146_v46 = vcvt.s32.f32 %v2610_v55  ;;  %v2982_v33 = vunpack.c.2.s8 %v1926_v36 }
 0x27d   : > { %6179 = vmatpush.bf16.msrb.mxu2 %v5538_v27  ;;  %v5730_v26 = vpack.c.bf16 %v4770_v30, %v4758_v48  ;;  %6161 = vmatmul.bf16.vlgmr.msrb.gmra.mxu0 %v9180_v24  ;;  %v4350_v31 = vcvt.s32.f32 %v2814_v61  ;;  %v2994_v32 = vunpack.c.3.s8 %v1926_v36  ;;  %v4362_v58 = vcvt.s32.f32 %v2826_v49  ;;  %v1866_v27 = vld [vmem:[%s8946_s11 + $0x4f0] sm:$0xff] }
 0x27e   : > { %6193 = vmatpush.bf16.msrb.mxu3 %v5622_v45  ;;  %v5418_v54 = vpack.c.bf16 %v4146_v46, %v4134_v38  ;;  %v3198_v42 = vunpack.c.0.s8 %v1986_v1  ;;  %v3210_v23 = vunpack.c.1.s8 %v1986_v1  ;;  %v4518_v10 = vcvt.s32.f32 %v2982_v33 }
 0x27f   : > { %6205 = vmatpush.bf16.msra.mxu0 %v5730_v26  ;;  %v4530_v28 = vcvt.s32.f32 %v2994_v32  ;;  %v2574_v3 = vunpack.c.0.s8 %v1830_v57  ;;  %v2586_v37 = vunpack.c.1.s8 %v1830_v57  ;;  %v5526_v35 = vpack.c.bf16 %v4362_v58, %v4350_v31 }
 0x280   : > { %6168 = vmatpush.bf16.msrb.mxu1 %v5418_v54  ;;  %v4734_v63 = vcvt.s32.f32 %v3198_v42  ;;  %v4746_v40 = vcvt.s32.f32 %v3210_v23  ;;  %v2790_v52 = vunpack.c.2.s8 %v1878_v44  ;;  %v2802_v56 = vunpack.c.3.s8 %v1878_v44  ;;  %v1962_v54 = vld [vmem:[%s8946_s11 + $0x7f0] sm:$0xff] }
 0x281   : > { %v5610_v39 = vpack.c.bf16 %v4530_v28, %v4518_v10  ;;  %v4110_v53 = vcvt.s32.f32 %v2574_v3  ;;  %v4122_v5 = vcvt.s32.f32 %v2586_v37  ;;  %6180 = vmatpush.bf16.msrb.mxu2 %v5526_v35  ;;  %v2958_v62 = vunpack.c.0.s8 %v1926_v36  ;;  %v1806_v28 = vld [vmem:[%s8946_s11 + $0x310] sm:$0xff] }
 0x282   : > { %v5718_v15 = vpack.c.bf16 %v4746_v40, %v4734_v63  ;;  %v4326_v19 = vcvt.s32.f32 %v2790_v52  ;;  %v2970_v22 = vunpack.c.1.s8 %v1926_v36  ;;  %v4338_v17 = vcvt.s32.f32 %v2802_v56 }
 0x283   : > { %6194 = vmatpush.bf16.msrb.mxu3 %v5610_v39  ;;  %v5406_v6 = vpack.c.bf16 %v4122_v5, %v4110_v53  ;;  %v3174_v1 = vunpack.c.2.s8 %v1974_v47  ;;  %v3186_v34 = vunpack.c.3.s8 %v1974_v47  ;;  %v4494_v21 = vcvt.s32.f32 %v2958_v62 }
 0x284   : > { %6206 = vmatpush.bf16.msra.mxu0 %v5718_v15  ;;  %v4506_v4 = vcvt.s32.f32 %v2970_v22  ;;  %v2550_v25 = vunpack.c.2.s8 %v1818_v14  ;;  %v2562_v57 = vunpack.c.3.s8 %v1818_v14  ;;  %v5514_v13 = vpack.c.bf16 %v4338_v17, %v4326_v19  ;;  %v1902_v19 = vld [vmem:[%s8946_s11 + $0x610] sm:$0xff] }
 0x285   : > { %6169 = vmatpush.bf16.msrb.mxu1 %v5406_v6  ;;  %v4710_v18 = vcvt.s32.f32 %v3174_v1  ;;  %v4722_v60 = vcvt.s32.f32 %v3186_v34  ;;  %v2766_v9 = vunpack.c.0.s8 %v1878_v44  ;;  %v2778_v29 = vunpack.c.1.s8 %v1878_v44 }
 0x286   : > { %v5598_v8 = vpack.c.bf16 %v4506_v4, %v4494_v21  ;;  %v4086_v59 = vcvt.s32.f32 %v2550_v25  ;;  %v4098_v0 = vcvt.s32.f32 %v2562_v57  ;;  %6181 = vmatpush.bf16.msrb.mxu2 %v5514_v13  ;;  %v2934_v55 = vunpack.c.2.s8 %v1914_v11 }
 0x287   : > { %v5706_v7 = vpack.c.bf16 %v4722_v60, %v4710_v18  ;;  %v4302_v43 = vcvt.s32.f32 %v2766_v9  ;;  %v2946_v36 = vunpack.c.3.s8 %v1914_v11  ;;  %v4314_v30 = vcvt.s32.f32 %v2778_v29  ;;  %v9434_v60 = vld [vmem:[%s8946_s11 + $0x490] sm:$0xff] }
 0x288   : > { %6195 = vmatpush.bf16.msrb.mxu3 %v5598_v8  ;;  %v5394_v48 = vpack.c.bf16 %v4098_v0, %v4086_v59  ;;  %v3150_v61 = vunpack.c.0.s8 %v1974_v47  ;;  %v3162_v45 = vunpack.c.1.s8 %v1974_v47  ;;  %v4470_v38 = vcvt.s32.f32 %v2934_v55 }
 0x289   : > { %6207 = vmatpush.bf16.msra.mxu0 %v5706_v7  ;;  %v4482_v46 = vcvt.s32.f32 %v2946_v36  ;;  %v2526_v49 = vunpack.c.0.s8 %v1818_v14  ;;  %v2538_v26 = vunpack.c.1.s8 %v1818_v14  ;;  %v5502_v31 = vpack.c.bf16 %v4314_v30, %v4302_v43 }
 0x28a   : > { %6170 = vmatpush.bf16.msrb.mxu1 %v5394_v48  ;;  %v4686_v33 = vcvt.s32.f32 %v3150_v61  ;;  %v4698_v32 = vcvt.s32.f32 %v3162_v45  ;;  %v2742_v44 = vunpack.c.2.s8 %v1866_v27  ;;  %v2754_v10 = vunpack.c.3.s8 %v1866_v27  ;;  %v1950_v61 = vld [vmem:[%s8946_s11 + $0x790] sm:$0xff] }
 0x28b   : > { %v5586_v58 = vpack.c.bf16 %v4482_v46, %v4470_v38  ;;  %v4062_v42 = vcvt.s32.f32 %v2526_v49  ;;  %v4074_v23 = vcvt.s32.f32 %v2538_v26  ;;  %6182 = vmatpush.bf16.msrb.mxu2 %v5502_v31  ;;  %v2910_v35 = vunpack.c.0.s8 %v1914_v11  ;;  %v2034_v31 = vld [vmem:[%s8946_s11 + $0xa30] sm:$0xff] }
 0x28c   : > { %v5694_v3 = vpack.c.bf16 %v4698_v32, %v4686_v33  ;;  %v4278_v37 = vcvt.s32.f32 %v2742_v44  ;;  %v2922_v63 = vunpack.c.1.s8 %v1914_v11  ;;  %v4290_v47 = vcvt.s32.f32 %v2754_v10 }
 0x28d   : > { %6196 = vmatpush.bf16.msrb.mxu3 %v5586_v58  ;;  %v5382_v52 = vpack.c.bf16 %v4074_v23, %v4062_v42  ;;  %v3126_v39 = vunpack.c.2.s8 %v1962_v54  ;;  %v3138_v53 = vunpack.c.3.s8 %v1962_v54  ;;  %v4446_v5 = vcvt.s32.f32 %v2910_v35  ;;  %v9441_v58 = vld [vmem:[%s8946_s11 + $0x138] sm:$0xff] }
 0x28e   : > { %6208 = vmatpush.bf16.msra.mxu0 %v5694_v3  ;;  %v4458_v56 = vcvt.s32.f32 %v2922_v63  ;;  %v2502_v14 = vunpack.c.2.s8 %v1806_v28  ;;  %v2514_v15 = vunpack.c.3.s8 %v1806_v28  ;;  %v5490_v62 = vpack.c.bf16 %v4290_v47, %v4278_v37 }
 0x28f   : > { %6171 = vmatpush.bf16.msrb.mxu1 %v5382_v52  ;;  %v4662_v22 = vcvt.s32.f32 %v3126_v39  ;;  %v4674_v6 = vcvt.s32.f32 %v3138_v53  ;;  %v2718_v17 = vunpack.c.0.s8 %v1866_v27  ;;  %v2730_v25 = vunpack.c.1.s8 %v1866_v27 }
 0x290   : > { %v5574_v34 = vpack.c.bf16 %v4458_v56, %v4446_v5  ;;  %v4038_v21 = vcvt.s32.f32 %v2502_v14  ;;  %v4050_v4 = vcvt.s32.f32 %v2514_v15  ;;  %6183 = vmatpush.bf16.msrb.mxu2 %v5490_v62  ;;  %v2886_v13 = vunpack.c.2.s8 %v1902_v19 }
 0x291   : > { %v9428_v40 = vpop.f32.mrf.mxu0  ;;  %v5682_v57 = vpack.c.bf16 %v4674_v6, %v4662_v22  ;;  %v4254_v11 = vcvt.s32.f32 %v2718_v17  ;;  %v2898_v18 = vunpack.c.3.s8 %v1902_v19  ;;  %v4266_v8 = vcvt.s32.f32 %v2730_v25 }
 0x292   : > { %6197 = vmatpush.bf16.msrb.mxu3 %v5574_v34  ;;  %v5370_v9 = vpack.c.bf16 %v4050_v4, %v4038_v21  ;;  %v3102_v59 = vunpack.c.0.s8 %v1962_v54  ;;  %v3114_v0 = vunpack.c.1.s8 %v1962_v54  ;;  %v4422_v29 = vcvt.s32.f32 %v2886_v13  ;;  %v2082_v34 = vld [vmem:[%s8946_s11 + $0xbb0] sm:$0xff] }
 0x293   : > { %v9431_v1 = vpop.f32.mrf.mxu3  ;;  %6209 = vmatpush.bf16.msra.mxu0 %v5682_v57  ;;  %v4434_v7 = vcvt.s32.f32 %v2898_v18  ;;  %v2478_v43 = vunpack.c.0.s8 %v1806_v28  ;;  %v2490_v55 = vunpack.c.1.s8 %v1806_v28  ;;  %v5478_v36 = vpack.c.bf16 %v4266_v8, %v4254_v11 }
 0x294   : > { %6172 = vmatpush.bf16.msrb.mxu1 %v5370_v9  ;;  %v4638_v27 = vcvt.s32.f32 %v3102_v59  ;;  %v4650_v48 = vcvt.s32.f32 %v3114_v0  ;;  %v2694_v30 = vunpack.c.2.s8 %v9434_v60  ;;  %v2706_v26 = vunpack.c.3.s8 %v9434_v60 }
 0x295   : > { %v5562_v38 = vpack.c.bf16 %v4434_v7, %v4422_v29  ;;  %v4014_v46 = vcvt.s32.f32 %v2478_v43  ;;  %v4026_v49 = vcvt.s32.f32 %v2490_v55  ;;  %6184 = vmatpush.bf16.msrb.mxu2 %v5478_v36  ;;  %v2862_v44 = vunpack.c.0.s8 %v1902_v19  ;;  %v1795_v7 = vld [vmem:[%s8946_s11 + $0x2b8] sm:$0xff] }
 0x296   : > { %v5670_v33 = vpack.c.bf16 %v4650_v48, %v4638_v27  ;;  %v4230_v32 = vcvt.s32.f32 %v2694_v30  ;;  %v2874_v54 = vunpack.c.1.s8 %v1902_v19  ;;  %v4242_v23 = vcvt.s32.f32 %v2706_v26  ;;  %v2022_v48 = vld [vmem:[%s8946_s11 + $0x9d0] sm:$0xff] }
 0x297   : > { %6198 = vmatpush.bf16.msrb.mxu3 %v5562_v38  ;;  %v5358_v42 = vpack.c.bf16 %v4026_v49, %v4014_v46  ;;  %v3078_v10 = vunpack.c.2.s8 %v1950_v61  ;;  %v3090_v28 = vunpack.c.3.s8 %v1950_v61  ;;  %v4398_v37 = vcvt.s32.f32 %v2862_v44 }
 0x298   : > { %6210 = vmatpush.bf16.msra.mxu0 %v5670_v33  ;;  %v4410_v35 = vcvt.s32.f32 %v2874_v54  ;;  %v3414_v63 = vunpack.c.2.s8 %v2034_v31  ;;  %v3426_v52 = vunpack.c.3.s8 %v2034_v31  ;;  %v5466_v47 = vpack.c.bf16 %v4242_v23, %v4230_v32 }
 0x299   : > { %v5956_v45 = vpop.f32.mrf.mxu0  ;;  %6173 = vmatpush.bf16.msrb.mxu1 %v5358_v42  ;;  %v4614_v39 = vcvt.s32.f32 %v3078_v10  ;;  %v4626_v53 = vcvt.s32.f32 %v3090_v28  ;;  %v2263_v5 = vunpack.c.2.s8 %v9441_v58  ;;  %v2275_v19 = vunpack.c.3.s8 %v9441_v58  ;;  %v1735_v42 = vld [vmem:[%s8946_s11 + $0xd8] sm:$0xff] }
 0x29a   : > { %v5550_v56 = vpack.c.bf16 %v4410_v35, %v4398_v37  ;;  %v4950_v14 = vcvt.s32.f32 %v3414_v63  ;;  %v4962_v15 = vcvt.s32.f32 %v3426_v52  ;;  %6185 = vmatpush.bf16.msrb.mxu2 %v5466_v47  ;;  %v2670_v6 = vunpack.c.0.s8 %v9434_v60 }
 0x29b   : > { %v5943_v3 = vpop.f32.mrf.mxu3  ;;  %v5658_v62 = vpack.c.bf16 %v4626_v53, %v4614_v39  ;;  %v3799_v22 = vcvt.s32.f32 %v2263_v5  ;;  %v2682_v17 = vunpack.c.1.s8 %v9434_v60  ;;  %v3811_v25 = vcvt.s32.f32 %v2275_v19 }
 0x29c   : > { %6199 = vmatpush.bf16.msrb.mxu3 %v5550_v56  ;;  %v5826_v4 = vpack.c.bf16 %v4962_v15, %v4950_v14  ;;  %6174 = vmatmul.bf16.vlgmr.msrb.gmra.mxu1 %v9254_v50  ;;  %v3054_v57 = vunpack.c.0.s8 %v1950_v61  ;;  %v3066_v11 = vunpack.c.1.s8 %v1950_v61  ;;  %v4206_v13 = vcvt.s32.f32 %v2670_v6  ;;  %v2070_v56 = vld [vmem:[%s8946_s11 + $0xb50] sm:$0xff] }
 0x29d   : > { %v9448_v21 = vpop.f32.mrf.mxu1  ;;  %6211 = vmatpush.bf16.msra.mxu0 %v5658_v62  ;;  %v4218_v18 = vcvt.s32.f32 %v2682_v17  ;;  %v3390_v9 = vunpack.c.0.s8 %v2034_v31  ;;  %v3402_v8 = vunpack.c.1.s8 %v2034_v31  ;;  %v5251_v59 = vpack.c.bf16 %v3811_v25, %v3799_v22 }
 0x29e   : > { %6218 = vmatpush.bf16.msra.mxu1 %v5826_v4  ;;  %v4590_v60 = vcvt.s32.f32 %v3054_v57  ;;  %v4602_v0 = vcvt.s32.f32 %v3066_v11  ;;  %v3606_v29 = vunpack.c.2.s8 %v2082_v34  ;;  %v3618_v27 = vunpack.c.3.s8 %v2082_v34 }
 0x29f   : > { %v5454_v43 = vpack.c.bf16 %v4218_v18, %v4206_v13  ;;  %6200 = vmatmul.bf16.vlgmr.msrb.gmra.mxu3 %v9335_v51  ;;  %v4926_v55 = vcvt.s32.f32 %v3390_v9  ;;  %v4938_v36 = vcvt.s32.f32 %v3402_v8  ;;  %v2239_v45 = vunpack.c.0.s8 %v9441_v58  ;;  %v1783_v13 = vld [vmem:[%s8946_s11 + $0x258] sm:$0xff] }
 0x2a0   : > { %6244 = vmatpush.bf16.msra.mxu3 %v5251_v59  ;;  %v5646_v30 = vpack.c.bf16 %v4602_v0, %v4590_v60  ;;  %v5142_v61 = vcvt.s32.f32 %v3606_v29  ;;  %v2251_v38 = vunpack.c.1.s8 %v9441_v58  ;;  %v5154_v49 = vcvt.s32.f32 %v3618_v27  ;;  %v2010_v60 = vld [vmem:[%s8946_s11 + $0x970] sm:$0xff] }
 0x2a1   : > { %6186 = vmatpush.bf16.msrb.mxu2 %v5454_v43  ;;  %v5814_v46 = vpack.c.bf16 %v4938_v36, %v4926_v55  ;;  %v2455_v26 = vunpack.c.2.s8 %v1795_v7  ;;  %v2467_v31 = vunpack.c.3.s8 %v1795_v7  ;;  %v3775_v33 = vcvt.s32.f32 %v2239_v45 }
 0x2a2   : > { %6212 = vmatpush.bf16.msra.mxu0 %v5646_v30  ;;  %v3787_v32 = vcvt.s32.f32 %v2251_v38  ;;  %v3366_v44 = vunpack.c.2.s8 %v2022_v48  ;;  %v3378_v54 = vunpack.c.3.s8 %v2022_v48  ;;  %v5922_v23 = vpack.c.bf16 %v5154_v49, %v5142_v61  ;;  %v1723_v49 = vld [vmem:[%s8946_s11 + $0x78] sm:$0xff] }
 0x2a3   : > { %6219 = vmatpush.bf16.msra.mxu1 %v5814_v46  ;;  %v3991_v10 = vcvt.s32.f32 %v2455_v26  ;;  %v4003_v28 = vcvt.s32.f32 %v2467_v31  ;;  %v3582_v3 = vunpack.c.0.s8 %v2082_v34  ;;  %v3594_v52 = vunpack.c.1.s8 %v2082_v34 }
 0x2a4   : > { %v5239_v35 = vpack.c.bf16 %v3787_v32, %v3775_v33  ;;  %6187 = vmatmul.bf16.vlgmr.msrb.gmra.mxu2 %v9279_v12  ;;  %v4902_v58 = vcvt.s32.f32 %v3366_v44  ;;  %v4914_v63 = vcvt.s32.f32 %v3378_v54  ;;  %v2215_v53 = vunpack.c.2.s8 %v1735_v42 }
 0x2a5   : > { %v5969_v37 = vpop.f32.mrf.mxu1  ;;  %6231 = vmatpush.bf16.msra.mxu2 %v5922_v23  ;;  %v5347_v47 = vpack.c.bf16 %v4003_v28, %v3991_v10  ;;  %6213 = vmatmul.bf16.vlgmr.msra.gmra.mxu0 %v9348_v20  ;;  %v5118_v39 = vcvt.s32.f32 %v3582_v3  ;;  %v2227_v5 = vunpack.c.3.s8 %v1735_v42  ;;  %v5130_v15 = vcvt.s32.f32 %v3594_v52  ;;  %v2058_v3 = vld [vmem:[%s8946_s11 + $0xaf0] sm:$0xff] }
 0x2a6   : > { %6245 = vmatpush.bf16.msra.mxu3 %v5239_v35  ;;  %v5802_v14 = vpack.c.bf16 %v4914_v63, %v4902_v58  ;;  %v2431_v19 = vunpack.c.0.s8 %v1795_v7  ;;  %v2443_v62 = vunpack.c.1.s8 %v1795_v7  ;;  %v3751_v22 = vcvt.s32.f32 %v2215_v53 }
 0x2a7   : > { %6257 = vmatpush.bf16.msrb.mxu0 %v5347_v47  ;;  %v3763_v6 = vcvt.s32.f32 %v2227_v5  ;;  %v3342_v17 = vunpack.c.0.s8 %v2022_v48  ;;  %v3354_v34 = vunpack.c.1.s8 %v2022_v48  ;;  %v5910_v4 = vpack.c.bf16 %v5130_v15, %v5118_v39  ;;  %v9466_v55 = vpop.f32.mrf.mxu2 }
 0x2a8   : > { %6220 = vmatpush.bf16.msra.mxu1 %v5802_v14  ;;  %v3967_v25 = vcvt.s32.f32 %v2431_v19  ;;  %v3979_v57 = vcvt.s32.f32 %v2443_v62  ;;  %v3558_v11 = vunpack.c.2.s8 %v2070_v56  ;;  %v3570_v59 = vunpack.c.3.s8 %v2070_v56  ;;  %v1771_v19 = vld [vmem:[%s8946_s11 + $0x1f8] sm:$0xff] }
 0x2a9   : > { %v5227_v18 = vpack.c.bf16 %v3763_v6, %v3751_v22  ;;  %v4878_v9 = vcvt.s32.f32 %v3342_v17  ;;  %v4890_v8 = vcvt.s32.f32 %v3354_v34  ;;  %6232 = vmatpush.bf16.msra.mxu2 %v5910_v4  ;;  %v9464_v7 = vadd.f32 %v9428_v40, %v9431_v1 }
 0x2aa   : > { %v5335_v0 = vpack.c.bf16 %v3979_v57, %v3967_v25  ;;  %v5094_v29 = vcvt.s32.f32 %v3558_v11  ;;  %v2191_v43 = vunpack.c.0.s8 %v1735_v42  ;;  %v5106_v27 = vcvt.s32.f32 %v3570_v59 }
 0x2ab   : > { %6246 = vmatpush.bf16.msra.mxu3 %v5227_v18  ;;  %v5790_v36 = vpack.c.bf16 %v4890_v8, %v4878_v9  ;;  %v2203_v48 = vunpack.c.1.s8 %v1735_v42  ;;  %v2407_v30 = vunpack.c.2.s8 %v1783_v13  ;;  %v2419_v45 = vunpack.c.3.s8 %v1783_v13 }
 0x2ac   : > { %6258 = vmatpush.bf16.msrb.mxu0 %v5335_v0  ;;  %v3727_v61 = vcvt.s32.f32 %v2191_v43  ;;  %v3318_v38 = vunpack.c.2.s8 %v2010_v60  ;;  %v3330_v46 = vunpack.c.3.s8 %v2010_v60  ;;  %v5898_v26 = vpack.c.bf16 %v5106_v27, %v5094_v29 }
 0x2ad   : > { %6221 = vmatpush.bf16.msra.mxu1 %v5790_v36  ;;  %v3739_v31 = vcvt.s32.f32 %v2203_v48  ;;  %v3943_v40 = vcvt.s32.f32 %v2407_v30  ;;  %v3534_v1 = vunpack.c.0.s8 %v2070_v56  ;;  %v3955_v33 = vcvt.s32.f32 %v2419_v45  ;;  %v1711_v36 = vld [vmem:[%s8946_s11 + $0x18] sm:$0xff] }
 0x2ae   : > { %v4854_v32 = vcvt.s32.f32 %v3318_v38  ;;  %v4866_v44 = vcvt.s32.f32 %v3330_v46  ;;  %v3546_v54 = vunpack.c.1.s8 %v2070_v56  ;;  %6233 = vmatpush.bf16.msra.mxu2 %v5898_v26  ;;  %v2167_v10 = vunpack.c.2.s8 %v1723_v49 }
 0x2af   : > { %v5215_v23 = vpack.c.bf16 %v3739_v31, %v3727_v61  ;;  %v5070_v42 = vcvt.s32.f32 %v3534_v1  ;;  %v2179_v28 = vunpack.c.3.s8 %v1723_v49  ;;  %v5323_v37 = vpack.c.bf16 %v3955_v33, %v3943_v40  ;;  %v5982_v62 = vpop.f32.mrf.mxu2 }
 0x2b0   : > { %v5778_v35 = vpack.c.bf16 %v4866_v44, %v4854_v32  ;;  %v5082_v58 = vcvt.s32.f32 %v3546_v54  ;;  %v2383_v63 = vunpack.c.0.s8 %v1783_v13  ;;  %v3703_v52 = vcvt.s32.f32 %v2167_v10  ;;  %v9478_v44 = vld [vmem:[%s8946_s11 + $0xa90] sm:$0xff]  ;;  %v1843_v62 = vld [vmem:[%s8946_s11 + $0x438] sm:$0xff] }
 0x2b1   : > { %6247 = vmatpush.bf16.msra.mxu3 %v5215_v23  ;;  %v3715_v47 = vcvt.s32.f32 %v2179_v28  ;;  %v2395_v39 = vunpack.c.1.s8 %v1783_v13  ;;  %v3294_v53 = vunpack.c.0.s8 %v2010_v60  ;;  %6259 = vmatpush.bf16.msrb.mxu0 %v5323_v37  ;;  %v3306_v14 = vunpack.c.1.s8 %v2010_v60  ;;  %v1998_v13 = vld [vmem:[%s8946_s11 + $0x910] sm:$0xff]  ;;  %v9480_v54 = vpop.f32.mrf.mxu0 }
 0x2b2   : > { %6222 = vmatpush.bf16.msra.mxu1 %v5778_v35  ;;  %v5886_v5 = vpack.c.bf16 %v5082_v58, %v5070_v42  ;;  %v3919_v56 = vcvt.s32.f32 %v2383_v63  ;;  %v3510_v15 = vunpack.c.2.s8 %v2058_v3  ;;  %v3522_v34 = vunpack.c.3.s8 %v2058_v3 }
 0x2b3   : > { %v5203_v22 = vpack.c.bf16 %v3715_v47, %v3703_v52  ;;  %v3931_v6 = vcvt.s32.f32 %v2395_v39  ;;  %v4830_v17 = vcvt.s32.f32 %v3294_v53  ;;  %v4842_v4 = vcvt.s32.f32 %v3306_v14  ;;  %v9482_v23 = vpop.f32.mrf.mxu3  ;;  %v1759_v52 = vld [vmem:[%s8946_s11 + $0x198] sm:$0xff] }
 0x2b4   : > { %6234 = vmatpush.bf16.msra.mxu2 %v5886_v5  ;;  %v5046_v25 = vcvt.s32.f32 %v3510_v15  ;;  %v2143_v57 = vunpack.c.0.s8 %v1723_v49  ;;  %v2155_v11 = vunpack.c.1.s8 %v1723_v49  ;;  %v5058_v9 = vcvt.s32.f32 %v3522_v34 }
 0x2b5   : > { %6248 = vmatpush.bf16.msra.mxu3 %v5203_v22  ;;  %v5311_v18 = vpack.c.bf16 %v3931_v6, %v3919_v56  ;;  %v2359_v8 = vunpack.c.2.s8 %v1771_v19  ;;  %v2371_v59 = vunpack.c.3.s8 %v1771_v19  ;;  %v5766_v60 = vpack.c.bf16 %v4842_v4, %v4830_v17  ;;  %v9489_v4 = vld [vmem:[%s8946_s11 + $0x738] sm:$0xff] }
 0x2b6   : > { %v3679_v0 = vcvt.s32.f32 %v2143_v57  ;;  %v3691_v29 = vcvt.s32.f32 %v2155_v11  ;;  %v9474_v43 = vadd.f32 %v9448_v21, %v9464_v7  ;;  %v5874_v27 = vpack.c.bf16 %v5058_v9, %v5046_v25 }
 0x2b7   : > { %6260 = vmatpush.bf16.msrb.mxu0 %v5311_v18  ;;  %v3895_v48 = vcvt.s32.f32 %v2359_v8  ;;  %v3907_v30 = vcvt.s32.f32 %v2371_v59  ;;  %v3270_v61 = vunpack.c.2.s8 %v1998_v13  ;;  %6223 = vmatpush.bf16.msra.mxu1 %v5766_v60  ;;  %v3282_v38 = vunpack.c.3.s8 %v1998_v13 }
 0x2b8   : > { %v5191_v45 = vpack.c.bf16 %v3691_v29, %v3679_v0  ;;  %v3486_v46 = vunpack.c.0.s8 %v2058_v3  ;;  %v3498_v49 = vunpack.c.1.s8 %v2058_v3  ;;  %6235 = vmatpush.bf16.msra.mxu2 %v5874_v27  ;;  %v2119_v40 = vunpack.c.2.s8 %v1711_v36 }
 0x2b9   : > { %v5299_v26 = vpack.c.bf16 %v3907_v30, %v3895_v48  ;;  %v4806_v31 = vcvt.s32.f32 %v3270_v61  ;;  %v2131_v1 = vunpack.c.3.s8 %v1711_v36  ;;  %v4818_v21 = vcvt.s32.f32 %v3282_v38  ;;  %v6008_v27 = vpop.f32.mrf.mxu0 }
 0x2ba   : > { %6249 = vmatpush.bf16.msra.mxu3 %v5191_v45  ;;  %v5022_v7 = vcvt.s32.f32 %v3486_v46  ;;  %v5034_v33 = vcvt.s32.f32 %v3498_v49  ;;  %v2335_v32 = vunpack.c.0.s8 %v1771_v19  ;;  %v3655_v42 = vcvt.s32.f32 %v2119_v40  ;;  %v1891_v40 = vld [vmem:[%s8946_s11 + $0x5b8] sm:$0xff] }
 0x2bb   : > { %6261 = vmatpush.bf16.msrb.mxu0 %v5299_v26  ;;  %v3667_v10 = vcvt.s32.f32 %v2131_v1  ;;  %v2347_v28 = vunpack.c.1.s8 %v1771_v19  ;;  %v3246_v3 = vunpack.c.0.s8 %v1998_v13  ;;  %v5754_v37 = vpack.c.bf16 %v4818_v21, %v4806_v31  ;;  %v5995_v48 = vpop.f32.mrf.mxu3  ;;  %v1879_v27 = vld [vmem:[%s8946_s11 + $0x558] sm:$0xff] }
 0x2bc   : > { %v5862_v35 = vpack.c.bf16 %v5034_v33, %v5022_v7  ;;  %v3871_v58 = vcvt.s32.f32 %v2335_v32  ;;  %v3258_v63 = vunpack.c.1.s8 %v1998_v13  ;;  %v3462_v5 = vunpack.c.2.s8 %v9478_v44 }
 0x2bd   : > { %v5179_v47 = vpack.c.bf16 %v3667_v10, %v3655_v42  ;;  %v3883_v39 = vcvt.s32.f32 %v2347_v28  ;;  %v4782_v53 = vcvt.s32.f32 %v3246_v3  ;;  %6224 = vmatpush.bf16.msra.mxu1 %v5754_v37  ;;  %v3474_v14 = vunpack.c.3.s8 %v9478_v44  ;;  %v1987_v37 = vld [vmem:[%s8946_s11 + $0x8b8] sm:$0xff] }
 0x2be   : > { %6236 = vmatpush.bf16.msra.mxu2 %v5862_v35  ;;  %v4794_v56 = vcvt.s32.f32 %v3258_v63  ;;  %v2095_v15 = vunpack.c.0.s8 %v1711_v36  ;;  %v2107_v19 = vunpack.c.1.s8 %v1711_v36  ;;  %v4998_v6 = vcvt.s32.f32 %v3462_v5 }
 0x2bf   : > { %6250 = vmatpush.bf16.msra.mxu3 %v5179_v47  ;;  %v5287_v22 = vpack.c.bf16 %v3883_v39, %v3871_v58  ;;  %v2311_v17 = vunpack.c.2.s8 %v1759_v52  ;;  %v2323_v34 = vunpack.c.3.s8 %v1759_v52  ;;  %v5010_v57 = vcvt.s32.f32 %v3474_v14  ;;  %v1831_v47 = vld [vmem:[%s8946_s11 + $0x3d8] sm:$0xff] }
 0x2c0   : > { %v5742_v25 = vpack.c.bf16 %v4794_v56, %v4782_v53  ;;  %v3631_v11 = vcvt.s32.f32 %v2095_v15  ;;  %v3643_v13 = vcvt.s32.f32 %v2107_v19  ;;  %v2647_v8 = vunpack.c.2.s8 %v1843_v62 }
 0x2c1   : > { %6262 = vmatpush.bf16.msrb.mxu0 %v5287_v22  ;;  %v3847_v18 = vcvt.s32.f32 %v2311_v17  ;;  %v3859_v9 = vcvt.s32.f32 %v2323_v34  ;;  %v2659_v59 = vunpack.c.3.s8 %v1843_v62  ;;  %v5850_v60 = vpack.c.bf16 %v5010_v57, %v4998_v6  ;;  %v1927_v22 = vld [vmem:[%s8946_s11 + $0x6d8] sm:$0xff] }
 0x2c2   : > { %6225 = vmatpush.bf16.msra.mxu1 %v5742_v25  ;;  %v5167_v0 = vpack.c.bf16 %v3643_v13, %v3631_v11  ;;  %v3031_v29 = vunpack.c.2.s8 %v9489_v4  ;;  %v3043_v36 = vunpack.c.3.s8 %v9489_v4  ;;  %v4183_v61 = vcvt.s32.f32 %v2647_v8 }
 0x2c3   : > { %v5275_v30 = vpack.c.bf16 %v3859_v9, %v3847_v18  ;;  %v4195_v45 = vcvt.s32.f32 %v2659_v59  ;;  %v3438_v38 = vunpack.c.0.s8 %v9478_v44  ;;  %6237 = vmatpush.bf16.msra.mxu2 %v5850_v60  ;;  %v3450_v26 = vunpack.c.1.s8 %v9478_v44 }
 0x2c4   : > { %6251 = vmatpush.bf16.msra.mxu3 %v5167_v0  ;;  %v4567_v46 = vcvt.s32.f32 %v3031_v29  ;;  %v4579_v49 = vcvt.s32.f32 %v3043_v36  ;;  %v9497_v31 = vadd.f32 %v9466_v55, %v9474_v43  ;;  %v2287_v7 = vunpack.c.0.s8 %v1759_v52 }
 0x2c5   : > { %6263 = vmatpush.bf16.msrb.mxu0 %v5275_v30  ;;  %v5443_v1 = vpack.c.bf16 %v4195_v45, %v4183_v61  ;;  %6226 = vmatmul.bf16.vlgmr.msra.gmra.mxu1 %v9377_v16  ;;  %v4974_v21 = vcvt.s32.f32 %v3438_v38  ;;  %v2299_v33 = vunpack.c.1.s8 %v1759_v52  ;;  %v4986_v42 = vcvt.s32.f32 %v3450_v26  ;;  %v9510_v38 = vpop.f32.mrf.mxu0 }
 0x2c6   : > { %v5635_v32 = vpack.c.bf16 %v4579_v49, %v4567_v46  ;;  %v2623_v10 = vunpack.c.0.s8 %v1843_v62  ;;  %v2635_v28 = vunpack.c.1.s8 %v1843_v62  ;;  %v3823_v44 = vcvt.s32.f32 %v2287_v7 }
 0x2c7   : > { %6270 = vmatpush.bf16.msrb.mxu1 %v5443_v1  ;;  %6252 = vmatmul.bf16.vlgmr.msra.gmra.mxu3 %v9159_v2  ;;  %v3835_v55 = vcvt.s32.f32 %v2299_v33  ;;  %v2839_v43 = vunpack.c.2.s8 %v1891_v40  ;;  %v2851_v3 = vunpack.c.3.s8 %v1891_v40  ;;  %v5838_v35 = vpack.c.bf16 %v4986_v42, %v4974_v21  ;;  %v9513_v42 = vpop.f32.mrf.mxu3 }
 0x2c8   : > { %6296 = vmatpush.bf16.msrb.mxu3 %v5635_v32  ;;  %v4159_v58 = vcvt.s32.f32 %v2623_v10  ;;  %v4171_v63 = vcvt.s32.f32 %v2635_v28  ;;  %v3007_v52 = vunpack.c.0.s8 %v9489_v4  ;;  %v3019_v56 = vunpack.c.1.s8 %v9489_v4  ;;  %v1975_v32 = vld [vmem:[%s8946_s11 + $0x858] sm:$0xff] }
 0x2c9   : > { %v5263_v39 = vpack.c.bf16 %v3835_v55, %v3823_v44  ;;  %v4375_v53 = vcvt.s32.f32 %v2839_v43  ;;  %v4387_v5 = vcvt.s32.f32 %v2851_v3  ;;  %6238 = vmatpush.bf16.msra.mxu2 %v5838_v35  ;;  %v3223_v19 = vunpack.c.2.s8 %v1987_v37  ;;  %v1819_v43 = vld [vmem:[%s8946_s11 + $0x378] sm:$0xff] }
 0x2ca   : > { %v5431_v14 = vpack.c.bf16 %v4171_v63, %v4159_v58  ;;  %v4543_v15 = vcvt.s32.f32 %v3007_v52  ;;  %v3235_v62 = vunpack.c.3.s8 %v1987_v37  ;;  %v4555_v17 = vcvt.s32.f32 %v3019_v56 }
 0x2cb   : > { %6264 = vmatpush.bf16.msrb.mxu0 %v5263_v39  ;;  %v5539_v6 = vpack.c.bf16 %v4387_v5, %v4375_v53  ;;  %v2599_v34 = vunpack.c.2.s8 %v1831_v47  ;;  %v2611_v25 = vunpack.c.3.s8 %v1831_v47  ;;  %v4759_v57 = vcvt.s32.f32 %v3223_v19  ;;  %v1915_v53 = vld [vmem:[%s8946_s11 + $0x678] sm:$0xff] }
 0x2cc   : > { %6271 = vmatpush.bf16.msrb.mxu1 %v5431_v14  ;;  %v4771_v11 = vcvt.s32.f32 %v3235_v62  ;;  %v2815_v13 = vunpack.c.0.s8 %v1891_v40  ;;  %v2827_v18 = vunpack.c.1.s8 %v1891_v40  ;;  %v5623_v9 = vpack.c.bf16 %v4555_v17, %v4543_v15  ;;  %6239 = vmatmul.bf16.vlgmr.msra.gmra.mxu2 %v9385_v41 }
 0x2cd   : > { %6283 = vmatpush.bf16.msrb.mxu2 %v5539_v6  ;;  %v4135_v4 = vcvt.s32.f32 %v2599_v34  ;;  %v4147_v8 = vcvt.s32.f32 %v2611_v25  ;;  %v2983_v59 = vunpack.c.2.s8 %v1927_v22  ;;  %v2995_v36 = vunpack.c.3.s8 %v1927_v22 }
 0x2ce   : > { %v5731_v60 = vpack.c.bf16 %v4771_v11, %v4759_v57  ;;  %6265 = vmatmul.bf16.vlgmr.msrb.gmra.mxu0 %v9180_v24  ;;  %v4351_v0 = vcvt.s32.f32 %v2815_v13  ;;  %v4363_v29 = vcvt.s32.f32 %v2827_v18  ;;  %6297 = vmatpush.bf16.msrb.mxu3 %v5623_v9  ;;  %v3199_v61 = vunpack.c.0.s8 %v1987_v37  ;;  %v6060_v11 = vpop.f32.mrf.mxu0 }
 0x2cf   : > { %v5419_v48 = vpack.c.bf16 %v4147_v8, %v4135_v4  ;;  %v4519_v30 = vcvt.s32.f32 %v2983_v59  ;;  %v3211_v45 = vunpack.c.1.s8 %v1987_v37  ;;  %v4531_v49 = vcvt.s32.f32 %v2995_v36  ;;  %v1867_v8 = vld [vmem:[%s8946_s11 + $0x4f8] sm:$0xff] }
 0x2d0   : > { %6309 = vmatpush.bf16.msra.mxu0 %v5731_v60  ;;  %v5527_v46 = vpack.c.bf16 %v4363_v29, %v4351_v0  ;;  %v2575_v26 = vunpack.c.0.s8 %v1831_v47  ;;  %v2587_v40 = vunpack.c.1.s8 %v1831_v47  ;;  %v4735_v1 = vcvt.s32.f32 %v3199_v61  ;;  %v6047_v0 = vpop.f32.mrf.mxu3 }
 0x2d1   : > { %6272 = vmatpush.bf16.msrb.mxu1 %v5419_v48  ;;  %v4747_v21 = vcvt.s32.f32 %v3211_v45  ;;  %v2791_v7 = vunpack.c.2.s8 %v1879_v27  ;;  %v2803_v33 = vunpack.c.3.s8 %v1879_v27  ;;  %v5611_v10 = vpack.c.bf16 %v4531_v49, %v4519_v30  ;;  %v1963_v49 = vld [vmem:[%s8946_s11 + $0x7f8] sm:$0xff] }
 0x2d2   : > { %6284 = vmatpush.bf16.msrb.mxu2 %v5527_v46  ;;  %v4111_v28 = vcvt.s32.f32 %v2575_v26  ;;  %v4123_v44 = vcvt.s32.f32 %v2587_v40  ;;  %v2959_v55 = vunpack.c.0.s8 %v1927_v22  ;;  %v2971_v58 = vunpack.c.1.s8 %v1927_v22  ;;  %v9523_v26 = vpop.f32.mrf.mxu1 }
 0x2d3   : > { %v5719_v3 = vpack.c.bf16 %v4747_v21, %v4735_v1  ;;  %v4327_v37 = vcvt.s32.f32 %v2791_v7  ;;  %v4339_v35 = vcvt.s32.f32 %v2803_v33  ;;  %6298 = vmatpush.bf16.msrb.mxu3 %v5611_v10  ;;  %v3175_v47 = vunpack.c.2.s8 %v1975_v32  ;;  %v1807_v33 = vld [vmem:[%s8946_s11 + $0x318] sm:$0xff] }
 0x2d4   : > { %v5407_v63 = vpack.c.bf16 %v4123_v44, %v4111_v28  ;;  %v4495_v52 = vcvt.s32.f32 %v2959_v55  ;;  %v3187_v39 = vunpack.c.3.s8 %v1975_v32  ;;  %v4507_v56 = vcvt.s32.f32 %v2971_v58 }
 0x2d5   : > { %6310 = vmatpush.bf16.msra.mxu0 %v5719_v3  ;;  %v5515_v5 = vpack.c.bf16 %v4339_v35, %v4327_v37  ;;  %v9519_v14 = vadd.f32 %v9482_v23, %v9497_v31  ;;  %v2551_v15 = vunpack.c.2.s8 %v1819_v43  ;;  %v4711_v19 = vcvt.s32.f32 %v3175_v47  ;;  %v1903_v47 = vld [vmem:[%s8946_s11 + $0x618] sm:$0xff] }
 0x2d6   : > { %6273 = vmatpush.bf16.msrb.mxu1 %v5407_v63  ;;  %v4723_v62 = vcvt.s32.f32 %v3187_v39  ;;  %v2563_v6 = vunpack.c.3.s8 %v1819_v43  ;;  %v2767_v22 = vunpack.c.0.s8 %v1879_v27  ;;  %v5599_v17 = vpack.c.bf16 %v4507_v56, %v4495_v52 }
 0x2d7   : > { %6285 = vmatpush.bf16.msrb.mxu2 %v5515_v5  ;;  %v4087_v34 = vcvt.s32.f32 %v2551_v15  ;;  %v2779_v25 = vunpack.c.1.s8 %v1879_v27  ;;  %v2935_v57 = vunpack.c.2.s8 %v1915_v53  ;;  %v2947_v4 = vunpack.c.3.s8 %v1915_v53 }
 0x2d8   : > { %v5707_v13 = vpack.c.bf16 %v4723_v62, %v4711_v19  ;;  %v4099_v18 = vcvt.s32.f32 %v2563_v6  ;;  %v4303_v9 = vcvt.s32.f32 %v2767_v22  ;;  %6299 = vmatpush.bf16.msrb.mxu3 %v5599_v17  ;;  %v3151_v59 = vunpack.c.0.s8 %v1975_v32 }
 0x2d9   : > { %v4315_v23 = vcvt.s32.f32 %v2779_v25  ;;  %v4471_v31 = vcvt.s32.f32 %v2935_v57  ;;  %v3163_v60 = vunpack.c.1.s8 %v1975_v32  ;;  %v4483_v36 = vcvt.s32.f32 %v2947_v4  ;;  %v9528_v57 = vld [vmem:[%s8946_s11 + $0x498] sm:$0xff] }
 0x2da   : > { %6311 = vmatpush.bf16.msra.mxu0 %v5707_v13  ;;  %v5395_v29 = vpack.c.bf16 %v4099_v18, %v4087_v34  ;;  %v2527_v48 = vunpack.c.0.s8 %v1819_v43  ;;  %v2539_v27 = vunpack.c.1.s8 %v1819_v43  ;;  %v4687_v61 = vcvt.s32.f32 %v3151_v59  ;;  %v6021_v4 = vpop.f32.mrf.mxu1 }
 0x2db   : > { %v5503_v30 = vpack.c.bf16 %v4315_v23, %v4303_v9  ;;  %v4699_v45 = vcvt.s32.f32 %v3163_v60  ;;  %v2743_v46 = vunpack.c.2.s8 %v1867_v8  ;;  %v5587_v40 = vpack.c.bf16 %v4483_v36, %v4471_v31 }
 0x2dc   : > { %6274 = vmatpush.bf16.msrb.mxu1 %v5395_v29  ;;  %v4063_v1 = vcvt.s32.f32 %v2527_v48  ;;  %v4075_v21 = vcvt.s32.f32 %v2539_v27  ;;  %v2755_v7 = vunpack.c.3.s8 %v1867_v8  ;;  %v2911_v28 = vunpack.c.0.s8 %v1915_v53  ;;  %v1951_v48 = vld [vmem:[%s8946_s11 + $0x798] sm:$0xff] }
 0x2dd   : > { %6286 = vmatpush.bf16.msrb.mxu2 %v5503_v30  ;;  %v5695_v32 = vpack.c.bf16 %v4699_v45, %v4687_v61  ;;  %v4279_v10 = vcvt.s32.f32 %v2743_v46  ;;  %v2923_v44 = vunpack.c.1.s8 %v1915_v53  ;;  %6300 = vmatpush.bf16.msrb.mxu3 %v5587_v40  ;;  %v3127_v3 = vunpack.c.2.s8 %v1963_v49  ;;  %v2035_v46 = vld [vmem:[%s8946_s11 + $0xa38] sm:$0xff] }
 0x2de   : > { %v5383_v55 = vpack.c.bf16 %v4075_v21, %v4063_v1  ;;  %v4291_v43 = vcvt.s32.f32 %v2755_v7  ;;  %v3139_v37 = vunpack.c.3.s8 %v1963_v49  ;;  %v4447_v35 = vcvt.s32.f32 %v2911_v28 }
 0x2df   : > { %6312 = vmatpush.bf16.msra.mxu0 %v5695_v32  ;;  %v4459_v58 = vcvt.s32.f32 %v2923_v44  ;;  %v2503_v63 = vunpack.c.2.s8 %v1807_v33  ;;  %v2515_v52 = vunpack.c.3.s8 %v1807_v33  ;;  %v4663_v5 = vcvt.s32.f32 %v3127_v3 }
 0x2e0   : > { %6275 = vmatpush.bf16.msrb.mxu1 %v5383_v55  ;;  %v5491_v39 = vpack.c.bf16 %v4291_v43, %v4279_v10  ;;  %v4675_v56 = vcvt.s32.f32 %v3139_v37  ;;  %v2719_v15 = vunpack.c.0.s8 %v1867_v8  ;;  %v2731_v6 = vunpack.c.1.s8 %v1867_v8  ;;  %v9539_v55 = vpop.f32.mrf.mxu2 }
 0x2e1   : > { %v5575_v19 = vpack.c.bf16 %v4459_v58, %v4447_v35  ;;  %v4039_v62 = vcvt.s32.f32 %v2503_v63  ;;  %v4051_v53 = vcvt.s32.f32 %v2515_v52  ;;  %v2887_v34 = vunpack.c.2.s8 %v1903_v47 }
 0x2e2   : > { %6287 = vmatpush.bf16.msrb.mxu2 %v5491_v39  ;;  %v5683_v22 = vpack.c.bf16 %v4675_v56, %v4663_v5  ;;  %v4255_v17 = vcvt.s32.f32 %v2719_v15  ;;  %v2899_v25 = vunpack.c.3.s8 %v1903_v47  ;;  %v4267_v13 = vcvt.s32.f32 %v2731_v6 }
 0x2e3   : > { %6301 = vmatpush.bf16.msrb.mxu3 %v5575_v19  ;;  %v5371_v11 = vpack.c.bf16 %v4051_v53, %v4039_v62  ;;  %v3103_v18 = vunpack.c.0.s8 %v1963_v49  ;;  %v3115_v9 = vunpack.c.1.s8 %v1963_v49  ;;  %v4423_v23 = vcvt.s32.f32 %v2887_v34  ;;  %v9534_v49 = vpop.f32.mrf.mxu0 }
 0x2e4   : > { %6313 = vmatpush.bf16.msra.mxu0 %v5683_v22  ;;  %v4435_v31 = vcvt.s32.f32 %v2899_v25  ;;  %v2479_v59 = vunpack.c.0.s8 %v1807_v33  ;;  %v2491_v8 = vunpack.c.1.s8 %v1807_v33  ;;  %v5479_v60 = vpack.c.bf16 %v4267_v13, %v4255_v17  ;;  %v9537_v33 = vld [vmem:[%s8946_s11 + $0x140] sm:$0xff]  ;;  %v2083_v22 = vld [vmem:[%s8946_s11 + $0xbb8] sm:$0xff] }
 0x2e5   : > { %6276 = vmatpush.bf16.msrb.mxu1 %v5371_v11  ;;  %v4639_v0 = vcvt.s32.f32 %v3103_v18  ;;  %v4651_v29 = vcvt.s32.f32 %v3115_v9  ;;  %v2695_v36 = vunpack.c.2.s8 %v9528_v57  ;;  %v2707_v45 = vunpack.c.3.s8 %v9528_v57 }
 0x2e6   : > { %v5563_v27 = vpack.c.bf16 %v4435_v31, %v4423_v23  ;;  %v4015_v30 = vcvt.s32.f32 %v2479_v59  ;;  %v4027_v61 = vcvt.s32.f32 %v2491_v8  ;;  %6288 = vmatpush.bf16.msrb.mxu2 %v5479_v60  ;;  %v2863_v21 = vunpack.c.0.s8 %v1903_v47  ;;  %v1796_v8 = vld [vmem:[%s8946_s11 + $0x2c0] sm:$0xff] }
 0x2e7   : > { %v5671_v40 = vpack.c.bf16 %v4651_v29, %v4639_v0  ;;  %v4231_v1 = vcvt.s32.f32 %v2695_v36  ;;  %v2875_v7 = vunpack.c.1.s8 %v1903_v47  ;;  %v4243_v10 = vcvt.s32.f32 %v2707_v45  ;;  %v9554_v36 = vld [vmem:[%s8946_s11 + $0x9d8] sm:$0xff] }
 0x2e8   : > { %6302 = vmatpush.bf16.msrb.mxu3 %v5563_v27  ;;  %v5359_v32 = vpack.c.bf16 %v4027_v61, %v4015_v30  ;;  %v3079_v28 = vunpack.c.2.s8 %v1951_v48  ;;  %v3091_v44 = vunpack.c.3.s8 %v1951_v48  ;;  %v4399_v43 = vcvt.s32.f32 %v2863_v21  ;;  %v9556_v27 = vpop.f32.mrf.mxu3 }
 0x2e9   : > { %6314 = vmatpush.bf16.msra.mxu0 %v5671_v40  ;;  %v4411_v3 = vcvt.s32.f32 %v2875_v7  ;;  %v3415_v37 = vunpack.c.2.s8 %v2035_v46  ;;  %v3427_v35 = vunpack.c.3.s8 %v2035_v46  ;;  %v5467_v58 = vpack.c.bf16 %v4243_v10, %v4231_v1  ;;  %v9560_v40 = vpop.f32.mrf.mxu1 }
 0x2ea   : > { %6277 = vmatpush.bf16.msrb.mxu1 %v5359_v32  ;;  %v4615_v63 = vcvt.s32.f32 %v3079_v28  ;;  %v4627_v52 = vcvt.s32.f32 %v3091_v44  ;;  %v2264_v47 = vunpack.c.2.s8 %v9537_v33  ;;  %v2276_v15 = vunpack.c.3.s8 %v9537_v33 }
 0x2eb   : > { %v5551_v39 = vpack.c.bf16 %v4411_v3, %v4399_v43  ;;  %v4951_v5 = vcvt.s32.f32 %v3415_v37  ;;  %v4963_v56 = vcvt.s32.f32 %v3427_v35  ;;  %6289 = vmatpush.bf16.msrb.mxu2 %v5467_v58  ;;  %v9545_v53 = vadd.f32 %v9510_v38, %v9513_v42  ;;  %v6112_v38 = vpop.f32.mrf.mxu0  ;;  %v1736_v3 = vld [vmem:[%s8946_s11 + $0xe0] sm:$0xff] }
 0x2ec   : > { %v5659_v19 = vpack.c.bf16 %v4627_v52, %v4615_v63  ;;  %v3800_v62 = vcvt.s32.f32 %v2264_v47  ;;  %v2671_v6 = vunpack.c.0.s8 %v9528_v57  ;;  %v3812_v34 = vcvt.s32.f32 %v2276_v15 }
 0x2ed   : > { %6303 = vmatpush.bf16.msrb.mxu3 %v5551_v39  ;;  %v5827_v17 = vpack.c.bf16 %v4963_v56, %v4951_v5  ;;  %6278 = vmatmul.bf16.vlgmr.msrb.gmra.mxu1 %v9254_v50  ;;  %v2683_v25 = vunpack.c.1.s8 %v9528_v57  ;;  %v3055_v11 = vunpack.c.0.s8 %v1951_v48  ;;  %v3067_v18 = vunpack.c.1.s8 %v1951_v48  ;;  %v6034_v48 = vpop.f32.mrf.mxu2 }
 0x2ee   : > { %6315 = vmatpush.bf16.msra.mxu0 %v5659_v19  ;;  %v4207_v13 = vcvt.s32.f32 %v2671_v6  ;;  %v3391_v9 = vunpack.c.0.s8 %v2035_v46  ;;  %v3403_v4 = vunpack.c.1.s8 %v2035_v46  ;;  %v5252_v42 = vpack.c.bf16 %v3812_v34, %v3800_v62  ;;  %v9577_v48 = vld [vmem:[%s8946_s11 + $0x978] sm:$0xff] }
 0x2ef   : > { %6322 = vmatpush.bf16.msra.mxu1 %v5827_v17  ;;  %v4219_v23 = vcvt.s32.f32 %v2683_v25  ;;  %v4591_v31 = vcvt.s32.f32 %v3055_v11  ;;  %v3607_v59 = vunpack.c.2.s8 %v2083_v22  ;;  %v4603_v60 = vcvt.s32.f32 %v3067_v18  ;;  %v2071_v25 = vld [vmem:[%s8946_s11 + $0xb58] sm:$0xff] }
 0x2f0   : > { %6304 = vmatmul.bf16.vlgmr.msrb.gmra.mxu3 %v9335_v51  ;;  %v4927_v0 = vcvt.s32.f32 %v3391_v9  ;;  %v4939_v29 = vcvt.s32.f32 %v3403_v4  ;;  %v3619_v57 = vunpack.c.3.s8 %v2083_v22  ;;  %v2240_v45 = vunpack.c.0.s8 %v9537_v33  ;;  %v6099_v9 = vpop.f32.mrf.mxu3 }
 0x2f1   : > { %6348 = vmatpush.bf16.msra.mxu3 %v5252_v42  ;;  %v5455_v30 = vpack.c.bf16 %v4219_v23, %v4207_v13  ;;  %v5143_v61 = vcvt.s32.f32 %v3607_v59  ;;  %v2252_v46 = vunpack.c.1.s8 %v9537_v33  ;;  %v5647_v1 = vpack.c.bf16 %v4603_v60, %v4591_v31  ;;  %v6073_v42 = vpop.f32.mrf.mxu1 }
 0x2f2   : > { %v5815_v21 = vpack.c.bf16 %v4939_v29, %v4927_v0  ;;  %v5155_v7 = vcvt.s32.f32 %v3619_v57  ;;  %v2456_v32 = vunpack.c.2.s8 %v1796_v8  ;;  %v3776_v10 = vcvt.s32.f32 %v2240_v45  ;;  %v1784_v0 = vld [vmem:[%s8946_s11 + $0x260] sm:$0xff] }
 0x2f3   : > { %6290 = vmatpush.bf16.msrb.mxu2 %v5455_v30  ;;  %v3788_v28 = vcvt.s32.f32 %v2252_v46  ;;  %v2468_v44 = vunpack.c.3.s8 %v1796_v8  ;;  %v3367_v43 = vunpack.c.2.s8 %v9554_v36  ;;  %6316 = vmatpush.bf16.msra.mxu0 %v5647_v1  ;;  %v3379_v58 = vunpack.c.3.s8 %v9554_v36 }
 0x2f4   : > { %6323 = vmatpush.bf16.msra.mxu1 %v5815_v21  ;;  %v5923_v37 = vpack.c.bf16 %v5155_v7, %v5143_v61  ;;  %v3992_v35 = vcvt.s32.f32 %v2456_v32  ;;  %v3583_v33 = vunpack.c.0.s8 %v2083_v22  ;;  %v3595_v39 = vunpack.c.1.s8 %v2083_v22  ;;  %v9580_v32 = vld [vmem:[%s8946_s11 + $0x80] sm:$0xff] }
 0x2f5   : > { %v5240_v63 = vpack.c.bf16 %v3788_v28, %v3776_v10  ;;  %v4004_v52 = vcvt.s32.f32 %v2468_v44  ;;  %v4903_v47 = vcvt.s32.f32 %v3367_v43  ;;  %v4915_v5 = vcvt.s32.f32 %v3379_v58 }
 0x2f6   : > { %v5119_v56 = vcvt.s32.f32 %v3583_v33  ;;  %v6007_v15 = vadd.f32 %v9480_v54, %v9519_v14  ;;  %v2216_v19 = vunpack.c.2.s8 %v1736_v3  ;;  %6291 = vmatmul.bf16.vlgmr.msrb.gmra.mxu2 %v9279_v12  ;;  %v5131_v6 = vcvt.s32.f32 %v3595_v39  ;;  %6317 = vmatmul.bf16.vlgmr.msra.gmra.mxu0 %v9348_v20  ;;  %v9587_v39 = vld [vmem:[%s8952_s5] sm:$0xff] }
 0x2f7   : > { %6335 = vmatpush.bf16.msra.mxu2 %v5923_v37  ;;  %6349 = vmatpush.bf16.msra.mxu3 %v5240_v63  ;;  %v5348_v62 = vpack.c.bf16 %v4004_v52, %v3992_v35  ;;  %v2228_v17 = vunpack.c.3.s8 %v1736_v3  ;;  %v2432_v34 = vunpack.c.0.s8 %v1796_v8  ;;  %v5803_v11 = vpack.c.bf16 %v4915_v5, %v4903_v47 }
 0x2f8   : > { %v9571_v22 = vadd.f32 %v9523_v26, %v6007_v15  ;;  %v3752_v13 = vcvt.s32.f32 %v2216_v19  ;;  %v2444_v18 = vunpack.c.1.s8 %v1796_v8  ;;  %v5911_v54 = vpack.c.bf16 %v5131_v6, %v5119_v56 }
 0x2f9   : > { %6361 = vmatpush.bf16.msrb.mxu0 %v5348_v62  ;;  %v3764_v14 = vcvt.s32.f32 %v2228_v17  ;;  %v3968_v4 = vcvt.s32.f32 %v2432_v34  ;;  %v3343_v38 = vunpack.c.0.s8 %v9554_v36  ;;  %6324 = vmatpush.bf16.msra.mxu1 %v5803_v11  ;;  %v3355_v31 = vunpack.c.1.s8 %v9554_v36  ;;  %v9591_v62 = vld [vmem:[%s8954_s22] sm:$0xff] }
 0x2fa   : > { %v3980_v23 = vcvt.s32.f32 %v2444_v18  ;;  %v3559_v59 = vunpack.c.2.s8 %v2071_v25  ;;  %v3571_v60 = vunpack.c.3.s8 %v2071_v25  ;;  %v2192_v29 = vunpack.c.0.s8 %v1736_v3 }
 0x2fb   : > { %6336 = vmatpush.bf16.msra.mxu2 %v5911_v54  ;;  %v5228_v26 = vpack.c.bf16 %v3764_v14, %v3752_v13  ;;  %v4879_v8 = vcvt.s32.f32 %v3343_v38  ;;  %v2204_v57 = vunpack.c.1.s8 %v1736_v3  ;;  %v4891_v61 = vcvt.s32.f32 %v3355_v31  ;;  %v9603_v14 = vpop.f32.mrf.mxu2 }
 0x2fc   : > { %v5336_v30 = vpack.c.bf16 %v3980_v23, %v3968_v4  ;;  %v5095_v45 = vcvt.s32.f32 %v3559_v59  ;;  %v5107_v46 = vcvt.s32.f32 %v3571_v60  ;;  %v3728_v1 = vcvt.s32.f32 %v2192_v29 }
 0x2fd   : > { %6350 = vmatpush.bf16.msra.mxu3 %v5228_v26  ;;  %v3740_v21 = vcvt.s32.f32 %v2204_v57  ;;  %v2408_v36 = vunpack.c.2.s8 %v1784_v0  ;;  %v2420_v7 = vunpack.c.3.s8 %v1784_v0  ;;  %v5791_v10 = vpack.c.bf16 %v4891_v61, %v4879_v8  ;;  %v1772_v26 = vld [vmem:[%s8946_s11 + $0x200] sm:$0xff]  ;;  %v1999_v57 = vld [vmem:[%s8946_s11 + $0x918] sm:$0xff] }
 0x2fe   : > { %6362 = vmatpush.bf16.msrb.mxu0 %v5336_v30  ;;  %v5899_v28 = vpack.c.bf16 %v5107_v46, %v5095_v45  ;;  %v3319_v44 = vunpack.c.2.s8 %v9577_v48  ;;  %v3331_v43 = vunpack.c.3.s8 %v9577_v48  ;;  %v3535_v58 = vunpack.c.0.s8 %v2071_v25 }
 0x2ff   : > { %v5216_v3 = vpack.c.bf16 %v3740_v21, %v3728_v1  ;;  %v3944_v37 = vcvt.s32.f32 %v2408_v36  ;;  %v3956_v35 = vcvt.s32.f32 %v2420_v7  ;;  %6325 = vmatpush.bf16.msra.mxu1 %v5791_v10  ;;  %v3547_v52 = vunpack.c.1.s8 %v2071_v25  ;;  %v2059_v25 = vld [vmem:[%s8946_s11 + $0xaf8] sm:$0xff]  ;;  %v9618_v7 = vpop.f32.mrf.mxu1 }
 0x300   : > { %6337 = vmatpush.bf16.msra.mxu2 %v5899_v28  ;;  %v4855_v33 = vcvt.s32.f32 %v3319_v44  ;;  %v4867_v63 = vcvt.s32.f32 %v3331_v43  ;;  %v2168_v47 = vunpack.c.2.s8 %v9580_v32  ;;  %v5071_v56 = vcvt.s32.f32 %v3535_v58  ;;  %v1712_v43 = vld [vmem:[%s8946_s11 + $0x20] sm:$0xff] }
 0x301   : > { %6351 = vmatpush.bf16.msra.mxu3 %v5216_v3  ;;  %v5324_v5 = vpack.c.bf16 %v3956_v35, %v3944_v37  ;;  %v2180_v15 = vunpack.c.3.s8 %v9580_v32  ;;  %v2384_v19 = vunpack.c.0.s8 %v1784_v0  ;;  %v5083_v17 = vcvt.s32.f32 %v3547_v52 }
 0x302   : > { %v5779_v6 = vpack.c.bf16 %v4867_v63, %v4855_v33  ;;  %v3704_v34 = vcvt.s32.f32 %v2168_v47  ;;  %v2396_v11 = vunpack.c.1.s8 %v1784_v0  ;;  %v6033_v9 = vadd.f32 %v9539_v55, %v9571_v22 }
 0x303   : > { %6363 = vmatpush.bf16.msrb.mxu0 %v5324_v5  ;;  %v3716_v13 = vcvt.s32.f32 %v2180_v15  ;;  %v3920_v18 = vcvt.s32.f32 %v2384_v19  ;;  %v7184_v54 = vperm.slane %v9587_v39, 0  ;;  %v5887_v4 = vpack.c.bf16 %v5083_v17, %v5071_v56  ;;  %v6086_v47 = vpop.f32.mrf.mxu2 }
 0x304   : > { %6326 = vmatpush.bf16.msra.mxu1 %v5779_v6  ;;  %v3932_v38 = vcvt.s32.f32 %v2396_v11  ;;  %v7224_v42 = vperm.slane %v9591_v62, 0  ;;  %v3295_v23 = vunpack.c.0.s8 %v9577_v48  ;;  %v3307_v60 = vunpack.c.1.s8 %v9577_v48 }
 0x305   : > { %v5204_v31 = vpack.c.bf16 %v3716_v13, %v3704_v34  ;;  %v7208_v59 = vmul.f32 %v7184_v54, %v6033_v9  ;;  %v3511_v0 = vunpack.c.2.s8 %v2059_v25  ;;  %6338 = vmatpush.bf16.msra.mxu2 %v5887_v4  ;;  %v3523_v8 = vunpack.c.3.s8 %v2059_v25  ;;  %v9632_v13 = vpop.f32.mrf.mxu0 }
 0x306   : > { %v5312_v55 = vpack.c.bf16 %v3932_v38, %v3920_v18  ;;  %v4831_v22 = vcvt.s32.f32 %v3295_v23  ;;  %v2144_v29 = vunpack.c.0.s8 %v9580_v32  ;;  %v4843_v61 = vcvt.s32.f32 %v3307_v60 }
 0x307   : > { %6352 = vmatpush.bf16.msra.mxu3 %v5204_v31  ;;  %v7248_v30 = vadd.f32 %v7224_v42, %v7208_v59  ;;  %v5047_v45 = vcvt.s32.f32 %v3511_v0  ;;  %v2156_v48 = vunpack.c.1.s8 %v9580_v32  ;;  %v5059_v46 = vcvt.s32.f32 %v3523_v8  ;;  %v1760_v31 = vld [vmem:[%s8946_s11 + $0x1a0] sm:$0xff] }
 0x308   : > { %6364 = vmatpush.bf16.msrb.mxu0 %v5312_v55  ;;  %v3680_v1 = vcvt.s32.f32 %v2144_v29  ;;  %v2360_v21 = vunpack.c.2.s8 %v1772_v26  ;;  %v2372_v36 = vunpack.c.3.s8 %v1772_v26  ;;  %v5767_v10 = vpack.c.bf16 %v4843_v61, %v4831_v22  ;;  %v6125_v22 = vpop.f32.mrf.mxu1  ;;  %v1844_v61 = vld [vmem:[%s8946_s11 + $0x440] sm:$0xff] }
 0x309   : > { %8314 = vtanh.f32 %v7248_v30  ;;  %v3692_v28 = vcvt.s32.f32 %v2156_v48  ;;  %v3271_v44 = vunpack.c.2.s8 %v1999_v57  ;;  %v5875_v3 = vpack.c.bf16 %v5059_v46, %v5047_v45 }
 0x30a   : > { %v3896_v37 = vcvt.s32.f32 %v2360_v21  ;;  %v3908_v35 = vcvt.s32.f32 %v2372_v36  ;;  %v3283_v58 = vunpack.c.3.s8 %v1999_v57  ;;  %6327 = vmatpush.bf16.msra.mxu1 %v5767_v10  ;;  %v3487_v63 = vunpack.c.0.s8 %v2059_v25 }
 0x30b   : > { %v5192_v33 = vpack.c.bf16 %v3692_v28, %v3680_v1  ;;  %v4807_v32 = vcvt.s32.f32 %v3271_v44  ;;  %v3499_v52 = vunpack.c.1.s8 %v2059_v25  ;;  %6339 = vmatpush.bf16.msra.mxu2 %v5875_v3  ;;  %v9624_v15 = vadd.f32 %v9560_v40, %v9545_v53  ;;  %v2047_v25 = vld [vmem:[%s8946_s11 + $0xa98] sm:$0xff]  ;;  %v9638_v44 = vpop.f32.mrf.mxu3 }
 0x30c   : > { %v5300_v5 = vpack.c.bf16 %v3908_v35, %v3896_v37  ;;  %v4819_v56 = vcvt.s32.f32 %v3283_v58  ;;  %v2120_v19 = vunpack.c.2.s8 %v1712_v43  ;;  %v5023_v6 = vcvt.s32.f32 %v3487_v63 }
 0x30d   : > { %6353 = vmatpush.bf16.msra.mxu3 %v5192_v33  ;;  %v5035_v17 = vcvt.s32.f32 %v3499_v52  ;;  %v2132_v34 = vunpack.c.3.s8 %v1712_v43  ;;  %v2336_v11 = vunpack.c.0.s8 %v1772_v26  ;;  %v2348_v40 = vunpack.c.1.s8 %v1772_v26  ;;  %v6164_v52 = vpop.f32.mrf.mxu0 }
 0x30e   : > { %6365 = vmatpush.bf16.msrb.mxu0 %v5300_v5  ;;  %v5755_v18 = vpack.c.bf16 %v4819_v56, %v4807_v32  ;;  %v3656_v53 = vcvt.s32.f32 %v2120_v19  ;;  %v3247_v9 = vunpack.c.0.s8 %v1999_v57  ;;  %v3259_v23 = vunpack.c.1.s8 %v1999_v57  ;;  %v1940_v57 = vld [vmem:[%s8946_s11 + $0x740] sm:$0xff] }
 0x30f   : > { %v8315_v54 = vpop.eup %8314  ;;  %v5863_v4 = vpack.c.bf16 %v5035_v17, %v5023_v6  ;;  %v3668_v38 = vcvt.s32.f32 %v2132_v34  ;;  %v3872_v42 = vcvt.s32.f32 %v2336_v11  ;;  %v3884_v59 = vcvt.s32.f32 %v2348_v40 }
 0x310   : > { %7272 = vst [vmem:[%s9629_s3] sm:$0xff] %v8315_v54  ;;  %6328 = vmatpush.bf16.msra.mxu1 %v5755_v18  ;;  %v4783_v60 = vcvt.s32.f32 %v3247_v9  ;;  %v3463_v0 = vunpack.c.2.s8 %v2047_v25  ;;  %v3475_v55 = vunpack.c.3.s8 %v2047_v25  ;;  %v4795_v29 = vcvt.s32.f32 %v3259_v23  ;;  %v1892_v18 = vld [vmem:[%s8946_s11 + $0x5c0] sm:$0xff] }
 0x311   : > { %6340 = vmatpush.bf16.msra.mxu2 %v5863_v4  ;;  %v5180_v8 = vpack.c.bf16 %v3668_v38, %v3656_v53  ;;  %v2096_v26 = vunpack.c.0.s8 %v1712_v43  ;;  %v2108_v30 = vunpack.c.1.s8 %v1712_v43  ;;  %v5288_v45 = vpack.c.bf16 %v3884_v59, %v3872_v42  ;;  %v9642_v4 = vpop.f32.mrf.mxu2  ;;  %v1988_v59 = vld [vmem:[%s8946_s11 + $0x8c0] sm:$0xff] }
 0x312   : > { %v4999_v48 = vcvt.s32.f32 %v3463_v0  ;;  %v5011_v46 = vcvt.s32.f32 %v3475_v55  ;;  %v2312_v1 = vunpack.c.2.s8 %v1760_v31  ;;  %v5743_v21 = vpack.c.bf16 %v4795_v29, %v4783_v60 }
 0x313   : > { %6354 = vmatpush.bf16.msra.mxu3 %v5180_v8  ;;  %v3632_v36 = vcvt.s32.f32 %v2096_v26  ;;  %v3644_v10 = vcvt.s32.f32 %v2108_v30  ;;  %v2324_v28 = vunpack.c.3.s8 %v1760_v31  ;;  %6366 = vmatpush.bf16.msrb.mxu0 %v5288_v45  ;;  %v2648_v35 = vunpack.c.2.s8 %v1844_v61  ;;  %v1832_v30 = vld [vmem:[%s8946_s11 + $0x3e0] sm:$0xff]  ;;  %v6151_v45 = vpop.f32.mrf.mxu3 }
 0x314   : > { %v5851_v3 = vpack.c.bf16 %v5011_v46, %v4999_v48  ;;  %v3848_v37 = vcvt.s32.f32 %v2312_v1  ;;  %v2660_v58 = vunpack.c.3.s8 %v1844_v61  ;;  %6329 = vmatpush.bf16.msra.mxu1 %v5743_v21  ;;  %v3032_v32 = vunpack.c.2.s8 %v1940_v57 }
 0x315   : > { %v5168_v43 = vpack.c.bf16 %v3644_v10, %v3632_v36  ;;  %v3860_v33 = vcvt.s32.f32 %v2324_v28  ;;  %v3044_v63 = vunpack.c.3.s8 %v1940_v57  ;;  %v4184_v47 = vcvt.s32.f32 %v2648_v35 }
 0x316   : > { %6341 = vmatpush.bf16.msra.mxu2 %v5851_v3  ;;  %v4196_v5 = vcvt.s32.f32 %v2660_v58  ;;  %v3439_v56 = vunpack.c.0.s8 %v2047_v25  ;;  %v3451_v19 = vunpack.c.1.s8 %v2047_v25  ;;  %v4568_v17 = vcvt.s32.f32 %v3032_v32  ;;  %v1928_v3 = vld [vmem:[%s8946_s11 + $0x6e0] sm:$0xff] }
 0x317   : > { %6355 = vmatpush.bf16.msra.mxu3 %v5168_v43  ;;  %v5276_v6 = vpack.c.bf16 %v3860_v33, %v3848_v37  ;;  %v4580_v34 = vcvt.s32.f32 %v3044_v63  ;;  %v2288_v11 = vunpack.c.0.s8 %v1760_v31  ;;  %6330 = vmatmul.bf16.vlgmr.msra.gmra.mxu1 %v9377_v16  ;;  %v2300_v54 = vunpack.c.1.s8 %v1760_v31 }
 0x318   : > { %v5444_v53 = vpack.c.bf16 %v4196_v5, %v4184_v47  ;;  %v4975_v40 = vcvt.s32.f32 %v3439_v56  ;;  %v4987_v9 = vcvt.s32.f32 %v3451_v19  ;;  %v2624_v25 = vunpack.c.0.s8 %v1844_v61 }
 0x319   : > { %6367 = vmatpush.bf16.msrb.mxu0 %v5276_v6  ;;  %v5636_v38 = vpack.c.bf16 %v4580_v34, %v4568_v17  ;;  %v3824_v42 = vcvt.s32.f32 %v2288_v11  ;;  %v2636_v23 = vunpack.c.1.s8 %v1844_v61  ;;  %v3836_v0 = vcvt.s32.f32 %v2300_v54  ;;  %v6138_v19 = vpop.f32.mrf.mxu2 }
 0x31a   : > { %6374 = vmatpush.bf16.msrb.mxu1 %v5444_v53  ;;  %v5839_v60 = vpack.c.bf16 %v4987_v9, %v4975_v40  ;;  %6356 = vmatmul.bf16.vlgmr.msra.gmra.mxu3 %v9159_v2  ;;  %v2840_v55 = vunpack.c.2.s8 %v1892_v18  ;;  %v2852_v22 = vunpack.c.3.s8 %v1892_v18  ;;  %v4160_v8 = vcvt.s32.f32 %v2624_v25  ;;  %v1880_v9 = vld [vmem:[%s8946_s11 + $0x560] sm:$0xff] }
 0x31b   : > { %6400 = vmatpush.bf16.msrb.mxu3 %v5636_v38  ;;  %v4172_v31 = vcvt.s32.f32 %v2636_v23  ;;  %v3008_v29 = vunpack.c.0.s8 %v1940_v57  ;;  %v3020_v26 = vunpack.c.1.s8 %v1940_v57  ;;  %v5264_v48 = vpack.c.bf16 %v3836_v0, %v3824_v42  ;;  %v1976_v0 = vld [vmem:[%s8946_s11 + $0x860] sm:$0xff] }
 0x31c   : > { %6342 = vmatpush.bf16.msra.mxu2 %v5839_v60  ;;  %v4376_v46 = vcvt.s32.f32 %v2840_v55  ;;  %v4388_v61 = vcvt.s32.f32 %v2852_v22  ;;  %v3224_v1 = vunpack.c.2.s8 %v1988_v59  ;;  %v3236_v28 = vunpack.c.3.s8 %v1988_v59 }
 0x31d   : > { %v5432_v21 = vpack.c.bf16 %v4172_v31, %v4160_v8  ;;  %v4544_v36 = vcvt.s32.f32 %v3008_v29  ;;  %v4556_v10 = vcvt.s32.f32 %v3020_v26  ;;  %6368 = vmatpush.bf16.msrb.mxu0 %v5264_v48  ;;  %v6085_v58 = vadd.f32 %v9603_v14, %v9624_v15  ;;  %v1820_v31 = vld [vmem:[%s8946_s11 + $0x380] sm:$0xff] }
 0x31e   : > { %v5540_v37 = vpack.c.bf16 %v4388_v61, %v4376_v46  ;;  %v4760_v35 = vcvt.s32.f32 %v3224_v1  ;;  %v2600_v43 = vunpack.c.2.s8 %v1832_v30  ;;  %v4772_v33 = vcvt.s32.f32 %v3236_v28 }
 0x31f   : > { %6375 = vmatpush.bf16.msrb.mxu1 %v5432_v21  ;;  %v5624_v57 = vpack.c.bf16 %v4556_v10, %v4544_v36  ;;  %6343 = vmatmul.bf16.vlgmr.msra.gmra.mxu2 %v9385_v41  ;;  %v2612_v32 = vunpack.c.3.s8 %v1832_v30  ;;  %v2816_v63 = vunpack.c.0.s8 %v1892_v18  ;;  %v6098_v52 = vadd.f32 %v9556_v27, %v6085_v58  ;;  %v1916_v10 = vld [vmem:[%s8946_s11 + $0x680] sm:$0xff] }
 0x320   : > { %6387 = vmatpush.bf16.msrb.mxu2 %v5540_v37  ;;  %v4136_v47 = vcvt.s32.f32 %v2600_v43  ;;  %v2828_v5 = vunpack.c.1.s8 %v1892_v18  ;;  %v2984_v56 = vunpack.c.2.s8 %v1928_v3  ;;  %v5732_v6 = vpack.c.bf16 %v4772_v33, %v4760_v35  ;;  %6369 = vmatmul.bf16.vlgmr.msrb.gmra.mxu0 %v9180_v24 }
 0x321   : > { %6401 = vmatpush.bf16.msrb.mxu3 %v5624_v57  ;;  %v4148_v14 = vcvt.s32.f32 %v2612_v32  ;;  %v4352_v15 = vcvt.s32.f32 %v2816_v63  ;;  %v2996_v17 = vunpack.c.3.s8 %v1928_v3  ;;  %v3200_v53 = vunpack.c.0.s8 %v1988_v59 }
 0x322   : > { %v4364_v34 = vcvt.s32.f32 %v2828_v5  ;;  %v4520_v11 = vcvt.s32.f32 %v2984_v56  ;;  %v3212_v40 = vunpack.c.1.s8 %v1988_v59  ;;  %6413 = vmatpush.bf16.msra.mxu0 %v5732_v6  ;;  %v6111_v18 = vadd.f32 %v9534_v49, %v6098_v52 }
 0x323   : > { %v5420_v27 = vpack.c.bf16 %v4148_v14, %v4136_v47  ;;  %v4532_v54 = vcvt.s32.f32 %v2996_v17  ;;  %v2576_v38 = vunpack.c.0.s8 %v1832_v30  ;;  %v4736_v25 = vcvt.s32.f32 %v3200_v53  ;;  %v1868_v14 = vld [vmem:[%s8946_s11 + $0x500] sm:$0xff] }
 0x324   : > { %v5528_v42 = vpack.c.bf16 %v4364_v34, %v4352_v15  ;;  %v4748_v23 = vcvt.s32.f32 %v3212_v40  ;;  %v2588_v60 = vunpack.c.1.s8 %v1832_v30  ;;  %v9657_v22 = vadd.f32 %v9618_v7, %v6111_v18 }
 0x325   : > { %6376 = vmatpush.bf16.msrb.mxu1 %v5420_v27  ;;  %v5612_v55 = vpack.c.bf16 %v4532_v54, %v4520_v11  ;;  %v4112_v8 = vcvt.s32.f32 %v2576_v38  ;;  %v2792_v59 = vunpack.c.2.s8 %v1880_v9  ;;  %v2804_v45 = vunpack.c.3.s8 %v1880_v9 }
 0x326   : > { %6388 = vmatpush.bf16.msrb.mxu2 %v5528_v42  ;;  %v5720_v29 = vpack.c.bf16 %v4748_v23, %v4736_v25  ;;  %v4124_v26 = vcvt.s32.f32 %v2588_v60  ;;  %v2960_v49 = vunpack.c.0.s8 %v1928_v3  ;;  %v2972_v46 = vunpack.c.1.s8 %v1928_v3  ;;  %v1964_v25 = vld [vmem:[%s8946_s11 + $0x800] sm:$0xff] }
 0x327   : > { %6402 = vmatpush.bf16.msrb.mxu3 %v5612_v55  ;;  %v4328_v48 = vcvt.s32.f32 %v2792_v59  ;;  %v3176_v61 = vunpack.c.2.s8 %v1976_v0  ;;  %v3188_v30 = vunpack.c.3.s8 %v1976_v0  ;;  %v4340_v21 = vcvt.s32.f32 %v2804_v45 }
 0x328   : > { %6414 = vmatpush.bf16.msra.mxu0 %v5720_v29  ;;  %v5408_v1 = vpack.c.bf16 %v4124_v26, %v4112_v8  ;;  %v4496_v36 = vcvt.s32.f32 %v2960_v49  ;;  %v2552_v7 = vunpack.c.2.s8 %v1820_v31  ;;  %v4508_v28 = vcvt.s32.f32 %v2972_v46 }
 0x329   : > { %v4712_v37 = vcvt.s32.f32 %v3176_v61  ;;  %v4724_v35 = vcvt.s32.f32 %v3188_v30  ;;  %v2564_v58 = vunpack.c.3.s8 %v1820_v31  ;;  %v5516_v43 = vpack.c.bf16 %v4340_v21, %v4328_v48  ;;  %v9668_v48 = vpop.f32.mrf.mxu1  ;;  %v1904_v21 = vld [vmem:[%s8946_s11 + $0x620] sm:$0xff] }
 0x32a   : > { %6377 = vmatpush.bf16.msrb.mxu1 %v5408_v1  ;;  %v4088_v57 = vcvt.s32.f32 %v2552_v7  ;;  %v2768_v33 = vunpack.c.0.s8 %v1880_v9  ;;  %v2780_v32 = vunpack.c.1.s8 %v1880_v9  ;;  %v5600_v63 = vpack.c.bf16 %v4508_v28, %v4496_v36 }
 0x32b   : > { %v5708_v3 = vpack.c.bf16 %v4724_v35, %v4712_v37  ;;  %v4100_v52 = vcvt.s32.f32 %v2564_v58  ;;  %v2936_v47 = vunpack.c.2.s8 %v1916_v10  ;;  %6389 = vmatpush.bf16.msrb.mxu2 %v5516_v43  ;;  %v2948_v19 = vunpack.c.3.s8 %v1916_v10 }
 0x32c   : > { %v4304_v5 = vcvt.s32.f32 %v2768_v33  ;;  %v4316_v56 = vcvt.s32.f32 %v2780_v32  ;;  %v3152_v6 = vunpack.c.0.s8 %v1976_v0  ;;  %6403 = vmatpush.bf16.msrb.mxu3 %v5600_v63  ;;  %v3164_v34 = vunpack.c.1.s8 %v1976_v0 }
 0x32d   : > { %6415 = vmatpush.bf16.msra.mxu0 %v5708_v3  ;;  %v5396_v15 = vpack.c.bf16 %v4100_v52, %v4088_v57  ;;  %v4472_v17 = vcvt.s32.f32 %v2936_v47  ;;  %v9664_v11 = vadd.f32 %v9632_v13, %v9638_v44  ;;  %v4484_v40 = vcvt.s32.f32 %v2948_v19  ;;  %v9676_v19 = vpop.f32.mrf.mxu0 }
 0x32e   : > { %v5504_v53 = vpack.c.bf16 %v4316_v56, %v4304_v5  ;;  %v4688_v9 = vcvt.s32.f32 %v3152_v6  ;;  %v2528_v27 = vunpack.c.0.s8 %v1820_v31  ;;  %v4700_v54 = vcvt.s32.f32 %v3164_v34  ;;  %v1856_v56 = vld [vmem:[%s8946_s11 + $0x4a0] sm:$0xff] }
 0x32f   : > { %6378 = vmatpush.bf16.msrb.mxu1 %v5396_v15  ;;  %v2540_v18 = vunpack.c.1.s8 %v1820_v31  ;;  %v2744_v38 = vunpack.c.2.s8 %v1868_v14  ;;  %v2756_v42 = vunpack.c.3.s8 %v1868_v14  ;;  %v5588_v23 = vpack.c.bf16 %v4484_v40, %v4472_v17  ;;  %v1808_v31 = vld [vmem:[%s8946_s11 + $0x320] sm:$0xff] }
 0x330   : > { %6390 = vmatpush.bf16.msrb.mxu2 %v5504_v53  ;;  %v4064_v60 = vcvt.s32.f32 %v2528_v27  ;;  %v2912_v55 = vunpack.c.0.s8 %v1916_v10  ;;  %v2924_v0 = vunpack.c.1.s8 %v1916_v10  ;;  %v5696_v8 = vpack.c.bf16 %v4700_v54, %v4688_v9 }
 0x331   : > { %v4076_v13 = vcvt.s32.f32 %v2540_v18  ;;  %v4280_v44 = vcvt.s32.f32 %v2744_v38  ;;  %v4292_v59 = vcvt.s32.f32 %v2756_v42  ;;  %6404 = vmatpush.bf16.msrb.mxu3 %v5588_v23  ;;  %v3128_v45 = vunpack.c.2.s8 %v1964_v25  ;;  %v6177_v27 = vpop.f32.mrf.mxu1 }
 0x332   : > { %v4448_v29 = vcvt.s32.f32 %v2912_v55  ;;  %v4460_v26 = vcvt.s32.f32 %v2924_v0  ;;  %v3140_v49 = vunpack.c.3.s8 %v1964_v25  ;;  %6416 = vmatpush.bf16.msra.mxu0 %v5696_v8  ;;  %v6137_v30 = vadd.f32 %v9642_v4, %v9657_v22  ;;  %v2036_v0 = vld [vmem:[%s8946_s11 + $0xa40] sm:$0xff]  ;;  %v9683_v8 = vpop.f32.mrf.mxu3 }
 0x333   : > { %v5384_v46 = vpack.c.bf16 %v4076_v13, %v4064_v60  ;;  %v5492_v61 = vpack.c.bf16 %v4292_v59, %v4280_v44  ;;  %v7185_v1 = vperm.slane %v9587_v39, 1  ;;  %v4664_v7 = vcvt.s32.f32 %v3128_v45 }
 0x334   : > { %v5576_v36 = vpack.c.bf16 %v4460_v26, %v4448_v29  ;;  %v4676_v10 = vcvt.s32.f32 %v3140_v49  ;;  %v7225_v28 = vperm.slane %v9591_v62, 1  ;;  %v2504_v35 = vunpack.c.2.s8 %v1808_v31  ;;  %v1749_v26 = vld [vmem:[%s8946_s11 + $0x148] sm:$0xff] }
 0x335   : > { %6379 = vmatpush.bf16.msrb.mxu1 %v5384_v46  ;;  %6391 = vmatpush.bf16.msrb.mxu2 %v5492_v61  ;;  %v7209_v37 = vmul.f32 %v7185_v1, %v6137_v30  ;;  %v2516_v58 = vunpack.c.3.s8 %v1808_v31  ;;  %v2720_v43 = vunpack.c.0.s8 %v1868_v14  ;;  %v2732_v33 = vunpack.c.1.s8 %v1868_v14  ;;  %v9679_v14 = vld [vmem:[%s8946_s11 + $0x7a0] sm:$0xff] }
 0x336   : > { %6405 = vmatpush.bf16.msrb.mxu3 %v5576_v36  ;;  %v5684_v57 = vpack.c.bf16 %v4676_v10, %v4664_v7  ;;  %v2888_v32 = vunpack.c.2.s8 %v1904_v21  ;;  %v2900_v4 = vunpack.c.3.s8 %v1904_v21  ;;  %v4040_v22 = vcvt.s32.f32 %v2504_v35  ;;  %v9687_v7 = vpop.f32.mrf.mxu2 }
 0x337   : > { %v7249_v39 = vadd.f32 %v7225_v28, %v7209_v37  ;;  %v4052_v63 = vcvt.s32.f32 %v2516_v58  ;;  %v4256_v3 = vcvt.s32.f32 %v2720_v43  ;;  %v4268_v52 = vcvt.s32.f32 %v2732_v33  ;;  %v6216_v58 = vpop.f32.mrf.mxu0 }
 0x338   : > { %6417 = vmatpush.bf16.msra.mxu0 %v5684_v57  ;;  %v4424_v62 = vcvt.s32.f32 %v2888_v32  ;;  %v4436_v47 = vcvt.s32.f32 %v2900_v4  ;;  %v3104_v5 = vunpack.c.0.s8 %v1964_v25  ;;  %v3116_v15 = vunpack.c.1.s8 %v1964_v25  ;;  %v2084_v4 = vld [vmem:[%s8946_s11 + $0xbc0] sm:$0xff] }
 0x339   : > { %8316 = vtanh.f32 %v7249_v39  ;;  %v5372_v6 = vpack.c.bf16 %v4052_v63, %v4040_v22  ;;  %v2480_v17 = vunpack.c.0.s8 %v1808_v31  ;;  %v5480_v34 = vpack.c.bf16 %v4268_v52, %v4256_v3 }
 0x33a   : > { %v5564_v53 = vpack.c.bf16 %v4436_v47, %v4424_v62  ;;  %v4640_v40 = vcvt.s32.f32 %v3104_v5  ;;  %v2492_v9 = vunpack.c.1.s8 %v1808_v31  ;;  %v4652_v54 = vcvt.s32.f32 %v3116_v15 }
 0x33b   : > { %6380 = vmatpush.bf16.msrb.mxu1 %v5372_v6  ;;  %v4016_v18 = vcvt.s32.f32 %v2480_v17  ;;  %v2696_v38 = vunpack.c.2.s8 %v1856_v56  ;;  %v2708_v42 = vunpack.c.3.s8 %v1856_v56  ;;  %6392 = vmatpush.bf16.msrb.mxu2 %v5480_v34  ;;  %v2864_v60 = vunpack.c.0.s8 %v1904_v21  ;;  %v1797_v34 = vld [vmem:[%s8946_s11 + $0x2c8] sm:$0xff] }
 0x33c   : > { %6406 = vmatpush.bf16.msrb.mxu3 %v5564_v53  ;;  %v4028_v23 = vcvt.s32.f32 %v2492_v9  ;;  %v2876_v25 = vunpack.c.1.s8 %v1904_v21  ;;  %v3080_v55 = vunpack.c.2.s8 %v9679_v14  ;;  %v5672_v13 = vpack.c.bf16 %v4652_v54, %v4640_v40  ;;  %v6203_v53 = vpop.f32.mrf.mxu3 }
 0x33d   : > { %v4232_v44 = vcvt.s32.f32 %v2696_v38  ;;  %v4244_v59 = vcvt.s32.f32 %v2708_v42  ;;  %v3092_v29 = vunpack.c.3.s8 %v9679_v14  ;;  %v4400_v49 = vcvt.s32.f32 %v2864_v60 }
 0x33e   : > { %v5360_v45 = vpack.c.bf16 %v4028_v23, %v4016_v18  ;;  %v4412_v31 = vcvt.s32.f32 %v2876_v25  ;;  %v4616_v46 = vcvt.s32.f32 %v3080_v55  ;;  %6418 = vmatpush.bf16.msra.mxu0 %v5672_v13  ;;  %v3416_v21 = vunpack.c.2.s8 %v2036_v0  ;;  %v2024_v18 = vld [vmem:[%s8946_s11 + $0x9e0] sm:$0xff]  ;;  %v6190_v13 = vpop.f32.mrf.mxu2 }
 0x33f   : > { %v8317_v61 = vpop.eup %8316  ;;  %v5468_v30 = vpack.c.bf16 %v4244_v59, %v4232_v44  ;;  %v4628_v1 = vcvt.s32.f32 %v3092_v29  ;;  %v3428_v36 = vunpack.c.3.s8 %v2036_v0  ;;  %v2265_v28 = vunpack.c.2.s8 %v1749_v26 }
 0x340   : > { %7273 = vst [vmem:[%s9629_s3 + $0x8] sm:$0xff] %v8317_v61  ;;  %6381 = vmatpush.bf16.msrb.mxu1 %v5360_v45  ;;  %v5552_v10 = vpack.c.bf16 %v4412_v31, %v4400_v49  ;;  %v2277_v37 = vunpack.c.3.s8 %v1749_v26  ;;  %v2672_v35 = vunpack.c.0.s8 %v1856_v56  ;;  %v4952_v57 = vcvt.s32.f32 %v3416_v21  ;;  %v1737_v49 = vld [vmem:[%s8946_s11 + $0xe8] sm:$0xff] }
 0x341   : > { %6393 = vmatpush.bf16.msrb.mxu2 %v5468_v30  ;;  %v5660_v43 = vpack.c.bf16 %v4628_v1, %v4616_v46  ;;  %v4964_v33 = vcvt.s32.f32 %v3428_v36  ;;  %v2684_v32 = vunpack.c.1.s8 %v1856_v56  ;;  %v3801_v39 = vcvt.s32.f32 %v2265_v28 }
 0x342   : > { %6407 = vmatpush.bf16.msrb.mxu3 %v5552_v10  ;;  %v3813_v22 = vcvt.s32.f32 %v2277_v37  ;;  %v4208_v63 = vcvt.s32.f32 %v2672_v35  ;;  %v3056_v3 = vunpack.c.0.s8 %v9679_v14  ;;  %v3068_v47 = vunpack.c.1.s8 %v9679_v14 }
 0x343   : > { %6419 = vmatpush.bf16.msra.mxu0 %v5660_v43  ;;  %v5828_v52 = vpack.c.bf16 %v4964_v33, %v4952_v57  ;;  %6382 = vmatmul.bf16.vlgmr.msrb.gmra.mxu1 %v9254_v50  ;;  %v4220_v62 = vcvt.s32.f32 %v2684_v32  ;;  %v3392_v5 = vunpack.c.0.s8 %v2036_v0  ;;  %v3404_v56 = vunpack.c.1.s8 %v2036_v0  ;;  %v2072_v32 = vld [vmem:[%s8946_s11 + $0xb60] sm:$0xff] }
 0x344   : > { %v5253_v6 = vpack.c.bf16 %v3813_v22, %v3801_v39  ;;  %v4592_v15 = vcvt.s32.f32 %v3056_v3  ;;  %v3608_v17 = vunpack.c.2.s8 %v2084_v4  ;;  %v4604_v9 = vcvt.s32.f32 %v3068_v47 }
 0x345   : > { %6426 = vmatpush.bf16.msra.mxu1 %v5828_v52  ;;  %v5456_v40 = vpack.c.bf16 %v4220_v62, %v4208_v63  ;;  %6408 = vmatmul.bf16.vlgmr.msrb.gmra.mxu3 %v9335_v51  ;;  %v4928_v27 = vcvt.s32.f32 %v3392_v5  ;;  %v3620_v54 = vunpack.c.3.s8 %v2084_v4  ;;  %v4940_v38 = vcvt.s32.f32 %v3404_v56  ;;  %v1785_v5 = vld [vmem:[%s8946_s11 + $0x268] sm:$0xff] }
 0x346   : > { %6452 = vmatpush.bf16.msra.mxu3 %v5253_v6  ;;  %v5144_v42 = vcvt.s32.f32 %v3608_v17  ;;  %v2241_v14 = vunpack.c.0.s8 %v1749_v26  ;;  %v2253_v23 = vunpack.c.1.s8 %v1749_v26  ;;  %v5648_v60 = vpack.c.bf16 %v4604_v9, %v4592_v15 }
 0x347   : > { %6394 = vmatpush.bf16.msrb.mxu2 %v5456_v40  ;;  %v5156_v25 = vcvt.s32.f32 %v3620_v54  ;;  %v2457_v55 = vunpack.c.2.s8 %v1797_v34  ;;  %v2469_v0 = vunpack.c.3.s8 %v1797_v34  ;;  %v5816_v44 = vpack.c.bf16 %v4940_v38, %v4928_v27 }
 0x348   : > { %v3777_v59 = vcvt.s32.f32 %v2241_v14  ;;  %v3789_v29 = vcvt.s32.f32 %v2253_v23  ;;  %v3368_v45 = vunpack.c.2.s8 %v2024_v18  ;;  %6420 = vmatpush.bf16.msra.mxu0 %v5648_v60  ;;  %v3380_v30 = vunpack.c.3.s8 %v2024_v18 }
 0x349   : > { %v5924_v31 = vpack.c.bf16 %v5156_v25, %v5144_v42  ;;  %v3993_v46 = vcvt.s32.f32 %v2457_v55  ;;  %v4005_v61 = vcvt.s32.f32 %v2469_v0  ;;  %6427 = vmatpush.bf16.msra.mxu1 %v5816_v44  ;;  %v3584_v21 = vunpack.c.0.s8 %v2084_v4 }
 0x34a   : > { %v5241_v1 = vpack.c.bf16 %v3789_v29, %v3777_v59  ;;  %6395 = vmatmul.bf16.vlgmr.msrb.gmra.mxu2 %v9279_v12  ;;  %v4904_v26 = vcvt.s32.f32 %v3368_v45  ;;  %v3596_v36 = vunpack.c.1.s8 %v2084_v4  ;;  %v4916_v28 = vcvt.s32.f32 %v3380_v30 }
 0x34b   : > { %6439 = vmatpush.bf16.msra.mxu2 %v5924_v31  ;;  %v5349_v10 = vpack.c.bf16 %v4005_v61, %v3993_v46  ;;  %v2217_v37 = vunpack.c.2.s8 %v1737_v49  ;;  %v2229_v35 = vunpack.c.3.s8 %v1737_v49  ;;  %6421 = vmatmul.bf16.vlgmr.msra.gmra.mxu0 %v9348_v20  ;;  %v5120_v58 = vcvt.s32.f32 %v3584_v21 }
 0x34c   : > { %6453 = vmatpush.bf16.msra.mxu3 %v5241_v1  ;;  %v5132_v43 = vcvt.s32.f32 %v3596_v36  ;;  %v2433_v57 = vunpack.c.0.s8 %v1797_v34  ;;  %v2445_v33 = vunpack.c.1.s8 %v1797_v34  ;;  %v5804_v39 = vpack.c.bf16 %v4916_v28, %v4904_v26  ;;  %v2012_v34 = vld [vmem:[%s8946_s11 + $0x980] sm:$0xff] }
 0x34d   : > { %6465 = vmatpush.bf16.msrb.mxu0 %v5349_v10  ;;  %v3753_v22 = vcvt.s32.f32 %v2217_v37  ;;  %v3765_v63 = vcvt.s32.f32 %v2229_v35  ;;  %v9703_v4 = vadd.f32 %v9668_v48, %v9664_v11  ;;  %v3344_v47 = vunpack.c.0.s8 %v2024_v18  ;;  %v2060_v36 = vld [vmem:[%s8946_s11 + $0xb00] sm:$0xff] }
 0x34e   : > { %v5912_v3 = vpack.c.bf16 %v5132_v43, %v5120_v58  ;;  %v3969_v52 = vcvt.s32.f32 %v2433_v57  ;;  %v3981_v62 = vcvt.s32.f32 %v2445_v33  ;;  %6428 = vmatpush.bf16.msra.mxu1 %v5804_v39  ;;  %v3356_v15 = vunpack.c.1.s8 %v2024_v18  ;;  %v1725_v18 = vld [vmem:[%s8946_s11 + $0x88] sm:$0xff] }
 0x34f   : > { %v5229_v6 = vpack.c.bf16 %v3765_v63, %v3753_v22  ;;  %v3560_v56 = vunpack.c.2.s8 %v2072_v32  ;;  %v3572_v17 = vunpack.c.3.s8 %v2072_v32  ;;  %v4880_v40 = vcvt.s32.f32 %v3344_v47 }
 0x350   : > { %6440 = vmatpush.bf16.msra.mxu2 %v5912_v3  ;;  %v5337_v53 = vpack.c.bf16 %v3981_v62, %v3969_v52  ;;  %v2193_v9 = vunpack.c.0.s8 %v1737_v49  ;;  %v2205_v27 = vunpack.c.1.s8 %v1737_v49  ;;  %v4892_v11 = vcvt.s32.f32 %v3356_v15  ;;  %v1773_v3 = vld [vmem:[%s8946_s11 + $0x208] sm:$0xff] }
 0x351   : > { %6454 = vmatpush.bf16.msra.mxu3 %v5229_v6  ;;  %v5096_v48 = vcvt.s32.f32 %v3560_v56  ;;  %v5108_v54 = vcvt.s32.f32 %v3572_v17  ;;  %v2409_v38 = vunpack.c.2.s8 %v1785_v5  ;;  %v2421_v23 = vunpack.c.3.s8 %v1785_v5  ;;  %v2000_v6 = vld [vmem:[%s8946_s11 + $0x920] sm:$0xff] }
 0x352   : > { %6466 = vmatpush.bf16.msrb.mxu0 %v5337_v53  ;;  %v3729_v42 = vcvt.s32.f32 %v2193_v9  ;;  %v3741_v14 = vcvt.s32.f32 %v2205_v27  ;;  %v3320_v60 = vunpack.c.2.s8 %v2012_v34  ;;  %v5792_v25 = vpack.c.bf16 %v4892_v11, %v4880_v40  ;;  %v9713_v53 = vpop.f32.mrf.mxu1 }
 0x353   : > { %v5900_v55 = vpack.c.bf16 %v5108_v54, %v5096_v48  ;;  %v3945_v0 = vcvt.s32.f32 %v2409_v38  ;;  %v3332_v13 = vunpack.c.3.s8 %v2012_v34  ;;  %v3957_v59 = vcvt.s32.f32 %v2421_v23  ;;  %v1713_v48 = vld [vmem:[%s8946_s11 + $0x28] sm:$0xff] }
 0x354   : > { %v5217_v44 = vpack.c.bf16 %v3741_v14, %v3729_v42  ;;  %v4856_v29 = vcvt.s32.f32 %v3320_v60  ;;  %v3536_v45 = vunpack.c.0.s8 %v2072_v32  ;;  %6429 = vmatpush.bf16.msra.mxu1 %v5792_v25  ;;  %v3548_v31 = vunpack.c.1.s8 %v2072_v32 }
 0x355   : > { %6441 = vmatpush.bf16.msra.mxu2 %v5900_v55  ;;  %v4868_v49 = vcvt.s32.f32 %v3332_v13  ;;  %v2169_v46 = vunpack.c.2.s8 %v1725_v18  ;;  %v2181_v61 = vunpack.c.3.s8 %v1725_v18  ;;  %v5325_v30 = vpack.c.bf16 %v3957_v59, %v3945_v0 }
 0x356   : > { %6455 = vmatpush.bf16.msra.mxu3 %v5217_v44  ;;  %v5072_v1 = vcvt.s32.f32 %v3536_v45  ;;  %v2385_v26 = vunpack.c.0.s8 %v1785_v5  ;;  %v2397_v21 = vunpack.c.1.s8 %v1785_v5  ;;  %v5084_v28 = vcvt.s32.f32 %v3548_v31  ;;  %v9722_v45 = vpop.f32.mrf.mxu0 }
 0x357   : > { %v5780_v10 = vpack.c.bf16 %v4868_v49, %v4856_v29  ;;  %v3705_v37 = vcvt.s32.f32 %v2169_v46  ;;  %v3717_v35 = vcvt.s32.f32 %v2181_v61  ;;  %6467 = vmatpush.bf16.msrb.mxu0 %v5325_v30  ;;  %v3296_v57 = vunpack.c.0.s8 %v2012_v34  ;;  %v9720_v29 = vld [vmem:[%s8946_s11 + $0xaa0] sm:$0xff] }
 0x358   : > { %v3921_v58 = vcvt.s32.f32 %v2385_v26  ;;  %v3933_v43 = vcvt.s32.f32 %v2397_v21  ;;  %v3308_v33 = vunpack.c.1.s8 %v2012_v34  ;;  %v5888_v32 = vpack.c.bf16 %v5084_v28, %v5072_v1 }
 0x359   : > { %6430 = vmatpush.bf16.msra.mxu1 %v5780_v10  ;;  %v5205_v39 = vpack.c.bf16 %v3717_v35, %v3705_v37  ;;  %v3512_v22 = vunpack.c.2.s8 %v2060_v36  ;;  %v3524_v63 = vunpack.c.3.s8 %v2060_v36  ;;  %v4832_v62 = vcvt.s32.f32 %v3296_v57  ;;  %v1761_v35 = vld [vmem:[%s8946_s11 + $0x1a8] sm:$0xff] }
 0x35a   : > { %v5313_v52 = vpack.c.bf16 %v3933_v43, %v3921_v58  ;;  %v4844_v47 = vcvt.s32.f32 %v3308_v33  ;;  %v6189_v5 = vadd.f32 %v9687_v7, %v9703_v4  ;;  %6442 = vmatpush.bf16.msra.mxu2 %v5888_v32  ;;  %v2145_v17 = vunpack.c.0.s8 %v1725_v18  ;;  %v6229_v58 = vpop.f32.mrf.mxu1 }
 0x35b   : > { %6456 = vmatpush.bf16.msra.mxu3 %v5205_v39  ;;  %v5048_v15 = vcvt.s32.f32 %v3512_v22  ;;  %v5060_v56 = vcvt.s32.f32 %v3524_v63  ;;  %v2157_v34 = vunpack.c.1.s8 %v1725_v18  ;;  %v2361_v27 = vunpack.c.2.s8 %v1773_v3  ;;  %v1845_v39 = vld [vmem:[%s8946_s11 + $0x448] sm:$0xff] }
 0x35c   : > { %6468 = vmatpush.bf16.msrb.mxu0 %v5313_v52  ;;  %v5768_v40 = vpack.c.bf16 %v4844_v47, %v4832_v62  ;;  %v9716_v9 = vadd.f32 %v9683_v8, %v6189_v5  ;;  %v2373_v11 = vunpack.c.3.s8 %v1773_v3  ;;  %v3681_v38 = vcvt.s32.f32 %v2145_v17  ;;  %v9729_v62 = vld [vmem:[%s8946_s11 + $0x748] sm:$0xff] }
 0x35d   : > { %v5876_v54 = vpack.c.bf16 %v5060_v56, %v5048_v15  ;;  %v3693_v7 = vcvt.s32.f32 %v2157_v34  ;;  %v3272_v4 = vunpack.c.2.s8 %v2000_v6  ;;  %v3897_v42 = vcvt.s32.f32 %v2361_v27  ;;  %v9731_v56 = vpop.f32.mrf.mxu3 }
 0x35e   : > { %6431 = vmatpush.bf16.msra.mxu1 %v5768_v40  ;;  %v3909_v14 = vcvt.s32.f32 %v2373_v11  ;;  %v3284_v23 = vunpack.c.3.s8 %v2000_v6  ;;  %v3488_v60 = vunpack.c.0.s8 %v2060_v36  ;;  %v3500_v55 = vunpack.c.1.s8 %v2060_v36 }
 0x35f   : > { %6443 = vmatpush.bf16.msra.mxu2 %v5876_v54  ;;  %v5193_v18 = vpack.c.bf16 %v3693_v7, %v3681_v38  ;;  %v4808_v25 = vcvt.s32.f32 %v3272_v4  ;;  %v2121_v0 = vunpack.c.2.s8 %v1713_v48  ;;  %v2133_v59 = vunpack.c.3.s8 %v1713_v48  ;;  %v9734_v7 = vpop.f32.mrf.mxu2  ;;  %v6268_v4 = vpop.f32.mrf.mxu0 }
 0x360   : > { %v5301_v8 = vpack.c.bf16 %v3909_v14, %v3897_v42  ;;  %v4820_v13 = vcvt.s32.f32 %v3284_v23  ;;  %v5024_v44 = vcvt.s32.f32 %v3488_v60  ;;  %v5036_v49 = vcvt.s32.f32 %v3500_v55 }
 0x361   : > { %6457 = vmatpush.bf16.msra.mxu3 %v5193_v18  ;;  %v3657_v31 = vcvt.s32.f32 %v2121_v0  ;;  %v2337_v46 = vunpack.c.0.s8 %v1773_v3  ;;  %v2349_v61 = vunpack.c.1.s8 %v1773_v3  ;;  %v3669_v1 = vcvt.s32.f32 %v2133_v59 }
 0x362   : > { %6469 = vmatpush.bf16.msrb.mxu0 %v5301_v8  ;;  %v5756_v30 = vpack.c.bf16 %v4820_v13, %v4808_v25  ;;  %v3248_v26 = vunpack.c.0.s8 %v2000_v6  ;;  %v3260_v21 = vunpack.c.1.s8 %v2000_v6  ;;  %v5864_v36 = vpack.c.bf16 %v5036_v49, %v5024_v44  ;;  %v1893_v8 = vld [vmem:[%s8946_s11 + $0x5c8] sm:$0xff] }
 0x363   : > { %v3873_v10 = vcvt.s32.f32 %v2337_v46  ;;  %v3885_v28 = vcvt.s32.f32 %v2349_v61  ;;  %v3464_v37 = vunpack.c.2.s8 %v9720_v29  ;;  %v5181_v43 = vpack.c.bf16 %v3669_v1, %v3657_v31 }
 0x364   : > { %6432 = vmatpush.bf16.msra.mxu1 %v5756_v30  ;;  %v4784_v57 = vcvt.s32.f32 %v3248_v26  ;;  %v4796_v33 = vcvt.s32.f32 %v3260_v21  ;;  %v3476_v32 = vunpack.c.3.s8 %v9720_v29  ;;  %6444 = vmatpush.bf16.msra.mxu2 %v5864_v36  ;;  %v2097_v3 = vunpack.c.0.s8 %v1713_v48  ;;  %v1989_v36 = vld [vmem:[%s8946_s11 + $0x8c8] sm:$0xff] }
 0x365   : > { %v5289_v22 = vpack.c.bf16 %v3885_v28, %v3873_v10  ;;  %v5000_v63 = vcvt.s32.f32 %v3464_v37  ;;  %v2109_v52 = vunpack.c.1.s8 %v1713_v48  ;;  %6458 = vmatpush.bf16.msra.mxu3 %v5181_v43  ;;  %v2313_v6 = vunpack.c.2.s8 %v1761_v35  ;;  %v1833_v43 = vld [vmem:[%s8946_s11 + $0x3e8] sm:$0xff] }
 0x366   : > { %v5744_v47 = vpack.c.bf16 %v4796_v33, %v4784_v57  ;;  %v5012_v5 = vcvt.s32.f32 %v3476_v32  ;;  %v2325_v15 = vunpack.c.3.s8 %v1761_v35  ;;  %v3633_v17 = vcvt.s32.f32 %v2097_v3 }
 0x367   : > { %6470 = vmatpush.bf16.msrb.mxu0 %v5289_v22  ;;  %v3645_v34 = vcvt.s32.f32 %v2109_v52  ;;  %v2649_v40 = vunpack.c.2.s8 %v1845_v39  ;;  %v2661_v27 = vunpack.c.3.s8 %v1845_v39  ;;  %v3849_v54 = vcvt.s32.f32 %v2313_v6 }
 0x368   : > { %6433 = vmatpush.bf16.msra.mxu1 %v5744_v47  ;;  %v5852_v11 = vpack.c.bf16 %v5012_v5, %v5000_v63  ;;  %v3861_v38 = vcvt.s32.f32 %v2325_v15  ;;  %v3033_v48 = vunpack.c.2.s8 %v9729_v62  ;;  %v3045_v60 = vunpack.c.3.s8 %v9729_v62  ;;  %v6242_v47 = vpop.f32.mrf.mxu2 }
 0x369   : > { %v5169_v42 = vpack.c.bf16 %v3645_v34, %v3633_v17  ;;  %v4185_v14 = vcvt.s32.f32 %v2649_v40  ;;  %v4197_v23 = vcvt.s32.f32 %v2661_v27  ;;  %v3440_v55 = vunpack.c.0.s8 %v9720_v29  ;;  %v1929_v34 = vld [vmem:[%s8946_s11 + $0x6e8] sm:$0xff] }
 0x36a   : > { %6445 = vmatpush.bf16.msra.mxu2 %v5852_v11  ;;  %v5277_v18 = vpack.c.bf16 %v3861_v38, %v3849_v54  ;;  %v4569_v25 = vcvt.s32.f32 %v3033_v48  ;;  %v3452_v0 = vunpack.c.1.s8 %v9720_v29  ;;  %v4581_v44 = vcvt.s32.f32 %v3045_v60 }
 0x36b   : > { %6459 = vmatpush.bf16.msra.mxu3 %v5169_v42  ;;  %v5445_v13 = vpack.c.bf16 %v4197_v23, %v4185_v14  ;;  %6434 = vmatmul.bf16.vlgmr.msra.gmra.mxu1 %v9377_v16  ;;  %v2289_v59 = vunpack.c.0.s8 %v1761_v35  ;;  %v2301_v49 = vunpack.c.1.s8 %v1761_v35  ;;  %v4976_v31 = vcvt.s32.f32 %v3440_v55  ;;  %v6255_v35 = vpop.f32.mrf.mxu3 }
 0x36c   : > { %6471 = vmatpush.bf16.msrb.mxu0 %v5277_v18  ;;  %v4988_v46 = vcvt.s32.f32 %v3452_v0  ;;  %v2625_v61 = vunpack.c.0.s8 %v1845_v39  ;;  %v2637_v30 = vunpack.c.1.s8 %v1845_v39  ;;  %v5637_v1 = vpack.c.bf16 %v4581_v44, %v4569_v25 }
 0x36d   : > { %6478 = vmatpush.bf16.msrb.mxu1 %v5445_v13  ;;  %v3825_v26 = vcvt.s32.f32 %v2289_v59  ;;  %v3837_v21 = vcvt.s32.f32 %v2301_v49  ;;  %v2841_v29 = vunpack.c.2.s8 %v1893_v8  ;;  %v2853_v58 = vunpack.c.3.s8 %v1893_v8  ;;  %v1881_v13 = vld [vmem:[%s8946_s11 + $0x568] sm:$0xff] }
 0x36e   : > { %v5840_v10 = vpack.c.bf16 %v4988_v46, %v4976_v31  ;;  %6460 = vmatmul.bf16.vlgmr.msra.gmra.mxu3 %v9159_v2  ;;  %v4161_v28 = vcvt.s32.f32 %v2625_v61  ;;  %v4173_v37 = vcvt.s32.f32 %v2637_v30  ;;  %v3009_v32 = vunpack.c.0.s8 %v9729_v62 }
 0x36f   : > { %6504 = vmatpush.bf16.msrb.mxu3 %v5637_v1  ;;  %v5265_v57 = vpack.c.bf16 %v3837_v21, %v3825_v26  ;;  %v4377_v33 = vcvt.s32.f32 %v2841_v29  ;;  %v3021_v39 = vunpack.c.1.s8 %v9729_v62  ;;  %v4389_v63 = vcvt.s32.f32 %v2853_v58  ;;  %v1977_v1 = vld [vmem:[%s8946_s11 + $0x868] sm:$0xff] }
 0x370   : > { %6446 = vmatpush.bf16.msra.mxu2 %v5840_v10  ;;  %v5433_v22 = vpack.c.bf16 %v4173_v37, %v4161_v28  ;;  %v3225_v3 = vunpack.c.2.s8 %v1989_v36  ;;  %v3237_v52 = vunpack.c.3.s8 %v1989_v36  ;;  %v4545_v5 = vcvt.s32.f32 %v3009_v32  ;;  %v1821_v10 = vld [vmem:[%s8946_s11 + $0x388] sm:$0xff] }
 0x371   : > { %6472 = vmatpush.bf16.msrb.mxu0 %v5265_v57  ;;  %v4557_v6 = vcvt.s32.f32 %v3021_v39  ;;  %v2601_v15 = vunpack.c.2.s8 %v1833_v43  ;;  %v2613_v17 = vunpack.c.3.s8 %v1833_v43  ;;  %v5541_v40 = vpack.c.bf16 %v4389_v63, %v4377_v33 }
 0x372   : > { %6479 = vmatpush.bf16.msrb.mxu1 %v5433_v22  ;;  %v4761_v27 = vcvt.s32.f32 %v3225_v3  ;;  %v4773_v11 = vcvt.s32.f32 %v3237_v52  ;;  %v2817_v54 = vunpack.c.0.s8 %v1893_v8  ;;  %v2829_v4 = vunpack.c.1.s8 %v1893_v8 }
 0x373   : > { %v5625_v38 = vpack.c.bf16 %v4557_v6, %v4545_v5  ;;  %6447 = vmatmul.bf16.vlgmr.msra.gmra.mxu2 %v9385_v41  ;;  %v4137_v62 = vcvt.s32.f32 %v2601_v15  ;;  %v4149_v48 = vcvt.s32.f32 %v2613_v17  ;;  %v2985_v23 = vunpack.c.2.s8 %v1929_v34 }
 0x374   : > { %6491 = vmatpush.bf16.msrb.mxu2 %v5541_v40  ;;  %v5733_v42 = vpack.c.bf16 %v4773_v11, %v4761_v27  ;;  %6473 = vmatmul.bf16.vlgmr.msrb.gmra.mxu0 %v9180_v24  ;;  %v4353_v14 = vcvt.s32.f32 %v2817_v54  ;;  %v2997_v60 = vunpack.c.3.s8 %v1929_v34  ;;  %v4365_v25 = vcvt.s32.f32 %v2829_v4  ;;  %v1869_v4 = vld [vmem:[%s8946_s11 + $0x508] sm:$0xff] }
 0x375   : > { %6505 = vmatpush.bf16.msrb.mxu3 %v5625_v38  ;;  %v5421_v18 = vpack.c.bf16 %v4149_v48, %v4137_v62  ;;  %v3201_v55 = vunpack.c.0.s8 %v1989_v36  ;;  %v3213_v0 = vunpack.c.1.s8 %v1989_v36  ;;  %v4521_v44 = vcvt.s32.f32 %v2985_v23 }
 0x376   : > { %6517 = vmatpush.bf16.msra.mxu0 %v5733_v42  ;;  %v4533_v59 = vcvt.s32.f32 %v2997_v60  ;;  %v6215_v8 = vadd.f32 %v9676_v19, %v9716_v9  ;;  %v2577_v49 = vunpack.c.0.s8 %v1833_v43  ;;  %v5529_v31 = vpack.c.bf16 %v4365_v25, %v4353_v14 }
 0x377   : > { %6480 = vmatpush.bf16.msrb.mxu1 %v5421_v18  ;;  %v4737_v46 = vcvt.s32.f32 %v3201_v55  ;;  %v4749_v61 = vcvt.s32.f32 %v3213_v0  ;;  %v2589_v30 = vunpack.c.1.s8 %v1833_v43  ;;  %v2793_v36 = vunpack.c.2.s8 %v1881_v13 }
 0x378   : > { %v5613_v26 = vpack.c.bf16 %v4533_v59, %v4521_v44  ;;  %v6228_v21 = vadd.f32 %v9713_v53, %v6215_v8  ;;  %v4113_v29 = vcvt.s32.f32 %v2577_v49  ;;  %6492 = vmatpush.bf16.msrb.mxu2 %v5529_v31  ;;  %v2805_v58 = vunpack.c.3.s8 %v1881_v13  ;;  %v1917_v53 = vld [vmem:[%s8946_s11 + $0x688] sm:$0xff] }
 0x379   : > { %v5721_v28 = vpack.c.bf16 %v4749_v61, %v4737_v46  ;;  %v4125_v37 = vcvt.s32.f32 %v2589_v30  ;;  %v2961_v35 = vunpack.c.0.s8 %v1929_v34  ;;  %v4329_v19 = vcvt.s32.f32 %v2793_v36  ;;  %v9763_v61 = vld [vmem:[%s8952_s5] sm:$0xff] }
 0x37a   : > { %6506 = vmatpush.bf16.msrb.mxu3 %v5613_v26  ;;  %v2973_v9 = vunpack.c.1.s8 %v1929_v34  ;;  %v3177_v57 = vunpack.c.2.s8 %v1977_v1  ;;  %v3189_v33 = vunpack.c.3.s8 %v1977_v1  ;;  %v4341_v32 = vcvt.s32.f32 %v2805_v58  ;;  %v1809_v36 = vld [vmem:[%s8946_s11 + $0x328] sm:$0xff] }
 0x37b   : > { %6518 = vmatpush.bf16.msra.mxu0 %v5721_v28  ;;  %v5409_v43 = vpack.c.bf16 %v4125_v37, %v4113_v29  ;;  %v4497_v39 = vcvt.s32.f32 %v2961_v35  ;;  %v2553_v22 = vunpack.c.2.s8 %v1821_v10  ;;  %v2565_v47 = vunpack.c.3.s8 %v1821_v10  ;;  %v9769_v28 = vld [vmem:[%s8954_s22] sm:$0xff] }
 0x37c   : > { %v4509_v63 = vcvt.s32.f32 %v2973_v9  ;;  %v4713_v3 = vcvt.s32.f32 %v3177_v57  ;;  %v4725_v52 = vcvt.s32.f32 %v3189_v33  ;;  %v5517_v5 = vpack.c.bf16 %v4341_v32, %v4329_v19 }
 0x37d   : > { %6481 = vmatpush.bf16.msrb.mxu1 %v5409_v43  ;;  %v4089_v6 = vcvt.s32.f32 %v2553_v22  ;;  %v2769_v15 = vunpack.c.0.s8 %v1881_v13  ;;  %v2781_v17 = vunpack.c.1.s8 %v1881_v13  ;;  %v4101_v27 = vcvt.s32.f32 %v2565_v47  ;;  %v1905_v22 = vld [vmem:[%s8946_s11 + $0x628] sm:$0xff] }
 0x37e   : > { %v5601_v40 = vpack.c.bf16 %v4509_v63, %v4497_v39  ;;  %v5709_v34 = vpack.c.bf16 %v4725_v52, %v4713_v3  ;;  %v2937_v11 = vunpack.c.2.s8 %v1917_v53  ;;  %6493 = vmatpush.bf16.msrb.mxu2 %v5517_v5  ;;  %v2949_v62 = vunpack.c.3.s8 %v1917_v53 }
 0x37f   : > { %v4305_v54 = vcvt.s32.f32 %v2769_v15  ;;  %v4317_v38 = vcvt.s32.f32 %v2781_v17  ;;  %v3153_v48 = vunpack.c.0.s8 %v1977_v1  ;;  %v5397_v42 = vpack.c.bf16 %v4101_v27, %v4089_v6 }
 0x380   : > { %6507 = vmatpush.bf16.msrb.mxu3 %v5601_v40  ;;  %6519 = vmatpush.bf16.msra.mxu0 %v5709_v34  ;;  %v4473_v14 = vcvt.s32.f32 %v2937_v11  ;;  %v3165_v23 = vunpack.c.1.s8 %v1977_v1  ;;  %v9759_v60 = vadd.f32 %v9722_v45, %v9731_v56  ;;  %v4485_v25 = vcvt.s32.f32 %v2949_v62  ;;  %v1965_v56 = vld [vmem:[%s8946_s11 + $0x808] sm:$0xff] }
 0x381   : > { %v5505_v18 = vpack.c.bf16 %v4317_v38, %v4305_v54  ;;  %v4689_v55 = vcvt.s32.f32 %v3153_v48  ;;  %v2529_v0 = vunpack.c.0.s8 %v1821_v10  ;;  %6482 = vmatpush.bf16.msrb.mxu1 %v5397_v42  ;;  %v2541_v44 = vunpack.c.1.s8 %v1821_v10  ;;  %v9776_v62 = vld [vmem:[%s8946_s11 + $0x4a8] sm:$0xff]  ;;  %v9778_v48 = vpop.f32.mrf.mxu0 }
 0x382   : > { %v4701_v13 = vcvt.s32.f32 %v3165_v23  ;;  %v2745_v59 = vunpack.c.2.s8 %v1869_v4  ;;  %v2757_v8 = vunpack.c.3.s8 %v1869_v4  ;;  %v5589_v49 = vpack.c.bf16 %v4485_v25, %v4473_v14 }
 0x383   : > { %6494 = vmatpush.bf16.msrb.mxu2 %v5505_v18  ;;  %v4065_v31 = vcvt.s32.f32 %v2529_v0  ;;  %v6241_v46 = vadd.f32 %v9734_v7, %v6228_v21  ;;  %v7186_v45 = vperm.slane %v9763_v61, 2  ;;  %v4077_v1 = vcvt.s32.f32 %v2541_v44  ;;  %v9772_v7 = vpop.f32.mrf.mxu1 }
 0x384   : > { %v5697_v30 = vpack.c.bf16 %v4701_v13, %v4689_v55  ;;  %v4281_v26 = vcvt.s32.f32 %v2745_v59  ;;  %v4293_v29 = vcvt.s32.f32 %v2757_v8  ;;  %6508 = vmatpush.bf16.msrb.mxu3 %v5589_v49  ;;  %v7226_v37 = vperm.slane %v9769_v28, 2  ;;  %v1953_v13 = vld [vmem:[%s8946_s11 + $0x7a8] sm:$0xff] }
 0x385   : > { %v7210_v10 = vmul.f32 %v7186_v45, %v6241_v46  ;;  %v2913_v58 = vunpack.c.0.s8 %v1917_v53  ;;  %v2925_v35 = vunpack.c.1.s8 %v1917_v53  ;;  %v5385_v21 = vpack.c.bf16 %v4077_v1, %v4065_v31  ;;  %v9784_v46 = vld [vmem:[%s8946_s11 + $0xa48] sm:$0xff] }
 0x386   : > { %6520 = vmatpush.bf16.msra.mxu0 %v5697_v30  ;;  %v5493_v19 = vpack.c.bf16 %v4293_v29, %v4281_v26  ;;  %v3129_v9 = vunpack.c.2.s8 %v1965_v56  ;;  %v3141_v57 = vunpack.c.3.s8 %v1965_v56  ;;  %v2505_v39 = vunpack.c.2.s8 %v1809_v36  ;;  %v9787_v29 = vld [vmem:[%s8946_s11 + $0x150] sm:$0xff] }
 0x387   : > { %v7250_v33 = vadd.f32 %v7226_v37, %v7210_v10  ;;  %v4449_v43 = vcvt.s32.f32 %v2913_v58  ;;  %v4461_v32 = vcvt.s32.f32 %v2925_v35  ;;  %6483 = vmatpush.bf16.msrb.mxu1 %v5385_v21  ;;  %v2517_v52 = vunpack.c.3.s8 %v1809_v36 }
 0x388   : > { %6495 = vmatpush.bf16.msrb.mxu2 %v5493_v19  ;;  %v4665_v63 = vcvt.s32.f32 %v3129_v9  ;;  %v4677_v3 = vcvt.s32.f32 %v3141_v57  ;;  %v2721_v47 = vunpack.c.0.s8 %v1869_v4  ;;  %v4041_v5 = vcvt.s32.f32 %v2505_v39 }
 0x389   : > { %8318 = vtanh.f32 %v7250_v33  ;;  %v5577_v53 = vpack.c.bf16 %v4461_v32, %v4449_v43  ;;  %v2733_v6 = vunpack.c.1.s8 %v1869_v4  ;;  %v4053_v17 = vcvt.s32.f32 %v2517_v52 }
 0x38a   : > { %v5685_v15 = vpack.c.bf16 %v4677_v3, %v4665_v63  ;;  %v4257_v40 = vcvt.s32.f32 %v2721_v47  ;;  %v2889_v34 = vunpack.c.2.s8 %v1905_v22  ;;  %v2901_v11 = vunpack.c.3.s8 %v1905_v22 }
 0x38b   : > { %6509 = vmatpush.bf16.msrb.mxu3 %v5577_v53  ;;  %v4269_v27 = vcvt.s32.f32 %v2733_v6  ;;  %v3105_v54 = vunpack.c.0.s8 %v1965_v56  ;;  %v3117_v38 = vunpack.c.1.s8 %v1965_v56  ;;  %v5373_v42 = vpack.c.bf16 %v4053_v17, %v4041_v5  ;;  %v6281_v44 = vpop.f32.mrf.mxu1  ;;  %v6320_v53 = vpop.f32.mrf.mxu0 }
 0x38c   : > { %6521 = vmatpush.bf16.msra.mxu0 %v5685_v15  ;;  %v4425_v14 = vcvt.s32.f32 %v2889_v34  ;;  %v2481_v23 = vunpack.c.0.s8 %v1809_v36  ;;  %v2493_v4 = vunpack.c.1.s8 %v1809_v36  ;;  %v4437_v25 = vcvt.s32.f32 %v2901_v11  ;;  %v9789_v36 = vpop.f32.mrf.mxu3 }
 0x38d   : > { %v5481_v18 = vpack.c.bf16 %v4269_v27, %v4257_v40  ;;  %v4641_v55 = vcvt.s32.f32 %v3105_v54  ;;  %v4653_v0 = vcvt.s32.f32 %v3117_v38  ;;  %6484 = vmatpush.bf16.msrb.mxu1 %v5373_v42  ;;  %v2697_v49 = vunpack.c.2.s8 %v9776_v62  ;;  %v2085_v54 = vld [vmem:[%s8946_s11 + $0xbc8] sm:$0xff] }
 0x38e   : > { %v4017_v59 = vcvt.s32.f32 %v2481_v23  ;;  %v4029_v8 = vcvt.s32.f32 %v2493_v4  ;;  %v2709_v31 = vunpack.c.3.s8 %v9776_v62  ;;  %v5565_v56 = vpack.c.bf16 %v4437_v25, %v4425_v14 }
 0x38f   : > { %v8319_v45 = vpop.eup %8318  ;;  %6496 = vmatpush.bf16.msrb.mxu2 %v5481_v18  ;;  %v5673_v30 = vpack.c.bf16 %v4653_v0, %v4641_v55  ;;  %v2865_v1 = vunpack.c.0.s8 %v1905_v22  ;;  %v2877_v26 = vunpack.c.1.s8 %v1905_v22  ;;  %v4233_v37 = vcvt.s32.f32 %v2697_v49  ;;  %v9795_v22 = vpop.f32.mrf.mxu2  ;;  %v1798_v55 = vld [vmem:[%s8946_s11 + $0x2d0] sm:$0xff]  ;;  %v2025_v49 = vld [vmem:[%s8946_s11 + $0x9e8] sm:$0xff] }
 0x390   : > { %7274 = vst [vmem:[%s9629_s3 + $0x10] sm:$0xff] %v8319_v45  ;;  %v5361_v10 = vpack.c.bf16 %v4029_v8, %v4017_v59  ;;  %v4245_v58 = vcvt.s32.f32 %v2709_v31  ;;  %v3081_v35 = vunpack.c.2.s8 %v1953_v13  ;;  %6510 = vmatpush.bf16.msrb.mxu3 %v5565_v56  ;;  %v3093_v9 = vunpack.c.3.s8 %v1953_v13 }
 0x391   : > { %6522 = vmatpush.bf16.msra.mxu0 %v5673_v30  ;;  %v4401_v21 = vcvt.s32.f32 %v2865_v1  ;;  %v4413_v19 = vcvt.s32.f32 %v2877_v26  ;;  %v3417_v57 = vunpack.c.2.s8 %v9784_v46  ;;  %v3429_v32 = vunpack.c.3.s8 %v9784_v46 }
 0x392   : > { %6485 = vmatpush.bf16.msrb.mxu1 %v5361_v10  ;;  %v5469_v33 = vpack.c.bf16 %v4245_v58, %v4233_v37  ;;  %v4617_v43 = vcvt.s32.f32 %v3081_v35  ;;  %v2266_v39 = vunpack.c.2.s8 %v9787_v29  ;;  %v4629_v3 = vcvt.s32.f32 %v3093_v9  ;;  %v1738_v9 = vld [vmem:[%s8946_s11 + $0xf0] sm:$0xff] }
 0x393   : > { %v5553_v63 = vpack.c.bf16 %v4413_v19, %v4401_v21  ;;  %v4953_v52 = vcvt.s32.f32 %v3417_v57  ;;  %v2278_v47 = vunpack.c.3.s8 %v9787_v29  ;;  %v4965_v5 = vcvt.s32.f32 %v3429_v32 }
 0x394   : > { %6497 = vmatpush.bf16.msrb.mxu2 %v5469_v33  ;;  %v3802_v6 = vcvt.s32.f32 %v2266_v39  ;;  %v2673_v15 = vunpack.c.0.s8 %v9776_v62  ;;  %v2685_v17 = vunpack.c.1.s8 %v9776_v62  ;;  %v5661_v40 = vpack.c.bf16 %v4629_v3, %v4617_v43  ;;  %v6307_v0 = vpop.f32.mrf.mxu3 }
 0x395   : > { %6511 = vmatpush.bf16.msrb.mxu3 %v5553_v63  ;;  %v3814_v34 = vcvt.s32.f32 %v2278_v47  ;;  %6486 = vmatmul.bf16.vlgmr.msrb.gmra.mxu1 %v9254_v50  ;;  %v3057_v27 = vunpack.c.0.s8 %v1953_v13  ;;  %v3069_v11 = vunpack.c.1.s8 %v1953_v13  ;;  %v5829_v38 = vpack.c.bf16 %v4965_v5, %v4953_v52 }
 0x396   : > { %v4209_v42 = vcvt.s32.f32 %v2673_v15  ;;  %v4221_v14 = vcvt.s32.f32 %v2685_v17  ;;  %v3393_v23 = vunpack.c.0.s8 %v9784_v46  ;;  %6523 = vmatpush.bf16.msra.mxu0 %v5661_v40  ;;  %v3405_v62 = vunpack.c.1.s8 %v9784_v46 }
 0x397   : > { %v5254_v4 = vpack.c.bf16 %v3814_v34, %v3802_v6  ;;  %v4593_v18 = vcvt.s32.f32 %v3057_v27  ;;  %v4605_v25 = vcvt.s32.f32 %v3069_v11  ;;  %6530 = vmatpush.bf16.msra.mxu1 %v5829_v38  ;;  %v3609_v59 = vunpack.c.2.s8 %v2085_v54  ;;  %v6294_v37 = vpop.f32.mrf.mxu2  ;;  %v2073_v34 = vld [vmem:[%s8946_s11 + $0xb68] sm:$0xff] }
 0x398   : > { %v5457_v44 = vpack.c.bf16 %v4221_v14, %v4209_v42  ;;  %6512 = vmatmul.bf16.vlgmr.msrb.gmra.mxu3 %v9335_v51  ;;  %v4929_v13 = vcvt.s32.f32 %v3393_v23  ;;  %v3621_v8 = vunpack.c.3.s8 %v2085_v54  ;;  %v4941_v45 = vcvt.s32.f32 %v3405_v62 }
 0x399   : > { %6556 = vmatpush.bf16.msra.mxu3 %v5254_v4  ;;  %v5649_v31 = vpack.c.bf16 %v4605_v25, %v4593_v18  ;;  %v2242_v56 = vunpack.c.0.s8 %v9787_v29  ;;  %v2254_v30 = vunpack.c.1.s8 %v9787_v29  ;;  %v5145_v46 = vcvt.s32.f32 %v3609_v59  ;;  %v1786_v18 = vld [vmem:[%s8946_s11 + $0x270] sm:$0xff] }
 0x39a   : > { %6498 = vmatpush.bf16.msrb.mxu2 %v5457_v44  ;;  %v5157_v1 = vcvt.s32.f32 %v3621_v8  ;;  %v2458_v26 = vunpack.c.2.s8 %v1798_v55  ;;  %v2470_v10 = vunpack.c.3.s8 %v1798_v55  ;;  %v5817_v58 = vpack.c.bf16 %v4941_v45, %v4929_v13  ;;  %v2013_v44 = vld [vmem:[%s8946_s11 + $0x988] sm:$0xff] }
 0x39b   : > { %6524 = vmatpush.bf16.msra.mxu0 %v5649_v31  ;;  %v3778_v35 = vcvt.s32.f32 %v2242_v56  ;;  %v3790_v21 = vcvt.s32.f32 %v2254_v30  ;;  %v3369_v19 = vunpack.c.2.s8 %v2025_v49  ;;  %v3381_v32 = vunpack.c.3.s8 %v2025_v49 }
 0x39c   : > { %v5925_v57 = vpack.c.bf16 %v5157_v1, %v5145_v46  ;;  %v3994_v33 = vcvt.s32.f32 %v2458_v26  ;;  %v4006_v43 = vcvt.s32.f32 %v2470_v10  ;;  %6531 = vmatpush.bf16.msra.mxu1 %v5817_v58  ;;  %v3585_v63 = vunpack.c.0.s8 %v2085_v54 }
 0x39d   : > { %v5242_v39 = vpack.c.bf16 %v3790_v21, %v3778_v35  ;;  %6499 = vmatmul.bf16.vlgmr.msrb.gmra.mxu2 %v9279_v12  ;;  %v4905_v29 = vcvt.s32.f32 %v3369_v19  ;;  %v3597_v3 = vunpack.c.1.s8 %v2085_v54  ;;  %v4917_v47 = vcvt.s32.f32 %v3381_v32 }
 0x39e   : > { %6543 = vmatpush.bf16.msra.mxu2 %v5925_v57  ;;  %v5350_v52 = vpack.c.bf16 %v4006_v43, %v3994_v33  ;;  %6525 = vmatmul.bf16.vlgmr.msra.gmra.mxu0 %v9348_v20  ;;  %v2218_v53 = vunpack.c.2.s8 %v1738_v9  ;;  %v2230_v5 = vunpack.c.3.s8 %v1738_v9  ;;  %v5121_v6 = vcvt.s32.f32 %v3585_v63 }
 0x39f   : > { %6557 = vmatpush.bf16.msra.mxu3 %v5242_v39  ;;  %v5133_v15 = vcvt.s32.f32 %v3597_v3  ;;  %v2434_v17 = vunpack.c.0.s8 %v1798_v55  ;;  %v2446_v40 = vunpack.c.1.s8 %v1798_v55  ;;  %v5805_v27 = vpack.c.bf16 %v4917_v47, %v4905_v29  ;;  %v2061_v47 = vld [vmem:[%s8946_s11 + $0xb08] sm:$0xff] }
 0x3a0   : > { %6569 = vmatpush.bf16.msrb.mxu0 %v5350_v52  ;;  %v3754_v11 = vcvt.s32.f32 %v2218_v53  ;;  %v3766_v38 = vcvt.s32.f32 %v2230_v5  ;;  %v9815_v54 = vadd.f32 %v9772_v7, %v9759_v60  ;;  %v3345_v4 = vunpack.c.0.s8 %v2025_v49 }
 0x3a1   : > { %v5913_v42 = vpack.c.bf16 %v5133_v15, %v5121_v6  ;;  %v3970_v14 = vcvt.s32.f32 %v2434_v17  ;;  %v3982_v23 = vcvt.s32.f32 %v2446_v40  ;;  %6532 = vmatpush.bf16.msra.mxu1 %v5805_v27  ;;  %v3357_v62 = vunpack.c.1.s8 %v2025_v49  ;;  %v1726_v49 = vld [vmem:[%s8946_s11 + $0x90] sm:$0xff] }
 0x3a2   : > { %v5230_v25 = vpack.c.bf16 %v3766_v38, %v3754_v11  ;;  %v3561_v0 = vunpack.c.2.s8 %v2073_v34  ;;  %v3573_v55 = vunpack.c.3.s8 %v2073_v34  ;;  %v4881_v59 = vcvt.s32.f32 %v3345_v4 }
 0x3a3   : > { %6544 = vmatpush.bf16.msra.mxu2 %v5913_v42  ;;  %v5338_v13 = vpack.c.bf16 %v3982_v23, %v3970_v14  ;;  %v2194_v8 = vunpack.c.0.s8 %v1738_v9  ;;  %v2206_v31 = vunpack.c.1.s8 %v1738_v9  ;;  %v4893_v60 = vcvt.s32.f32 %v3357_v62  ;;  %v1774_v23 = vld [vmem:[%s8946_s11 + $0x210] sm:$0xff] }
 0x3a4   : > { %6558 = vmatpush.bf16.msra.mxu3 %v5230_v25  ;;  %v5097_v7 = vcvt.s32.f32 %v3561_v0  ;;  %v5109_v45 = vcvt.s32.f32 %v3573_v55  ;;  %v2410_v56 = vunpack.c.2.s8 %v1786_v18  ;;  %v2422_v1 = vunpack.c.3.s8 %v1786_v18  ;;  %v2001_v0 = vld [vmem:[%s8946_s11 + $0x928] sm:$0xff] }
 0x3a5   : > { %6570 = vmatpush.bf16.msrb.mxu0 %v5338_v13  ;;  %v3730_v30 = vcvt.s32.f32 %v2194_v8  ;;  %v3742_v46 = vcvt.s32.f32 %v2206_v31  ;;  %v3321_v26 = vunpack.c.2.s8 %v2013_v44  ;;  %v5793_v10 = vpack.c.bf16 %v4893_v60, %v4881_v59  ;;  %v9825_v8 = vpop.f32.mrf.mxu1 }
 0x3a6   : > { %v5901_v37 = vpack.c.bf16 %v5109_v45, %v5097_v7  ;;  %v3946_v58 = vcvt.s32.f32 %v2410_v56  ;;  %v3333_v35 = vunpack.c.3.s8 %v2013_v44  ;;  %v3958_v19 = vcvt.s32.f32 %v2422_v1  ;;  %v1714_v56 = vld [vmem:[%s8946_s11 + $0x30] sm:$0xff] }
 0x3a7   : > { %v5218_v21 = vpack.c.bf16 %v3742_v46, %v3730_v30  ;;  %v4857_v57 = vcvt.s32.f32 %v3321_v26  ;;  %v3537_v9 = vunpack.c.0.s8 %v2073_v34  ;;  %6533 = vmatpush.bf16.msra.mxu1 %v5793_v10  ;;  %v3549_v43 = vunpack.c.1.s8 %v2073_v34 }
 0x3a8   : > { %6545 = vmatpush.bf16.msra.mxu2 %v5901_v37  ;;  %v4869_v33 = vcvt.s32.f32 %v3333_v35  ;;  %v2170_v32 = vunpack.c.2.s8 %v1726_v49  ;;  %v2182_v39 = vunpack.c.3.s8 %v1726_v49  ;;  %v5326_v29 = vpack.c.bf16 %v3958_v19, %v3946_v58 }
 0x3a9   : > { %6559 = vmatpush.bf16.msra.mxu3 %v5218_v21  ;;  %v5073_v63 = vcvt.s32.f32 %v3537_v9  ;;  %v2386_v3 = vunpack.c.0.s8 %v1786_v18  ;;  %v2398_v52 = vunpack.c.1.s8 %v1786_v18  ;;  %v5085_v5 = vcvt.s32.f32 %v3549_v43  ;;  %v9834_v43 = vpop.f32.mrf.mxu0 }
 0x3aa   : > { %v5781_v53 = vpack.c.bf16 %v4869_v33, %v4857_v57  ;;  %v3706_v6 = vcvt.s32.f32 %v2170_v32  ;;  %v3718_v15 = vcvt.s32.f32 %v2182_v39  ;;  %6571 = vmatpush.bf16.msrb.mxu0 %v5326_v29  ;;  %v3297_v27 = vunpack.c.0.s8 %v2013_v44  ;;  %v9832_v33 = vld [vmem:[%s8946_s11 + $0xaa8] sm:$0xff] }
 0x3ab   : > { %v3922_v17 = vcvt.s32.f32 %v2386_v3  ;;  %v3934_v40 = vcvt.s32.f32 %v2398_v52  ;;  %v3309_v11 = vunpack.c.1.s8 %v2013_v44  ;;  %v5889_v34 = vpack.c.bf16 %v5085_v5, %v5073_v63 }
 0x3ac   : > { %6534 = vmatpush.bf16.msra.mxu1 %v5781_v53  ;;  %v5206_v38 = vpack.c.bf16 %v3718_v15, %v3706_v6  ;;  %v3513_v42 = vunpack.c.2.s8 %v2061_v47  ;;  %v3525_v14 = vunpack.c.3.s8 %v2061_v47  ;;  %v4833_v18 = vcvt.s32.f32 %v3297_v27 }
 0x3ad   : > { %v5314_v4 = vpack.c.bf16 %v3934_v40, %v3922_v17  ;;  %v4845_v25 = vcvt.s32.f32 %v3309_v11  ;;  %v6293_v62 = vadd.f32 %v9795_v22, %v9815_v54  ;;  %6546 = vmatpush.bf16.msra.mxu2 %v5889_v34  ;;  %v2146_v59 = vunpack.c.0.s8 %v1726_v49  ;;  %v1762_v40 = vld [vmem:[%s8946_s11 + $0x1b0] sm:$0xff]  ;;  %v6333_v27 = vpop.f32.mrf.mxu1 }
 0x3ae   : > { %6560 = vmatpush.bf16.msra.mxu3 %v5206_v38  ;;  %v5049_v55 = vcvt.s32.f32 %v3513_v42  ;;  %v5061_v13 = vcvt.s32.f32 %v3525_v14  ;;  %v2158_v44 = vunpack.c.1.s8 %v1726_v49  ;;  %v2362_v7 = vunpack.c.2.s8 %v1774_v23  ;;  %v1846_v14 = vld [vmem:[%s8946_s11 + $0x450] sm:$0xff] }
 0x3af   : > { %6572 = vmatpush.bf16.msrb.mxu0 %v5314_v4  ;;  %v5769_v31 = vpack.c.bf16 %v4845_v25, %v4833_v18  ;;  %v9828_v60 = vadd.f32 %v9789_v36, %v6293_v62  ;;  %v2374_v45 = vunpack.c.3.s8 %v1774_v23  ;;  %v3682_v46 = vcvt.s32.f32 %v2146_v59  ;;  %v9841_v62 = vld [vmem:[%s8946_s11 + $0x750] sm:$0xff] }
 0x3b0   : > { %v5877_v30 = vpack.c.bf16 %v5061_v13, %v5049_v55  ;;  %v3694_v22 = vcvt.s32.f32 %v2158_v44  ;;  %v3273_v54 = vunpack.c.2.s8 %v2001_v0  ;;  %v3898_v1 = vcvt.s32.f32 %v2362_v7  ;;  %v9843_v44 = vpop.f32.mrf.mxu3 }
 0x3b1   : > { %6535 = vmatpush.bf16.msra.mxu1 %v5769_v31  ;;  %v3910_v26 = vcvt.s32.f32 %v2374_v45  ;;  %v3285_v10 = vunpack.c.3.s8 %v2001_v0  ;;  %v3489_v49 = vunpack.c.0.s8 %v2061_v47  ;;  %v3501_v35 = vunpack.c.1.s8 %v2061_v47 }
 0x3b2   : > { %6547 = vmatpush.bf16.msra.mxu2 %v5877_v30  ;;  %v5194_v37 = vpack.c.bf16 %v3694_v22, %v3682_v46  ;;  %v4809_v58 = vcvt.s32.f32 %v3273_v54  ;;  %v2122_v21 = vunpack.c.2.s8 %v1714_v56  ;;  %v2134_v9 = vunpack.c.3.s8 %v1714_v56 }
 0x3b3   : > { %v5302_v36 = vpack.c.bf16 %v3910_v26, %v3898_v1  ;;  %v4821_v19 = vcvt.s32.f32 %v3285_v10  ;;  %v5025_v57 = vcvt.s32.f32 %v3489_v49  ;;  %v5037_v32 = vcvt.s32.f32 %v3501_v35  ;;  %v9846_v1 = vpop.f32.mrf.mxu2  ;;  %v6372_v26 = vpop.f32.mrf.mxu0 }
 0x3b4   : > { %6561 = vmatpush.bf16.msra.mxu3 %v5194_v37  ;;  %v3658_v39 = vcvt.s32.f32 %v2122_v21  ;;  %v2338_v29 = vunpack.c.0.s8 %v1774_v23  ;;  %v2350_v63 = vunpack.c.1.s8 %v1774_v23  ;;  %v3670_v52 = vcvt.s32.f32 %v2134_v9 }
 0x3b5   : > { %6573 = vmatpush.bf16.msrb.mxu0 %v5302_v36  ;;  %v5757_v3 = vpack.c.bf16 %v4821_v19, %v4809_v58  ;;  %v3249_v47 = vunpack.c.0.s8 %v2001_v0  ;;  %v3261_v53 = vunpack.c.1.s8 %v2001_v0  ;;  %v5865_v5 = vpack.c.bf16 %v5037_v32, %v5025_v57  ;;  %v1894_v57 = vld [vmem:[%s8946_s11 + $0x5d0] sm:$0xff] }
 0x3b6   : > { %v3874_v6 = vcvt.s32.f32 %v2338_v29  ;;  %v3886_v15 = vcvt.s32.f32 %v2350_v63  ;;  %v3465_v17 = vunpack.c.2.s8 %v9832_v33  ;;  %v5182_v11 = vpack.c.bf16 %v3670_v52, %v3658_v39 }
 0x3b7   : > { %6536 = vmatpush.bf16.msra.mxu1 %v5757_v3  ;;  %v4785_v34 = vcvt.s32.f32 %v3249_v47  ;;  %v4797_v38 = vcvt.s32.f32 %v3261_v53  ;;  %v3477_v42 = vunpack.c.3.s8 %v9832_v33  ;;  %6548 = vmatpush.bf16.msra.mxu2 %v5865_v5  ;;  %v2098_v18 = vunpack.c.0.s8 %v1714_v56 }
 0x3b8   : > { %v5290_v23 = vpack.c.bf16 %v3886_v15, %v3874_v6  ;;  %v5001_v4 = vcvt.s32.f32 %v3465_v17  ;;  %v2110_v25 = vunpack.c.1.s8 %v1714_v56  ;;  %6562 = vmatpush.bf16.msra.mxu3 %v5182_v11  ;;  %v2314_v13 = vunpack.c.2.s8 %v1762_v40  ;;  %v1990_v15 = vld [vmem:[%s8946_s11 + $0x8d0] sm:$0xff] }
 0x3b9   : > { %v5745_v0 = vpack.c.bf16 %v4797_v38, %v4785_v34  ;;  %v5013_v55 = vcvt.s32.f32 %v3477_v42  ;;  %v2326_v59 = vunpack.c.3.s8 %v1762_v40  ;;  %v3634_v31 = vcvt.s32.f32 %v2098_v18  ;;  %v1834_v38 = vld [vmem:[%s8946_s11 + $0x3f0] sm:$0xff] }
 0x3ba   : > { %6574 = vmatpush.bf16.msrb.mxu0 %v5290_v23  ;;  %v3646_v7 = vcvt.s32.f32 %v2110_v25  ;;  %v2650_v45 = vunpack.c.2.s8 %v1846_v14  ;;  %v2662_v30 = vunpack.c.3.s8 %v1846_v14  ;;  %v3850_v22 = vcvt.s32.f32 %v2314_v13 }
 0x3bb   : > { %6537 = vmatpush.bf16.msra.mxu1 %v5745_v0  ;;  %v5853_v46 = vpack.c.bf16 %v5013_v55, %v5001_v4  ;;  %v3862_v54 = vcvt.s32.f32 %v2326_v59  ;;  %v3034_v56 = vunpack.c.2.s8 %v9841_v62  ;;  %v3046_v58 = vunpack.c.3.s8 %v9841_v62  ;;  %v6346_v13 = vpop.f32.mrf.mxu2 }
 0x3bc   : > { %v5170_v10 = vpack.c.bf16 %v3646_v7, %v3634_v31  ;;  %v4186_v49 = vcvt.s32.f32 %v2650_v45  ;;  %v4198_v37 = vcvt.s32.f32 %v2662_v30  ;;  %v3441_v36 = vunpack.c.0.s8 %v9832_v33  ;;  %v1930_v30 = vld [vmem:[%s8946_s11 + $0x6f0] sm:$0xff] }
 0x3bd   : > { %6549 = vmatpush.bf16.msra.mxu2 %v5853_v46  ;;  %v5278_v35 = vpack.c.bf16 %v3862_v54, %v3850_v22  ;;  %v4570_v21 = vcvt.s32.f32 %v3034_v56  ;;  %v3453_v19 = vunpack.c.1.s8 %v9832_v33  ;;  %v4582_v32 = vcvt.s32.f32 %v3046_v58 }
 0x3be   : > { %6563 = vmatpush.bf16.msra.mxu3 %v5170_v10  ;;  %v5446_v9 = vpack.c.bf16 %v4198_v37, %v4186_v49  ;;  %6538 = vmatmul.bf16.vlgmr.msra.gmra.mxu1 %v9377_v16  ;;  %v2290_v39 = vunpack.c.0.s8 %v1762_v40  ;;  %v2302_v29 = vunpack.c.1.s8 %v1762_v40  ;;  %v4977_v63 = vcvt.s32.f32 %v3441_v36  ;;  %v6359_v40 = vpop.f32.mrf.mxu3 }
 0x3bf   : > { %6575 = vmatpush.bf16.msrb.mxu0 %v5278_v35  ;;  %v4989_v3 = vcvt.s32.f32 %v3453_v19  ;;  %v2626_v52 = vunpack.c.0.s8 %v1846_v14  ;;  %v2638_v47 = vunpack.c.1.s8 %v1846_v14  ;;  %v5638_v53 = vpack.c.bf16 %v4582_v32, %v4570_v21 }
 0x3c0   : > { %6582 = vmatpush.bf16.msrb.mxu1 %v5446_v9  ;;  %v3826_v5 = vcvt.s32.f32 %v2290_v39  ;;  %v3838_v6 = vcvt.s32.f32 %v2302_v29  ;;  %v2842_v33 = vunpack.c.2.s8 %v1894_v57  ;;  %v2854_v34 = vunpack.c.3.s8 %v1894_v57  ;;  %v1882_v39 = vld [vmem:[%s8946_s11 + $0x570] sm:$0xff] }
 0x3c1   : > { %v5841_v17 = vpack.c.bf16 %v4989_v3, %v4977_v63  ;;  %6564 = vmatmul.bf16.vlgmr.msra.gmra.mxu3 %v9159_v2  ;;  %v4162_v27 = vcvt.s32.f32 %v2626_v52  ;;  %v4174_v11 = vcvt.s32.f32 %v2638_v47  ;;  %v3010_v14 = vunpack.c.0.s8 %v9841_v62 }
 0x3c2   : > { %6608 = vmatpush.bf16.msrb.mxu3 %v5638_v53  ;;  %v5266_v42 = vpack.c.bf16 %v3838_v6, %v3826_v5  ;;  %v4378_v23 = vcvt.s32.f32 %v2842_v33  ;;  %v3022_v4 = vunpack.c.1.s8 %v9841_v62  ;;  %v4390_v25 = vcvt.s32.f32 %v2854_v34  ;;  %v1978_v6 = vld [vmem:[%s8946_s11 + $0x870] sm:$0xff] }
 0x3c3   : > { %6550 = vmatpush.bf16.msra.mxu2 %v5841_v17  ;;  %v5434_v18 = vpack.c.bf16 %v4174_v11, %v4162_v27  ;;  %v3226_v0 = vunpack.c.2.s8 %v1990_v15  ;;  %v3238_v55 = vunpack.c.3.s8 %v1990_v15  ;;  %v4546_v59 = vcvt.s32.f32 %v3010_v14  ;;  %v1822_v11 = vld [vmem:[%s8946_s11 + $0x390] sm:$0xff] }
 0x3c4   : > { %6576 = vmatpush.bf16.msrb.mxu0 %v5266_v42  ;;  %v4558_v31 = vcvt.s32.f32 %v3022_v4  ;;  %v2602_v7 = vunpack.c.2.s8 %v1834_v38  ;;  %v2614_v45 = vunpack.c.3.s8 %v1834_v38  ;;  %v5542_v46 = vpack.c.bf16 %v4390_v25, %v4378_v23 }
 0x3c5   : > { %6583 = vmatpush.bf16.msrb.mxu1 %v5434_v18  ;;  %v4762_v22 = vcvt.s32.f32 %v3226_v0  ;;  %v4774_v54 = vcvt.s32.f32 %v3238_v55  ;;  %v2818_v56 = vunpack.c.0.s8 %v1894_v57  ;;  %v2830_v49 = vunpack.c.1.s8 %v1894_v57 }
 0x3c6   : > { %v5626_v26 = vpack.c.bf16 %v4558_v31, %v4546_v59  ;;  %6551 = vmatmul.bf16.vlgmr.msra.gmra.mxu2 %v9385_v41  ;;  %v4138_v62 = vcvt.s32.f32 %v2602_v7  ;;  %v4150_v10 = vcvt.s32.f32 %v2614_v45  ;;  %v2986_v35 = vunpack.c.2.s8 %v1930_v30 }
 0x3c7   : > { %6595 = vmatpush.bf16.msrb.mxu2 %v5542_v46  ;;  %v5734_v37 = vpack.c.bf16 %v4774_v54, %v4762_v22  ;;  %6577 = vmatmul.bf16.vlgmr.msrb.gmra.mxu0 %v9180_v24  ;;  %v4354_v58 = vcvt.s32.f32 %v2818_v56  ;;  %v2998_v21 = vunpack.c.3.s8 %v1930_v30  ;;  %v4366_v19 = vcvt.s32.f32 %v2830_v49 }
 0x3c8   : > { %6609 = vmatpush.bf16.msrb.mxu3 %v5626_v26  ;;  %v5422_v36 = vpack.c.bf16 %v4150_v10, %v4138_v62  ;;  %v3202_v9 = vunpack.c.0.s8 %v1990_v15  ;;  %v3214_v32 = vunpack.c.1.s8 %v1990_v15  ;;  %v4522_v29 = vcvt.s32.f32 %v2986_v35 }
 0x3c9   : > { %6621 = vmatpush.bf16.msra.mxu0 %v5734_v37  ;;  %v4534_v63 = vcvt.s32.f32 %v2998_v21  ;;  %v6319_v57 = vadd.f32 %v9778_v48, %v9828_v60  ;;  %v2578_v3 = vunpack.c.0.s8 %v1834_v38  ;;  %v5530_v52 = vpack.c.bf16 %v4366_v19, %v4354_v58  ;;  %v1870_v58 = vld [vmem:[%s8946_s11 + $0x510] sm:$0xff] }
 0x3ca   : > { %6584 = vmatpush.bf16.msrb.mxu1 %v5422_v36  ;;  %v4738_v47 = vcvt.s32.f32 %v3202_v9  ;;  %v4750_v53 = vcvt.s32.f32 %v3214_v32  ;;  %v2590_v5 = vunpack.c.1.s8 %v1834_v38  ;;  %v2794_v15 = vunpack.c.2.s8 %v1882_v39 }
 0x3cb   : > { %v5614_v33 = vpack.c.bf16 %v4534_v63, %v4522_v29  ;;  %v6332_v17 = vadd.f32 %v9825_v8, %v6319_v57  ;;  %v4114_v27 = vcvt.s32.f32 %v2578_v3  ;;  %6596 = vmatpush.bf16.msrb.mxu2 %v5530_v52  ;;  %v2806_v42 = vunpack.c.3.s8 %v1882_v39  ;;  %v1918_v8 = vld [vmem:[%s8946_s11 + $0x690] sm:$0xff] }
 0x3cc   : > { %v5722_v34 = vpack.c.bf16 %v4750_v53, %v4738_v47  ;;  %v4126_v40 = vcvt.s32.f32 %v2590_v5  ;;  %v2962_v23 = vunpack.c.0.s8 %v1930_v30  ;;  %v4330_v48 = vcvt.s32.f32 %v2794_v15 }
 0x3cd   : > { %6610 = vmatpush.bf16.msrb.mxu3 %v5614_v33  ;;  %v2974_v60 = vunpack.c.1.s8 %v1930_v30  ;;  %v3178_v14 = vunpack.c.2.s8 %v1978_v6  ;;  %v3190_v4 = vunpack.c.3.s8 %v1978_v6  ;;  %v4342_v18 = vcvt.s32.f32 %v2806_v42  ;;  %v1966_v33 = vld [vmem:[%s8946_s11 + $0x810] sm:$0xff] }
 0x3ce   : > { %6622 = vmatpush.bf16.msra.mxu0 %v5722_v34  ;;  %v5410_v38 = vpack.c.bf16 %v4126_v40, %v4114_v27  ;;  %v4498_v25 = vcvt.s32.f32 %v2962_v23  ;;  %v2554_v0 = vunpack.c.2.s8 %v1822_v11  ;;  %v2566_v31 = vunpack.c.3.s8 %v1822_v11  ;;  %v1810_v34 = vld [vmem:[%s8946_s11 + $0x330] sm:$0xff] }
 0x3cf   : > { %v4510_v55 = vcvt.s32.f32 %v2974_v60  ;;  %v4714_v13 = vcvt.s32.f32 %v3178_v14  ;;  %v4726_v59 = vcvt.s32.f32 %v3190_v4  ;;  %v5518_v7 = vpack.c.bf16 %v4342_v18, %v4330_v48  ;;  %v9878_v48 = vpop.f32.mrf.mxu1 }
 0x3d0   : > { %6585 = vmatpush.bf16.msrb.mxu1 %v5410_v38  ;;  %v4090_v45 = vcvt.s32.f32 %v2554_v0  ;;  %v2770_v46 = vunpack.c.0.s8 %v1882_v39  ;;  %v2782_v22 = vunpack.c.1.s8 %v1882_v39  ;;  %v4102_v56 = vcvt.s32.f32 %v2566_v31 }
 0x3d1   : > { %v5602_v54 = vpack.c.bf16 %v4510_v55, %v4498_v25  ;;  %v5710_v30 = vpack.c.bf16 %v4726_v59, %v4714_v13  ;;  %v2938_v26 = vunpack.c.2.s8 %v1918_v8  ;;  %6597 = vmatpush.bf16.msrb.mxu2 %v5518_v7  ;;  %v2950_v49 = vunpack.c.3.s8 %v1918_v8  ;;  %v1906_v25 = vld [vmem:[%s8946_s11 + $0x630] sm:$0xff] }
 0x3d2   : > { %v4306_v62 = vcvt.s32.f32 %v2770_v46  ;;  %v4318_v10 = vcvt.s32.f32 %v2782_v22  ;;  %v3154_v37 = vunpack.c.0.s8 %v1978_v6  ;;  %v5398_v35 = vpack.c.bf16 %v4102_v56, %v4090_v45 }
 0x3d3   : > { %6611 = vmatpush.bf16.msrb.mxu3 %v5602_v54  ;;  %6623 = vmatpush.bf16.msra.mxu0 %v5710_v30  ;;  %v4474_v21 = vcvt.s32.f32 %v2938_v26  ;;  %v3166_v36 = vunpack.c.1.s8 %v1978_v6  ;;  %v9871_v19 = vadd.f32 %v9834_v43, %v9843_v44  ;;  %v4486_v32 = vcvt.s32.f32 %v2950_v49 }
 0x3d4   : > { %v5506_v9 = vpack.c.bf16 %v4318_v10, %v4306_v62  ;;  %v4690_v39 = vcvt.s32.f32 %v3154_v37  ;;  %v2530_v29 = vunpack.c.0.s8 %v1822_v11  ;;  %6586 = vmatpush.bf16.msrb.mxu1 %v5398_v35  ;;  %v2542_v57 = vunpack.c.1.s8 %v1822_v11  ;;  %v9882_v62 = vld [vmem:[%s8946_s11 + $0x4b0] sm:$0xff]  ;;  %v9884_v10 = vpop.f32.mrf.mxu0 }
 0x3d5   : > { %v4702_v63 = vcvt.s32.f32 %v3166_v36  ;;  %v2746_v3 = vunpack.c.2.s8 %v1870_v58  ;;  %v2758_v52 = vunpack.c.3.s8 %v1870_v58  ;;  %v5590_v47 = vpack.c.bf16 %v4486_v32, %v4474_v21 }
 0x3d6   : > { %6598 = vmatpush.bf16.msrb.mxu2 %v5506_v9  ;;  %v4066_v53 = vcvt.s32.f32 %v2530_v29  ;;  %v6345_v5 = vadd.f32 %v9846_v1, %v6332_v17  ;;  %v7187_v6 = vperm.slane %v9763_v61, 3  ;;  %v4078_v44 = vcvt.s32.f32 %v2542_v57 }
 0x3d7   : > { %v5698_v43 = vpack.c.bf16 %v4702_v63, %v4690_v39  ;;  %v4282_v27 = vcvt.s32.f32 %v2746_v3  ;;  %v4294_v15 = vcvt.s32.f32 %v2758_v52  ;;  %6612 = vmatpush.bf16.msrb.mxu3 %v5590_v47  ;;  %v7227_v11 = vperm.slane %v9769_v28, 3  ;;  %v1954_v39 = vld [vmem:[%s8946_s11 + $0x7b0] sm:$0xff]  ;;  %v6385_v29 = vpop.f32.mrf.mxu1 }
 0x3d8   : > { %v7211_v40 = vmul.f32 %v7187_v6, %v6345_v5  ;;  %v2914_v42 = vunpack.c.0.s8 %v1918_v8  ;;  %v2926_v23 = vunpack.c.1.s8 %v1918_v8  ;;  %v5386_v60 = vpack.c.bf16 %v4078_v44, %v4066_v53  ;;  %v9890_v47 = vld [vmem:[%s8946_s11 + $0xa50] sm:$0xff]  ;;  %v9893_v44 = vld [vmem:[%s8946_s11 + $0x158] sm:$0xff] }
 0x3d9   : > { %6624 = vmatpush.bf16.msra.mxu0 %v5698_v43  ;;  %v5494_v1 = vpack.c.bf16 %v4294_v15, %v4282_v27  ;;  %v3130_v17 = vunpack.c.2.s8 %v1966_v33  ;;  %v3142_v61 = vunpack.c.3.s8 %v1966_v33  ;;  %v2506_v18 = vunpack.c.2.s8 %v1810_v34  ;;  %v9895_v27 = vpop.f32.mrf.mxu3 }
 0x3da   : > { %v7251_v14 = vadd.f32 %v7227_v11, %v7211_v40  ;;  %v4450_v4 = vcvt.s32.f32 %v2914_v42  ;;  %v4462_v38 = vcvt.s32.f32 %v2926_v23  ;;  %6587 = vmatpush.bf16.msrb.mxu1 %v5386_v60  ;;  %v2518_v28 = vunpack.c.3.s8 %v1810_v34 }
 0x3db   : > { %6599 = vmatpush.bf16.msrb.mxu2 %v5494_v1  ;;  %v4666_v0 = vcvt.s32.f32 %v3130_v17  ;;  %v4678_v55 = vcvt.s32.f32 %v3142_v61  ;;  %v2722_v13 = vunpack.c.0.s8 %v1870_v58  ;;  %v4042_v59 = vcvt.s32.f32 %v2506_v18 }
 0x3dc   : > { %8320 = vtanh.f32 %v7251_v14  ;;  %v5578_v8 = vpack.c.bf16 %v4462_v38, %v4450_v4  ;;  %v2734_v31 = vunpack.c.1.s8 %v1870_v58  ;;  %v4054_v45 = vcvt.s32.f32 %v2518_v28  ;;  %v9901_v38 = vpop.f32.mrf.mxu2  ;;  %v6424_v28 = vpop.f32.mrf.mxu0 }
 0x3dd   : > { %v5686_v7 = vpack.c.bf16 %v4678_v55, %v4666_v0  ;;  %v4258_v46 = vcvt.s32.f32 %v2722_v13  ;;  %v2890_v22 = vunpack.c.2.s8 %v1906_v25  ;;  %v2902_v30 = vunpack.c.3.s8 %v1906_v25 }
 0x3de   : > { %6613 = vmatpush.bf16.msrb.mxu3 %v5578_v8  ;;  %v4270_v54 = vcvt.s32.f32 %v2734_v31  ;;  %v3106_v56 = vunpack.c.0.s8 %v1966_v33  ;;  %v3118_v26 = vunpack.c.1.s8 %v1966_v33  ;;  %v5374_v49 = vpack.c.bf16 %v4054_v45, %v4042_v59 }
 0x3df   : > { %6625 = vmatpush.bf16.msra.mxu0 %v5686_v7  ;;  %v4426_v37 = vcvt.s32.f32 %v2890_v22  ;;  %v2482_v35 = vunpack.c.0.s8 %v1810_v34  ;;  %v2494_v58 = vunpack.c.1.s8 %v1810_v34  ;;  %v4438_v36 = vcvt.s32.f32 %v2902_v30 }
 0x3e0   : > { %v5482_v21 = vpack.c.bf16 %v4270_v54, %v4258_v46  ;;  %v4642_v9 = vcvt.s32.f32 %v3106_v56  ;;  %v4654_v32 = vcvt.s32.f32 %v3118_v26  ;;  %6588 = vmatpush.bf16.msrb.mxu1 %v5374_v49  ;;  %v2698_v3 = vunpack.c.2.s8 %v9882_v62  ;;  %v2086_v54 = vld [vmem:[%s8946_s11 + $0xbd0] sm:$0xff] }
 0x3e1   : > { %v4018_v63 = vcvt.s32.f32 %v2482_v35  ;;  %v4030_v57 = vcvt.s32.f32 %v2494_v58  ;;  %v2710_v52 = vunpack.c.3.s8 %v9882_v62  ;;  %v5566_v5 = vpack.c.bf16 %v4438_v36, %v4426_v37  ;;  %v6411_v36 = vpop.f32.mrf.mxu3 }
 0x3e2   : > { %v8321_v53 = vpop.eup %8320  ;;  %6600 = vmatpush.bf16.msrb.mxu2 %v5482_v21  ;;  %v5674_v6 = vpack.c.bf16 %v4654_v32, %v4642_v9  ;;  %v2866_v33 = vunpack.c.0.s8 %v1906_v25  ;;  %v2878_v43 = vunpack.c.1.s8 %v1906_v25  ;;  %v4234_v34 = vcvt.s32.f32 %v2698_v3  ;;  %v1799_v21 = vld [vmem:[%s8946_s11 + $0x2d8] sm:$0xff] }
 0x3e3   : > { %7275 = vst [vmem:[%s9629_s3 + $0x18] sm:$0xff] %v8321_v53  ;;  %v5362_v15 = vpack.c.bf16 %v4030_v57, %v4018_v63  ;;  %v4246_v40 = vcvt.s32.f32 %v2710_v52  ;;  %v3082_v11 = vunpack.c.2.s8 %v1954_v39  ;;  %6614 = vmatpush.bf16.msrb.mxu3 %v5566_v5  ;;  %v3094_v60 = vunpack.c.3.s8 %v1954_v39  ;;  %v2026_v63 = vld [vmem:[%s8946_s11 + $0x9f0] sm:$0xff] }
 0x3e4   : > { %6626 = vmatpush.bf16.msra.mxu0 %v5674_v6  ;;  %v4402_v42 = vcvt.s32.f32 %v2866_v33  ;;  %v4414_v23 = vcvt.s32.f32 %v2878_v43  ;;  %v3418_v1 = vunpack.c.2.s8 %v9890_v47  ;;  %v3430_v14 = vunpack.c.3.s8 %v9890_v47  ;;  %v6398_v43 = vpop.f32.mrf.mxu2 }
 0x3e5   : > { %6589 = vmatpush.bf16.msrb.mxu1 %v5362_v15  ;;  %v5470_v17 = vpack.c.bf16 %v4246_v40, %v4234_v34  ;;  %v4618_v61 = vcvt.s32.f32 %v3082_v11  ;;  %v2267_v4 = vunpack.c.2.s8 %v9893_v44  ;;  %v4630_v25 = vcvt.s32.f32 %v3094_v60 }
 0x3e6   : > { %v5554_v18 = vpack.c.bf16 %v4414_v23, %v4402_v42  ;;  %v4954_v0 = vcvt.s32.f32 %v3418_v1  ;;  %v2279_v55 = vunpack.c.3.s8 %v9893_v44  ;;  %v4966_v13 = vcvt.s32.f32 %v3430_v14  ;;  %v1739_v42 = vld [vmem:[%s8946_s11 + $0xf8] sm:$0xff] }
 0x3e7   : > { %6601 = vmatpush.bf16.msrb.mxu2 %v5470_v17  ;;  %v3803_v8 = vcvt.s32.f32 %v2267_v4  ;;  %v2674_v59 = vunpack.c.0.s8 %v9882_v62  ;;  %v2686_v31 = vunpack.c.1.s8 %v9882_v62  ;;  %v5662_v7 = vpack.c.bf16 %v4630_v25, %v4618_v61 }
 0x3e8   : > { %6615 = vmatpush.bf16.msrb.mxu3 %v5554_v18  ;;  %v3815_v45 = vcvt.s32.f32 %v2279_v55  ;;  %6590 = vmatmul.bf16.vlgmr.msrb.gmra.mxu1 %v9254_v50  ;;  %v3058_v46 = vunpack.c.0.s8 %v1954_v39  ;;  %v3070_v22 = vunpack.c.1.s8 %v1954_v39  ;;  %v5830_v30 = vpack.c.bf16 %v4966_v13, %v4954_v0 }
 0x3e9   : > { %v4210_v56 = vcvt.s32.f32 %v2674_v59  ;;  %v4222_v26 = vcvt.s32.f32 %v2686_v31  ;;  %v3394_v49 = vunpack.c.0.s8 %v9890_v47  ;;  %6627 = vmatpush.bf16.msra.mxu0 %v5662_v7  ;;  %v3406_v62 = vunpack.c.1.s8 %v9890_v47  ;;  %v2074_v31 = vld [vmem:[%s8946_s11 + $0xb70] sm:$0xff] }
 0x3ea   : > { %v5255_v37 = vpack.c.bf16 %v3815_v45, %v3803_v8  ;;  %v4594_v35 = vcvt.s32.f32 %v3058_v46  ;;  %v4606_v58 = vcvt.s32.f32 %v3070_v22  ;;  %6634 = vmatpush.bf16.msra.mxu1 %v5830_v30  ;;  %v3610_v39 = vunpack.c.2.s8 %v2086_v54 }
 0x3eb   : > { %v5458_v9 = vpack.c.bf16 %v4222_v26, %v4210_v56  ;;  %6616 = vmatmul.bf16.vlgmr.msrb.gmra.mxu3 %v9335_v51  ;;  %v4930_v32 = vcvt.s32.f32 %v3394_v49  ;;  %v3622_v29 = vunpack.c.3.s8 %v2086_v54  ;;  %v4942_v3 = vcvt.s32.f32 %v3406_v62  ;;  %v1787_v49 = vld [vmem:[%s8946_s11 + $0x278] sm:$0xff] }
 0x3ec   : > { %6660 = vmatpush.bf16.msra.mxu3 %v5255_v37  ;;  %v5650_v57 = vpack.c.bf16 %v4606_v58, %v4594_v35  ;;  %v2243_v52 = vunpack.c.0.s8 %v9893_v44  ;;  %v2255_v53 = vunpack.c.1.s8 %v9893_v44  ;;  %v5146_v47 = vcvt.s32.f32 %v3610_v39 }
 0x3ed   : > { %6602 = vmatpush.bf16.msrb.mxu2 %v5458_v9  ;;  %v5158_v5 = vcvt.s32.f32 %v3622_v29  ;;  %v2459_v6 = vunpack.c.2.s8 %v1799_v21  ;;  %v2471_v33 = vunpack.c.3.s8 %v1799_v21  ;;  %v5818_v15 = vpack.c.bf16 %v4942_v3, %v4930_v32 }
 0x3ee   : > { %6628 = vmatpush.bf16.msra.mxu0 %v5650_v57  ;;  %v3779_v34 = vcvt.s32.f32 %v2243_v52  ;;  %v3791_v40 = vcvt.s32.f32 %v2255_v53  ;;  %v3370_v11 = vunpack.c.2.s8 %v2026_v63  ;;  %v3382_v17 = vunpack.c.3.s8 %v2026_v63 }
 0x3ef   : > { %v5926_v23 = vpack.c.bf16 %v5158_v5, %v5146_v47  ;;  %v3995_v60 = vcvt.s32.f32 %v2459_v6  ;;  %v4007_v1 = vcvt.s32.f32 %v2471_v33  ;;  %6635 = vmatpush.bf16.msra.mxu1 %v5818_v15  ;;  %v3586_v14 = vunpack.c.0.s8 %v2086_v54 }
 0x3f0   : > { %v5243_v61 = vpack.c.bf16 %v3791_v40, %v3779_v34  ;;  %6603 = vmatmul.bf16.vlgmr.msrb.gmra.mxu2 %v9279_v12  ;;  %v4906_v44 = vcvt.s32.f32 %v3370_v11  ;;  %v3598_v4 = vunpack.c.1.s8 %v2086_v54  ;;  %v4918_v25 = vcvt.s32.f32 %v3382_v17 }
 0x3f1   : > { %6647 = vmatpush.bf16.msra.mxu2 %v5926_v23  ;;  %v5351_v18 = vpack.c.bf16 %v4007_v1, %v3995_v60  ;;  %6629 = vmatmul.bf16.vlgmr.msra.gmra.mxu0 %v9348_v20  ;;  %v2219_v0 = vunpack.c.2.s8 %v1739_v42  ;;  %v2231_v55 = vunpack.c.3.s8 %v1739_v42  ;;  %v5122_v28 = vcvt.s32.f32 %v3586_v14 }
 0x3f2   : > { %6661 = vmatpush.bf16.msra.mxu3 %v5243_v61  ;;  %v5134_v13 = vcvt.s32.f32 %v3598_v4  ;;  %v2435_v8 = vunpack.c.0.s8 %v1799_v21  ;;  %v2447_v59 = vunpack.c.1.s8 %v1799_v21  ;;  %v5806_v7 = vpack.c.bf16 %v4918_v25, %v4906_v44  ;;  %v2014_v21 = vld [vmem:[%s8946_s11 + $0x990] sm:$0xff] }
 0x3f3   : > { %6673 = vmatpush.bf16.msrb.mxu0 %v5351_v18  ;;  %v3755_v45 = vcvt.s32.f32 %v2219_v0  ;;  %v3767_v46 = vcvt.s32.f32 %v2231_v55  ;;  %v9921_v22 = vadd.f32 %v9878_v48, %v9871_v19  ;;  %v3346_v26 = vunpack.c.0.s8 %v2026_v63  ;;  %v2062_v4 = vld [vmem:[%s8946_s11 + $0xb10] sm:$0xff] }
 0x3f4   : > { %v5914_v54 = vpack.c.bf16 %v5134_v13, %v5122_v28  ;;  %v3971_v30 = vcvt.s32.f32 %v2435_v8  ;;  %v3983_v56 = vcvt.s32.f32 %v2447_v59  ;;  %6636 = vmatpush.bf16.msra.mxu1 %v5806_v7  ;;  %v3358_v35 = vunpack.c.1.s8 %v2026_v63  ;;  %v1727_v63 = vld [vmem:[%s8946_s11 + $0x98] sm:$0xff] }
 0x3f5   : > { %v5231_v37 = vpack.c.bf16 %v3767_v46, %v3755_v45  ;;  %v3562_v58 = vunpack.c.2.s8 %v2074_v31  ;;  %v3574_v62 = vunpack.c.3.s8 %v2074_v31  ;;  %v4882_v9 = vcvt.s32.f32 %v3346_v26 }
 0x3f6   : > { %6648 = vmatpush.bf16.msra.mxu2 %v5914_v54  ;;  %v5339_v36 = vpack.c.bf16 %v3983_v56, %v3971_v30  ;;  %v2195_v32 = vunpack.c.0.s8 %v1739_v42  ;;  %v2207_v39 = vunpack.c.1.s8 %v1739_v42  ;;  %v4894_v19 = vcvt.s32.f32 %v3358_v35  ;;  %v1775_v54 = vld [vmem:[%s8946_s11 + $0x218] sm:$0xff] }
 0x3f7   : > { %6662 = vmatpush.bf16.msra.mxu3 %v5231_v37  ;;  %v5098_v48 = vcvt.s32.f32 %v3562_v58  ;;  %v5110_v29 = vcvt.s32.f32 %v3574_v62  ;;  %v2411_v57 = vunpack.c.2.s8 %v1787_v49  ;;  %v2423_v53 = vunpack.c.3.s8 %v1787_v49  ;;  %v2002_v37 = vld [vmem:[%s8946_s11 + $0x930] sm:$0xff] }
 0x3f8   : > { %6674 = vmatpush.bf16.msrb.mxu0 %v5339_v36  ;;  %v3731_v3 = vcvt.s32.f32 %v2195_v32  ;;  %v3743_v52 = vcvt.s32.f32 %v2207_v39  ;;  %v3322_v47 = vunpack.c.2.s8 %v2014_v21  ;;  %v5794_v5 = vpack.c.bf16 %v4894_v19, %v4882_v9  ;;  %v9931_v36 = vpop.f32.mrf.mxu1 }
 0x3f9   : > { %v5902_v6 = vpack.c.bf16 %v5110_v29, %v5098_v48  ;;  %v3947_v33 = vcvt.s32.f32 %v2411_v57  ;;  %v3334_v43 = vunpack.c.3.s8 %v2014_v21  ;;  %v3959_v34 = vcvt.s32.f32 %v2423_v53  ;;  %v1715_v48 = vld [vmem:[%s8946_s11 + $0x38] sm:$0xff] }
 0x3fa   : > { %v5219_v15 = vpack.c.bf16 %v3743_v52, %v3731_v3  ;;  %v4858_v40 = vcvt.s32.f32 %v3322_v47  ;;  %v3538_v11 = vunpack.c.0.s8 %v2074_v31  ;;  %6637 = vmatpush.bf16.msra.mxu1 %v5794_v5  ;;  %v3550_v23 = vunpack.c.1.s8 %v2074_v31 }
 0x3fb   : > { %6649 = vmatpush.bf16.msra.mxu2 %v5902_v6  ;;  %v4870_v42 = vcvt.s32.f32 %v3334_v43  ;;  %v2171_v60 = vunpack.c.2.s8 %v1727_v63  ;;  %v2183_v1 = vunpack.c.3.s8 %v1727_v63  ;;  %v5327_v17 = vpack.c.bf16 %v3959_v34, %v3947_v33 }
 0x3fc   : > { %6663 = vmatpush.bf16.msra.mxu3 %v5219_v15  ;;  %v5074_v61 = vcvt.s32.f32 %v3538_v11  ;;  %v2387_v44 = vunpack.c.0.s8 %v1787_v49  ;;  %v2399_v14 = vunpack.c.1.s8 %v1787_v49  ;;  %v5086_v25 = vcvt.s32.f32 %v3550_v23  ;;  %v9940_v11 = vpop.f32.mrf.mxu0 }
 0x3fd   : > { %v5782_v18 = vpack.c.bf16 %v4870_v42, %v4858_v40  ;;  %v3707_v0 = vcvt.s32.f32 %v2171_v60  ;;  %v3719_v55 = vcvt.s32.f32 %v2183_v1  ;;  %6675 = vmatpush.bf16.msrb.mxu0 %v5327_v17  ;;  %v3298_v8 = vunpack.c.0.s8 %v2014_v21  ;;  %v9938_v40 = vld [vmem:[%s8946_s11 + $0xab0] sm:$0xff] }
 0x3fe   : > { %v3923_v28 = vcvt.s32.f32 %v2387_v44  ;;  %v3935_v13 = vcvt.s32.f32 %v2399_v14  ;;  %v3310_v59 = vunpack.c.1.s8 %v2014_v21  ;;  %v5890_v31 = vpack.c.bf16 %v5086_v25, %v5074_v61 }
 0x3ff   : > { %6638 = vmatpush.bf16.msra.mxu1 %v5782_v18  ;;  %v5207_v7 = vpack.c.bf16 %v3719_v55, %v3707_v0  ;;  %v3514_v45 = vunpack.c.2.s8 %v2062_v4  ;;  %v3526_v46 = vunpack.c.3.s8 %v2062_v4  ;;  %v4834_v56 = vcvt.s32.f32 %v3298_v8  ;;  %v1763_v55 = vld [vmem:[%s8946_s11 + $0x1b8] sm:$0xff] }
 0x400   : > { %v5315_v30 = vpack.c.bf16 %v3935_v13, %v3923_v28  ;;  %v4846_v26 = vcvt.s32.f32 %v3310_v59  ;;  %v6397_v49 = vadd.f32 %v9901_v38, %v9921_v22  ;;  %6650 = vmatpush.bf16.msra.mxu2 %v5890_v31  ;;  %v2147_v62 = vunpack.c.0.s8 %v1727_v63  ;;  %v6437_v28 = vpop.f32.mrf.mxu1 }
 0x401   : > { %6664 = vmatpush.bf16.msra.mxu3 %v5207_v7  ;;  %v5050_v35 = vcvt.s32.f32 %v3514_v45  ;;  %v5062_v58 = vcvt.s32.f32 %v3526_v46  ;;  %v2159_v21 = vunpack.c.1.s8 %v1727_v63  ;;  %v2363_v39 = vunpack.c.2.s8 %v1775_v54  ;;  %v1847_v7 = vld [vmem:[%s8946_s11 + $0x458] sm:$0xff] }
 0x402   : > { %6676 = vmatpush.bf16.msrb.mxu0 %v5315_v30  ;;  %v5770_v9 = vpack.c.bf16 %v4846_v26, %v4834_v56  ;;  %v9934_v32 = vadd.f32 %v9895_v27, %v6397_v49  ;;  %v2375_v19 = vunpack.c.3.s8 %v1775_v54  ;;  %v3683_v57 = vcvt.s32.f32 %v2147_v62  ;;  %v9947_v56 = vld [vmem:[%s8946_s11 + $0x758] sm:$0xff] }
 0x403   : > { %v5878_v29 = vpack.c.bf16 %v5062_v58, %v5050_v35  ;;  %v3695_v38 = vcvt.s32.f32 %v2159_v21  ;;  %v3274_v22 = vunpack.c.2.s8 %v2002_v37  ;;  %v3899_v3 = vcvt.s32.f32 %v2363_v39  ;;  %v9949_v58 = vpop.f32.mrf.mxu3 }
 0x404   : > { %6639 = vmatpush.bf16.msra.mxu1 %v5770_v9  ;;  %v3911_v52 = vcvt.s32.f32 %v2375_v19  ;;  %v3286_v53 = vunpack.c.3.s8 %v2002_v37  ;;  %v3490_v47 = vunpack.c.0.s8 %v2062_v4  ;;  %v3502_v6 = vunpack.c.1.s8 %v2062_v4 }
 0x405   : > { %6651 = vmatpush.bf16.msra.mxu2 %v5878_v29  ;;  %v5195_v63 = vpack.c.bf16 %v3695_v38, %v3683_v57  ;;  %v4810_v5 = vcvt.s32.f32 %v3274_v22  ;;  %v2123_v33 = vunpack.c.2.s8 %v1715_v48  ;;  %v2135_v34 = vunpack.c.3.s8 %v1715_v48  ;;  %v9952_v38 = vpop.f32.mrf.mxu2  ;;  %v6476_v22 = vpop.f32.mrf.mxu0 }
 0x406   : > { %v5303_v27 = vpack.c.bf16 %v3911_v52, %v3899_v3  ;;  %v4822_v43 = vcvt.s32.f32 %v3286_v53  ;;  %v5026_v15 = vcvt.s32.f32 %v3490_v47  ;;  %v5038_v42 = vcvt.s32.f32 %v3502_v6 }
 0x407   : > { %6665 = vmatpush.bf16.msra.mxu3 %v5195_v63  ;;  %v3659_v23 = vcvt.s32.f32 %v2123_v33  ;;  %v2339_v60 = vunpack.c.0.s8 %v1775_v54  ;;  %v2351_v1 = vunpack.c.1.s8 %v1775_v54  ;;  %v3671_v61 = vcvt.s32.f32 %v2135_v34 }
 0x408   : > { %6677 = vmatpush.bf16.msrb.mxu0 %v5303_v27  ;;  %v5758_v17 = vpack.c.bf16 %v4822_v43, %v4810_v5  ;;  %v3250_v44 = vunpack.c.0.s8 %v2002_v37  ;;  %v3262_v14 = vunpack.c.1.s8 %v2002_v37  ;;  %v5866_v4 = vpack.c.bf16 %v5038_v42, %v5026_v15  ;;  %v1895_v27 = vld [vmem:[%s8946_s11 + $0x5d8] sm:$0xff] }
 0x409   : > { %v3875_v18 = vcvt.s32.f32 %v2339_v60  ;;  %v3887_v25 = vcvt.s32.f32 %v2351_v1  ;;  %v3466_v0 = vunpack.c.2.s8 %v9938_v40  ;;  %v5183_v13 = vpack.c.bf16 %v3671_v61, %v3659_v23 }
 0x40a   : > { %6640 = vmatpush.bf16.msra.mxu1 %v5758_v17  ;;  %v4786_v8 = vcvt.s32.f32 %v3250_v44  ;;  %v4798_v59 = vcvt.s32.f32 %v3262_v14  ;;  %v3478_v31 = vunpack.c.3.s8 %v9938_v40  ;;  %6652 = vmatpush.bf16.msra.mxu2 %v5866_v4  ;;  %v2099_v54 = vunpack.c.0.s8 %v1715_v48  ;;  %v1991_v4 = vld [vmem:[%s8946_s11 + $0x8d8] sm:$0xff] }
 0x40b   : > { %v5291_v45 = vpack.c.bf16 %v3887_v25, %v3875_v18  ;;  %v5002_v46 = vcvt.s32.f32 %v3466_v0  ;;  %v2111_v30 = vunpack.c.1.s8 %v1715_v48  ;;  %6666 = vmatpush.bf16.msra.mxu3 %v5183_v13  ;;  %v2315_v37 = vunpack.c.2.s8 %v1763_v55  ;;  %v1835_v13 = vld [vmem:[%s8946_s11 + $0x3f8] sm:$0xff] }
 0x40c   : > { %v5746_v26 = vpack.c.bf16 %v4798_v59, %v4786_v8  ;;  %v5014_v49 = vcvt.s32.f32 %v3478_v31  ;;  %v2327_v35 = vunpack.c.3.s8 %v1763_v55  ;;  %v3635_v62 = vcvt.s32.f32 %v2099_v54 }
 0x40d   : > { %6678 = vmatpush.bf16.msrb.mxu0 %v5291_v45  ;;  %v3647_v21 = vcvt.s32.f32 %v2111_v30  ;;  %v2651_v9 = vunpack.c.2.s8 %v1847_v7  ;;  %v2663_v39 = vunpack.c.3.s8 %v1847_v7  ;;  %v3851_v29 = vcvt.s32.f32 %v2315_v37 }
 0x40e   : > { %6641 = vmatpush.bf16.msra.mxu1 %v5746_v26  ;;  %v5854_v19 = vpack.c.bf16 %v5014_v49, %v5002_v46  ;;  %v3863_v57 = vcvt.s32.f32 %v2327_v35  ;;  %v3035_v48 = vunpack.c.2.s8 %v9947_v56  ;;  %v3047_v47 = vunpack.c.3.s8 %v9947_v56  ;;  %v6450_v26 = vpop.f32.mrf.mxu2 }
 0x40f   : > { %v5171_v3 = vpack.c.bf16 %v3647_v21, %v3635_v62  ;;  %v4187_v52 = vcvt.s32.f32 %v2651_v9  ;;  %v4199_v53 = vcvt.s32.f32 %v2663_v39  ;;  %v3442_v6 = vunpack.c.0.s8 %v9938_v40  ;;  %v1931_v21 = vld [vmem:[%s8946_s11 + $0x6f8] sm:$0xff] }
 0x410   : > { %6653 = vmatpush.bf16.msra.mxu2 %v5854_v19  ;;  %v5279_v63 = vpack.c.bf16 %v3863_v57, %v3851_v29  ;;  %v4571_v5 = vcvt.s32.f32 %v3035_v48  ;;  %v3454_v33 = vunpack.c.1.s8 %v9938_v40  ;;  %v4583_v15 = vcvt.s32.f32 %v3047_v47 }
 0x411   : > { %6667 = vmatpush.bf16.msra.mxu3 %v5171_v3  ;;  %v5447_v43 = vpack.c.bf16 %v4199_v53, %v4187_v52  ;;  %6642 = vmatmul.bf16.vlgmr.msra.gmra.mxu1 %v9377_v16  ;;  %v2291_v34 = vunpack.c.0.s8 %v1763_v55  ;;  %v2303_v42 = vunpack.c.1.s8 %v1763_v55  ;;  %v4978_v23 = vcvt.s32.f32 %v3442_v6  ;;  %v6463_v55 = vpop.f32.mrf.mxu3 }
 0x412   : > { %6679 = vmatpush.bf16.msrb.mxu0 %v5279_v63  ;;  %v4990_v60 = vcvt.s32.f32 %v3454_v33  ;;  %v2627_v1 = vunpack.c.0.s8 %v1847_v7  ;;  %v2639_v17 = vunpack.c.1.s8 %v1847_v7  ;;  %v5639_v61 = vpack.c.bf16 %v4583_v15, %v4571_v5 }
 0x413   : > { %6686 = vmatpush.bf16.msrb.mxu1 %v5447_v43  ;;  %v3827_v44 = vcvt.s32.f32 %v2291_v34  ;;  %v3839_v14 = vcvt.s32.f32 %v2303_v42  ;;  %v2843_v40 = vunpack.c.2.s8 %v1895_v27  ;;  %v2855_v28 = vunpack.c.3.s8 %v1895_v27  ;;  %v1883_v43 = vld [vmem:[%s8946_s11 + $0x578] sm:$0xff] }
 0x414   : > { %v5842_v18 = vpack.c.bf16 %v4990_v60, %v4978_v23  ;;  %6668 = vmatmul.bf16.vlgmr.msra.gmra.mxu3 %v9159_v2  ;;  %v4163_v25 = vcvt.s32.f32 %v2627_v1  ;;  %v4175_v0 = vcvt.s32.f32 %v2639_v17  ;;  %v3011_v31 = vunpack.c.0.s8 %v9947_v56 }
 0x415   : > { %6712 = vmatpush.bf16.msrb.mxu3 %v5639_v61  ;;  %v5267_v8 = vpack.c.bf16 %v3839_v14, %v3827_v44  ;;  %v4379_v59 = vcvt.s32.f32 %v2843_v40  ;;  %v3023_v7 = vunpack.c.1.s8 %v9947_v56  ;;  %v4391_v46 = vcvt.s32.f32 %v2855_v28  ;;  %v1979_v61 = vld [vmem:[%s8946_s11 + $0x878] sm:$0xff] }
 0x416   : > { %6654 = vmatpush.bf16.msra.mxu2 %v5842_v18  ;;  %v5435_v45 = vpack.c.bf16 %v4175_v0, %v4163_v25  ;;  %v3227_v54 = vunpack.c.2.s8 %v1991_v4  ;;  %v3239_v30 = vunpack.c.3.s8 %v1991_v4  ;;  %v4547_v49 = vcvt.s32.f32 %v3011_v31  ;;  %v1823_v18 = vld [vmem:[%s8946_s11 + $0x398] sm:$0xff] }
 0x417   : > { %6680 = vmatpush.bf16.msrb.mxu0 %v5267_v8  ;;  %v4559_v37 = vcvt.s32.f32 %v3023_v7  ;;  %v2603_v35 = vunpack.c.2.s8 %v1835_v13  ;;  %v2615_v62 = vunpack.c.3.s8 %v1835_v13  ;;  %v5543_v9 = vpack.c.bf16 %v4391_v46, %v4379_v59 }
 0x418   : > { %6687 = vmatpush.bf16.msrb.mxu1 %v5435_v45  ;;  %v4763_v39 = vcvt.s32.f32 %v3227_v54  ;;  %v4775_v19 = vcvt.s32.f32 %v3239_v30  ;;  %v2819_v29 = vunpack.c.0.s8 %v1895_v27  ;;  %v2831_v22 = vunpack.c.1.s8 %v1895_v27 }
 0x419   : > { %v5627_v57 = vpack.c.bf16 %v4559_v37, %v4547_v49  ;;  %6655 = vmatmul.bf16.vlgmr.msra.gmra.mxu2 %v9385_v41  ;;  %v4139_v56 = vcvt.s32.f32 %v2603_v35  ;;  %v4151_v48 = vcvt.s32.f32 %v2615_v62  ;;  %v2987_v53 = vunpack.c.2.s8 %v1931_v21 }
 0x41a   : > { %6699 = vmatpush.bf16.msrb.mxu2 %v5543_v9  ;;  %v5735_v3 = vpack.c.bf16 %v4775_v19, %v4763_v39  ;;  %6681 = vmatmul.bf16.vlgmr.msrb.gmra.mxu0 %v9180_v24  ;;  %v4355_v52 = vcvt.s32.f32 %v2819_v29  ;;  %v2999_v47 = vunpack.c.3.s8 %v1931_v21  ;;  %v4367_v5 = vcvt.s32.f32 %v2831_v22  ;;  %v1871_v22 = vld [vmem:[%s8946_s11 + $0x518] sm:$0xff] }
 0x41b   : > { %6713 = vmatpush.bf16.msrb.mxu3 %v5627_v57  ;;  %v5423_v63 = vpack.c.bf16 %v4151_v48, %v4139_v56  ;;  %v3203_v6 = vunpack.c.0.s8 %v1991_v4  ;;  %v3215_v33 = vunpack.c.1.s8 %v1991_v4  ;;  %v4523_v15 = vcvt.s32.f32 %v2987_v53 }
 0x41c   : > { %6725 = vmatpush.bf16.msra.mxu0 %v5735_v3  ;;  %v4535_v34 = vcvt.s32.f32 %v2999_v47  ;;  %v6423_v27 = vadd.f32 %v9884_v10, %v9934_v32  ;;  %v2579_v42 = vunpack.c.0.s8 %v1835_v13  ;;  %v5531_v23 = vpack.c.bf16 %v4367_v5, %v4355_v52 }
 0x41d   : > { %6688 = vmatpush.bf16.msrb.mxu1 %v5423_v63  ;;  %v4739_v60 = vcvt.s32.f32 %v3203_v6  ;;  %v4751_v1 = vcvt.s32.f32 %v3215_v33  ;;  %v2591_v17 = vunpack.c.1.s8 %v1835_v13  ;;  %v2795_v4 = vunpack.c.2.s8 %v1883_v43 }
 0x41e   : > { %v5615_v44 = vpack.c.bf16 %v4535_v34, %v4523_v15  ;;  %v6436_v14 = vadd.f32 %v9931_v36, %v6423_v27  ;;  %v4115_v40 = vcvt.s32.f32 %v2579_v42  ;;  %6700 = vmatpush.bf16.msrb.mxu2 %v5531_v23  ;;  %v2807_v28 = vunpack.c.3.s8 %v1883_v43  ;;  %v1919_v36 = vld [vmem:[%s8946_s11 + $0x698] sm:$0xff] }
 0x41f   : > { %v5723_v25 = vpack.c.bf16 %v4751_v1, %v4739_v60  ;;  %v4127_v0 = vcvt.s32.f32 %v2591_v17  ;;  %v2963_v55 = vunpack.c.0.s8 %v1931_v21  ;;  %v4331_v10 = vcvt.s32.f32 %v2795_v4  ;;  %v9981_v1 = vld [vmem:[%s8952_s5] sm:$0xff]  ;;  %v1811_v4 = vld [vmem:[%s8946_s11 + $0x338] sm:$0xff] }
 0x420   : > { %6714 = vmatpush.bf16.msrb.mxu3 %v5615_v44  ;;  %v2975_v32 = vunpack.c.1.s8 %v1931_v21  ;;  %v3179_v8 = vunpack.c.2.s8 %v1979_v61  ;;  %v3191_v59 = vunpack.c.3.s8 %v1979_v61  ;;  %v4343_v31 = vcvt.s32.f32 %v2807_v28 }
 0x421   : > { %6726 = vmatpush.bf16.msra.mxu0 %v5723_v25  ;;  %v5411_v13 = vpack.c.bf16 %v4127_v0, %v4115_v40  ;;  %v4499_v7 = vcvt.s32.f32 %v2963_v55  ;;  %v2555_v45 = vunpack.c.2.s8 %v1823_v18  ;;  %v2567_v26 = vunpack.c.3.s8 %v1823_v18  ;;  %v9987_v25 = vld [vmem:[%s8954_s22] sm:$0xff] }
 0x422   : > { %v4511_v46 = vcvt.s32.f32 %v2975_v32  ;;  %v4715_v54 = vcvt.s32.f32 %v3179_v8  ;;  %v4727_v30 = vcvt.s32.f32 %v3191_v59  ;;  %v5519_v49 = vpack.c.bf16 %v4343_v31, %v4331_v10 }
 0x423   : > { %6689 = vmatpush.bf16.msrb.mxu1 %v5411_v13  ;;  %v4091_v37 = vcvt.s32.f32 %v2555_v45  ;;  %v2771_v35 = vunpack.c.0.s8 %v1883_v43  ;;  %v2783_v62 = vunpack.c.1.s8 %v1883_v43  ;;  %v4103_v39 = vcvt.s32.f32 %v2567_v26  ;;  %v1907_v45 = vld [vmem:[%s8946_s11 + $0x638] sm:$0xff] }
 0x424   : > { %v5603_v9 = vpack.c.bf16 %v4511_v46, %v4499_v7  ;;  %v5711_v21 = vpack.c.bf16 %v4727_v30, %v4715_v54  ;;  %v2939_v19 = vunpack.c.2.s8 %v1919_v36  ;;  %6701 = vmatpush.bf16.msrb.mxu2 %v5519_v49  ;;  %v2951_v56 = vunpack.c.3.s8 %v1919_v36 }
 0x425   : > { %v4307_v29 = vcvt.s32.f32 %v2771_v35  ;;  %v4319_v57 = vcvt.s32.f32 %v2783_v62  ;;  %v3155_v48 = vunpack.c.0.s8 %v1979_v61  ;;  %v5399_v3 = vpack.c.bf16 %v4103_v39, %v4091_v37 }
 0x426   : > { %6715 = vmatpush.bf16.msrb.mxu3 %v5603_v9  ;;  %6727 = vmatpush.bf16.msra.mxu0 %v5711_v21  ;;  %v4475_v52 = vcvt.s32.f32 %v2939_v19  ;;  %v3167_v53 = vunpack.c.1.s8 %v1979_v61  ;;  %v9977_v47 = vadd.f32 %v9940_v11, %v9949_v58  ;;  %v4487_v5 = vcvt.s32.f32 %v2951_v56  ;;  %v1967_v58 = vld [vmem:[%s8946_s11 + $0x818] sm:$0xff] }
 0x427   : > { %v5507_v63 = vpack.c.bf16 %v4319_v57, %v4307_v29  ;;  %v4691_v6 = vcvt.s32.f32 %v3155_v48  ;;  %v2531_v33 = vunpack.c.0.s8 %v1823_v18  ;;  %6690 = vmatpush.bf16.msrb.mxu1 %v5399_v3  ;;  %v2543_v15 = vunpack.c.1.s8 %v1823_v18  ;;  %v9994_v56 = vld [vmem:[%s8946_s11 + $0x4b8] sm:$0xff]  ;;  %v9996_v48 = vpop.f32.mrf.mxu0 }
 0x428   : > { %v4703_v43 = vcvt.s32.f32 %v3167_v53  ;;  %v2747_v34 = vunpack.c.2.s8 %v1871_v22  ;;  %v2759_v27 = vunpack.c.3.s8 %v1871_v22  ;;  %v5591_v42 = vpack.c.bf16 %v4487_v5, %v4475_v52 }
 0x429   : > { %6702 = vmatpush.bf16.msrb.mxu2 %v5507_v63  ;;  %v4067_v23 = vcvt.s32.f32 %v2531_v33  ;;  %v6449_v60 = vadd.f32 %v9952_v38, %v6436_v14  ;;  %v7188_v11 = vperm.slane %v9981_v1, 4  ;;  %v4079_v61 = vcvt.s32.f32 %v2543_v15  ;;  %v9990_v38 = vpop.f32.mrf.mxu1 }
 0x42a   : > { %v5699_v17 = vpack.c.bf16 %v4703_v43, %v4691_v6  ;;  %v4283_v44 = vcvt.s32.f32 %v2747_v34  ;;  %v4295_v40 = vcvt.s32.f32 %v2759_v27  ;;  %6716 = vmatpush.bf16.msrb.mxu3 %v5591_v42  ;;  %v7228_v0 = vperm.slane %v9987_v25, 4  ;;  %v1955_v43 = vld [vmem:[%s8946_s11 + $0x7b8] sm:$0xff] }
 0x42b   : > { %v7212_v18 = vmul.f32 %v7188_v11, %v6449_v60  ;;  %v2915_v28 = vunpack.c.0.s8 %v1919_v36  ;;  %v2927_v55 = vunpack.c.1.s8 %v1919_v36  ;;  %v5387_v14 = vpack.c.bf16 %v4079_v61, %v4067_v23  ;;  %v10002_v60 = vld [vmem:[%s8946_s11 + $0xa58] sm:$0xff] }
 0x42c   : > { %6728 = vmatpush.bf16.msra.mxu0 %v5699_v17  ;;  %v5495_v10 = vpack.c.bf16 %v4295_v40, %v4283_v44  ;;  %v3131_v32 = vunpack.c.2.s8 %v1967_v58  ;;  %v3143_v8 = vunpack.c.3.s8 %v1967_v58  ;;  %v2507_v7 = vunpack.c.2.s8 %v1811_v4  ;;  %v10005_v40 = vld [vmem:[%s8946_s11 + $0x160] sm:$0xff] }
 0x42d   : > { %v7252_v59 = vadd.f32 %v7228_v0, %v7212_v18  ;;  %v4451_v13 = vcvt.s32.f32 %v2915_v28  ;;  %v4463_v31 = vcvt.s32.f32 %v2927_v55  ;;  %6691 = vmatpush.bf16.msrb.mxu1 %v5387_v14  ;;  %v2519_v30 = vunpack.c.3.s8 %v1811_v4 }
 0x42e   : > { %6703 = vmatpush.bf16.msrb.mxu2 %v5495_v10  ;;  %v4667_v46 = vcvt.s32.f32 %v3131_v32  ;;  %v4679_v54 = vcvt.s32.f32 %v3143_v8  ;;  %v2723_v26 = vunpack.c.0.s8 %v1871_v22  ;;  %v4043_v49 = vcvt.s32.f32 %v2507_v7 }
 0x42f   : > { %8322 = vtanh.f32 %v7252_v59  ;;  %v5579_v36 = vpack.c.bf16 %v4463_v31, %v4451_v13  ;;  %v2735_v37 = vunpack.c.1.s8 %v1871_v22  ;;  %v4055_v62 = vcvt.s32.f32 %v2519_v30 }
 0x430   : > { %v5687_v35 = vpack.c.bf16 %v4679_v54, %v4667_v46  ;;  %v4259_v9 = vcvt.s32.f32 %v2723_v26  ;;  %v2891_v21 = vunpack.c.2.s8 %v1907_v45  ;;  %v2903_v19 = vunpack.c.3.s8 %v1907_v45 }
 0x431   : > { %6717 = vmatpush.bf16.msrb.mxu3 %v5579_v36  ;;  %v4271_v39 = vcvt.s32.f32 %v2735_v37  ;;  %v3107_v29 = vunpack.c.0.s8 %v1967_v58  ;;  %v3119_v57 = vunpack.c.1.s8 %v1967_v58  ;;  %v5375_v3 = vpack.c.bf16 %v4055_v62, %v4043_v49  ;;  %v6489_v15 = vpop.f32.mrf.mxu1  ;;  %v6528_v36 = vpop.f32.mrf.mxu0 }
 0x432   : > { %6729 = vmatpush.bf16.msra.mxu0 %v5687_v35  ;;  %v4427_v52 = vcvt.s32.f32 %v2891_v21  ;;  %v2483_v53 = vunpack.c.0.s8 %v1811_v4  ;;  %v2495_v22 = vunpack.c.1.s8 %v1811_v4  ;;  %v4439_v5 = vcvt.s32.f32 %v2903_v19  ;;  %v10007_v4 = vpop.f32.mrf.mxu3 }
 0x433   : > { %v5483_v63 = vpack.c.bf16 %v4271_v39, %v4259_v9  ;;  %v4643_v6 = vcvt.s32.f32 %v3107_v29  ;;  %v4655_v33 = vcvt.s32.f32 %v3119_v57  ;;  %6692 = vmatpush.bf16.msrb.mxu1 %v5375_v3  ;;  %v2699_v42 = vunpack.c.2.s8 %v9994_v56  ;;  %v2087_v29 = vld [vmem:[%s8946_s11 + $0xbd8] sm:$0xff] }
 0x434   : > { %v4019_v34 = vcvt.s32.f32 %v2483_v53  ;;  %v4031_v27 = vcvt.s32.f32 %v2495_v22  ;;  %v2711_v23 = vunpack.c.3.s8 %v9994_v56  ;;  %v5567_v58 = vpack.c.bf16 %v4439_v5, %v4427_v52 }
 0x435   : > { %v8323_v11 = vpop.eup %8322  ;;  %6704 = vmatpush.bf16.msrb.mxu2 %v5483_v63  ;;  %v5675_v17 = vpack.c.bf16 %v4655_v33, %v4643_v6  ;;  %v2867_v61 = vunpack.c.0.s8 %v1907_v45  ;;  %v2879_v44 = vunpack.c.1.s8 %v1907_v45  ;;  %v4235_v0 = vcvt.s32.f32 %v2699_v42  ;;  %v10013_v45 = vpop.f32.mrf.mxu2  ;;  %v1800_v6 = vld [vmem:[%s8946_s11 + $0x2e0] sm:$0xff]  ;;  %v2027_v42 = vld [vmem:[%s8946_s11 + $0x9f8] sm:$0xff] }
 0x436   : > { %7276 = vst [vmem:[%s9629_s3 + $0x20] sm:$0xff] %v8323_v11  ;;  %v5363_v18 = vpack.c.bf16 %v4031_v27, %v4019_v34  ;;  %v4247_v28 = vcvt.s32.f32 %v2711_v23  ;;  %v3083_v55 = vunpack.c.2.s8 %v1955_v43  ;;  %6718 = vmatpush.bf16.msrb.mxu3 %v5567_v58  ;;  %v3095_v32 = vunpack.c.3.s8 %v1955_v43 }
 0x437   : > { %6730 = vmatpush.bf16.msra.mxu0 %v5675_v17  ;;  %v4403_v14 = vcvt.s32.f32 %v2867_v61  ;;  %v4415_v10 = vcvt.s32.f32 %v2879_v44  ;;  %v3419_v8 = vunpack.c.2.s8 %v10002_v60  ;;  %v3431_v31 = vunpack.c.3.s8 %v10002_v60 }
 0x438   : > { %6693 = vmatpush.bf16.msrb.mxu1 %v5363_v18  ;;  %v5471_v59 = vpack.c.bf16 %v4247_v28, %v4235_v0  ;;  %v4619_v13 = vcvt.s32.f32 %v3083_v55  ;;  %v2268_v7 = vunpack.c.2.s8 %v10005_v40  ;;  %v4631_v54 = vcvt.s32.f32 %v3095_v32  ;;  %v1740_v32 = vld [vmem:[%s8946_s11 + $0x100] sm:$0xff] }
 0x439   : > { %v5555_v46 = vpack.c.bf16 %v4415_v10, %v4403_v14  ;;  %v4955_v30 = vcvt.s32.f32 %v3419_v8  ;;  %v2280_v26 = vunpack.c.3.s8 %v10005_v40  ;;  %v4967_v49 = vcvt.s32.f32 %v3431_v31 }
 0x43a   : > { %6705 = vmatpush.bf16.msrb.mxu2 %v5471_v59  ;;  %v3804_v37 = vcvt.s32.f32 %v2268_v7  ;;  %v2675_v35 = vunpack.c.0.s8 %v9994_v56  ;;  %v2687_v62 = vunpack.c.1.s8 %v9994_v56  ;;  %v5663_v9 = vpack.c.bf16 %v4631_v54, %v4619_v13  ;;  %v6515_v33 = vpop.f32.mrf.mxu3 }
 0x43b   : > { %6719 = vmatpush.bf16.msrb.mxu3 %v5555_v46  ;;  %v3816_v21 = vcvt.s32.f32 %v2280_v26  ;;  %6694 = vmatmul.bf16.vlgmr.msrb.gmra.mxu1 %v9254_v50  ;;  %v3059_v39 = vunpack.c.0.s8 %v1955_v43  ;;  %v3071_v19 = vunpack.c.1.s8 %v1955_v43  ;;  %v5831_v57 = vpack.c.bf16 %v4967_v49, %v4955_v30 }
 0x43c   : > { %v4211_v3 = vcvt.s32.f32 %v2675_v35  ;;  %v4223_v52 = vcvt.s32.f32 %v2687_v62  ;;  %v3395_v53 = vunpack.c.0.s8 %v10002_v60  ;;  %6731 = vmatpush.bf16.msra.mxu0 %v5663_v9  ;;  %v3407_v56 = vunpack.c.1.s8 %v10002_v60 }
 0x43d   : > { %v5256_v22 = vpack.c.bf16 %v3816_v21, %v3804_v37  ;;  %v4595_v63 = vcvt.s32.f32 %v3059_v39  ;;  %v4607_v5 = vcvt.s32.f32 %v3071_v19  ;;  %6738 = vmatpush.bf16.msra.mxu1 %v5831_v57  ;;  %v3611_v34 = vunpack.c.2.s8 %v2087_v29  ;;  %v6502_v0 = vpop.f32.mrf.mxu2  ;;  %v2075_v21 = vld [vmem:[%s8946_s11 + $0xb78] sm:$0xff] }
 0x43e   : > { %v5459_v15 = vpack.c.bf16 %v4223_v52, %v4211_v3  ;;  %6720 = vmatmul.bf16.vlgmr.msrb.gmra.mxu3 %v9335_v51  ;;  %v4931_v43 = vcvt.s32.f32 %v3395_v53  ;;  %v3623_v27 = vunpack.c.3.s8 %v2087_v29  ;;  %v4943_v11 = vcvt.s32.f32 %v3407_v56 }
 0x43f   : > { %6764 = vmatpush.bf16.msra.mxu3 %v5256_v22  ;;  %v5651_v23 = vpack.c.bf16 %v4607_v5, %v4595_v63  ;;  %v2244_v58 = vunpack.c.0.s8 %v10005_v40  ;;  %v2256_v17 = vunpack.c.1.s8 %v10005_v40  ;;  %v5147_v60 = vcvt.s32.f32 %v3611_v34  ;;  %v1788_v63 = vld [vmem:[%s8946_s11 + $0x280] sm:$0xff] }
 0x440   : > { %6706 = vmatpush.bf16.msrb.mxu2 %v5459_v15  ;;  %v5159_v61 = vcvt.s32.f32 %v3623_v27  ;;  %v2460_v44 = vunpack.c.2.s8 %v1800_v6  ;;  %v2472_v18 = vunpack.c.3.s8 %v1800_v6  ;;  %v5819_v28 = vpack.c.bf16 %v4943_v11, %v4931_v43  ;;  %v2015_v15 = vld [vmem:[%s8946_s11 + $0x998] sm:$0xff] }
 0x441   : > { %6732 = vmatpush.bf16.msra.mxu0 %v5651_v23  ;;  %v3780_v55 = vcvt.s32.f32 %v2244_v58  ;;  %v3792_v14 = vcvt.s32.f32 %v2256_v17  ;;  %v3371_v10 = vunpack.c.2.s8 %v2027_v42  ;;  %v3383_v31 = vunpack.c.3.s8 %v2027_v42 }
 0x442   : > { %v5927_v8 = vpack.c.bf16 %v5159_v61, %v5147_v60  ;;  %v3996_v59 = vcvt.s32.f32 %v2460_v44  ;;  %v4008_v13 = vcvt.s32.f32 %v2472_v18  ;;  %6739 = vmatpush.bf16.msra.mxu1 %v5819_v28  ;;  %v3587_v46 = vunpack.c.0.s8 %v2087_v29 }
 0x443   : > { %v5244_v7 = vpack.c.bf16 %v3792_v14, %v3780_v55  ;;  %6707 = vmatmul.bf16.vlgmr.msrb.gmra.mxu2 %v9279_v12  ;;  %v4907_v40 = vcvt.s32.f32 %v3371_v10  ;;  %v3599_v54 = vunpack.c.1.s8 %v2087_v29  ;;  %v4919_v26 = vcvt.s32.f32 %v3383_v31 }
 0x444   : > { %6751 = vmatpush.bf16.msra.mxu2 %v5927_v8  ;;  %v5352_v30 = vpack.c.bf16 %v4008_v13, %v3996_v59  ;;  %6733 = vmatmul.bf16.vlgmr.msra.gmra.mxu0 %v9348_v20  ;;  %v2220_v36 = vunpack.c.2.s8 %v1740_v32  ;;  %v2232_v49 = vunpack.c.3.s8 %v1740_v32  ;;  %v5123_v37 = vcvt.s32.f32 %v3587_v46 }
 0x445   : > { %6765 = vmatpush.bf16.msra.mxu3 %v5244_v7  ;;  %v5135_v35 = vcvt.s32.f32 %v3599_v54  ;;  %v2436_v62 = vunpack.c.0.s8 %v1800_v6  ;;  %v2448_v9 = vunpack.c.1.s8 %v1800_v6  ;;  %v5807_v39 = vpack.c.bf16 %v4919_v26, %v4907_v40  ;;  %v2063_v26 = vld [vmem:[%s8946_s11 + $0xb18] sm:$0xff] }
 0x446   : > { %6777 = vmatpush.bf16.msrb.mxu0 %v5352_v30  ;;  %v3756_v19 = vcvt.s32.f32 %v2220_v36  ;;  %v3768_v57 = vcvt.s32.f32 %v2232_v49  ;;  %v10033_v29 = vadd.f32 %v9990_v38, %v9977_v47  ;;  %v3347_v22 = vunpack.c.0.s8 %v2027_v42 }
 0x447   : > { %v5915_v3 = vpack.c.bf16 %v5135_v35, %v5123_v37  ;;  %v3972_v52 = vcvt.s32.f32 %v2436_v62  ;;  %v3984_v53 = vcvt.s32.f32 %v2448_v9  ;;  %6740 = vmatpush.bf16.msra.mxu1 %v5807_v39  ;;  %v3359_v56 = vunpack.c.1.s8 %v2027_v42  ;;  %v1728_v42 = vld [vmem:[%s8946_s11 + $0xa0] sm:$0xff] }
 0x448   : > { %v5232_v5 = vpack.c.bf16 %v3768_v57, %v3756_v19  ;;  %v3563_v33 = vunpack.c.2.s8 %v2075_v21  ;;  %v3575_v6 = vunpack.c.3.s8 %v2075_v21  ;;  %v4883_v34 = vcvt.s32.f32 %v3347_v22 }
 0x449   : > { %6752 = vmatpush.bf16.msra.mxu2 %v5915_v3  ;;  %v5340_v43 = vpack.c.bf16 %v3984_v53, %v3972_v52  ;;  %v2196_v27 = vunpack.c.0.s8 %v1740_v32  ;;  %v2208_v23 = vunpack.c.1.s8 %v1740_v32  ;;  %v4895_v47 = vcvt.s32.f32 %v3359_v56  ;;  %v1776_v53 = vld [vmem:[%s8946_s11 + $0x220] sm:$0xff] }
 0x44a   : > { %6766 = vmatpush.bf16.msra.mxu3 %v5232_v5  ;;  %v5099_v38 = vcvt.s32.f32 %v3563_v33  ;;  %v5111_v11 = vcvt.s32.f32 %v3575_v6  ;;  %v2412_v58 = vunpack.c.2.s8 %v1788_v63  ;;  %v2424_v61 = vunpack.c.3.s8 %v1788_v63  ;;  %v2003_v33 = vld [vmem:[%s8946_s11 + $0x938] sm:$0xff] }
 0x44b   : > { %6778 = vmatpush.bf16.msrb.mxu0 %v5340_v43  ;;  %v3732_v17 = vcvt.s32.f32 %v2196_v27  ;;  %v3744_v60 = vcvt.s32.f32 %v2208_v23  ;;  %v3323_v44 = vunpack.c.2.s8 %v2015_v15  ;;  %v5795_v18 = vpack.c.bf16 %v4895_v47, %v4883_v34  ;;  %v10043_v27 = vpop.f32.mrf.mxu1 }
 0x44c   : > { %v5903_v0 = vpack.c.bf16 %v5111_v11, %v5099_v38  ;;  %v3948_v28 = vcvt.s32.f32 %v2412_v58  ;;  %v3335_v55 = vunpack.c.3.s8 %v2015_v15  ;;  %v3960_v10 = vcvt.s32.f32 %v2424_v61  ;;  %v1716_v58 = vld [vmem:[%s8946_s11 + $0x40] sm:$0xff] }
 0x44d   : > { %v5220_v14 = vpack.c.bf16 %v3744_v60, %v3732_v17  ;;  %v4859_v8 = vcvt.s32.f32 %v3323_v44  ;;  %v3539_v32 = vunpack.c.0.s8 %v2075_v21  ;;  %6741 = vmatpush.bf16.msra.mxu1 %v5795_v18  ;;  %v3551_v13 = vunpack.c.1.s8 %v2075_v21 }
 0x44e   : > { %6753 = vmatpush.bf16.msra.mxu2 %v5903_v0  ;;  %v4871_v59 = vcvt.s32.f32 %v3335_v55  ;;  %v2172_v31 = vunpack.c.2.s8 %v1728_v42  ;;  %v2184_v7 = vunpack.c.3.s8 %v1728_v42  ;;  %v5328_v40 = vpack.c.bf16 %v3960_v10, %v3948_v28 }
 0x44f   : > { %6767 = vmatpush.bf16.msra.mxu3 %v5220_v14  ;;  %v5075_v46 = vcvt.s32.f32 %v3539_v32  ;;  %v2388_v54 = vunpack.c.0.s8 %v1788_v63  ;;  %v2400_v30 = vunpack.c.1.s8 %v1788_v63  ;;  %v5087_v49 = vcvt.s32.f32 %v3551_v13  ;;  %v10052_v13 = vpop.f32.mrf.mxu0 }
 0x450   : > { %v5783_v36 = vpack.c.bf16 %v4871_v59, %v4859_v8  ;;  %v3708_v37 = vcvt.s32.f32 %v2172_v31  ;;  %v3720_v35 = vcvt.s32.f32 %v2184_v7  ;;  %6779 = vmatpush.bf16.msrb.mxu0 %v5328_v40  ;;  %v3299_v39 = vunpack.c.0.s8 %v2015_v15  ;;  %v10050_v59 = vld [vmem:[%s8946_s11 + $0xab8] sm:$0xff] }
 0x451   : > { %v3924_v62 = vcvt.s32.f32 %v2388_v54  ;;  %v3936_v9 = vcvt.s32.f32 %v2400_v30  ;;  %v3311_v19 = vunpack.c.1.s8 %v2015_v15  ;;  %v5891_v21 = vpack.c.bf16 %v5087_v49, %v5075_v46 }
 0x452   : > { %6742 = vmatpush.bf16.msra.mxu1 %v5783_v36  ;;  %v5208_v57 = vpack.c.bf16 %v3720_v35, %v3708_v37  ;;  %v3515_v3 = vunpack.c.2.s8 %v2063_v26  ;;  %v3527_v52 = vunpack.c.3.s8 %v2063_v26  ;;  %v4835_v63 = vcvt.s32.f32 %v3299_v39 }
 0x453   : > { %v5316_v22 = vpack.c.bf16 %v3936_v9, %v3924_v62  ;;  %v4847_v5 = vcvt.s32.f32 %v3311_v19  ;;  %v6501_v56 = vadd.f32 %v10013_v45, %v10033_v29  ;;  %6754 = vmatpush.bf16.msra.mxu2 %v5891_v21  ;;  %v2148_v34 = vunpack.c.0.s8 %v1728_v42  ;;  %v1764_v9 = vld [vmem:[%s8946_s11 + $0x1c0] sm:$0xff]  ;;  %v6541_v39 = vpop.f32.mrf.mxu1 }
 0x454   : > { %6768 = vmatpush.bf16.msra.mxu3 %v5208_v57  ;;  %v5051_v6 = vcvt.s32.f32 %v3515_v3  ;;  %v5063_v43 = vcvt.s32.f32 %v3527_v52  ;;  %v2160_v15 = vunpack.c.1.s8 %v1728_v42  ;;  %v2364_v38 = vunpack.c.2.s8 %v1776_v53  ;;  %v1848_v52 = vld [vmem:[%s8946_s11 + $0x460] sm:$0xff] }
 0x455   : > { %6780 = vmatpush.bf16.msrb.mxu0 %v5316_v22  ;;  %v5771_v23 = vpack.c.bf16 %v4847_v5, %v4835_v63  ;;  %v10046_v47 = vadd.f32 %v10007_v4, %v6501_v56  ;;  %v2376_v11 = vunpack.c.3.s8 %v1776_v53  ;;  %v3684_v60 = vcvt.s32.f32 %v2148_v34  ;;  %v10059_v56 = vld [vmem:[%s8946_s11 + $0x760] sm:$0xff] }
 0x456   : > { %v5879_v17 = vpack.c.bf16 %v5063_v43, %v5051_v6  ;;  %v3696_v45 = vcvt.s32.f32 %v2160_v15  ;;  %v3275_v29 = vunpack.c.2.s8 %v2003_v33  ;;  %v3900_v61 = vcvt.s32.f32 %v2364_v38  ;;  %v10061_v15 = vpop.f32.mrf.mxu3 }
 0x457   : > { %6743 = vmatpush.bf16.msra.mxu1 %v5771_v23  ;;  %v3912_v44 = vcvt.s32.f32 %v2376_v11  ;;  %v3287_v18 = vunpack.c.3.s8 %v2003_v33  ;;  %v3491_v42 = vunpack.c.0.s8 %v2063_v26  ;;  %v3503_v55 = vunpack.c.1.s8 %v2063_v26 }
 0x458   : > { %6755 = vmatpush.bf16.msra.mxu2 %v5879_v17  ;;  %v5196_v0 = vpack.c.bf16 %v3696_v45, %v3684_v60  ;;  %v4811_v28 = vcvt.s32.f32 %v3275_v29  ;;  %v2124_v14 = vunpack.c.2.s8 %v1716_v58  ;;  %v2136_v32 = vunpack.c.3.s8 %v1716_v58 }
 0x459   : > { %v5304_v4 = vpack.c.bf16 %v3912_v44, %v3900_v61  ;;  %v4823_v10 = vcvt.s32.f32 %v3287_v18  ;;  %v5027_v8 = vcvt.s32.f32 %v3491_v42  ;;  %v5039_v31 = vcvt.s32.f32 %v3503_v55  ;;  %v10064_v61 = vpop.f32.mrf.mxu2  ;;  %v6580_v44 = vpop.f32.mrf.mxu0 }
 0x45a   : > { %6769 = vmatpush.bf16.msra.mxu3 %v5196_v0  ;;  %v3660_v7 = vcvt.s32.f32 %v2124_v14  ;;  %v2340_v40 = vunpack.c.0.s8 %v1776_v53  ;;  %v2352_v46 = vunpack.c.1.s8 %v1776_v53  ;;  %v3672_v30 = vcvt.s32.f32 %v2136_v32 }
 0x45b   : > { %6781 = vmatpush.bf16.msrb.mxu0 %v5304_v4  ;;  %v5759_v54 = vpack.c.bf16 %v4823_v10, %v4811_v28  ;;  %v3251_v26 = vunpack.c.0.s8 %v2003_v33  ;;  %v3263_v36 = vunpack.c.1.s8 %v2003_v33  ;;  %v5867_v49 = vpack.c.bf16 %v5039_v31, %v5027_v8  ;;  %v1896_v8 = vld [vmem:[%s8946_s11 + $0x5e0] sm:$0xff] }
 0x45c   : > { %v3876_v37 = vcvt.s32.f32 %v2340_v40  ;;  %v3888_v35 = vcvt.s32.f32 %v2352_v46  ;;  %v3467_v62 = vunpack.c.2.s8 %v10050_v59  ;;  %v5184_v19 = vpack.c.bf16 %v3672_v30, %v3660_v7 }
 0x45d   : > { %6744 = vmatpush.bf16.msra.mxu1 %v5759_v54  ;;  %v4787_v21 = vcvt.s32.f32 %v3251_v26  ;;  %v4799_v57 = vcvt.s32.f32 %v3263_v36  ;;  %v3479_v3 = vunpack.c.3.s8 %v10050_v59  ;;  %6756 = vmatpush.bf16.msra.mxu2 %v5867_v49  ;;  %v2100_v63 = vunpack.c.0.s8 %v1716_v58 }
 0x45e   : > { %v5292_v53 = vpack.c.bf16 %v3888_v35, %v3876_v37  ;;  %v5003_v22 = vcvt.s32.f32 %v3467_v62  ;;  %v2112_v5 = vunpack.c.1.s8 %v1716_v58  ;;  %6770 = vmatpush.bf16.msra.mxu3 %v5184_v19  ;;  %v2316_v43 = vunpack.c.2.s8 %v1764_v9  ;;  %v1992_v35 = vld [vmem:[%s8946_s11 + $0x8e0] sm:$0xff] }
 0x45f   : > { %v5747_v33 = vpack.c.bf16 %v4799_v57, %v4787_v21  ;;  %v5015_v6 = vcvt.s32.f32 %v3479_v3  ;;  %v2328_v34 = vunpack.c.3.s8 %v1764_v9  ;;  %v3636_v23 = vcvt.s32.f32 %v2100_v63  ;;  %v1836_v57 = vld [vmem:[%s8946_s11 + $0x400] sm:$0xff] }
 0x460   : > { %6782 = vmatpush.bf16.msrb.mxu0 %v5292_v53  ;;  %v3648_v38 = vcvt.s32.f32 %v2112_v5  ;;  %v2652_v11 = vunpack.c.2.s8 %v1848_v52  ;;  %v2664_v17 = vunpack.c.3.s8 %v1848_v52  ;;  %v3852_v45 = vcvt.s32.f32 %v2316_v43 }
 0x461   : > { %6745 = vmatpush.bf16.msra.mxu1 %v5747_v33  ;;  %v5855_v60 = vpack.c.bf16 %v5015_v6, %v5003_v22  ;;  %v3864_v29 = vcvt.s32.f32 %v2328_v34  ;;  %v3036_v58 = vunpack.c.2.s8 %v10059_v56  ;;  %v3048_v28 = vunpack.c.3.s8 %v10059_v56  ;;  %v6554_v43 = vpop.f32.mrf.mxu2 }
 0x462   : > { %v5172_v18 = vpack.c.bf16 %v3648_v38, %v3636_v23  ;;  %v4188_v42 = vcvt.s32.f32 %v2652_v11  ;;  %v4200_v0 = vcvt.s32.f32 %v2664_v17  ;;  %v3443_v4 = vunpack.c.0.s8 %v10050_v59  ;;  %v1932_v17 = vld [vmem:[%s8946_s11 + $0x700] sm:$0xff] }
 0x463   : > { %6757 = vmatpush.bf16.msra.mxu2 %v5855_v60  ;;  %v5280_v55 = vpack.c.bf16 %v3864_v29, %v3852_v45  ;;  %v4572_v14 = vcvt.s32.f32 %v3036_v58  ;;  %v3455_v10 = vunpack.c.1.s8 %v10050_v59  ;;  %v4584_v31 = vcvt.s32.f32 %v3048_v28 }
 0x464   : > { %6771 = vmatpush.bf16.msra.mxu3 %v5172_v18  ;;  %v5448_v32 = vpack.c.bf16 %v4200_v0, %v4188_v42  ;;  %6746 = vmatmul.bf16.vlgmr.msra.gmra.mxu1 %v9377_v16  ;;  %v2292_v7 = vunpack.c.0.s8 %v1764_v9  ;;  %v2304_v40 = vunpack.c.1.s8 %v1764_v9  ;;  %v4979_v46 = vcvt.s32.f32 %v3443_v4  ;;  %v6567_v9 = vpop.f32.mrf.mxu3 }
 0x465   : > { %6783 = vmatpush.bf16.msrb.mxu0 %v5280_v55  ;;  %v4991_v54 = vcvt.s32.f32 %v3455_v10  ;;  %v2628_v30 = vunpack.c.0.s8 %v1848_v52  ;;  %v2640_v26 = vunpack.c.1.s8 %v1848_v52  ;;  %v5640_v36 = vpack.c.bf16 %v4584_v31, %v4572_v14 }
 0x466   : > { %6790 = vmatpush.bf16.msrb.mxu1 %v5448_v32  ;;  %v3828_v49 = vcvt.s32.f32 %v2292_v7  ;;  %v3840_v37 = vcvt.s32.f32 %v2304_v40  ;;  %v2844_v59 = vunpack.c.2.s8 %v1896_v8  ;;  %v2856_v21 = vunpack.c.3.s8 %v1896_v8  ;;  %v1884_v7 = vld [vmem:[%s8946_s11 + $0x580] sm:$0xff] }
 0x467   : > { %v5843_v62 = vpack.c.bf16 %v4991_v54, %v4979_v46  ;;  %6772 = vmatmul.bf16.vlgmr.msra.gmra.mxu3 %v9159_v2  ;;  %v4164_v39 = vcvt.s32.f32 %v2628_v30  ;;  %v4176_v19 = vcvt.s32.f32 %v2640_v26  ;;  %v3012_v52 = vunpack.c.0.s8 %v10059_v56 }
 0x468   : > { %6816 = vmatpush.bf16.msrb.mxu3 %v5640_v36  ;;  %v5268_v3 = vpack.c.bf16 %v3840_v37, %v3828_v49  ;;  %v4380_v53 = vcvt.s32.f32 %v2844_v59  ;;  %v3024_v22 = vunpack.c.1.s8 %v10059_v56  ;;  %v4392_v5 = vcvt.s32.f32 %v2856_v21  ;;  %v1980_v37 = vld [vmem:[%s8946_s11 + $0x880] sm:$0xff] }
 0x469   : > { %6758 = vmatpush.bf16.msra.mxu2 %v5843_v62  ;;  %v5436_v63 = vpack.c.bf16 %v4176_v19, %v4164_v39  ;;  %v3228_v33 = vunpack.c.2.s8 %v1992_v35  ;;  %v3240_v6 = vunpack.c.3.s8 %v1992_v35  ;;  %v4548_v34 = vcvt.s32.f32 %v3012_v52  ;;  %v1824_v19 = vld [vmem:[%s8946_s11 + $0x3a0] sm:$0xff] }
 0x46a   : > { %6784 = vmatpush.bf16.msrb.mxu0 %v5268_v3  ;;  %v4560_v23 = vcvt.s32.f32 %v3024_v22  ;;  %v2604_v38 = vunpack.c.2.s8 %v1836_v57  ;;  %v2616_v11 = vunpack.c.3.s8 %v1836_v57  ;;  %v5544_v60 = vpack.c.bf16 %v4392_v5, %v4380_v53 }
 0x46b   : > { %6791 = vmatpush.bf16.msrb.mxu1 %v5436_v63  ;;  %v4764_v45 = vcvt.s32.f32 %v3228_v33  ;;  %v4776_v29 = vcvt.s32.f32 %v3240_v6  ;;  %v2820_v58 = vunpack.c.0.s8 %v1896_v8  ;;  %v2832_v42 = vunpack.c.1.s8 %v1896_v8 }
 0x46c   : > { %v5628_v44 = vpack.c.bf16 %v4560_v23, %v4548_v34  ;;  %6759 = vmatmul.bf16.vlgmr.msra.gmra.mxu2 %v9385_v41  ;;  %v4140_v56 = vcvt.s32.f32 %v2604_v38  ;;  %v4152_v18 = vcvt.s32.f32 %v2616_v11  ;;  %v2988_v55 = vunpack.c.2.s8 %v1932_v17 }
 0x46d   : > { %6803 = vmatpush.bf16.msrb.mxu2 %v5544_v60  ;;  %v5736_v0 = vpack.c.bf16 %v4776_v29, %v4764_v45  ;;  %6785 = vmatmul.bf16.vlgmr.msrb.gmra.mxu0 %v9180_v24  ;;  %v4356_v28 = vcvt.s32.f32 %v2820_v58  ;;  %v3000_v14 = vunpack.c.3.s8 %v1932_v17  ;;  %v4368_v10 = vcvt.s32.f32 %v2832_v42 }
 0x46e   : > { %6817 = vmatpush.bf16.msrb.mxu3 %v5628_v44  ;;  %v5424_v4 = vpack.c.bf16 %v4152_v18, %v4140_v56  ;;  %v3204_v32 = vunpack.c.0.s8 %v1992_v35  ;;  %v3216_v31 = vunpack.c.1.s8 %v1992_v35  ;;  %v4524_v40 = vcvt.s32.f32 %v2988_v55 }
 0x46f   : > { %6829 = vmatpush.bf16.msra.mxu0 %v5736_v0  ;;  %v4536_v46 = vcvt.s32.f32 %v3000_v14  ;;  %v6527_v8 = vadd.f32 %v9996_v48, %v10046_v47  ;;  %v2580_v54 = vunpack.c.0.s8 %v1836_v57  ;;  %v5532_v30 = vpack.c.bf16 %v4368_v10, %v4356_v28  ;;  %v1872_v28 = vld [vmem:[%s8946_s11 + $0x520] sm:$0xff] }
 0x470   : > { %6792 = vmatpush.bf16.msrb.mxu1 %v5424_v4  ;;  %v4740_v26 = vcvt.s32.f32 %v3204_v32  ;;  %v4752_v36 = vcvt.s32.f32 %v3216_v31  ;;  %v2592_v49 = vunpack.c.1.s8 %v1836_v57  ;;  %v2796_v35 = vunpack.c.2.s8 %v1884_v7 }
 0x471   : > { %v5616_v59 = vpack.c.bf16 %v4536_v46, %v4524_v40  ;;  %v6540_v62 = vadd.f32 %v10043_v27, %v6527_v8  ;;  %v4116_v39 = vcvt.s32.f32 %v2580_v54  ;;  %6804 = vmatpush.bf16.msrb.mxu2 %v5532_v30  ;;  %v2808_v3 = vunpack.c.3.s8 %v1884_v7  ;;  %v1920_v27 = vld [vmem:[%s8946_s11 + $0x6a0] sm:$0xff] }
 0x472   : > { %v5724_v21 = vpack.c.bf16 %v4752_v36, %v4740_v26  ;;  %v4128_v9 = vcvt.s32.f32 %v2592_v49  ;;  %v2964_v53 = vunpack.c.0.s8 %v1932_v17  ;;  %v4332_v48 = vcvt.s32.f32 %v2796_v35 }
 0x473   : > { %6818 = vmatpush.bf16.msrb.mxu3 %v5616_v59  ;;  %v2976_v47 = vunpack.c.1.s8 %v1932_v17  ;;  %v3180_v52 = vunpack.c.2.s8 %v1980_v37  ;;  %v3192_v22 = vunpack.c.3.s8 %v1980_v37  ;;  %v4344_v63 = vcvt.s32.f32 %v2808_v3  ;;  %v1968_v59 = vld [vmem:[%s8946_s11 + $0x820] sm:$0xff] }
 0x474   : > { %6830 = vmatpush.bf16.msra.mxu0 %v5724_v21  ;;  %v5412_v57 = vpack.c.bf16 %v4128_v9, %v4116_v39  ;;  %v4500_v5 = vcvt.s32.f32 %v2964_v53  ;;  %v2556_v33 = vunpack.c.2.s8 %v1824_v19  ;;  %v2568_v23 = vunpack.c.3.s8 %v1824_v19  ;;  %v1812_v21 = vld [vmem:[%s8946_s11 + $0x340] sm:$0xff] }
 0x475   : > { %v4512_v6 = vcvt.s32.f32 %v2976_v47  ;;  %v4716_v43 = vcvt.s32.f32 %v3180_v52  ;;  %v4728_v34 = vcvt.s32.f32 %v3192_v22  ;;  %v5520_v38 = vpack.c.bf16 %v4344_v63, %v4332_v48  ;;  %v10096_v48 = vpop.f32.mrf.mxu1 }
 0x476   : > { %6793 = vmatpush.bf16.msrb.mxu1 %v5412_v57  ;;  %v4092_v11 = vcvt.s32.f32 %v2556_v33  ;;  %v2772_v60 = vunpack.c.0.s8 %v1884_v7  ;;  %v2784_v45 = vunpack.c.1.s8 %v1884_v7  ;;  %v4104_v58 = vcvt.s32.f32 %v2568_v23 }
 0x477   : > { %v5604_v29 = vpack.c.bf16 %v4512_v6, %v4500_v5  ;;  %v5712_v17 = vpack.c.bf16 %v4728_v34, %v4716_v43  ;;  %v2940_v44 = vunpack.c.2.s8 %v1920_v27  ;;  %6805 = vmatpush.bf16.msrb.mxu2 %v5520_v38  ;;  %v2952_v42 = vunpack.c.3.s8 %v1920_v27  ;;  %v1908_v5 = vld [vmem:[%s8946_s11 + $0x640] sm:$0xff] }
 0x478   : > { %v4308_v56 = vcvt.s32.f32 %v2772_v60  ;;  %v4320_v18 = vcvt.s32.f32 %v2784_v45  ;;  %v3156_v0 = vunpack.c.0.s8 %v1980_v37  ;;  %v5400_v55 = vpack.c.bf16 %v4104_v58, %v4092_v11 }
 0x479   : > { %6819 = vmatpush.bf16.msrb.mxu3 %v5604_v29  ;;  %6831 = vmatpush.bf16.msra.mxu0 %v5712_v17  ;;  %v4476_v14 = vcvt.s32.f32 %v2940_v44  ;;  %v3168_v4 = vunpack.c.1.s8 %v1980_v37  ;;  %v10089_v10 = vadd.f32 %v10052_v13, %v10061_v15  ;;  %v4488_v31 = vcvt.s32.f32 %v2952_v42 }
 0x47a   : > { %v5508_v32 = vpack.c.bf16 %v4320_v18, %v4308_v56  ;;  %v4692_v7 = vcvt.s32.f32 %v3156_v0  ;;  %v2532_v40 = vunpack.c.0.s8 %v1824_v19  ;;  %6794 = vmatpush.bf16.msrb.mxu1 %v5400_v55  ;;  %v2544_v8 = vunpack.c.1.s8 %v1824_v19  ;;  %v10100_v56 = vld [vmem:[%s8946_s11 + $0x4c0] sm:$0xff]  ;;  %v10102_v18 = vpop.f32.mrf.mxu0 }
 0x47b   : > { %v4704_v46 = vcvt.s32.f32 %v3168_v4  ;;  %v2748_v54 = vunpack.c.2.s8 %v1872_v28  ;;  %v2760_v30 = vunpack.c.3.s8 %v1872_v28  ;;  %v5592_v26 = vpack.c.bf16 %v4488_v31, %v4476_v14 }
 0x47c   : > { %6806 = vmatpush.bf16.msrb.mxu2 %v5508_v32  ;;  %v4068_v36 = vcvt.s32.f32 %v2532_v40  ;;  %v6553_v49 = vadd.f32 %v10064_v61, %v6540_v62  ;;  %v7189_v37 = vperm.slane %v9981_v1, 5  ;;  %v4080_v15 = vcvt.s32.f32 %v2544_v8 }
 0x47d   : > { %v5700_v13 = vpack.c.bf16 %v4704_v46, %v4692_v7  ;;  %v4284_v39 = vcvt.s32.f32 %v2748_v54  ;;  %v4296_v35 = vcvt.s32.f32 %v2760_v30  ;;  %6820 = vmatpush.bf16.msrb.mxu3 %v5592_v26  ;;  %v7229_v19 = vperm.slane %v9987_v25, 5  ;;  %v1956_v7 = vld [vmem:[%s8946_s11 + $0x7c0] sm:$0xff]  ;;  %v6593_v40 = vpop.f32.mrf.mxu1 }
 0x47e   : > { %v7213_v9 = vmul.f32 %v7189_v37, %v6553_v49  ;;  %v2916_v3 = vunpack.c.0.s8 %v1920_v27  ;;  %v2928_v53 = vunpack.c.1.s8 %v1920_v27  ;;  %v5388_v47 = vpack.c.bf16 %v4080_v15, %v4068_v36  ;;  %v10108_v26 = vld [vmem:[%s8946_s11 + $0xa60] sm:$0xff]  ;;  %v10111_v15 = vld [vmem:[%s8946_s11 + $0x168] sm:$0xff] }
 0x47f   : > { %6832 = vmatpush.bf16.msra.mxu0 %v5700_v13  ;;  %v5496_v61 = vpack.c.bf16 %v4296_v35, %v4284_v39  ;;  %v3132_v62 = vunpack.c.2.s8 %v1968_v59  ;;  %v3144_v1 = vunpack.c.3.s8 %v1968_v59  ;;  %v2508_v63 = vunpack.c.2.s8 %v1812_v21  ;;  %v10113_v39 = vpop.f32.mrf.mxu3 }
 0x480   : > { %v7253_v52 = vadd.f32 %v7229_v19, %v7213_v9  ;;  %v4452_v22 = vcvt.s32.f32 %v2916_v3  ;;  %v4464_v57 = vcvt.s32.f32 %v2928_v53  ;;  %6795 = vmatpush.bf16.msrb.mxu1 %v5388_v47  ;;  %v2520_v25 = vunpack.c.3.s8 %v1812_v21 }
 0x481   : > { %6807 = vmatpush.bf16.msrb.mxu2 %v5496_v61  ;;  %v4668_v33 = vcvt.s32.f32 %v3132_v62  ;;  %v4680_v6 = vcvt.s32.f32 %v3144_v1  ;;  %v2724_v43 = vunpack.c.0.s8 %v1872_v28  ;;  %v4044_v34 = vcvt.s32.f32 %v2508_v63 }
 0x482   : > { %8324 = vtanh.f32 %v7253_v52  ;;  %v5580_v27 = vpack.c.bf16 %v4464_v57, %v4452_v22  ;;  %v2736_v23 = vunpack.c.1.s8 %v1872_v28  ;;  %v4056_v11 = vcvt.s32.f32 %v2520_v25  ;;  %v10119_v57 = vpop.f32.mrf.mxu2  ;;  %v6632_v25 = vpop.f32.mrf.mxu0 }
 0x483   : > { %v5688_v38 = vpack.c.bf16 %v4680_v6, %v4668_v33  ;;  %v4260_v60 = vcvt.s32.f32 %v2724_v43  ;;  %v2892_v45 = vunpack.c.2.s8 %v1908_v5  ;;  %v2904_v17 = vunpack.c.3.s8 %v1908_v5 }
 0x484   : > { %6821 = vmatpush.bf16.msrb.mxu3 %v5580_v27  ;;  %v4272_v29 = vcvt.s32.f32 %v2736_v23  ;;  %v3108_v58 = vunpack.c.0.s8 %v1968_v59  ;;  %v3120_v44 = vunpack.c.1.s8 %v1968_v59  ;;  %v5376_v42 = vpack.c.bf16 %v4056_v11, %v4044_v34 }
 0x485   : > { %6833 = vmatpush.bf16.msra.mxu0 %v5688_v38  ;;  %v4428_v0 = vcvt.s32.f32 %v2892_v45  ;;  %v2484_v55 = vunpack.c.0.s8 %v1812_v21  ;;  %v2496_v28 = vunpack.c.1.s8 %v1812_v21  ;;  %v4440_v4 = vcvt.s32.f32 %v2904_v17 }
 0x486   : > { %v5484_v14 = vpack.c.bf16 %v4272_v29, %v4260_v60  ;;  %v4644_v32 = vcvt.s32.f32 %v3108_v58  ;;  %v4656_v31 = vcvt.s32.f32 %v3120_v44  ;;  %6796 = vmatpush.bf16.msrb.mxu1 %v5376_v42  ;;  %v2700_v54 = vunpack.c.2.s8 %v10100_v56  ;;  %v2088_v29 = vld [vmem:[%s8946_s11 + $0xbe0] sm:$0xff] }
 0x487   : > { %v4020_v46 = vcvt.s32.f32 %v2484_v55  ;;  %v4032_v8 = vcvt.s32.f32 %v2496_v28  ;;  %v2712_v30 = vunpack.c.3.s8 %v10100_v56  ;;  %v5568_v49 = vpack.c.bf16 %v4440_v4, %v4428_v0  ;;  %v6619_v4 = vpop.f32.mrf.mxu3 }
 0x488   : > { %v8325_v36 = vpop.eup %8324  ;;  %6808 = vmatpush.bf16.msrb.mxu2 %v5484_v14  ;;  %v5676_v37 = vpack.c.bf16 %v4656_v31, %v4644_v32  ;;  %v2868_v59 = vunpack.c.0.s8 %v1908_v5  ;;  %v2880_v13 = vunpack.c.1.s8 %v1908_v5  ;;  %v4236_v21 = vcvt.s32.f32 %v2700_v54  ;;  %v1801_v14 = vld [vmem:[%s8946_s11 + $0x2e8] sm:$0xff] }
 0x489   : > { %7277 = vst [vmem:[%s9629_s3 + $0x28] sm:$0xff] %v8325_v36  ;;  %v5364_v35 = vpack.c.bf16 %v4032_v8, %v4020_v46  ;;  %v4248_v9 = vcvt.s32.f32 %v2712_v30  ;;  %v3084_v19 = vunpack.c.2.s8 %v1956_v7  ;;  %6822 = vmatpush.bf16.msrb.mxu3 %v5568_v49  ;;  %v3096_v47 = vunpack.c.3.s8 %v1956_v7  ;;  %v2028_v46 = vld [vmem:[%s8946_s11 + $0xa00] sm:$0xff] }
 0x48a   : > { %6834 = vmatpush.bf16.msra.mxu0 %v5676_v37  ;;  %v4404_v3 = vcvt.s32.f32 %v2868_v59  ;;  %v4416_v53 = vcvt.s32.f32 %v2880_v13  ;;  %v3420_v61 = vunpack.c.2.s8 %v10108_v26  ;;  %v3432_v52 = vunpack.c.3.s8 %v10108_v26  ;;  %v6606_v13 = vpop.f32.mrf.mxu2 }
 0x48b   : > { %6797 = vmatpush.bf16.msrb.mxu1 %v5364_v35  ;;  %v5472_v62 = vpack.c.bf16 %v4248_v9, %v4236_v21  ;;  %v4620_v1 = vcvt.s32.f32 %v3084_v19  ;;  %v2269_v22 = vunpack.c.2.s8 %v10111_v15  ;;  %v4632_v5 = vcvt.s32.f32 %v3096_v47 }
 0x48c   : > { %v5556_v63 = vpack.c.bf16 %v4416_v53, %v4404_v3  ;;  %v4956_v33 = vcvt.s32.f32 %v3420_v61  ;;  %v2281_v6 = vunpack.c.3.s8 %v10111_v15  ;;  %v4968_v43 = vcvt.s32.f32 %v3432_v52  ;;  %v1741_v3 = vld [vmem:[%s8946_s11 + $0x108] sm:$0xff] }
 0x48d   : > { %6809 = vmatpush.bf16.msrb.mxu2 %v5472_v62  ;;  %v3805_v27 = vcvt.s32.f32 %v2269_v22  ;;  %v2676_v34 = vunpack.c.0.s8 %v10100_v56  ;;  %v2688_v23 = vunpack.c.1.s8 %v10100_v56  ;;  %v5664_v38 = vpack.c.bf16 %v4632_v5, %v4620_v1 }
 0x48e   : > { %6823 = vmatpush.bf16.msrb.mxu3 %v5556_v63  ;;  %v3817_v11 = vcvt.s32.f32 %v2281_v6  ;;  %6798 = vmatmul.bf16.vlgmr.msrb.gmra.mxu1 %v9254_v50  ;;  %v3060_v60 = vunpack.c.0.s8 %v1956_v7  ;;  %v3072_v45 = vunpack.c.1.s8 %v1956_v7  ;;  %v5832_v17 = vpack.c.bf16 %v4968_v43, %v4956_v33 }
 0x48f   : > { %v4212_v58 = vcvt.s32.f32 %v2676_v34  ;;  %v4224_v44 = vcvt.s32.f32 %v2688_v23  ;;  %v3396_v42 = vunpack.c.0.s8 %v10108_v26  ;;  %6835 = vmatpush.bf16.msra.mxu0 %v5664_v38  ;;  %v3408_v56 = vunpack.c.1.s8 %v10108_v26  ;;  %v2076_v23 = vld [vmem:[%s8946_s11 + $0xb80] sm:$0xff] }
 0x490   : > { %v5257_v0 = vpack.c.bf16 %v3817_v11, %v3805_v27  ;;  %v4596_v55 = vcvt.s32.f32 %v3060_v60  ;;  %v4608_v28 = vcvt.s32.f32 %v3072_v45  ;;  %6842 = vmatpush.bf16.msra.mxu1 %v5832_v17  ;;  %v3612_v7 = vunpack.c.2.s8 %v2088_v29 }
 0x491   : > { %v5460_v32 = vpack.c.bf16 %v4224_v44, %v4212_v58  ;;  %6824 = vmatmul.bf16.vlgmr.msrb.gmra.mxu3 %v9335_v51  ;;  %v4932_v31 = vcvt.s32.f32 %v3396_v42  ;;  %v3624_v40 = vunpack.c.3.s8 %v2088_v29  ;;  %v4944_v54 = vcvt.s32.f32 %v3408_v56  ;;  %v1789_v42 = vld [vmem:[%s8946_s11 + $0x288] sm:$0xff] }
 0x492   : > { %6868 = vmatpush.bf16.msra.mxu3 %v5257_v0  ;;  %v5652_v8 = vpack.c.bf16 %v4608_v28, %v4596_v55  ;;  %v2245_v30 = vunpack.c.0.s8 %v10111_v15  ;;  %v2257_v36 = vunpack.c.1.s8 %v10111_v15  ;;  %v5148_v26 = vcvt.s32.f32 %v3612_v7 }
 0x493   : > { %6810 = vmatpush.bf16.msrb.mxu2 %v5460_v32  ;;  %v5160_v49 = vcvt.s32.f32 %v3624_v40  ;;  %v2461_v37 = vunpack.c.2.s8 %v1801_v14  ;;  %v2473_v59 = vunpack.c.3.s8 %v1801_v14  ;;  %v5820_v35 = vpack.c.bf16 %v4944_v54, %v4932_v31 }
 0x494   : > { %6836 = vmatpush.bf16.msra.mxu0 %v5652_v8  ;;  %v3781_v21 = vcvt.s32.f32 %v2245_v30  ;;  %v3793_v9 = vcvt.s32.f32 %v2257_v36  ;;  %v3372_v19 = vunpack.c.2.s8 %v2028_v46  ;;  %v3384_v62 = vunpack.c.3.s8 %v2028_v46 }
 0x495   : > { %v5928_v53 = vpack.c.bf16 %v5160_v49, %v5148_v26  ;;  %v3997_v47 = vcvt.s32.f32 %v2461_v37  ;;  %v4009_v61 = vcvt.s32.f32 %v2473_v59  ;;  %6843 = vmatpush.bf16.msra.mxu1 %v5820_v35  ;;  %v3588_v52 = vunpack.c.0.s8 %v2088_v29 }
 0x496   : > { %v5245_v1 = vpack.c.bf16 %v3793_v9, %v3781_v21  ;;  %6811 = vmatmul.bf16.vlgmr.msrb.gmra.mxu2 %v9279_v12  ;;  %v4908_v15 = vcvt.s32.f32 %v3372_v19  ;;  %v3600_v22 = vunpack.c.1.s8 %v2088_v29  ;;  %v4920_v5 = vcvt.s32.f32 %v3384_v62 }
 0x497   : > { %6855 = vmatpush.bf16.msra.mxu2 %v5928_v53  ;;  %v5353_v63 = vpack.c.bf16 %v4009_v61, %v3997_v47  ;;  %6837 = vmatmul.bf16.vlgmr.msra.gmra.mxu0 %v9348_v20  ;;  %v2221_v33 = vunpack.c.2.s8 %v1741_v3  ;;  %v2233_v6 = vunpack.c.3.s8 %v1741_v3  ;;  %v5124_v25 = vcvt.s32.f32 %v3588_v52 }
 0x498   : > { %6869 = vmatpush.bf16.msra.mxu3 %v5245_v1  ;;  %v5136_v43 = vcvt.s32.f32 %v3600_v22  ;;  %v2437_v27 = vunpack.c.0.s8 %v1801_v14  ;;  %v2449_v34 = vunpack.c.1.s8 %v1801_v14  ;;  %v5808_v38 = vpack.c.bf16 %v4920_v5, %v4908_v15  ;;  %v2016_v14 = vld [vmem:[%s8946_s11 + $0x9a0] sm:$0xff] }
 0x499   : > { %6881 = vmatpush.bf16.msrb.mxu0 %v5353_v63  ;;  %v3757_v11 = vcvt.s32.f32 %v2221_v33  ;;  %v3769_v60 = vcvt.s32.f32 %v2233_v6  ;;  %v10139_v45 = vadd.f32 %v10096_v48, %v10089_v10  ;;  %v3348_v44 = vunpack.c.0.s8 %v2028_v46  ;;  %v2064_v22 = vld [vmem:[%s8946_s11 + $0xb20] sm:$0xff] }
 0x49a   : > { %v5916_v29 = vpack.c.bf16 %v5136_v43, %v5124_v25  ;;  %v3973_v17 = vcvt.s32.f32 %v2437_v27  ;;  %v3985_v58 = vcvt.s32.f32 %v2449_v34  ;;  %6844 = vmatpush.bf16.msra.mxu1 %v5808_v38  ;;  %v3360_v55 = vunpack.c.1.s8 %v2028_v46  ;;  %v1729_v46 = vld [vmem:[%s8946_s11 + $0xa8] sm:$0xff] }
 0x49b   : > { %v5233_v0 = vpack.c.bf16 %v3769_v60, %v3757_v11  ;;  %v3564_v28 = vunpack.c.2.s8 %v2076_v23  ;;  %v3576_v56 = vunpack.c.3.s8 %v2076_v23  ;;  %v4884_v32 = vcvt.s32.f32 %v3348_v44 }
 0x49c   : > { %6856 = vmatpush.bf16.msra.mxu2 %v5916_v29  ;;  %v5341_v4 = vpack.c.bf16 %v3985_v58, %v3973_v17  ;;  %v2197_v31 = vunpack.c.0.s8 %v1741_v3  ;;  %v2209_v7 = vunpack.c.1.s8 %v1741_v3  ;;  %v4896_v10 = vcvt.s32.f32 %v3360_v55  ;;  %v1777_v29 = vld [vmem:[%s8946_s11 + $0x228] sm:$0xff] }
 0x49d   : > { %6870 = vmatpush.bf16.msra.mxu3 %v5233_v0  ;;  %v5100_v48 = vcvt.s32.f32 %v3564_v28  ;;  %v5112_v40 = vcvt.s32.f32 %v3576_v56  ;;  %v2413_v8 = vunpack.c.2.s8 %v1789_v42  ;;  %v2425_v36 = vunpack.c.3.s8 %v1789_v42  ;;  %v2004_v0 = vld [vmem:[%s8946_s11 + $0x940] sm:$0xff] }
 0x49e   : > { %6882 = vmatpush.bf16.msrb.mxu0 %v5341_v4  ;;  %v3733_v54 = vcvt.s32.f32 %v2197_v31  ;;  %v3745_v30 = vcvt.s32.f32 %v2209_v7  ;;  %v3324_v26 = vunpack.c.2.s8 %v2016_v14  ;;  %v5796_v49 = vpack.c.bf16 %v4896_v10, %v4884_v32  ;;  %v10149_v4 = vpop.f32.mrf.mxu1 }
 0x49f   : > { %v5904_v37 = vpack.c.bf16 %v5112_v40, %v5100_v48  ;;  %v3949_v59 = vcvt.s32.f32 %v2413_v8  ;;  %v3336_v13 = vunpack.c.3.s8 %v2016_v14  ;;  %v3961_v21 = vcvt.s32.f32 %v2425_v36  ;;  %v1717_v48 = vld [vmem:[%s8946_s11 + $0x48] sm:$0xff] }
 0x4a0   : > { %v5221_v35 = vpack.c.bf16 %v3745_v30, %v3733_v54  ;;  %v4860_v9 = vcvt.s32.f32 %v3324_v26  ;;  %v3540_v19 = vunpack.c.0.s8 %v2076_v23  ;;  %6845 = vmatpush.bf16.msra.mxu1 %v5796_v49  ;;  %v3552_v53 = vunpack.c.1.s8 %v2076_v23 }
 0x4a1   : > { %6857 = vmatpush.bf16.msra.mxu2 %v5904_v37  ;;  %v4872_v3 = vcvt.s32.f32 %v3336_v13  ;;  %v2173_v47 = vunpack.c.2.s8 %v1729_v46  ;;  %v2185_v61 = vunpack.c.3.s8 %v1729_v46  ;;  %v5329_v62 = vpack.c.bf16 %v3961_v21, %v3949_v59 }
 0x4a2   : > { %6871 = vmatpush.bf16.msra.mxu3 %v5221_v35  ;;  %v5076_v1 = vcvt.s32.f32 %v3540_v19  ;;  %v2389_v15 = vunpack.c.0.s8 %v1789_v42  ;;  %v2401_v52 = vunpack.c.1.s8 %v1789_v42  ;;  %v5088_v5 = vcvt.s32.f32 %v3552_v53  ;;  %v10158_v19 = vpop.f32.mrf.mxu0 }
 0x4a3   : > { %v5784_v63 = vpack.c.bf16 %v4872_v3, %v4860_v9  ;;  %v3709_v33 = vcvt.s32.f32 %v2173_v47  ;;  %v3721_v6 = vcvt.s32.f32 %v2185_v61  ;;  %6883 = vmatpush.bf16.msrb.mxu0 %v5329_v62  ;;  %v3300_v27 = vunpack.c.0.s8 %v2016_v14  ;;  %v10156_v9 = vld [vmem:[%s8946_s11 + $0xac0] sm:$0xff] }
 0x4a4   : > { %v3925_v25 = vcvt.s32.f32 %v2389_v15  ;;  %v3937_v43 = vcvt.s32.f32 %v2401_v52  ;;  %v3312_v34 = vunpack.c.1.s8 %v2016_v14  ;;  %v5892_v23 = vpack.c.bf16 %v5088_v5, %v5076_v1 }
 0x4a5   : > { %6846 = vmatpush.bf16.msra.mxu1 %v5784_v63  ;;  %v5209_v38 = vpack.c.bf16 %v3721_v6, %v3709_v33  ;;  %v3516_v11 = vunpack.c.2.s8 %v2064_v22  ;;  %v3528_v60 = vunpack.c.3.s8 %v2064_v22  ;;  %v4836_v58 = vcvt.s32.f32 %v3300_v27  ;;  %v1765_v6 = vld [vmem:[%s8946_s11 + $0x1c8] sm:$0xff] }
 0x4a6   : > { %v5317_v17 = vpack.c.bf16 %v3937_v43, %v3925_v25  ;;  %v4848_v44 = vcvt.s32.f32 %v3312_v34  ;;  %v6605_v42 = vadd.f32 %v10119_v57, %v10139_v45  ;;  %6858 = vmatpush.bf16.msra.mxu2 %v5892_v23  ;;  %v2149_v56 = vunpack.c.0.s8 %v1729_v46  ;;  %v6645_v25 = vpop.f32.mrf.mxu1 }
 0x4a7   : > { %6872 = vmatpush.bf16.msra.mxu3 %v5209_v38  ;;  %v5052_v55 = vcvt.s32.f32 %v3516_v11  ;;  %v5064_v28 = vcvt.s32.f32 %v3528_v60  ;;  %v2161_v14 = vunpack.c.1.s8 %v1729_v46  ;;  %v2365_v7 = vunpack.c.2.s8 %v1777_v29  ;;  %v1849_v38 = vld [vmem:[%s8946_s11 + $0x468] sm:$0xff] }
 0x4a8   : > { %6884 = vmatpush.bf16.msrb.mxu0 %v5317_v17  ;;  %v5772_v32 = vpack.c.bf16 %v4848_v44, %v4836_v58  ;;  %v10152_v31 = vadd.f32 %v10113_v39, %v6605_v42  ;;  %v2377_v10 = vunpack.c.3.s8 %v1777_v29  ;;  %v3685_v8 = vcvt.s32.f32 %v2149_v56  ;;  %v10165_v58 = vld [vmem:[%s8946_s11 + $0x768] sm:$0xff] }
 0x4a9   : > { %v5880_v40 = vpack.c.bf16 %v5064_v28, %v5052_v55  ;;  %v3697_v57 = vcvt.s32.f32 %v2161_v14  ;;  %v3276_v45 = vunpack.c.2.s8 %v2004_v0  ;;  %v3901_v54 = vcvt.s32.f32 %v2365_v7  ;;  %v10167_v28 = vpop.f32.mrf.mxu3 }
 0x4aa   : > { %6847 = vmatpush.bf16.msra.mxu1 %v5772_v32  ;;  %v3913_v30 = vcvt.s32.f32 %v2377_v10  ;;  %v3288_v36 = vunpack.c.3.s8 %v2004_v0  ;;  %v3492_v26 = vunpack.c.0.s8 %v2064_v22  ;;  %v3504_v37 = vunpack.c.1.s8 %v2064_v22 }
 0x4ab   : > { %6859 = vmatpush.bf16.msra.mxu2 %v5880_v40  ;;  %v5197_v46 = vpack.c.bf16 %v3697_v57, %v3685_v8  ;;  %v4812_v49 = vcvt.s32.f32 %v3276_v45  ;;  %v2125_v59 = vunpack.c.2.s8 %v1717_v48  ;;  %v2137_v21 = vunpack.c.3.s8 %v1717_v48  ;;  %v10170_v57 = vpop.f32.mrf.mxu2  ;;  %v6684_v45 = vpop.f32.mrf.mxu0 }
 0x4ac   : > { %v5305_v39 = vpack.c.bf16 %v3913_v30, %v3901_v54  ;;  %v4824_v13 = vcvt.s32.f32 %v3288_v36  ;;  %v5028_v35 = vcvt.s32.f32 %v3492_v26  ;;  %v5040_v3 = vcvt.s32.f32 %v3504_v37 }
 0x4ad   : > { %6873 = vmatpush.bf16.msra.mxu3 %v5197_v46  ;;  %v3661_v53 = vcvt.s32.f32 %v2125_v59  ;;  %v2341_v47 = vunpack.c.0.s8 %v1777_v29  ;;  %v2353_v61 = vunpack.c.1.s8 %v1777_v29  ;;  %v3673_v1 = vcvt.s32.f32 %v2137_v21 }
 0x4ae   : > { %6885 = vmatpush.bf16.msrb.mxu0 %v5305_v39  ;;  %v5760_v62 = vpack.c.bf16 %v4824_v13, %v4812_v49  ;;  %v3252_v15 = vunpack.c.0.s8 %v2004_v0  ;;  %v3264_v52 = vunpack.c.1.s8 %v2004_v0  ;;  %v5868_v22 = vpack.c.bf16 %v5040_v3, %v5028_v35  ;;  %v1897_v39 = vld [vmem:[%s8946_s11 + $0x5e8] sm:$0xff] }
 0x4af   : > { %v3877_v63 = vcvt.s32.f32 %v2341_v47  ;;  %v3889_v5 = vcvt.s32.f32 %v2353_v61  ;;  %v3468_v33 = vunpack.c.2.s8 %v10156_v9  ;;  %v5185_v43 = vpack.c.bf16 %v3673_v1, %v3661_v53 }
 0x4b0   : > { %6848 = vmatpush.bf16.msra.mxu1 %v5760_v62  ;;  %v4788_v27 = vcvt.s32.f32 %v3252_v15  ;;  %v4800_v34 = vcvt.s32.f32 %v3264_v52  ;;  %v3480_v23 = vunpack.c.3.s8 %v10156_v9  ;;  %6860 = vmatpush.bf16.msra.mxu2 %v5868_v22  ;;  %v2101_v29 = vunpack.c.0.s8 %v1717_v48  ;;  %v1993_v22 = vld [vmem:[%s8946_s11 + $0x8e8] sm:$0xff] }
 0x4b1   : > { %v5293_v11 = vpack.c.bf16 %v3889_v5, %v3877_v63  ;;  %v5004_v60 = vcvt.s32.f32 %v3468_v33  ;;  %v2113_v17 = vunpack.c.1.s8 %v1717_v48  ;;  %6874 = vmatpush.bf16.msra.mxu3 %v5185_v43  ;;  %v2317_v0 = vunpack.c.2.s8 %v1765_v6  ;;  %v1837_v43 = vld [vmem:[%s8946_s11 + $0x408] sm:$0xff] }
 0x4b2   : > { %v5748_v44 = vpack.c.bf16 %v4800_v34, %v4788_v27  ;;  %v5016_v42 = vcvt.s32.f32 %v3480_v23  ;;  %v2329_v55 = vunpack.c.3.s8 %v1765_v6  ;;  %v3637_v56 = vcvt.s32.f32 %v2101_v29 }
 0x4b3   : > { %6886 = vmatpush.bf16.msrb.mxu0 %v5293_v11  ;;  %v3649_v14 = vcvt.s32.f32 %v2113_v17  ;;  %v2653_v32 = vunpack.c.2.s8 %v1849_v38  ;;  %v2665_v7 = vunpack.c.3.s8 %v1849_v38  ;;  %v3853_v40 = vcvt.s32.f32 %v2317_v0 }
 0x4b4   : > { %6849 = vmatpush.bf16.msra.mxu1 %v5748_v44  ;;  %v5856_v10 = vpack.c.bf16 %v5016_v42, %v5004_v60  ;;  %v3865_v8 = vcvt.s32.f32 %v2329_v55  ;;  %v3037_v48 = vunpack.c.2.s8 %v10165_v58  ;;  %v3049_v26 = vunpack.c.3.s8 %v10165_v58  ;;  %v6658_v44 = vpop.f32.mrf.mxu2 }
 0x4b5   : > { %v5173_v54 = vpack.c.bf16 %v3649_v14, %v3637_v56  ;;  %v4189_v30 = vcvt.s32.f32 %v2653_v32  ;;  %v4201_v36 = vcvt.s32.f32 %v2665_v7  ;;  %v3444_v37 = vunpack.c.0.s8 %v10156_v9  ;;  %v1933_v14 = vld [vmem:[%s8946_s11 + $0x708] sm:$0xff] }
 0x4b6   : > { %6861 = vmatpush.bf16.msra.mxu2 %v5856_v10  ;;  %v5281_v46 = vpack.c.bf16 %v3865_v8, %v3853_v40  ;;  %v4573_v49 = vcvt.s32.f32 %v3037_v48  ;;  %v3456_v59 = vunpack.c.1.s8 %v10156_v9  ;;  %v4585_v35 = vcvt.s32.f32 %v3049_v26 }
 0x4b7   : > { %6875 = vmatpush.bf16.msra.mxu3 %v5173_v54  ;;  %v5449_v13 = vpack.c.bf16 %v4201_v36, %v4189_v30  ;;  %6850 = vmatmul.bf16.vlgmr.msra.gmra.mxu1 %v9377_v16  ;;  %v2293_v21 = vunpack.c.0.s8 %v1765_v6  ;;  %v2305_v3 = vunpack.c.1.s8 %v1765_v6  ;;  %v4980_v53 = vcvt.s32.f32 %v3444_v37  ;;  %v6671_v6 = vpop.f32.mrf.mxu3 }
 0x4b8   : > { %6887 = vmatpush.bf16.msrb.mxu0 %v5281_v46  ;;  %v4992_v47 = vcvt.s32.f32 %v3456_v59  ;;  %v2629_v61 = vunpack.c.0.s8 %v1849_v38  ;;  %v2641_v62 = vunpack.c.1.s8 %v1849_v38  ;;  %v5641_v1 = vpack.c.bf16 %v4585_v35, %v4573_v49 }
 0x4b9   : > { %6894 = vmatpush.bf16.msrb.mxu1 %v5449_v13  ;;  %v3829_v15 = vcvt.s32.f32 %v2293_v21  ;;  %v3841_v52 = vcvt.s32.f32 %v2305_v3  ;;  %v2845_v9 = vunpack.c.2.s8 %v1897_v39  ;;  %v2857_v25 = vunpack.c.3.s8 %v1897_v39  ;;  %v1885_v13 = vld [vmem:[%s8946_s11 + $0x588] sm:$0xff] }
 0x4ba   : > { %v5844_v63 = vpack.c.bf16 %v4992_v47, %v4980_v53  ;;  %6876 = vmatmul.bf16.vlgmr.msra.gmra.mxu3 %v9159_v2  ;;  %v4165_v5 = vcvt.s32.f32 %v2629_v61  ;;  %v4177_v33 = vcvt.s32.f32 %v2641_v62  ;;  %v3013_v23 = vunpack.c.0.s8 %v10165_v58 }
 0x4bb   : > { %6920 = vmatpush.bf16.msrb.mxu3 %v5641_v1  ;;  %v5269_v27 = vpack.c.bf16 %v3841_v52, %v3829_v15  ;;  %v4381_v34 = vcvt.s32.f32 %v2845_v9  ;;  %v3025_v38 = vunpack.c.1.s8 %v10165_v58  ;;  %v4393_v60 = vcvt.s32.f32 %v2857_v25  ;;  %v1981_v1 = vld [vmem:[%s8946_s11 + $0x888] sm:$0xff] }
 0x4bc   : > { %6862 = vmatpush.bf16.msra.mxu2 %v5844_v63  ;;  %v5437_v11 = vpack.c.bf16 %v4177_v33, %v4165_v5  ;;  %v3229_v29 = vunpack.c.2.s8 %v1993_v22  ;;  %v3241_v17 = vunpack.c.3.s8 %v1993_v22  ;;  %v4549_v42 = vcvt.s32.f32 %v3013_v23  ;;  %v1825_v63 = vld [vmem:[%s8946_s11 + $0x3a8] sm:$0xff] }
 0x4bd   : > { %6888 = vmatpush.bf16.msrb.mxu0 %v5269_v27  ;;  %v4561_v0 = vcvt.s32.f32 %v3025_v38  ;;  %v2605_v55 = vunpack.c.2.s8 %v1837_v43  ;;  %v2617_v56 = vunpack.c.3.s8 %v1837_v43  ;;  %v5545_v32 = vpack.c.bf16 %v4393_v60, %v4381_v34 }
 0x4be   : > { %6895 = vmatpush.bf16.msrb.mxu1 %v5437_v11  ;;  %v4765_v7 = vcvt.s32.f32 %v3229_v29  ;;  %v4777_v10 = vcvt.s32.f32 %v3241_v17  ;;  %v2821_v40 = vunpack.c.0.s8 %v1897_v39  ;;  %v2833_v45 = vunpack.c.1.s8 %v1897_v39 }
 0x4bf   : > { %v5629_v8 = vpack.c.bf16 %v4561_v0, %v4549_v42  ;;  %6863 = vmatmul.bf16.vlgmr.msra.gmra.mxu2 %v9385_v41  ;;  %v4141_v58 = vcvt.s32.f32 %v2605_v55  ;;  %v4153_v48 = vcvt.s32.f32 %v2617_v56  ;;  %v2989_v36 = vunpack.c.2.s8 %v1933_v14 }
 0x4c0   : > { %6907 = vmatpush.bf16.msrb.mxu2 %v5545_v32  ;;  %v5737_v54 = vpack.c.bf16 %v4777_v10, %v4765_v7  ;;  %6889 = vmatmul.bf16.vlgmr.msrb.gmra.mxu0 %v9180_v24  ;;  %v4357_v30 = vcvt.s32.f32 %v2821_v40  ;;  %v3001_v26 = vunpack.c.3.s8 %v1933_v14  ;;  %v4369_v49 = vcvt.s32.f32 %v2833_v45  ;;  %v1873_v45 = vld [vmem:[%s8946_s11 + $0x528] sm:$0xff] }
 0x4c1   : > { %6921 = vmatpush.bf16.msrb.mxu3 %v5629_v8  ;;  %v5425_v46 = vpack.c.bf16 %v4153_v48, %v4141_v58  ;;  %v3205_v37 = vunpack.c.0.s8 %v1993_v22  ;;  %v3217_v59 = vunpack.c.1.s8 %v1993_v22  ;;  %v4525_v35 = vcvt.s32.f32 %v2989_v36 }
 0x4c2   : > { %6933 = vmatpush.bf16.msra.mxu0 %v5737_v54  ;;  %v4537_v21 = vcvt.s32.f32 %v3001_v26  ;;  %v6631_v39 = vadd.f32 %v10102_v18, %v10152_v31  ;;  %v2581_v3 = vunpack.c.0.s8 %v1837_v43  ;;  %v5533_v53 = vpack.c.bf16 %v4369_v49, %v4357_v30 }
 0x4c3   : > { %6896 = vmatpush.bf16.msrb.mxu1 %v5425_v46  ;;  %v4741_v47 = vcvt.s32.f32 %v3205_v37  ;;  %v4753_v61 = vcvt.s32.f32 %v3217_v59  ;;  %v2593_v62 = vunpack.c.1.s8 %v1837_v43  ;;  %v2797_v22 = vunpack.c.2.s8 %v1885_v13 }
 0x4c4   : > { %v5617_v15 = vpack.c.bf16 %v4537_v21, %v4525_v35  ;;  %v6644_v52 = vadd.f32 %v10149_v4, %v6631_v39  ;;  %v4117_v9 = vcvt.s32.f32 %v2581_v3  ;;  %6908 = vmatpush.bf16.msrb.mxu2 %v5533_v53  ;;  %v2809_v25 = vunpack.c.3.s8 %v1885_v13  ;;  %v1921_v4 = vld [vmem:[%s8946_s11 + $0x6a8] sm:$0xff] }
 0x4c5   : > { %v5725_v5 = vpack.c.bf16 %v4753_v61, %v4741_v47  ;;  %v4129_v33 = vcvt.s32.f32 %v2593_v62  ;;  %v2965_v6 = vunpack.c.0.s8 %v1933_v14  ;;  %v4333_v18 = vcvt.s32.f32 %v2797_v22  ;;  %v10199_v61 = vld [vmem:[%s8952_s5] sm:$0xff] }
 0x4c6   : > { %6922 = vmatpush.bf16.msrb.mxu3 %v5617_v15  ;;  %v2977_v31 = vunpack.c.1.s8 %v1933_v14  ;;  %v3181_v27 = vunpack.c.2.s8 %v1981_v1  ;;  %v3193_v34 = vunpack.c.3.s8 %v1981_v1  ;;  %v4345_v23 = vcvt.s32.f32 %v2809_v25  ;;  %v1813_v22 = vld [vmem:[%s8946_s11 + $0x348] sm:$0xff] }
 0x4c7   : > { %6934 = vmatpush.bf16.msra.mxu0 %v5725_v5  ;;  %v5413_v43 = vpack.c.bf16 %v4129_v33, %v4117_v9  ;;  %v4501_v38 = vcvt.s32.f32 %v2965_v6  ;;  %v2557_v11 = vunpack.c.2.s8 %v1825_v63  ;;  %v2569_v44 = vunpack.c.3.s8 %v1825_v63  ;;  %v10205_v5 = vld [vmem:[%s8954_s22] sm:$0xff] }
 0x4c8   : > { %v4513_v60 = vcvt.s32.f32 %v2977_v31  ;;  %v4717_v29 = vcvt.s32.f32 %v3181_v27  ;;  %v4729_v17 = vcvt.s32.f32 %v3193_v34  ;;  %v5521_v42 = vpack.c.bf16 %v4345_v23, %v4333_v18 }
 0x4c9   : > { %6897 = vmatpush.bf16.msrb.mxu1 %v5413_v43  ;;  %v4093_v0 = vcvt.s32.f32 %v2557_v11  ;;  %v2773_v55 = vunpack.c.0.s8 %v1885_v13  ;;  %v2785_v56 = vunpack.c.1.s8 %v1885_v13  ;;  %v4105_v7 = vcvt.s32.f32 %v2569_v44  ;;  %v1909_v11 = vld [vmem:[%s8946_s11 + $0x648] sm:$0xff] }
 0x4ca   : > { %v5605_v32 = vpack.c.bf16 %v4513_v60, %v4501_v38  ;;  %v5713_v14 = vpack.c.bf16 %v4729_v17, %v4717_v29  ;;  %v2941_v10 = vunpack.c.2.s8 %v1921_v4  ;;  %6909 = vmatpush.bf16.msrb.mxu2 %v5521_v42  ;;  %v2953_v58 = vunpack.c.3.s8 %v1921_v4 }
 0x4cb   : > { %v4309_v40 = vcvt.s32.f32 %v2773_v55  ;;  %v4321_v8 = vcvt.s32.f32 %v2785_v56  ;;  %v3157_v48 = vunpack.c.0.s8 %v1981_v1  ;;  %v5401_v54 = vpack.c.bf16 %v4105_v7, %v4093_v0 }
 0x4cc   : > { %6923 = vmatpush.bf16.msrb.mxu3 %v5605_v32  ;;  %6935 = vmatpush.bf16.msra.mxu0 %v5713_v14  ;;  %v4477_v30 = vcvt.s32.f32 %v2941_v10  ;;  %v3169_v36 = vunpack.c.1.s8 %v1981_v1  ;;  %v10195_v26 = vadd.f32 %v10158_v19, %v10167_v28  ;;  %v4489_v49 = vcvt.s32.f32 %v2953_v58  ;;  %v1969_v28 = vld [vmem:[%s8946_s11 + $0x828] sm:$0xff] }
 0x4cd   : > { %v5509_v46 = vpack.c.bf16 %v4321_v8, %v4309_v40  ;;  %v4693_v37 = vcvt.s32.f32 %v3157_v48  ;;  %v2533_v59 = vunpack.c.0.s8 %v1825_v63  ;;  %6898 = vmatpush.bf16.msrb.mxu1 %v5401_v54  ;;  %v2545_v35 = vunpack.c.1.s8 %v1825_v63  ;;  %v10212_v58 = vld [vmem:[%s8946_s11 + $0x4c8] sm:$0xff]  ;;  %v10214_v48 = vpop.f32.mrf.mxu0 }
 0x4ce   : > { %v4705_v13 = vcvt.s32.f32 %v3169_v36  ;;  %v2749_v21 = vunpack.c.2.s8 %v1873_v45  ;;  %v2761_v39 = vunpack.c.3.s8 %v1873_v45  ;;  %v5593_v3 = vpack.c.bf16 %v4489_v49, %v4477_v30 }
 0x4cf   : > { %6910 = vmatpush.bf16.msrb.mxu2 %v5509_v46  ;;  %v4069_v53 = vcvt.s32.f32 %v2533_v59  ;;  %v6657_v47 = vadd.f32 %v10170_v57, %v6644_v52  ;;  %v7190_v19 = vperm.slane %v10199_v61, 6  ;;  %v4081_v1 = vcvt.s32.f32 %v2545_v35  ;;  %v10208_v57 = vpop.f32.mrf.mxu1 }
 0x4d0   : > { %v5701_v62 = vpack.c.bf16 %v4705_v13, %v4693_v37  ;;  %v4285_v15 = vcvt.s32.f32 %v2749_v21  ;;  %v4297_v9 = vcvt.s32.f32 %v2761_v39  ;;  %6924 = vmatpush.bf16.msrb.mxu3 %v5593_v3  ;;  %v7230_v33 = vperm.slane %v10205_v5, 6  ;;  %v1957_v13 = vld [vmem:[%s8946_s11 + $0x7c8] sm:$0xff] }
 0x4d1   : > { %v7214_v63 = vmul.f32 %v7190_v19, %v6657_v47  ;;  %v2917_v25 = vunpack.c.0.s8 %v1921_v4  ;;  %v2929_v6 = vunpack.c.1.s8 %v1921_v4  ;;  %v5389_v52 = vpack.c.bf16 %v4081_v1, %v4069_v53  ;;  %v10220_v47 = vld [vmem:[%s8946_s11 + $0xa68] sm:$0xff] }
 0x4d2   : > { %6936 = vmatpush.bf16.msra.mxu0 %v5701_v62  ;;  %v5497_v18 = vpack.c.bf16 %v4297_v9, %v4285_v15  ;;  %v3133_v31 = vunpack.c.2.s8 %v1969_v28  ;;  %v3145_v27 = vunpack.c.3.s8 %v1969_v28  ;;  %v2509_v38 = vunpack.c.2.s8 %v1813_v22  ;;  %v10223_v9 = vld [vmem:[%s8946_s11 + $0x170] sm:$0xff] }
 0x4d3   : > { %v7254_v34 = vadd.f32 %v7230_v33, %v7214_v63  ;;  %v4453_v43 = vcvt.s32.f32 %v2917_v25  ;;  %v4465_v23 = vcvt.s32.f32 %v2929_v6  ;;  %6899 = vmatpush.bf16.msrb.mxu1 %v5389_v52  ;;  %v2521_v17 = vunpack.c.3.s8 %v1813_v22 }
 0x4d4   : > { %6911 = vmatpush.bf16.msrb.mxu2 %v5497_v18  ;;  %v4669_v60 = vcvt.s32.f32 %v3133_v31  ;;  %v4681_v29 = vcvt.s32.f32 %v3145_v27  ;;  %v2725_v44 = vunpack.c.0.s8 %v1873_v45  ;;  %v4045_v42 = vcvt.s32.f32 %v2509_v38 }
 0x4d5   : > { %8326 = vtanh.f32 %v7254_v34  ;;  %v5581_v4 = vpack.c.bf16 %v4465_v23, %v4453_v43  ;;  %v2737_v0 = vunpack.c.1.s8 %v1873_v45  ;;  %v4057_v56 = vcvt.s32.f32 %v2521_v17 }
 0x4d6   : > { %v5689_v55 = vpack.c.bf16 %v4681_v29, %v4669_v60  ;;  %v4261_v32 = vcvt.s32.f32 %v2725_v44  ;;  %v2893_v14 = vunpack.c.2.s8 %v1909_v11  ;;  %v2905_v10 = vunpack.c.3.s8 %v1909_v11 }
 0x4d7   : > { %6925 = vmatpush.bf16.msrb.mxu3 %v5581_v4  ;;  %v4273_v7 = vcvt.s32.f32 %v2737_v0  ;;  %v3109_v40 = vunpack.c.0.s8 %v1969_v28  ;;  %v3121_v8 = vunpack.c.1.s8 %v1969_v28  ;;  %v5377_v54 = vpack.c.bf16 %v4057_v56, %v4045_v42  ;;  %v6697_v35 = vpop.f32.mrf.mxu1  ;;  %v6736_v4 = vpop.f32.mrf.mxu0 }
 0x4d8   : > { %6937 = vmatpush.bf16.msra.mxu0 %v5689_v55  ;;  %v4429_v30 = vcvt.s32.f32 %v2893_v14  ;;  %v2485_v36 = vunpack.c.0.s8 %v1813_v22  ;;  %v2497_v45 = vunpack.c.1.s8 %v1813_v22  ;;  %v4441_v49 = vcvt.s32.f32 %v2905_v10  ;;  %v10225_v22 = vpop.f32.mrf.mxu3 }
 0x4d9   : > { %v5485_v46 = vpack.c.bf16 %v4273_v7, %v4261_v32  ;;  %v4645_v37 = vcvt.s32.f32 %v3109_v40  ;;  %v4657_v59 = vcvt.s32.f32 %v3121_v8  ;;  %6900 = vmatpush.bf16.msrb.mxu1 %v5377_v54  ;;  %v2701_v3 = vunpack.c.2.s8 %v10212_v58  ;;  %v2089_v40 = vld [vmem:[%s8946_s11 + $0xbe8] sm:$0xff] }
 0x4da   : > { %v4021_v21 = vcvt.s32.f32 %v2485_v36  ;;  %v4033_v39 = vcvt.s32.f32 %v2497_v45  ;;  %v2713_v53 = vunpack.c.3.s8 %v10212_v58  ;;  %v5569_v28 = vpack.c.bf16 %v4441_v49, %v4429_v30 }
 0x4db   : > { %v8327_v19 = vpop.eup %8326  ;;  %6912 = vmatpush.bf16.msrb.mxu2 %v5485_v46  ;;  %v5677_v62 = vpack.c.bf16 %v4657_v59, %v4645_v37  ;;  %v2869_v1 = vunpack.c.0.s8 %v1909_v11  ;;  %v2881_v15 = vunpack.c.1.s8 %v1909_v11  ;;  %v4237_v33 = vcvt.s32.f32 %v2701_v3  ;;  %v10231_v11 = vpop.f32.mrf.mxu2  ;;  %v1802_v37 = vld [vmem:[%s8946_s11 + $0x2f0] sm:$0xff]  ;;  %v2029_v3 = vld [vmem:[%s8946_s11 + $0xa08] sm:$0xff] }
 0x4dc   : > { %7278 = vst [vmem:[%s9629_s3 + $0x30] sm:$0xff] %v8327_v19  ;;  %v5365_v63 = vpack.c.bf16 %v4033_v39, %v4021_v21  ;;  %v4249_v25 = vcvt.s32.f32 %v2713_v53  ;;  %v3085_v6 = vunpack.c.2.s8 %v1957_v13  ;;  %6926 = vmatpush.bf16.msrb.mxu3 %v5569_v28  ;;  %v3097_v31 = vunpack.c.3.s8 %v1957_v13 }
 0x4dd   : > { %6938 = vmatpush.bf16.msra.mxu0 %v5677_v62  ;;  %v4405_v52 = vcvt.s32.f32 %v2869_v1  ;;  %v4417_v18 = vcvt.s32.f32 %v2881_v15  ;;  %v3421_v27 = vunpack.c.2.s8 %v10220_v47  ;;  %v3433_v23 = vunpack.c.3.s8 %v10220_v47 }
 0x4de   : > { %6901 = vmatpush.bf16.msrb.mxu1 %v5365_v63  ;;  %v5473_v34 = vpack.c.bf16 %v4249_v25, %v4237_v33  ;;  %v4621_v43 = vcvt.s32.f32 %v3085_v6  ;;  %v2270_v38 = vunpack.c.2.s8 %v10223_v9  ;;  %v4633_v29 = vcvt.s32.f32 %v3097_v31  ;;  %v1742_v31 = vld [vmem:[%s8946_s11 + $0x110] sm:$0xff] }
 0x4df   : > { %v5557_v60 = vpack.c.bf16 %v4417_v18, %v4405_v52  ;;  %v4957_v17 = vcvt.s32.f32 %v3421_v27  ;;  %v2282_v44 = vunpack.c.3.s8 %v10223_v9  ;;  %v4969_v42 = vcvt.s32.f32 %v3433_v23 }
 0x4e0   : > { %6913 = vmatpush.bf16.msrb.mxu2 %v5473_v34  ;;  %v3806_v0 = vcvt.s32.f32 %v2270_v38  ;;  %v2677_v55 = vunpack.c.0.s8 %v10212_v58  ;;  %v2689_v56 = vunpack.c.1.s8 %v10212_v58  ;;  %v5665_v32 = vpack.c.bf16 %v4633_v29, %v4621_v43  ;;  %v6723_v59 = vpop.f32.mrf.mxu3 }
 0x4e1   : > { %6927 = vmatpush.bf16.msrb.mxu3 %v5557_v60  ;;  %v3818_v14 = vcvt.s32.f32 %v2282_v44  ;;  %6902 = vmatmul.bf16.vlgmr.msrb.gmra.mxu1 %v9254_v50  ;;  %v3061_v7 = vunpack.c.0.s8 %v1957_v13  ;;  %v3073_v10 = vunpack.c.1.s8 %v1957_v13  ;;  %v5833_v8 = vpack.c.bf16 %v4969_v42, %v4957_v17 }
 0x4e2   : > { %v4213_v54 = vcvt.s32.f32 %v2677_v55  ;;  %v4225_v30 = vcvt.s32.f32 %v2689_v56  ;;  %v3397_v36 = vunpack.c.0.s8 %v10220_v47  ;;  %6939 = vmatpush.bf16.msra.mxu0 %v5665_v32  ;;  %v3409_v58 = vunpack.c.1.s8 %v10220_v47 }
 0x4e3   : > { %v5258_v45 = vpack.c.bf16 %v3818_v14, %v3806_v0  ;;  %v4597_v46 = vcvt.s32.f32 %v3061_v7  ;;  %v4609_v49 = vcvt.s32.f32 %v3073_v10  ;;  %6946 = vmatpush.bf16.msra.mxu1 %v5833_v8  ;;  %v3613_v21 = vunpack.c.2.s8 %v2089_v40  ;;  %v6710_v33 = vpop.f32.mrf.mxu2  ;;  %v2077_v14 = vld [vmem:[%s8946_s11 + $0xb88] sm:$0xff] }
 0x4e4   : > { %v5461_v35 = vpack.c.bf16 %v4225_v30, %v4213_v54  ;;  %6928 = vmatmul.bf16.vlgmr.msrb.gmra.mxu3 %v9335_v51  ;;  %v4933_v13 = vcvt.s32.f32 %v3397_v36  ;;  %v3625_v39 = vunpack.c.3.s8 %v2089_v40  ;;  %v4945_v19 = vcvt.s32.f32 %v3409_v58 }
 0x4e5   : > { %6972 = vmatpush.bf16.msra.mxu3 %v5258_v45  ;;  %v5653_v53 = vpack.c.bf16 %v4609_v49, %v4597_v46  ;;  %v2246_v28 = vunpack.c.0.s8 %v10223_v9  ;;  %v2258_v62 = vunpack.c.1.s8 %v10223_v9  ;;  %v5149_v47 = vcvt.s32.f32 %v3613_v21  ;;  %v1790_v46 = vld [vmem:[%s8946_s11 + $0x290] sm:$0xff] }
 0x4e6   : > { %6914 = vmatpush.bf16.msrb.mxu2 %v5461_v35  ;;  %v5161_v1 = vcvt.s32.f32 %v3625_v39  ;;  %v2462_v15 = vunpack.c.2.s8 %v1802_v37  ;;  %v2474_v63 = vunpack.c.3.s8 %v1802_v37  ;;  %v5821_v25 = vpack.c.bf16 %v4945_v19, %v4933_v13  ;;  %v2017_v35 = vld [vmem:[%s8946_s11 + $0x9a8] sm:$0xff] }
 0x4e7   : > { %6940 = vmatpush.bf16.msra.mxu0 %v5653_v53  ;;  %v3782_v6 = vcvt.s32.f32 %v2246_v28  ;;  %v3794_v52 = vcvt.s32.f32 %v2258_v62  ;;  %v3373_v18 = vunpack.c.2.s8 %v2029_v3  ;;  %v3385_v23 = vunpack.c.3.s8 %v2029_v3 }
 0x4e8   : > { %v5929_v27 = vpack.c.bf16 %v5161_v1, %v5149_v47  ;;  %v3998_v34 = vcvt.s32.f32 %v2462_v15  ;;  %v4010_v43 = vcvt.s32.f32 %v2474_v63  ;;  %6947 = vmatpush.bf16.msra.mxu1 %v5821_v25  ;;  %v3589_v60 = vunpack.c.0.s8 %v2089_v40 }
 0x4e9   : > { %v5246_v38 = vpack.c.bf16 %v3794_v52, %v3782_v6  ;;  %6915 = vmatmul.bf16.vlgmr.msrb.gmra.mxu2 %v9279_v12  ;;  %v4909_v9 = vcvt.s32.f32 %v3373_v18  ;;  %v3601_v29 = vunpack.c.1.s8 %v2089_v40  ;;  %v4921_v44 = vcvt.s32.f32 %v3385_v23 }
 0x4ea   : > { %6959 = vmatpush.bf16.msra.mxu2 %v5929_v27  ;;  %v5354_v17 = vpack.c.bf16 %v4010_v43, %v3998_v34  ;;  %6941 = vmatmul.bf16.vlgmr.msra.gmra.mxu0 %v9348_v20  ;;  %v2222_v4 = vunpack.c.2.s8 %v1742_v31  ;;  %v2234_v42 = vunpack.c.3.s8 %v1742_v31  ;;  %v5125_v0 = vcvt.s32.f32 %v3589_v60 }
 0x4eb   : > { %6973 = vmatpush.bf16.msra.mxu3 %v5246_v38  ;;  %v5137_v55 = vcvt.s32.f32 %v3601_v29  ;;  %v2438_v56 = vunpack.c.0.s8 %v1802_v37  ;;  %v2450_v32 = vunpack.c.1.s8 %v1802_v37  ;;  %v5809_v7 = vpack.c.bf16 %v4921_v44, %v4909_v9  ;;  %v2065_v44 = vld [vmem:[%s8946_s11 + $0xb28] sm:$0xff] }
 0x4ec   : > { %6985 = vmatpush.bf16.msrb.mxu0 %v5354_v17  ;;  %v3758_v10 = vcvt.s32.f32 %v2222_v4  ;;  %v3770_v8 = vcvt.s32.f32 %v2234_v42  ;;  %v10251_v40 = vadd.f32 %v10208_v57, %v10195_v26  ;;  %v3349_v45 = vunpack.c.0.s8 %v2029_v3 }
 0x4ed   : > { %v5917_v54 = vpack.c.bf16 %v5137_v55, %v5125_v0  ;;  %v3974_v30 = vcvt.s32.f32 %v2438_v56  ;;  %v3986_v36 = vcvt.s32.f32 %v2450_v32  ;;  %6948 = vmatpush.bf16.msra.mxu1 %v5809_v7  ;;  %v3361_v58 = vunpack.c.1.s8 %v2029_v3  ;;  %v1730_v3 = vld [vmem:[%s8946_s11 + $0xb0] sm:$0xff] }
 0x4ee   : > { %v5234_v49 = vpack.c.bf16 %v3770_v8, %v3758_v10  ;;  %v3565_v59 = vunpack.c.2.s8 %v2077_v14  ;;  %v3577_v37 = vunpack.c.3.s8 %v2077_v14  ;;  %v4885_v21 = vcvt.s32.f32 %v3349_v45 }
 0x4ef   : > { %6960 = vmatpush.bf16.msra.mxu2 %v5917_v54  ;;  %v5342_v13 = vpack.c.bf16 %v3986_v36, %v3974_v30  ;;  %v2198_v39 = vunpack.c.0.s8 %v1742_v31  ;;  %v2210_v53 = vunpack.c.1.s8 %v1742_v31  ;;  %v4897_v26 = vcvt.s32.f32 %v3361_v58  ;;  %v1778_v36 = vld [vmem:[%s8946_s11 + $0x230] sm:$0xff] }
 0x4f0   : > { %6974 = vmatpush.bf16.msra.mxu3 %v5234_v49  ;;  %v5101_v57 = vcvt.s32.f32 %v3565_v59  ;;  %v5113_v19 = vcvt.s32.f32 %v3577_v37  ;;  %v2414_v28 = vunpack.c.2.s8 %v1790_v46  ;;  %v2426_v1 = vunpack.c.3.s8 %v1790_v46  ;;  %v2005_v59 = vld [vmem:[%s8946_s11 + $0x948] sm:$0xff] }
 0x4f1   : > { %6986 = vmatpush.bf16.msrb.mxu0 %v5342_v13  ;;  %v3734_v62 = vcvt.s32.f32 %v2198_v39  ;;  %v3746_v47 = vcvt.s32.f32 %v2210_v53  ;;  %v3325_v15 = vunpack.c.2.s8 %v2017_v35  ;;  %v5797_v63 = vpack.c.bf16 %v4897_v26, %v4885_v21  ;;  %v10261_v39 = vpop.f32.mrf.mxu1 }
 0x4f2   : > { %v5905_v33 = vpack.c.bf16 %v5113_v19, %v5101_v57  ;;  %v3950_v25 = vcvt.s32.f32 %v2414_v28  ;;  %v3337_v6 = vunpack.c.3.s8 %v2017_v35  ;;  %v3962_v18 = vcvt.s32.f32 %v2426_v1  ;;  %v1718_v28 = vld [vmem:[%s8946_s11 + $0x50] sm:$0xff] }
 0x4f3   : > { %v5222_v52 = vpack.c.bf16 %v3746_v47, %v3734_v62  ;;  %v4861_v27 = vcvt.s32.f32 %v3325_v15  ;;  %v3541_v31 = vunpack.c.0.s8 %v2077_v14  ;;  %6949 = vmatpush.bf16.msra.mxu1 %v5797_v63  ;;  %v3553_v43 = vunpack.c.1.s8 %v2077_v14 }
 0x4f4   : > { %6961 = vmatpush.bf16.msra.mxu2 %v5905_v33  ;;  %v4873_v34 = vcvt.s32.f32 %v3337_v6  ;;  %v2174_v23 = vunpack.c.2.s8 %v1730_v3  ;;  %v2186_v38 = vunpack.c.3.s8 %v1730_v3  ;;  %v5330_v9 = vpack.c.bf16 %v3962_v18, %v3950_v25 }
 0x4f5   : > { %6975 = vmatpush.bf16.msra.mxu3 %v5222_v52  ;;  %v5077_v60 = vcvt.s32.f32 %v3541_v31  ;;  %v2390_v29 = vunpack.c.0.s8 %v1790_v46  ;;  %v2402_v17 = vunpack.c.1.s8 %v1790_v46  ;;  %v5089_v42 = vcvt.s32.f32 %v3553_v43  ;;  %v10270_v43 = vpop.f32.mrf.mxu0 }
 0x4f6   : > { %v5785_v4 = vpack.c.bf16 %v4873_v34, %v4861_v27  ;;  %v3710_v0 = vcvt.s32.f32 %v2174_v23  ;;  %v3722_v55 = vcvt.s32.f32 %v2186_v38  ;;  %6987 = vmatpush.bf16.msrb.mxu0 %v5330_v9  ;;  %v3301_v7 = vunpack.c.0.s8 %v2017_v35  ;;  %v10268_v34 = vld [vmem:[%s8946_s11 + $0xac8] sm:$0xff] }
 0x4f7   : > { %v3926_v56 = vcvt.s32.f32 %v2390_v29  ;;  %v3938_v32 = vcvt.s32.f32 %v2402_v17  ;;  %v3313_v10 = vunpack.c.1.s8 %v2017_v35  ;;  %v5893_v14 = vpack.c.bf16 %v5089_v42, %v5077_v60 }
 0x4f8   : > { %6950 = vmatpush.bf16.msra.mxu1 %v5785_v4  ;;  %v5210_v8 = vpack.c.bf16 %v3722_v55, %v3710_v0  ;;  %v3517_v54 = vunpack.c.2.s8 %v2065_v44  ;;  %v3529_v30 = vunpack.c.3.s8 %v2065_v44  ;;  %v4837_v46 = vcvt.s32.f32 %v3301_v7 }
 0x4f9   : > { %v5318_v45 = vpack.c.bf16 %v3938_v32, %v3926_v56  ;;  %v4849_v49 = vcvt.s32.f32 %v3313_v10  ;;  %v6709_v58 = vadd.f32 %v10231_v11, %v10251_v40  ;;  %6962 = vmatpush.bf16.msra.mxu2 %v5893_v14  ;;  %v2150_v21 = vunpack.c.0.s8 %v1730_v3  ;;  %v1766_v32 = vld [vmem:[%s8946_s11 + $0x1d0] sm:$0xff]  ;;  %v6749_v7 = vpop.f32.mrf.mxu1 }
 0x4fa   : > { %6976 = vmatpush.bf16.msra.mxu3 %v5210_v8  ;;  %v5053_v37 = vcvt.s32.f32 %v3517_v54  ;;  %v5065_v13 = vcvt.s32.f32 %v3529_v30  ;;  %v2162_v35 = vunpack.c.1.s8 %v1730_v3  ;;  %v2366_v57 = vunpack.c.2.s8 %v1778_v36  ;;  %v1850_v30 = vld [vmem:[%s8946_s11 + $0x470] sm:$0xff] }
 0x4fb   : > { %6988 = vmatpush.bf16.msrb.mxu0 %v5318_v45  ;;  %v5773_v53 = vpack.c.bf16 %v4849_v49, %v4837_v46  ;;  %v10264_v26 = vadd.f32 %v10225_v22, %v6709_v58  ;;  %v2378_v19 = vunpack.c.3.s8 %v1778_v36  ;;  %v3686_v47 = vcvt.s32.f32 %v2150_v21  ;;  %v10277_v58 = vld [vmem:[%s8946_s11 + $0x770] sm:$0xff] }
 0x4fc   : > { %v5881_v62 = vpack.c.bf16 %v5065_v13, %v5053_v37  ;;  %v3698_v11 = vcvt.s32.f32 %v2162_v35  ;;  %v3277_v40 = vunpack.c.2.s8 %v2005_v59  ;;  %v3902_v1 = vcvt.s32.f32 %v2366_v57  ;;  %v10279_v35 = vpop.f32.mrf.mxu3 }
 0x4fd   : > { %6951 = vmatpush.bf16.msra.mxu1 %v5773_v53  ;;  %v3914_v15 = vcvt.s32.f32 %v2378_v19  ;;  %v3289_v63 = vunpack.c.3.s8 %v2005_v59  ;;  %v3493_v3 = vunpack.c.0.s8 %v2065_v44  ;;  %v3505_v6 = vunpack.c.1.s8 %v2065_v44 }
 0x4fe   : > { %6963 = vmatpush.bf16.msra.mxu2 %v5881_v62  ;;  %v5198_v33 = vpack.c.bf16 %v3698_v11, %v3686_v47  ;;  %v4813_v25 = vcvt.s32.f32 %v3277_v40  ;;  %v2126_v52 = vunpack.c.2.s8 %v1718_v28  ;;  %v2138_v31 = vunpack.c.3.s8 %v1718_v28 }
 0x4ff   : > { %v5306_v22 = vpack.c.bf16 %v3914_v15, %v3902_v1  ;;  %v4825_v18 = vcvt.s32.f32 %v3289_v63  ;;  %v5029_v27 = vcvt.s32.f32 %v3493_v3  ;;  %v5041_v23 = vcvt.s32.f32 %v3505_v6  ;;  %v10282_v1 = vpop.f32.mrf.mxu2  ;;  %v6788_v15 = vpop.f32.mrf.mxu0 }
 0x500   : > { %6977 = vmatpush.bf16.msra.mxu3 %v5198_v33  ;;  %v3662_v38 = vcvt.s32.f32 %v2126_v52  ;;  %v2342_v9 = vunpack.c.0.s8 %v1778_v36  ;;  %v2354_v60 = vunpack.c.1.s8 %v1778_v36  ;;  %v3674_v17 = vcvt.s32.f32 %v2138_v31 }
 0x501   : > { %6989 = vmatpush.bf16.msrb.mxu0 %v5306_v22  ;;  %v5761_v29 = vpack.c.bf16 %v4825_v18, %v4813_v25  ;;  %v3253_v44 = vunpack.c.0.s8 %v2005_v59  ;;  %v3265_v4 = vunpack.c.1.s8 %v2005_v59  ;;  %v5869_v42 = vpack.c.bf16 %v5041_v23, %v5029_v27  ;;  %v1898_v27 = vld [vmem:[%s8946_s11 + $0x5f0] sm:$0xff] }
 0x502   : > { %v3878_v0 = vcvt.s32.f32 %v2342_v9  ;;  %v3890_v55 = vcvt.s32.f32 %v2354_v60  ;;  %v3469_v56 = vunpack.c.2.s8 %v10268_v34  ;;  %v5186_v10 = vpack.c.bf16 %v3674_v17, %v3662_v38 }
 0x503   : > { %6952 = vmatpush.bf16.msra.mxu1 %v5761_v29  ;;  %v4789_v14 = vcvt.s32.f32 %v3253_v44  ;;  %v4801_v8 = vcvt.s32.f32 %v3265_v4  ;;  %v3481_v54 = vunpack.c.3.s8 %v10268_v34  ;;  %6964 = vmatpush.bf16.msra.mxu2 %v5869_v42  ;;  %v2102_v46 = vunpack.c.0.s8 %v1718_v28 }
 0x504   : > { %v5294_v36 = vpack.c.bf16 %v3890_v55, %v3878_v0  ;;  %v5005_v45 = vcvt.s32.f32 %v3469_v56  ;;  %v2114_v49 = vunpack.c.1.s8 %v1718_v28  ;;  %6978 = vmatpush.bf16.msra.mxu3 %v5186_v10  ;;  %v2318_v13 = vunpack.c.2.s8 %v1766_v32  ;;  %v1994_v55 = vld [vmem:[%s8946_s11 + $0x8f0] sm:$0xff] }
 0x505   : > { %v5749_v59 = vpack.c.bf16 %v4801_v8, %v4789_v14  ;;  %v5017_v37 = vcvt.s32.f32 %v3481_v54  ;;  %v2330_v21 = vunpack.c.3.s8 %v1766_v32  ;;  %v3638_v53 = vcvt.s32.f32 %v2102_v46  ;;  %v1838_v8 = vld [vmem:[%s8946_s11 + $0x410] sm:$0xff] }
 0x506   : > { %6990 = vmatpush.bf16.msrb.mxu0 %v5294_v36  ;;  %v3650_v57 = vcvt.s32.f32 %v2114_v49  ;;  %v2654_v19 = vunpack.c.2.s8 %v1850_v30  ;;  %v2666_v62 = vunpack.c.3.s8 %v1850_v30  ;;  %v3854_v11 = vcvt.s32.f32 %v2318_v13 }
 0x507   : > { %6953 = vmatpush.bf16.msra.mxu1 %v5749_v59  ;;  %v5857_v47 = vpack.c.bf16 %v5017_v37, %v5005_v45  ;;  %v3866_v40 = vcvt.s32.f32 %v2330_v21  ;;  %v3038_v28 = vunpack.c.2.s8 %v10277_v58  ;;  %v3050_v25 = vunpack.c.3.s8 %v10277_v58  ;;  %v6762_v13 = vpop.f32.mrf.mxu2 }
 0x508   : > { %v5174_v63 = vpack.c.bf16 %v3650_v57, %v3638_v53  ;;  %v4190_v3 = vcvt.s32.f32 %v2654_v19  ;;  %v4202_v33 = vcvt.s32.f32 %v2666_v62  ;;  %v3445_v22 = vunpack.c.0.s8 %v10268_v34  ;;  %v1934_v62 = vld [vmem:[%s8946_s11 + $0x710] sm:$0xff] }
 0x509   : > { %6965 = vmatpush.bf16.msra.mxu2 %v5857_v47  ;;  %v5282_v6 = vpack.c.bf16 %v3866_v40, %v3854_v11  ;;  %v4574_v52 = vcvt.s32.f32 %v3038_v28  ;;  %v3457_v18 = vunpack.c.1.s8 %v10268_v34  ;;  %v4586_v23 = vcvt.s32.f32 %v3050_v25 }
 0x50a   : > { %6979 = vmatpush.bf16.msra.mxu3 %v5174_v63  ;;  %v5450_v31 = vpack.c.bf16 %v4202_v33, %v4190_v3  ;;  %6954 = vmatmul.bf16.vlgmr.msra.gmra.mxu1 %v9377_v16  ;;  %v2294_v38 = vunpack.c.0.s8 %v1766_v32  ;;  %v2306_v9 = vunpack.c.1.s8 %v1766_v32  ;;  %v4981_v60 = vcvt.s32.f32 %v3445_v22  ;;  %v6775_v32 = vpop.f32.mrf.mxu3 }
 0x50b   : > { %6991 = vmatpush.bf16.msrb.mxu0 %v5282_v6  ;;  %v4993_v29 = vcvt.s32.f32 %v3457_v18  ;;  %v2630_v17 = vunpack.c.0.s8 %v1850_v30  ;;  %v2642_v44 = vunpack.c.1.s8 %v1850_v30  ;;  %v5642_v4 = vpack.c.bf16 %v4586_v23, %v4574_v52 }
 0x50c   : > { %6998 = vmatpush.bf16.msrb.mxu1 %v5450_v31  ;;  %v3830_v42 = vcvt.s32.f32 %v2294_v38  ;;  %v3842_v0 = vcvt.s32.f32 %v2306_v9  ;;  %v2846_v34 = vunpack.c.2.s8 %v1898_v27  ;;  %v2858_v14 = vunpack.c.3.s8 %v1898_v27  ;;  %v1886_v38 = vld [vmem:[%s8946_s11 + $0x590] sm:$0xff] }
 0x50d   : > { %v5845_v56 = vpack.c.bf16 %v4993_v29, %v4981_v60  ;;  %6980 = vmatmul.bf16.vlgmr.msra.gmra.mxu3 %v9159_v2  ;;  %v4166_v7 = vcvt.s32.f32 %v2630_v17  ;;  %v4178_v10 = vcvt.s32.f32 %v2642_v44  ;;  %v3014_v30 = vunpack.c.0.s8 %v10277_v58 }
 0x50e   : > { %7024 = vmatpush.bf16.msrb.mxu3 %v5642_v4  ;;  %v5270_v54 = vpack.c.bf16 %v3842_v0, %v3830_v42  ;;  %v4382_v36 = vcvt.s32.f32 %v2846_v34  ;;  %v3026_v45 = vunpack.c.1.s8 %v10277_v58  ;;  %v4394_v49 = vcvt.s32.f32 %v2858_v14  ;;  %v1982_v0 = vld [vmem:[%s8946_s11 + $0x890] sm:$0xff] }
 0x50f   : > { %6966 = vmatpush.bf16.msra.mxu2 %v5845_v56  ;;  %v5438_v46 = vpack.c.bf16 %v4178_v10, %v4166_v7  ;;  %v3230_v59 = vunpack.c.2.s8 %v1994_v55  ;;  %v3242_v37 = vunpack.c.3.s8 %v1994_v55  ;;  %v4550_v21 = vcvt.s32.f32 %v3014_v30  ;;  %v1826_v10 = vld [vmem:[%s8946_s11 + $0x3b0] sm:$0xff] }
 0x510   : > { %6992 = vmatpush.bf16.msrb.mxu0 %v5270_v54  ;;  %v4562_v53 = vcvt.s32.f32 %v3026_v45  ;;  %v2606_v57 = vunpack.c.2.s8 %v1838_v8  ;;  %v2618_v19 = vunpack.c.3.s8 %v1838_v8  ;;  %v5546_v47 = vpack.c.bf16 %v4394_v49, %v4382_v36 }
 0x511   : > { %6999 = vmatpush.bf16.msrb.mxu1 %v5438_v46  ;;  %v4766_v11 = vcvt.s32.f32 %v3230_v59  ;;  %v4778_v40 = vcvt.s32.f32 %v3242_v37  ;;  %v2822_v28 = vunpack.c.0.s8 %v1898_v27  ;;  %v2834_v3 = vunpack.c.1.s8 %v1898_v27 }
 0x512   : > { %v5630_v15 = vpack.c.bf16 %v4562_v53, %v4550_v21  ;;  %6967 = vmatmul.bf16.vlgmr.msra.gmra.mxu2 %v9385_v41  ;;  %v4142_v58 = vcvt.s32.f32 %v2606_v57  ;;  %v4154_v63 = vcvt.s32.f32 %v2618_v19  ;;  %v2990_v6 = vunpack.c.2.s8 %v1934_v62 }
 0x513   : > { %7011 = vmatpush.bf16.msrb.mxu2 %v5546_v47  ;;  %v5738_v33 = vpack.c.bf16 %v4778_v40, %v4766_v11  ;;  %6993 = vmatmul.bf16.vlgmr.msrb.gmra.mxu0 %v9180_v24  ;;  %v4358_v25 = vcvt.s32.f32 %v2822_v28  ;;  %v3002_v52 = vunpack.c.3.s8 %v1934_v62  ;;  %v4370_v18 = vcvt.s32.f32 %v2834_v3 }
 0x514   : > { %7025 = vmatpush.bf16.msrb.mxu3 %v5630_v15  ;;  %v5426_v22 = vpack.c.bf16 %v4154_v63, %v4142_v58  ;;  %v3206_v31 = vunpack.c.0.s8 %v1994_v55  ;;  %v3218_v23 = vunpack.c.1.s8 %v1994_v55  ;;  %v4526_v9 = vcvt.s32.f32 %v2990_v6 }
 0x515   : > { %7037 = vmatpush.bf16.msra.mxu0 %v5738_v33  ;;  %v4538_v60 = vcvt.s32.f32 %v3002_v52  ;;  %v6735_v27 = vadd.f32 %v10214_v48, %v10264_v26  ;;  %v2582_v29 = vunpack.c.0.s8 %v1838_v8  ;;  %v5534_v17 = vpack.c.bf16 %v4370_v18, %v4358_v25  ;;  %v1874_v25 = vld [vmem:[%s8946_s11 + $0x530] sm:$0xff] }
 0x516   : > { %7000 = vmatpush.bf16.msrb.mxu1 %v5426_v22  ;;  %v4742_v44 = vcvt.s32.f32 %v3206_v31  ;;  %v4754_v4 = vcvt.s32.f32 %v3218_v23  ;;  %v2594_v42 = vunpack.c.1.s8 %v1838_v8  ;;  %v2798_v55 = vunpack.c.2.s8 %v1886_v38 }
 0x517   : > { %v5618_v34 = vpack.c.bf16 %v4538_v60, %v4526_v9  ;;  %v6748_v56 = vadd.f32 %v10261_v39, %v6735_v27  ;;  %v4118_v7 = vcvt.s32.f32 %v2582_v29  ;;  %7012 = vmatpush.bf16.msrb.mxu2 %v5534_v17  ;;  %v2810_v54 = vunpack.c.3.s8 %v1886_v38  ;;  %v1922_v39 = vld [vmem:[%s8946_s11 + $0x6b0] sm:$0xff] }
 0x518   : > { %v5726_v14 = vpack.c.bf16 %v4754_v4, %v4742_v44  ;;  %v4130_v32 = vcvt.s32.f32 %v2594_v42  ;;  %v2966_v36 = vunpack.c.0.s8 %v1934_v62  ;;  %v4334_v48 = vcvt.s32.f32 %v2798_v55 }
 0x519   : > { %7026 = vmatpush.bf16.msrb.mxu3 %v5618_v34  ;;  %v2978_v26 = vunpack.c.1.s8 %v1934_v62  ;;  %v3182_v30 = vunpack.c.2.s8 %v1982_v0  ;;  %v3194_v45 = vunpack.c.3.s8 %v1982_v0  ;;  %v4346_v46 = vcvt.s32.f32 %v2810_v54  ;;  %v1970_v34 = vld [vmem:[%s8946_s11 + $0x830] sm:$0xff] }
 0x51a   : > { %7038 = vmatpush.bf16.msra.mxu0 %v5726_v14  ;;  %v5414_v8 = vpack.c.bf16 %v4130_v32, %v4118_v7  ;;  %v4502_v49 = vcvt.s32.f32 %v2966_v36  ;;  %v2558_v59 = vunpack.c.2.s8 %v1826_v10  ;;  %v2570_v53 = vunpack.c.3.s8 %v1826_v10  ;;  %v1814_v14 = vld [vmem:[%s8946_s11 + $0x350] sm:$0xff] }
 0x51b   : > { %v4514_v37 = vcvt.s32.f32 %v2978_v26  ;;  %v4718_v13 = vcvt.s32.f32 %v3182_v30  ;;  %v4730_v21 = vcvt.s32.f32 %v3194_v45  ;;  %v5522_v57 = vpack.c.bf16 %v4346_v46, %v4334_v48  ;;  %v10314_v48 = vpop.f32.mrf.mxu1 }
 0x51c   : > { %7001 = vmatpush.bf16.msrb.mxu1 %v5414_v8  ;;  %v4094_v19 = vcvt.s32.f32 %v2558_v59  ;;  %v2774_v47 = vunpack.c.0.s8 %v1886_v38  ;;  %v2786_v11 = vunpack.c.1.s8 %v1886_v38  ;;  %v4106_v28 = vcvt.s32.f32 %v2570_v53 }
 0x51d   : > { %v5606_v40 = vpack.c.bf16 %v4514_v37, %v4502_v49  ;;  %v5714_v62 = vpack.c.bf16 %v4730_v21, %v4718_v13  ;;  %v2942_v15 = vunpack.c.2.s8 %v1922_v39  ;;  %7013 = vmatpush.bf16.msrb.mxu2 %v5522_v57  ;;  %v2954_v3 = vunpack.c.3.s8 %v1922_v39  ;;  %v1910_v49 = vld [vmem:[%s8946_s11 + $0x650] sm:$0xff] }
 0x51e   : > { %v4310_v58 = vcvt.s32.f32 %v2774_v47  ;;  %v4322_v63 = vcvt.s32.f32 %v2786_v11  ;;  %v3158_v33 = vunpack.c.0.s8 %v1982_v0  ;;  %v5402_v6 = vpack.c.bf16 %v4106_v28, %v4094_v19 }
 0x51f   : > { %7027 = vmatpush.bf16.msrb.mxu3 %v5606_v40  ;;  %7039 = vmatpush.bf16.msra.mxu0 %v5714_v62  ;;  %v4478_v52 = vcvt.s32.f32 %v2942_v15  ;;  %v3170_v22 = vunpack.c.1.s8 %v1982_v0  ;;  %v10307_v18 = vadd.f32 %v10270_v43, %v10279_v35  ;;  %v4490_v23 = vcvt.s32.f32 %v2954_v3 }
 0x520   : > { %v5510_v31 = vpack.c.bf16 %v4322_v63, %v4310_v58  ;;  %v4694_v38 = vcvt.s32.f32 %v3158_v33  ;;  %v2534_v9 = vunpack.c.0.s8 %v1826_v10  ;;  %7002 = vmatpush.bf16.msrb.mxu1 %v5402_v6  ;;  %v2546_v27 = vunpack.c.1.s8 %v1826_v10  ;;  %v10318_v58 = vld [vmem:[%s8946_s11 + $0x4d0] sm:$0xff]  ;;  %v10320_v63 = vpop.f32.mrf.mxu0 }
 0x521   : > { %v4706_v60 = vcvt.s32.f32 %v3170_v22  ;;  %v2750_v29 = vunpack.c.2.s8 %v1874_v25  ;;  %v2762_v17 = vunpack.c.3.s8 %v1874_v25  ;;  %v5594_v44 = vpack.c.bf16 %v4490_v23, %v4478_v52 }
 0x522   : > { %7014 = vmatpush.bf16.msrb.mxu2 %v5510_v31  ;;  %v4070_v4 = vcvt.s32.f32 %v2534_v9  ;;  %v6761_v42 = vadd.f32 %v10282_v1, %v6748_v56  ;;  %v7191_v0 = vperm.slane %v10199_v61, 7  ;;  %v4082_v35 = vcvt.s32.f32 %v2546_v27 }
 0x523   : > { %v5702_v43 = vpack.c.bf16 %v4706_v60, %v4694_v38  ;;  %v4286_v7 = vcvt.s32.f32 %v2750_v29  ;;  %v4298_v55 = vcvt.s32.f32 %v2762_v17  ;;  %7028 = vmatpush.bf16.msrb.mxu3 %v5594_v44  ;;  %v7231_v10 = vperm.slane %v10205_v5, 7  ;;  %v1958_v38 = vld [vmem:[%s8946_s11 + $0x7d0] sm:$0xff]  ;;  %v6801_v9 = vpop.f32.mrf.mxu1 }
 0x524   : > { %v7215_v32 = vmul.f32 %v7191_v0, %v6761_v42  ;;  %v2918_v54 = vunpack.c.0.s8 %v1922_v39  ;;  %v2930_v36 = vunpack.c.1.s8 %v1922_v39  ;;  %v5390_v26 = vpack.c.bf16 %v4082_v35, %v4070_v4  ;;  %v10326_v44 = vld [vmem:[%s8946_s11 + $0xa70] sm:$0xff]  ;;  %v10329_v35 = vld [vmem:[%s8946_s11 + $0x178] sm:$0xff] }
 0x525   : > { %7040 = vmatpush.bf16.msra.mxu0 %v5702_v43  ;;  %v5498_v1 = vpack.c.bf16 %v4298_v55, %v4286_v7  ;;  %v3134_v56 = vunpack.c.2.s8 %v1970_v34  ;;  %v3146_v61 = vunpack.c.3.s8 %v1970_v34  ;;  %v2510_v46 = vunpack.c.2.s8 %v1814_v14  ;;  %v10331_v7 = vpop.f32.mrf.mxu3 }
 0x526   : > { %v7255_v30 = vadd.f32 %v7231_v10, %v7215_v32  ;;  %v4454_v45 = vcvt.s32.f32 %v2918_v54  ;;  %v4466_v8 = vcvt.s32.f32 %v2930_v36  ;;  %7003 = vmatpush.bf16.msrb.mxu1 %v5390_v26  ;;  %v2522_v5 = vunpack.c.3.s8 %v1814_v14 }
 0x527   : > { %7015 = vmatpush.bf16.msrb.mxu2 %v5498_v1  ;;  %v4670_v59 = vcvt.s32.f32 %v3134_v56  ;;  %v4682_v37 = vcvt.s32.f32 %v3146_v61  ;;  %v2726_v13 = vunpack.c.0.s8 %v1874_v25  ;;  %v4046_v21 = vcvt.s32.f32 %v2510_v46 }
 0x528   : > { %8328 = vtanh.f32 %v7255_v30  ;;  %v5582_v39 = vpack.c.bf16 %v4466_v8, %v4454_v45  ;;  %v2738_v53 = vunpack.c.1.s8 %v1874_v25  ;;  %v4058_v19 = vcvt.s32.f32 %v2522_v5  ;;  %v10337_v8 = vpop.f32.mrf.mxu2  ;;  %v6840_v5 = vpop.f32.mrf.mxu0 }
 0x529   : > { %v5690_v57 = vpack.c.bf16 %v4682_v37, %v4670_v59  ;;  %v4262_v47 = vcvt.s32.f32 %v2726_v13  ;;  %v2894_v11 = vunpack.c.2.s8 %v1910_v49  ;;  %v2906_v62 = vunpack.c.3.s8 %v1910_v49 }
 0x52a   : > { %7029 = vmatpush.bf16.msrb.mxu3 %v5582_v39  ;;  %v4274_v40 = vcvt.s32.f32 %v2738_v53  ;;  %v3110_v28 = vunpack.c.0.s8 %v1970_v34  ;;  %v3122_v15 = vunpack.c.1.s8 %v1970_v34  ;;  %v5378_v3 = vpack.c.bf16 %v4058_v19, %v4046_v21 }
 0x52b   : > { %7041 = vmatpush.bf16.msra.mxu0 %v5690_v57  ;;  %v4430_v33 = vcvt.s32.f32 %v2894_v11  ;;  %v2486_v6 = vunpack.c.0.s8 %v1814_v14  ;;  %v2498_v25 = vunpack.c.1.s8 %v1814_v14  ;;  %v4442_v22 = vcvt.s32.f32 %v2906_v62 }
 0x52c   : > { %v5486_v52 = vpack.c.bf16 %v4274_v40, %v4262_v47  ;;  %v4646_v31 = vcvt.s32.f32 %v3110_v28  ;;  %v4658_v23 = vcvt.s32.f32 %v3122_v15  ;;  %7004 = vmatpush.bf16.msrb.mxu1 %v5378_v3  ;;  %v2702_v29 = vunpack.c.2.s8 %v10318_v58  ;;  %v2090_v40 = vld [vmem:[%s8946_s11 + $0xbf0] sm:$0xff] }
 0x52d   : > { %v4022_v60 = vcvt.s32.f32 %v2486_v6  ;;  %v4034_v27 = vcvt.s32.f32 %v2498_v25  ;;  %v2714_v17 = vunpack.c.3.s8 %v10318_v58  ;;  %v5570_v42 = vpack.c.bf16 %v4442_v22, %v4430_v33  ;;  %v6827_v22 = vpop.f32.mrf.mxu3 }
 0x52e   : > { %v8329_v4 = vpop.eup %8328  ;;  %7016 = vmatpush.bf16.msrb.mxu2 %v5486_v52  ;;  %v5678_v0 = vpack.c.bf16 %v4658_v23, %v4646_v31  ;;  %v2870_v34 = vunpack.c.0.s8 %v1910_v49  ;;  %v2882_v43 = vunpack.c.1.s8 %v1910_v49  ;;  %v4238_v14 = vcvt.s32.f32 %v2702_v29  ;;  %v1803_v52 = vld [vmem:[%s8946_s11 + $0x2f8] sm:$0xff] }
 0x52f   : > { %7279 = vst [vmem:[%s9629_s3 + $0x38] sm:$0xff] %v8329_v4  ;;  %v5366_v55 = vpack.c.bf16 %v4034_v27, %v4022_v60  ;;  %v4250_v32 = vcvt.s32.f32 %v2714_v17  ;;  %v3086_v10 = vunpack.c.2.s8 %v1958_v38  ;;  %7030 = vmatpush.bf16.msrb.mxu3 %v5570_v42  ;;  %v3098_v26 = vunpack.c.3.s8 %v1958_v38  ;;  %v2030_v60 = vld [vmem:[%s8946_s11 + $0xa10] sm:$0xff] }
 0x530   : > { %7042 = vmatpush.bf16.msra.mxu0 %v5678_v0  ;;  %v4406_v54 = vcvt.s32.f32 %v2870_v34  ;;  %v4418_v36 = vcvt.s32.f32 %v2882_v43  ;;  %v3422_v1 = vunpack.c.2.s8 %v10326_v44  ;;  %v3434_v30 = vunpack.c.3.s8 %v10326_v44  ;;  %v6814_v43 = vpop.f32.mrf.mxu2 }
 0x531   : > { %7005 = vmatpush.bf16.msrb.mxu1 %v5366_v55  ;;  %v5474_v56 = vpack.c.bf16 %v4250_v32, %v4238_v14  ;;  %v4622_v61 = vcvt.s32.f32 %v3086_v10  ;;  %v2271_v45 = vunpack.c.2.s8 %v10329_v35  ;;  %v4634_v49 = vcvt.s32.f32 %v3098_v26 }
 0x532   : > { %v5558_v46 = vpack.c.bf16 %v4418_v36, %v4406_v54  ;;  %v4958_v59 = vcvt.s32.f32 %v3422_v1  ;;  %v2283_v37 = vunpack.c.3.s8 %v10329_v35  ;;  %v4970_v13 = vcvt.s32.f32 %v3434_v30  ;;  %v1743_v54 = vld [vmem:[%s8946_s11 + $0x118] sm:$0xff] }
 0x533   : > { %7017 = vmatpush.bf16.msrb.mxu2 %v5474_v56  ;;  %v3807_v39 = vcvt.s32.f32 %v2271_v45  ;;  %v2678_v21 = vunpack.c.0.s8 %v10318_v58  ;;  %v2690_v53 = vunpack.c.1.s8 %v10318_v58  ;;  %v5666_v57 = vpack.c.bf16 %v4634_v49, %v4622_v61 }
 0x534   : > { %7031 = vmatpush.bf16.msrb.mxu3 %v5558_v46  ;;  %v3819_v19 = vcvt.s32.f32 %v2283_v37  ;;  %7006 = vmatmul.bf16.vlgmr.msrb.gmra.mxu1 %v9254_v50  ;;  %v3062_v47 = vunpack.c.0.s8 %v1958_v38  ;;  %v3074_v11 = vunpack.c.1.s8 %v1958_v38  ;;  %v5834_v62 = vpack.c.bf16 %v4970_v13, %v4958_v59 }
 0x535   : > { %v4214_v28 = vcvt.s32.f32 %v2678_v21  ;;  %v4226_v15 = vcvt.s32.f32 %v2690_v53  ;;  %v3398_v3 = vunpack.c.0.s8 %v10326_v44  ;;  %7043 = vmatpush.bf16.msra.mxu0 %v5666_v57  ;;  %v3410_v58 = vunpack.c.1.s8 %v10326_v44  ;;  %v2078_v53 = vld [vmem:[%s8946_s11 + $0xb90] sm:$0xff] }
 0x536   : > { %v5259_v33 = vpack.c.bf16 %v3819_v19, %v3807_v39  ;;  %v4598_v6 = vcvt.s32.f32 %v3062_v47  ;;  %v4610_v25 = vcvt.s32.f32 %v3074_v11  ;;  %7050 = vmatpush.bf16.msra.mxu1 %v5834_v62  ;;  %v3614_v38 = vunpack.c.2.s8 %v2090_v40 }
 0x537   : > { %v5462_v31 = vpack.c.bf16 %v4226_v15, %v4214_v28  ;;  %7032 = vmatmul.bf16.vlgmr.msrb.gmra.mxu3 %v9335_v51  ;;  %v4934_v23 = vcvt.s32.f32 %v3398_v3  ;;  %v3626_v9 = vunpack.c.3.s8 %v2090_v40  ;;  %v4946_v29 = vcvt.s32.f32 %v3410_v58  ;;  %v1791_v3 = vld [vmem:[%s8946_s11 + $0x298] sm:$0xff] }
 0x538   : > { %7076 = vmatpush.bf16.msra.mxu3 %v5259_v33  ;;  %v5654_v27 = vpack.c.bf16 %v4610_v25, %v4598_v6  ;;  %v2247_v17 = vunpack.c.0.s8 %v10329_v35  ;;  %v2259_v4 = vunpack.c.1.s8 %v10329_v35  ;;  %v5150_v44 = vcvt.s32.f32 %v3614_v38 }
 0x539   : > { %7018 = vmatpush.bf16.msrb.mxu2 %v5462_v31  ;;  %v5162_v42 = vcvt.s32.f32 %v3626_v9  ;;  %v2463_v0 = vunpack.c.2.s8 %v1803_v52  ;;  %v2475_v34 = vunpack.c.3.s8 %v1803_v52  ;;  %v5822_v55 = vpack.c.bf16 %v4946_v29, %v4934_v23 }
 0x53a   : > { %7044 = vmatpush.bf16.msra.mxu0 %v5654_v27  ;;  %v3783_v14 = vcvt.s32.f32 %v2247_v17  ;;  %v3795_v32 = vcvt.s32.f32 %v2259_v4  ;;  %v3374_v10 = vunpack.c.2.s8 %v2030_v60  ;;  %v3386_v56 = vunpack.c.3.s8 %v2030_v60 }
 0x53b   : > { %v5930_v36 = vpack.c.bf16 %v5162_v42, %v5150_v44  ;;  %v3999_v26 = vcvt.s32.f32 %v2463_v0  ;;  %v4011_v1 = vcvt.s32.f32 %v2475_v34  ;;  %7051 = vmatpush.bf16.msra.mxu1 %v5822_v55  ;;  %v3590_v30 = vunpack.c.0.s8 %v2090_v40 }
 0x53c   : > { %v5247_v61 = vpack.c.bf16 %v3795_v32, %v3783_v14  ;;  %7019 = vmatmul.bf16.vlgmr.msrb.gmra.mxu2 %v9279_v12  ;;  %v4910_v35 = vcvt.s32.f32 %v3374_v10  ;;  %v3602_v45 = vunpack.c.1.s8 %v2090_v40  ;;  %v4922_v49 = vcvt.s32.f32 %v3386_v56 }
 0x53d   : > { %7063 = vmatpush.bf16.msra.mxu2 %v5930_v36  ;;  %v5355_v46 = vpack.c.bf16 %v4011_v1, %v3999_v26  ;;  %7045 = vmatmul.bf16.vlgmr.msra.gmra.mxu0 %v9348_v20  ;;  %v2223_v59 = vunpack.c.2.s8 %v1743_v54  ;;  %v2235_v37 = vunpack.c.3.s8 %v1743_v54  ;;  %v5126_v5 = vcvt.s32.f32 %v3590_v30 }
 0x53e   : > { %7077 = vmatpush.bf16.msra.mxu3 %v5247_v61  ;;  %v5138_v13 = vcvt.s32.f32 %v3602_v45  ;;  %v2439_v39 = vunpack.c.0.s8 %v1803_v52  ;;  %v2451_v21 = vunpack.c.1.s8 %v1803_v52  ;;  %v5810_v57 = vpack.c.bf16 %v4922_v49, %v4910_v35  ;;  %v2018_v52 = vld [vmem:[%s8946_s11 + $0x9b0] sm:$0xff] }
 0x53f   : > { %7089 = vmatpush.bf16.msrb.mxu0 %v5355_v46  ;;  %v3759_v19 = vcvt.s32.f32 %v2223_v59  ;;  %v3771_v47 = vcvt.s32.f32 %v2235_v37  ;;  %v10357_v11 = vadd.f32 %v10314_v48, %v10307_v18  ;;  %v3350_v15 = vunpack.c.0.s8 %v2030_v60  ;;  %v2066_v45 = vld [vmem:[%s8946_s11 + $0xb30] sm:$0xff] }
 0x540   : > { %v5918_v40 = vpack.c.bf16 %v5138_v13, %v5126_v5  ;;  %v3975_v62 = vcvt.s32.f32 %v2439_v39  ;;  %v3987_v28 = vcvt.s32.f32 %v2451_v21  ;;  %7052 = vmatpush.bf16.msra.mxu1 %v5810_v57  ;;  %v3362_v6 = vunpack.c.1.s8 %v2030_v60  ;;  %v1731_v60 = vld [vmem:[%s8946_s11 + $0xb8] sm:$0xff] }
 0x541   : > { %v5235_v33 = vpack.c.bf16 %v3771_v47, %v3759_v19  ;;  %v3566_v25 = vunpack.c.2.s8 %v2078_v53  ;;  %v3578_v58 = vunpack.c.3.s8 %v2078_v53  ;;  %v4886_v31 = vcvt.s32.f32 %v3350_v15 }
 0x542   : > { %7064 = vmatpush.bf16.msra.mxu2 %v5918_v40  ;;  %v5343_v22 = vpack.c.bf16 %v3987_v28, %v3975_v62  ;;  %v2199_v23 = vunpack.c.0.s8 %v1743_v54  ;;  %v2211_v38 = vunpack.c.1.s8 %v1743_v54  ;;  %v4898_v18 = vcvt.s32.f32 %v3362_v6  ;;  %v1779_v40 = vld [vmem:[%s8946_s11 + $0x238] sm:$0xff] }
 0x543   : > { %7078 = vmatpush.bf16.msra.mxu3 %v5235_v33  ;;  %v5102_v48 = vcvt.s32.f32 %v3566_v25  ;;  %v5114_v9 = vcvt.s32.f32 %v3578_v58  ;;  %v2415_v27 = vunpack.c.2.s8 %v1791_v3  ;;  %v2427_v4 = vunpack.c.3.s8 %v1791_v3  ;;  %v2006_v33 = vld [vmem:[%s8946_s11 + $0x950] sm:$0xff] }
 0x544   : > { %7090 = vmatpush.bf16.msrb.mxu0 %v5343_v22  ;;  %v3735_v29 = vcvt.s32.f32 %v2199_v23  ;;  %v3747_v17 = vcvt.s32.f32 %v2211_v38  ;;  %v3326_v44 = vunpack.c.2.s8 %v2018_v52  ;;  %v5798_v42 = vpack.c.bf16 %v4898_v18, %v4886_v31  ;;  %v10367_v22 = vpop.f32.mrf.mxu1 }
 0x545   : > { %v5906_v0 = vpack.c.bf16 %v5114_v9, %v5102_v48  ;;  %v3951_v34 = vcvt.s32.f32 %v2415_v27  ;;  %v3338_v43 = vunpack.c.3.s8 %v2018_v52  ;;  %v3963_v14 = vcvt.s32.f32 %v2427_v4  ;;  %v1719_v48 = vld [vmem:[%s8946_s11 + $0x58] sm:$0xff] }
 0x546   : > { %v5223_v55 = vpack.c.bf16 %v3747_v17, %v3735_v29  ;;  %v4862_v32 = vcvt.s32.f32 %v3326_v44  ;;  %v3542_v10 = vunpack.c.0.s8 %v2078_v53  ;;  %7053 = vmatpush.bf16.msra.mxu1 %v5798_v42  ;;  %v3554_v36 = vunpack.c.1.s8 %v2078_v53 }
 0x547   : > { %7065 = vmatpush.bf16.msra.mxu2 %v5906_v0  ;;  %v4874_v54 = vcvt.s32.f32 %v3338_v43  ;;  %v2175_v26 = vunpack.c.2.s8 %v1731_v60  ;;  %v2187_v1 = vunpack.c.3.s8 %v1731_v60  ;;  %v5331_v56 = vpack.c.bf16 %v3963_v14, %v3951_v34 }
 0x548   : > { %7079 = vmatpush.bf16.msra.mxu3 %v5223_v55  ;;  %v5078_v61 = vcvt.s32.f32 %v3542_v10  ;;  %v2391_v35 = vunpack.c.0.s8 %v1791_v3  ;;  %v2403_v30 = vunpack.c.1.s8 %v1791_v3  ;;  %v5090_v49 = vcvt.s32.f32 %v3554_v36  ;;  %v10376_v10 = vpop.f32.mrf.mxu0 }
 0x549   : > { %v5786_v46 = vpack.c.bf16 %v4874_v54, %v4862_v32  ;;  %v3711_v59 = vcvt.s32.f32 %v2175_v26  ;;  %v3723_v37 = vcvt.s32.f32 %v2187_v1  ;;  %7091 = vmatpush.bf16.msrb.mxu0 %v5331_v56  ;;  %v3302_v39 = vunpack.c.0.s8 %v2018_v52  ;;  %v10374_v32 = vld [vmem:[%s8946_s11 + $0xad0] sm:$0xff] }
 0x54a   : > { %v3927_v5 = vcvt.s32.f32 %v2391_v35  ;;  %v3939_v13 = vcvt.s32.f32 %v2403_v30  ;;  %v3314_v21 = vunpack.c.1.s8 %v2018_v52  ;;  %v5894_v53 = vpack.c.bf16 %v5090_v49, %v5078_v61 }
 0x54b   : > { %7054 = vmatpush.bf16.msra.mxu1 %v5786_v46  ;;  %v5211_v57 = vpack.c.bf16 %v3723_v37, %v3711_v59  ;;  %v3518_v19 = vunpack.c.2.s8 %v2066_v45  ;;  %v3530_v47 = vunpack.c.3.s8 %v2066_v45  ;;  %v4838_v28 = vcvt.s32.f32 %v3302_v39  ;;  %v1767_v37 = vld [vmem:[%s8946_s11 + $0x1d8] sm:$0xff] }
 0x54c   : > { %v5319_v62 = vpack.c.bf16 %v3939_v13, %v3927_v5  ;;  %v4850_v15 = vcvt.s32.f32 %v3314_v21  ;;  %v6813_v3 = vadd.f32 %v10337_v8, %v10357_v11  ;;  %7066 = vmatpush.bf16.msra.mxu2 %v5894_v53  ;;  %v2151_v58 = vunpack.c.0.s8 %v1731_v60  ;;  %v6853_v5 = vpop.f32.mrf.mxu1 }
 0x54d   : > { %7080 = vmatpush.bf16.msra.mxu3 %v5211_v57  ;;  %v5054_v6 = vcvt.s32.f32 %v3518_v19  ;;  %v5066_v25 = vcvt.s32.f32 %v3530_v47  ;;  %v2163_v52 = vunpack.c.1.s8 %v1731_v60  ;;  %v2367_v38 = vunpack.c.2.s8 %v1779_v40  ;;  %v1851_v57 = vld [vmem:[%s8946_s11 + $0x478] sm:$0xff] }
 0x54e   : > { %7092 = vmatpush.bf16.msrb.mxu0 %v5319_v62  ;;  %v5774_v31 = vpack.c.bf16 %v4850_v15, %v4838_v28  ;;  %v10370_v23 = vadd.f32 %v10331_v7, %v6813_v3  ;;  %v2379_v18 = vunpack.c.3.s8 %v1779_v40  ;;  %v3687_v27 = vcvt.s32.f32 %v2151_v58  ;;  %v10383_v28 = vld [vmem:[%s8946_s11 + $0x778] sm:$0xff] }
 0x54f   : > { %v5882_v9 = vpack.c.bf16 %v5066_v25, %v5054_v6  ;;  %v3699_v8 = vcvt.s32.f32 %v2163_v52  ;;  %v3278_v11 = vunpack.c.2.s8 %v2006_v33  ;;  %v3903_v29 = vcvt.s32.f32 %v2367_v38  ;;  %v10385_v25 = vpop.f32.mrf.mxu3 }
 0x550   : > { %7055 = vmatpush.bf16.msra.mxu1 %v5774_v31  ;;  %v3915_v17 = vcvt.s32.f32 %v2379_v18  ;;  %v3290_v4 = vunpack.c.3.s8 %v2006_v33  ;;  %v3494_v44 = vunpack.c.0.s8 %v2066_v45  ;;  %v3506_v0 = vunpack.c.1.s8 %v2066_v45 }
 0x551   : > { %7067 = vmatpush.bf16.msra.mxu2 %v5882_v9  ;;  %v5199_v60 = vpack.c.bf16 %v3699_v8, %v3687_v27  ;;  %v4814_v42 = vcvt.s32.f32 %v3278_v11  ;;  %v2127_v34 = vunpack.c.2.s8 %v1719_v48  ;;  %v2139_v14 = vunpack.c.3.s8 %v1719_v48  ;;  %v10388_v8 = vpop.f32.mrf.mxu2  ;;  %v6892_v11 = vpop.f32.mrf.mxu0 }
 0x552   : > { %v5307_v7 = vpack.c.bf16 %v3915_v17, %v3903_v29  ;;  %v4826_v43 = vcvt.s32.f32 %v3290_v4  ;;  %v5030_v55 = vcvt.s32.f32 %v3494_v44  ;;  %v5042_v54 = vcvt.s32.f32 %v3506_v0 }
 0x553   : > { %7081 = vmatpush.bf16.msra.mxu3 %v5199_v60  ;;  %v3663_v36 = vcvt.s32.f32 %v2127_v34  ;;  %v2343_v26 = vunpack.c.0.s8 %v1779_v40  ;;  %v2355_v1 = vunpack.c.1.s8 %v1779_v40  ;;  %v3675_v61 = vcvt.s32.f32 %v2139_v14 }
 0x554   : > { %7093 = vmatpush.bf16.msrb.mxu0 %v5307_v7  ;;  %v5762_v56 = vpack.c.bf16 %v4826_v43, %v4814_v42  ;;  %v3254_v35 = vunpack.c.0.s8 %v2006_v33  ;;  %v3266_v30 = vunpack.c.1.s8 %v2006_v33  ;;  %v5870_v45 = vpack.c.bf16 %v5042_v54, %v5030_v55  ;;  %v1899_v7 = vld [vmem:[%s8946_s11 + $0x5f8] sm:$0xff] }
 0x555   : > { %v3879_v46 = vcvt.s32.f32 %v2343_v26  ;;  %v3891_v49 = vcvt.s32.f32 %v2355_v1  ;;  %v3470_v59 = vunpack.c.2.s8 %v10374_v32  ;;  %v5187_v13 = vpack.c.bf16 %v3675_v61, %v3663_v36 }
 0x556   : > { %7056 = vmatpush.bf16.msra.mxu1 %v5762_v56  ;;  %v4790_v39 = vcvt.s32.f32 %v3254_v35  ;;  %v4802_v21 = vcvt.s32.f32 %v3266_v30  ;;  %v3482_v53 = vunpack.c.3.s8 %v10374_v32  ;;  %7068 = vmatpush.bf16.msra.mxu2 %v5870_v45  ;;  %v2103_v40 = vunpack.c.0.s8 %v1719_v48  ;;  %v1995_v45 = vld [vmem:[%s8946_s11 + $0x8f8] sm:$0xff] }
 0x557   : > { %v5295_v19 = vpack.c.bf16 %v3891_v49, %v3879_v46  ;;  %v5006_v47 = vcvt.s32.f32 %v3470_v59  ;;  %v2115_v62 = vunpack.c.1.s8 %v1719_v48  ;;  %7082 = vmatpush.bf16.msra.mxu3 %v5187_v13  ;;  %v2319_v33 = vunpack.c.2.s8 %v1767_v37  ;;  %v1839_v13 = vld [vmem:[%s8946_s11 + $0x418] sm:$0xff] }
 0x558   : > { %v5750_v15 = vpack.c.bf16 %v4802_v21, %v4790_v39  ;;  %v5018_v3 = vcvt.s32.f32 %v3482_v53  ;;  %v2331_v6 = vunpack.c.3.s8 %v1767_v37  ;;  %v3639_v58 = vcvt.s32.f32 %v2103_v40 }
 0x559   : > { %7094 = vmatpush.bf16.msrb.mxu0 %v5295_v19  ;;  %v3651_v52 = vcvt.s32.f32 %v2115_v62  ;;  %v2655_v31 = vunpack.c.2.s8 %v1851_v57  ;;  %v2667_v38 = vunpack.c.3.s8 %v1851_v57  ;;  %v3855_v9 = vcvt.s32.f32 %v2319_v33 }
 0x55a   : > { %7057 = vmatpush.bf16.msra.mxu1 %v5750_v15  ;;  %v5858_v18 = vpack.c.bf16 %v5018_v3, %v5006_v47  ;;  %v3867_v27 = vcvt.s32.f32 %v2331_v6  ;;  %v3039_v48 = vunpack.c.2.s8 %v10383_v28  ;;  %v3051_v44 = vunpack.c.3.s8 %v10383_v28  ;;  %v6866_v15 = vpop.f32.mrf.mxu2 }
 0x55b   : > { %v5175_v29 = vpack.c.bf16 %v3651_v52, %v3639_v58  ;;  %v4191_v17 = vcvt.s32.f32 %v2655_v31  ;;  %v4203_v4 = vcvt.s32.f32 %v2667_v38  ;;  %v3446_v0 = vunpack.c.0.s8 %v10374_v32  ;;  %v1935_v58 = vld [vmem:[%s8946_s11 + $0x718] sm:$0xff] }
 0x55c   : > { %7069 = vmatpush.bf16.msra.mxu2 %v5858_v18  ;;  %v5283_v60 = vpack.c.bf16 %v3867_v27, %v3855_v9  ;;  %v4575_v42 = vcvt.s32.f32 %v3039_v48  ;;  %v3458_v34 = vunpack.c.1.s8 %v10374_v32  ;;  %v4587_v55 = vcvt.s32.f32 %v3051_v44 }
 0x55d   : > { %7083 = vmatpush.bf16.msra.mxu3 %v5175_v29  ;;  %v5451_v43 = vpack.c.bf16 %v4203_v4, %v4191_v17  ;;  %7058 = vmatmul.bf16.vlgmr.msra.gmra.mxu1 %v9377_v16  ;;  %v2295_v14 = vunpack.c.0.s8 %v1767_v37  ;;  %v2307_v54 = vunpack.c.1.s8 %v1767_v37  ;;  %v4982_v36 = vcvt.s32.f32 %v3446_v0  ;;  %v6879_v37 = vpop.f32.mrf.mxu3 }
 0x55e   : > { %7095 = vmatpush.bf16.msrb.mxu0 %v5283_v60  ;;  %v4994_v26 = vcvt.s32.f32 %v3458_v34  ;;  %v2631_v1 = vunpack.c.0.s8 %v1851_v57  ;;  %v2643_v56 = vunpack.c.1.s8 %v1851_v57  ;;  %v5643_v61 = vpack.c.bf16 %v4587_v55, %v4575_v42  ;;  %v1887_v34 = vld [vmem:[%s8946_s11 + $0x598] sm:$0xff] }
 0x55f   : > { %7102 = vmatpush.bf16.msrb.mxu1 %v5451_v43  ;;  %v3831_v35 = vcvt.s32.f32 %v2295_v14  ;;  %v3843_v30 = vcvt.s32.f32 %v2307_v54  ;;  %v2847_v32 = vunpack.c.2.s8 %v1899_v7  ;;  %v2859_v5 = vunpack.c.3.s8 %v1899_v7 }
 0x560   : > { %v5846_v46 = vpack.c.bf16 %v4994_v26, %v4982_v36  ;;  %7084 = vmatmul.bf16.vlgmr.msra.gmra.mxu3 %v9159_v2  ;;  %v4167_v49 = vcvt.s32.f32 %v2631_v1  ;;  %v4179_v59 = vcvt.s32.f32 %v2643_v56  ;;  %v3015_v53 = vunpack.c.0.s8 %v10383_v28  ;;  %v1983_v1 = vld [vmem:[%s8946_s11 + $0x898] sm:$0xff] }
 0x561   : > { %7128 = vmatpush.bf16.msrb.mxu3 %v5643_v61  ;;  %v5271_v39 = vpack.c.bf16 %v3843_v30, %v3831_v35  ;;  %v4383_v21 = vcvt.s32.f32 %v2847_v32  ;;  %v3027_v57 = vunpack.c.1.s8 %v10383_v28  ;;  %v4395_v47 = vcvt.s32.f32 %v2859_v5  ;;  %v1827_v30 = vld [vmem:[%s8946_s11 + $0x3b8] sm:$0xff] }
 0x562   : > { %7070 = vmatpush.bf16.msra.mxu2 %v5846_v46  ;;  %v5439_v19 = vpack.c.bf16 %v4179_v59, %v4167_v49  ;;  %v3231_v40 = vunpack.c.2.s8 %v1995_v45  ;;  %v3243_v62 = vunpack.c.3.s8 %v1995_v45  ;;  %v4551_v2 = vcvt.s32.f32 %v3015_v53  ;;  %v1923_v53 = vld [vmem:[%s8946_s11 + $0x6b8] sm:$0xff] }
 0x563   : > { %7096 = vmatpush.bf16.msrb.mxu0 %v5271_v39  ;;  %v4563_v3 = vcvt.s32.f32 %v3027_v57  ;;  %v2607_v33 = vunpack.c.2.s8 %v1839_v13  ;;  %v2619_v6 = vunpack.c.3.s8 %v1839_v13  ;;  %v5547_v52 = vpack.c.bf16 %v4395_v47, %v4383_v21 }
 0x564   : > { %7103 = vmatpush.bf16.msrb.mxu1 %v5439_v19  ;;  %v4767_v31 = vcvt.s32.f32 %v3231_v40  ;;  %v4779_v38 = vcvt.s32.f32 %v3243_v62  ;;  %v2823_v18 = vunpack.c.0.s8 %v1899_v7  ;;  %v2835_v48 = vunpack.c.1.s8 %v1899_v7 }
 0x565   : > { %v5631_v9 = vpack.c.bf16 %v4563_v3, %v4551_v2  ;;  %7071 = vmatmul.bf16.vlgmr.msra.gmra.mxu2 %v9385_v41  ;;  %v4143_v28 = vcvt.s32.f32 %v2607_v33  ;;  %v4155_v27 = vcvt.s32.f32 %v2619_v6  ;;  %v2991_v17 = vunpack.c.2.s8 %v1935_v58 }
 0x566   : > { %7115 = vmatpush.bf16.msrb.mxu2 %v5547_v52  ;;  %v5739_v11 = vpack.c.bf16 %v4779_v38, %v4767_v31  ;;  %7097 = vmatmul.bf16.vlgmr.msrb.gmra.mxu0 %v9180_v24  ;;  %v4359_v29 = vcvt.s32.f32 %v2823_v18  ;;  %v3003_v4 = vunpack.c.3.s8 %v1935_v58  ;;  %v4371_v60 = vcvt.s32.f32 %v2835_v48 }
 0x567   : > { %7129 = vmatpush.bf16.msrb.mxu3 %v5631_v9  ;;  %v5427_v44 = vpack.c.bf16 %v4155_v27, %v4143_v28  ;;  %v3207_v42 = vunpack.c.0.s8 %v1995_v45  ;;  %v3219_v0 = vunpack.c.1.s8 %v1995_v45  ;;  %v4527_v43 = vcvt.s32.f32 %v2991_v17  ;;  %v10410_v28 = vld [vmem:[%s8946_s11 + $0x538] sm:$0xff]  ;;  %v10414_v17 = vld [vmem:[%s8952_s5 + $0x8] sm:$0xf] }
 0x568   : > { %7141 = vmatpush.bf16.msra.mxu0 %v5739_v11  ;;  %v4539_v55 = vcvt.s32.f32 %v3003_v4  ;;  %v6839_v7 = vadd.f32 %v10320_v63, %v10370_v23  ;;  %v2583_v14 = vunpack.c.0.s8 %v1839_v13  ;;  %v5535_v24 = vpack.c.bf16 %v4371_v60, %v4359_v29 }
 0x569   : > { %7104 = vmatpush.bf16.msrb.mxu1 %v5427_v44  ;;  %v4743_v54 = vcvt.s32.f32 %v3207_v42  ;;  %v4755_v36 = vcvt.s32.f32 %v3219_v0  ;;  %v2595_v26 = vunpack.c.1.s8 %v1839_v13  ;;  %v2799_v35 = vunpack.c.2.s8 %v1887_v34  ;;  %v10416_v0 = vpop.f32.mrf.mxu1 }
 0x56a   : > { %v5619_v56 = vpack.c.bf16 %v4539_v55, %v4527_v43  ;;  %v4119_v61 = vcvt.s32.f32 %v2583_v14  ;;  %7116 = vmatpush.bf16.msrb.mxu2 %v5535_v24  ;;  %v2811_v46 = vunpack.c.3.s8 %v1887_v34  ;;  %v2967_v49 = vunpack.c.0.s8 %v1935_v58 }
 0x56b   : > { %v5727_v32 = vpack.c.bf16 %v4755_v36, %v4743_v54  ;;  %v4131_v45 = vcvt.s32.f32 %v2595_v26  ;;  %v4335_v59 = vcvt.s32.f32 %v2799_v35  ;;  %v2979_v63 = vunpack.c.1.s8 %v1935_v58  ;;  %v1971_v26 = vld [vmem:[%s8946_s11 + $0x838] sm:$0xff] }
 0x56c   : > { %7130 = vmatpush.bf16.msrb.mxu3 %v5619_v56  ;;  %v3183_v23 = vunpack.c.2.s8 %v1983_v1  ;;  %v3195_v5 = vunpack.c.3.s8 %v1983_v1  ;;  %v4347_v39 = vcvt.s32.f32 %v2811_v46  ;;  %v4503_v13 = vcvt.s32.f32 %v2967_v49 }
 0x56d   : > { %7142 = vmatpush.bf16.msra.mxu0 %v5727_v32  ;;  %v5415_v37 = vpack.c.bf16 %v4131_v45, %v4119_v61  ;;  %v2559_v21 = vunpack.c.2.s8 %v1827_v30  ;;  %v4515_v57 = vcvt.s32.f32 %v2979_v63  ;;  %v2571_v40 = vunpack.c.3.s8 %v1827_v30  ;;  %v1815_v32 = vld [vmem:[%s8946_s11 + $0x358] sm:$0xff] }
 0x56e   : > { %v4719_v19 = vcvt.s32.f32 %v3183_v23  ;;  %v4731_v47 = vcvt.s32.f32 %v3195_v5  ;;  %v5523_v62 = vpack.c.bf16 %v4347_v39, %v4335_v59  ;;  %v2775_v2 = vunpack.c.0.s8 %v1887_v34  ;;  %v10428_v59 = vpop.f32.mrf.mxu0 }
 0x56f   : > { %7105 = vmatpush.bf16.msrb.mxu1 %v5415_v37  ;;  %v4095_v15 = vcvt.s32.f32 %v2559_v21  ;;  %v2787_v3 = vunpack.c.1.s8 %v1887_v34  ;;  %v5607_v33 = vpack.c.bf16 %v4515_v57, %v4503_v13  ;;  %v4107_v58 = vcvt.s32.f32 %v2571_v40  ;;  %v1911_v57 = vld [vmem:[%s8946_s11 + $0x658] sm:$0xff] }
 0x570   : > { %v5715_v6 = vpack.c.bf16 %v4731_v47, %v4719_v19  ;;  %v2943_v52 = vunpack.c.2.s8 %v1923_v53  ;;  %7117 = vmatpush.bf16.msrb.mxu2 %v5523_v62  ;;  %v4311_v31 = vcvt.s32.f32 %v2775_v2  ;;  %v2955_v18 = vunpack.c.3.s8 %v1923_v53 }
 0x571   : > { %v4323_v38 = vcvt.s32.f32 %v2787_v3  ;;  %v3159_v9 = vunpack.c.0.s8 %v1983_v1  ;;  %v6852_v27 = vadd.f32 %v10367_v22, %v6839_v7  ;;  %7131 = vmatpush.bf16.msrb.mxu3 %v5607_v33  ;;  %v5403_v48 = vpack.c.bf16 %v4107_v58, %v4095_v15  ;;  %v10421_v7 = vld [vmem:[%s8954_s22 + $0x8] sm:$0xf]  ;;  %v10433_v3 = vpop.f32.mrf.mxu3  ;;  %v6905_v33 = vpop.f32.mrf.mxu1 }
 0x572   : > { %7143 = vmatpush.bf16.msra.mxu0 %v5715_v6  ;;  %v4479_v11 = vcvt.s32.f32 %v2943_v52  ;;  %v3171_v29 = vunpack.c.1.s8 %v1983_v1  ;;  %v4491_v44 = vcvt.s32.f32 %v2955_v18  ;;  %v2535_v42 = vunpack.c.0.s8 %v1827_v30 }
 0x573   : > { %v5511_v4 = vpack.c.bf16 %v4323_v38, %v4311_v31  ;;  %v4695_v60 = vcvt.s32.f32 %v3159_v9  ;;  %7106 = vmatpush.bf16.msrb.mxu1 %v5403_v48  ;;  %v2547_v43 = vunpack.c.1.s8 %v1827_v30  ;;  %v2751_v22 = vunpack.c.2.s8 %v10410_v28  ;;  %v1863_v48 = vld [vmem:[%s8946_s11 + $0x4d8] sm:$0xff] }
 0x574   : > { %v4707_v34 = vcvt.s32.f32 %v3171_v29  ;;  %v2763_v55 = vunpack.c.3.s8 %v10410_v28  ;;  %v5595_v14 = vpack.c.bf16 %v4491_v44, %v4479_v11  ;;  %v4071_v24 = vcvt.s32.f32 %v2535_v42 }
 0x575   : > { %7118 = vmatpush.bf16.msrb.mxu2 %v5511_v4  ;;  %v6865_v54 = vadd.f32 %v10388_v8, %v6852_v27  ;;  %v7192_v36 = vperm.slane %v10414_v17, 0  ;;  %v4083_v56 = vcvt.s32.f32 %v2547_v43  ;;  %v4287_v61 = vcvt.s32.f32 %v2751_v22  ;;  %v1959_v43 = vld [vmem:[%s8946_s11 + $0x7d8] sm:$0xff]  ;;  %v10437_v22 = vpop.f32.mrf.mxu2 }
 0x576   : > { %v5703_v1 = vpack.c.bf16 %v4707_v34, %v4695_v60  ;;  %v4299_v35 = vcvt.s32.f32 %v2763_v55  ;;  %7132 = vmatpush.bf16.msrb.mxu3 %v5595_v14  ;;  %v7232_v45 = vperm.slane %v10421_v7, 0  ;;  %v2919_v46 = vunpack.c.0.s8 %v1923_v53  ;;  %v6944_v55 = vpop.f32.mrf.mxu0 }
 0x577   : > { %v7216_v30 = vmul.f32 %v7192_v36, %v6865_v54  ;;  %v2931_v49 = vunpack.c.1.s8 %v1923_v53  ;;  %v5391_v63 = vpack.c.bf16 %v4083_v56, %v4071_v24  ;;  %v3135_v23 = vunpack.c.2.s8 %v1971_v26 }
 0x578   : > { %7144 = vmatpush.bf16.msra.mxu0 %v5703_v1  ;;  %v5499_v8 = vpack.c.bf16 %v4299_v35, %v4287_v61  ;;  %v3147_v5 = vunpack.c.3.s8 %v1971_v26  ;;  %v4455_v39 = vcvt.s32.f32 %v2919_v46  ;;  %v2511_v21 = vunpack.c.2.s8 %v1815_v32 }
 0x579   : > { %v7256_v37 = vadd.f32 %v7232_v45, %v7216_v30  ;;  %v4467_v13 = vcvt.s32.f32 %v2931_v49  ;;  %7107 = vmatpush.bf16.msrb.mxu1 %v5391_v63  ;;  %v4671_v19 = vcvt.s32.f32 %v3135_v23  ;;  %v2523_v40 = vunpack.c.3.s8 %v1815_v32 }
 0x57a   : > { %7119 = vmatpush.bf16.msrb.mxu2 %v5499_v8  ;;  %v4683_v47 = vcvt.s32.f32 %v3147_v5  ;;  %v2727_v62 = vunpack.c.0.s8 %v10410_v28  ;;  %v4047_v15 = vcvt.s32.f32 %v2511_v21  ;;  %v2739_v2 = vunpack.c.1.s8 %v10410_v28 }
 0x57b   : > { %8330 = vtanh.f32 %v7256_v37  ;;  %v5583_v53 = vpack.c.bf16 %v4467_v13, %v4455_v39  ;;  %v4059_v58 = vcvt.s32.f32 %v2523_v40  ;;  %v2895_v31 = vunpack.c.2.s8 %v1911_v57  ;;  %v6931_v37 = vpop.f32.mrf.mxu3 }
 0x57c   : > { %v5691_v6 = vpack.c.bf16 %v4683_v47, %v4671_v19  ;;  %v4263_v52 = vcvt.s32.f32 %v2727_v62  ;;  %v4275_v38 = vcvt.s32.f32 %v2739_v2  ;;  %v2907_v18 = vunpack.c.3.s8 %v1911_v57 }
 0x57d   : > { %7133 = vmatpush.bf16.msrb.mxu3 %v5583_v53  ;;  %v3111_v9 = vunpack.c.0.s8 %v1971_v26  ;;  %v3123_v27 = vunpack.c.1.s8 %v1971_v26  ;;  %v5379_v11 = vpack.c.bf16 %v4059_v58, %v4047_v15  ;;  %v4431_v29 = vcvt.s32.f32 %v2895_v31  ;;  %v2043_v26 = vld [vmem:[%s8946_s11 + $0xa78] sm:$0xff] }
 0x57e   : > { %7145 = vmatpush.bf16.msra.mxu0 %v5691_v6  ;;  %v2487_v4 = vunpack.c.0.s8 %v1815_v32  ;;  %v2499_v28 = vunpack.c.1.s8 %v1815_v32  ;;  %v5487_v44 = vpack.c.bf16 %v4275_v38, %v4263_v52  ;;  %v4443_v60 = vcvt.s32.f32 %v2907_v18  ;;  %v2091_v53 = vld [vmem:[%s8946_s11 + $0xbf8] sm:$0xff] }
 0x57f   : > { %v4647_v42 = vcvt.s32.f32 %v3111_v9  ;;  %v4659_v34 = vcvt.s32.f32 %v3123_v27  ;;  %7108 = vmatpush.bf16.msrb.mxu1 %v5379_v11  ;;  %v2703_v54 = vunpack.c.2.s8 %v1863_v48  ;;  %v2715_v36 = vunpack.c.3.s8 %v1863_v48  ;;  %v2031_v18 = vld [vmem:[%s8946_s11 + $0xa18] sm:$0xff]  ;;  %v6918_v9 = vpop.f32.mrf.mxu2 }
 0x580   : > { %v4023_v14 = vcvt.s32.f32 %v2487_v4  ;;  %v4035_v24 = vcvt.s32.f32 %v2499_v28  ;;  %7120 = vmatpush.bf16.msrb.mxu2 %v5487_v44  ;;  %v5571_v56 = vpack.c.bf16 %v4443_v60, %v4431_v29  ;;  %v2871_v35 = vunpack.c.0.s8 %v1911_v57 }
 0x581   : > { %v8331_v1 = vpop.eup %8330  ;;  %v5679_v61 = vpack.c.bf16 %v4659_v34, %v4647_v42  ;;  %v2883_v32 = vunpack.c.1.s8 %v1911_v57  ;;  %v4239_v45 = vcvt.s32.f32 %v2703_v54  ;;  %v4251_v46 = vcvt.s32.f32 %v2715_v36  ;;  %v2079_v36 = vld [vmem:[%s8946_s11 + $0xb98] sm:$0xff] }
 0x582   : > { %7280 = vst [vmem:[%s9629_s3 + $0x40] sm:$0xff] %v8331_v1  ;;  %v5367_v30 = vpack.c.bf16 %v4035_v24, %v4023_v14  ;;  %v3087_v49 = vunpack.c.2.s8 %v1959_v43  ;;  %7134 = vmatpush.bf16.msrb.mxu3 %v5571_v56  ;;  %v4407_v63 = vcvt.s32.f32 %v2871_v35  ;;  %v3099_v23 = vunpack.c.3.s8 %v1959_v43  ;;  %v2019_v35 = vld [vmem:[%s8946_s11 + $0x9b8] sm:$0xff] }
 0x583   : > { %7146 = vmatpush.bf16.msra.mxu0 %v5679_v61  ;;  %v4419_v8 = vcvt.s32.f32 %v2883_v32  ;;  %v3423_v5 = vunpack.c.2.s8 %v2043_v26  ;;  %v5475_v39 = vpack.c.bf16 %v4251_v46, %v4239_v45  ;;  %v3435_v21 = vunpack.c.3.s8 %v2043_v26 }
 0x584   : > { %7109 = vmatpush.bf16.msrb.mxu1 %v5367_v30  ;;  %v4623_v13 = vcvt.s32.f32 %v3087_v49  ;;  %v2679_v19 = vunpack.c.0.s8 %v1863_v48  ;;  %v4635_v57 = vcvt.s32.f32 %v3099_v23  ;;  %v2691_v62 = vunpack.c.1.s8 %v1863_v48 }
 0x585   : > { %v5559_v47 = vpack.c.bf16 %v4419_v8, %v4407_v63  ;;  %v4959_v40 = vcvt.s32.f32 %v3423_v5  ;;  %7121 = vmatpush.bf16.msrb.mxu2 %v5475_v39  ;;  %v4971_v15 = vcvt.s32.f32 %v3435_v21  ;;  %v3063_v33 = vunpack.c.0.s8 %v1959_v43 }
 0x586   : > { %v4215_v2 = vcvt.s32.f32 %v2679_v19  ;;  %v3075_v6 = vunpack.c.1.s8 %v1959_v43  ;;  %v5667_v58 = vpack.c.bf16 %v4635_v57, %v4623_v13  ;;  %v4227_v52 = vcvt.s32.f32 %v2691_v62 }
 0x587   : > { %7135 = vmatpush.bf16.msrb.mxu3 %v5559_v47  ;;  %7110 = vmatmul.bf16.vlgmr.msrb.gmra.mxu1 %v9254_v50  ;;  %v3399_v31 = vunpack.c.0.s8 %v2043_v26  ;;  %v3411_v38 = vunpack.c.1.s8 %v2043_v26  ;;  %v5835_v27 = vpack.c.bf16 %v4971_v15, %v4959_v40  ;;  %v4599_v11 = vcvt.s32.f32 %v3063_v33  ;;  %v10450_v23 = vpop.f32.mrf.mxu1 }
 0x588   : > { %v4611_v29 = vcvt.s32.f32 %v3075_v6  ;;  %v3615_v4 = vunpack.c.2.s8 %v2091_v53  ;;  %7147 = vmatpush.bf16.msra.mxu0 %v5667_v58  ;;  %v5463_v48 = vpack.c.bf16 %v4227_v52, %v4215_v2  ;;  %v3627_v60 = vunpack.c.3.s8 %v2091_v53  ;;  %v2007_v58 = vld [vmem:[%s8946_s11 + $0x958] sm:$0xff] }
 0x589   : > { %v4935_v28 = vcvt.s32.f32 %v3399_v31  ;;  %v4947_v44 = vcvt.s32.f32 %v3411_v38  ;;  %7154 = vmatpush.bf16.msra.mxu1 %v5835_v27  ;;  %v3375_v34 = vunpack.c.2.s8 %v2031_v18  ;;  %v3387_v43 = vunpack.c.3.s8 %v2031_v18 }
 0x58a   : > { %7136 = vmatmul.bf16.vlgmr.msrb.gmra.mxu3 %v9335_v51  ;;  %v5655_v50 = vpack.c.bf16 %v4611_v29, %v4599_v11  ;;  %v5151_v42 = vcvt.s32.f32 %v3615_v4  ;;  %7122 = vmatpush.bf16.msrb.mxu2 %v5463_v48  ;;  %v5163_v14 = vcvt.s32.f32 %v3627_v60  ;;  %v3591_v24 = vunpack.c.0.s8 %v2091_v53 }
 0x58b   : > { %v5823_v55 = vpack.c.bf16 %v4947_v44, %v4935_v28  ;;  %v3603_v54 = vunpack.c.1.s8 %v2091_v53  ;;  %v6891_v26 = vadd.f32 %v10376_v10, %v10385_v25  ;;  %v4911_v1 = vcvt.s32.f32 %v3375_v34 }
 0x58c   : > { %v4923_v56 = vcvt.s32.f32 %v3387_v43  ;;  %v3351_v61 = vunpack.c.0.s8 %v2031_v18  ;;  %7148 = vmatpush.bf16.msra.mxu0 %v5655_v50  ;;  %v5931_v32 = vpack.c.bf16 %v5163_v14, %v5151_v42  ;;  %v5127_v51 = vcvt.s32.f32 %v3591_v24  ;;  %v2055_v43 = vld [vmem:[%s8946_s11 + $0xad8] sm:$0xff] }
 0x58d   : > { %v5139_v30 = vcvt.s32.f32 %v3603_v54  ;;  %v3363_v45 = vunpack.c.1.s8 %v2031_v18  ;;  %7155 = vmatpush.bf16.msra.mxu1 %v5823_v55  ;;  %7123 = vmatmul.bf16.vlgmr.msrb.gmra.mxu2 %v9279_v12  ;;  %v3567_v63 = vunpack.c.2.s8 %v2079_v36  ;;  %v3579_v8 = vunpack.c.3.s8 %v2079_v36  ;;  %v2067_v12 = vld [vmem:[%s8946_s11 + $0xb38] sm:$0xff] }
 0x58e   : > { %v5811_v46 = vpack.c.bf16 %v4923_v56, %v4911_v1  ;;  %v4887_v49 = vcvt.s32.f32 %v3351_v61  ;;  %7167 = vmatpush.bf16.msra.mxu2 %v5931_v32  ;;  %v3327_v5 = vunpack.c.2.s8 %v2019_v35  ;;  %v3339_v37 = vunpack.c.3.s8 %v2019_v35 }
 0x58f   : > { %v5919_v10 = vpack.c.bf16 %v5139_v30, %v5127_v51  ;;  %v4899_v25 = vcvt.s32.f32 %v3363_v45  ;;  %7149 = vmatmul.bf16.vlgmr.msra.gmra.mxu0 %v9348_v20  ;;  %v5103_v39 = vcvt.s32.f32 %v3567_v63  ;;  %v5115_v13 = vcvt.s32.f32 %v3579_v8  ;;  %v6957_v50 = vpop.f32.mrf.mxu1 }
 0x590   : > { %v3543_v21 = vunpack.c.0.s8 %v2079_v36  ;;  %v3555_v19 = vunpack.c.1.s8 %v2079_v36  ;;  %v6994_v47 = vpop.f32.mrf.mxu0  ;;  %v6981_v57 = vpop.f32.mrf.mxu3  ;;  %v4863_v40 = vcvt.s32.f32 %v3327_v5  ;;  %v4875_v62 = vcvt.s32.f32 %v3339_v37 }
 0x591   : > { %v3303_v53 = vunpack.c.0.s8 %v2019_v35  ;;  %7156 = vmatpush.bf16.msra.mxu1 %v5811_v46  ;;  %v6904_v15 = vadd.f32 %v10416_v0, %v6891_v26  ;;  %v5799_v2 = vpack.c.bf16 %v4899_v25, %v4887_v49  ;;  %v5907_v33 = vpack.c.bf16 %v5115_v13, %v5103_v39 }
 0x592   : > { %v3315_v6 = vunpack.c.1.s8 %v2019_v35  ;;  %7168 = vmatpush.bf16.msra.mxu2 %v5919_v10  ;;  %v5079_v20 = vcvt.s32.f32 %v3543_v21  ;;  %v5091_v52 = vcvt.s32.f32 %v3555_v19  ;;  %v3519_v31 = vunpack.c.2.s8 %v2067_v12 }
 0x593   : > { %v3531_v38 = vunpack.c.3.s8 %v2067_v12  ;;  %v5787_v18 = vpack.c.bf16 %v4875_v62, %v4863_v40  ;;  %v6917_v9 = vadd.f32 %v10437_v22, %v6904_v15  ;;  %v4839_v27 = vcvt.s32.f32 %v3303_v53 }
 0x594   : > { %v4851_v11 = vcvt.s32.f32 %v3315_v6  ;;  %v3279_v29 = vunpack.c.2.s8 %v2007_v58  ;;  %v3291_v4 = vunpack.c.3.s8 %v2007_v58  ;;  %v5055_v0 = vcvt.s32.f32 %v3519_v31 }
 0x595   : > { %v6968_v48 = vpop.f32.mrf.mxu2  ;;  %7157 = vmatpush.bf16.msra.mxu1 %v5799_v2  ;;  %v5067_v28 = vcvt.s32.f32 %v3531_v38  ;;  %v3495_v44 = vunpack.c.0.s8 %v2067_v12  ;;  %v3507_v60 = vunpack.c.1.s8 %v2067_v12  ;;  %v5895_v42 = vpack.c.bf16 %v5091_v52, %v5079_v20 }
 0x596   : > { %7169 = vmatpush.bf16.msra.mxu2 %v5907_v33  ;;  %v6930_v34 = vadd.f32 %v10433_v3, %v6917_v9  ;;  %v5775_v24 = vpack.c.bf16 %v4851_v11, %v4839_v27  ;;  %v4815_v22 = vcvt.s32.f32 %v3279_v29  ;;  %v4827_v54 = vcvt.s32.f32 %v3291_v4 }
 0x597   : > { %v3255_v36 = vunpack.c.0.s8 %v2007_v58  ;;  %v5883_v26 = vpack.c.bf16 %v5067_v28, %v5055_v0  ;;  %v5031_v1 = vcvt.s32.f32 %v3495_v44  ;;  %v5043_v56 = vcvt.s32.f32 %v3507_v60 }
 0x598   : > { %v6996_v55 = vpop.f32.mrf.mxu0  ;;  %v6983_v14 = vpop.f32.mrf.mxu3  ;;  %v3267_v61 = vunpack.c.1.s8 %v2007_v58  ;;  %v3471_v35 = vunpack.c.2.s8 %v2055_v43  ;;  %v3483_v32 = vunpack.c.3.s8 %v2055_v43  ;;  %v6943_v51 = vadd.f32 %v10428_v59, %v6930_v34 }
 0x599   : > { %7158 = vmatpush.bf16.msra.mxu1 %v5787_v18  ;;  %v6995_v30 = vadd.f32 %v6994_v47, %v6981_v57  ;;  %v5763_v45 = vpack.c.bf16 %v4827_v54, %v4815_v22  ;;  %v4791_v3 = vcvt.s32.f32 %v3255_v36  ;;  %v7193_v49 = vperm.slane %v10414_v17, 1 }
 0x59a   : > { %7170 = vmatpush.bf16.msra.mxu2 %v5895_v42  ;;  %v6956_v46 = vadd.f32 %v10450_v23, %v6943_v51  ;;  %v5871_v8 = vpack.c.bf16 %v5043_v56, %v5031_v1  ;;  %v4803_v10 = vcvt.s32.f32 %v3267_v61  ;;  %v3447_v25 = vunpack.c.0.s8 %v2055_v43 }
 0x59b   : > { %v3459_v5 = vunpack.c.1.s8 %v2055_v43  ;;  %v5007_v37 = vcvt.s32.f32 %v3471_v35  ;;  %v5019_v39 = vcvt.s32.f32 %v3483_v32  ;;  %v7233_v21 = vperm.slane %v10421_v7, 1 }
 0x59c   : > { %v6969_v13 = vadd.f32 %v6968_v48, %v6956_v46  ;;  %v5751_v19 = vpack.c.bf16 %v4803_v10, %v4791_v3  ;;  %v4983_v12 = vcvt.s32.f32 %v3447_v25  ;;  %v7234_v44 = vperm.slane %v10421_v7, 2 }
 0x59d   : > { %v6970_v63 = vpop.f32.mrf.mxu2  ;;  %7159 = vmatpush.bf16.msra.mxu1 %v5775_v24  ;;  %v5859_v23 = vpack.c.bf16 %v5019_v39, %v5007_v37  ;;  %v4995_v47 = vcvt.s32.f32 %v3459_v5  ;;  %v7195_v46 = vperm.slane %v10414_v17, 3 }
 0x59e   : > { %7171 = vmatpush.bf16.msra.mxu2 %v5883_v26  ;;  %v7217_v59 = vmul.f32 %v7193_v49, %v6969_v13 }
 0x59f   : > { %v5847_v40 = vpack.c.bf16 %v4995_v47, %v4983_v12 }
 0x5a0   : > { %v7257_v57 = vadd.f32 %v7233_v21, %v7217_v59 }
 0x5a1   : > { %7160 = vmatpush.bf16.msra.mxu1 %v5763_v45 }
 0x5a2   : > { %7172 = vmatpush.bf16.msra.mxu2 %v5871_v8  ;;  %8332 = vtanh.f32 %v7257_v57  ;;  %v7235_v8 = vperm.slane %v10421_v7, 3 }
 0x5a5   : > { %7161 = vmatpush.bf16.msra.mxu1 %v5751_v19 }
 0x5a6   : > { %7173 = vmatpush.bf16.msra.mxu2 %v5859_v23 }
 0x5a8   : > { %7162 = vmatmul.bf16.vlgmr.msra.gmra.mxu1 %v9377_v16  ;;  %v8333_v62 = vpop.eup %8332 }
 0x5a9   : > { %7281 = vst [vmem:[%s9629_s3 + $0x48] sm:$0xff] %v8333_v62 }
 0x5aa   : > { %7174 = vmatpush.bf16.msra.mxu2 %v5847_v40 }
 0x5ad   : > { %7175 = vmatmul.bf16.vlgmr.msra.gmra.mxu2 %v9385_v41  ;;  %v7194_v41 = vperm.slane %v10414_v17, 2 }
 0x5b1   : > { %v7007_v53 = vpop.f32.mrf.mxu1 }
 0x5b2   : > { %v7008_v38 = vadd.f32 %v7007_v53, %v6995_v30 }
 0x5b9   : > { %v7009_v15 = vpop.f32.mrf.mxu1 }
 0x5ba   : > { %v7046_v2 = vpop.f32.mrf.mxu0  ;;  %v7033_v33 = vpop.f32.mrf.mxu3 }
 0x5bf   : > { %v7020_v6 = vpop.f32.mrf.mxu2 }
 0x5c0   : > { %v7021_v18 = vadd.f32 %v7020_v6, %v7008_v38 }
 0x5c2   : > { %v7048_v58 = vpop.f32.mrf.mxu0  ;;  %v7035_v20 = vpop.f32.mrf.mxu3  ;;  %v7034_v9 = vadd.f32 %v7033_v33, %v7021_v18 }
 0x5c4   : > { %v7047_v4 = vadd.f32 %v7046_v2, %v7034_v9 }
 0x5c7   : > { %v7022_v52 = vpop.f32.mrf.mxu2 }
 0x5da   : > { %v7059_v31 = vpop.f32.mrf.mxu1 }
 0x5db   : > { %v7060_v48 = vadd.f32 %v7059_v31, %v7047_v4 }
 0x5e2   : > { %v7061_v27 = vpop.f32.mrf.mxu1 }
 0x5e3   : > { %v7098_v11 = vpop.f32.mrf.mxu0  ;;  %v7085_v16 = vpop.f32.mrf.mxu3 }
 0x5e4   : > { %v7099_v29 = vadd.f32 %v7098_v11, %v7085_v16 }
 0x5e8   : > { %v7072_v0 = vpop.f32.mrf.mxu2 }
 0x5e9   : > { %v7073_v28 = vadd.f32 %v7072_v0, %v7060_v48 }
 0x5eb   : > { %v7218_v60 = vmul.f32 %v7194_v41, %v7073_v28  ;;  %v7100_v50 = vpop.f32.mrf.mxu0  ;;  %v7087_v42 = vpop.f32.mrf.mxu3 }
 0x5ed   : > { %v7258_v34 = vadd.f32 %v7234_v44, %v7218_v60 }
 0x5ef   : > { %8334 = vtanh.f32 %v7258_v34 }
 0x5f0   : > { %v7074_v43 = vpop.f32.mrf.mxu2 }
 0x5f5   : > { %v8335_v55 = vpop.eup %8334 }
 0x5f6   : > { %7282 = vst [vmem:[%s9629_s3 + $0x50] sm:$0xff] %v8335_v55 }
 0x604   : > { %v7111_v14 = vpop.f32.mrf.mxu1 }
 0x605   : > { %v7112_v61 = vadd.f32 %v7111_v14, %v7099_v29 }
 0x60c   : > { %v7113_v24 = vpop.f32.mrf.mxu1  ;;  %v7150_v22 = vpop.f32.mrf.mxu0 }
 0x60d   : > { %v7137_v54 = vpop.f32.mrf.mxu3 }
 0x610   : > { %v7124_v36 = vpop.f32.mrf.mxu2 }
 0x611   : > { %v7125_v35 = vadd.f32 %v7124_v36, %v7112_v61 }
 0x613   : > { %v7138_v51 = vadd.f32 %v7137_v54, %v7125_v35 }
 0x614   : > { %v7152_v26 = vpop.f32.mrf.mxu0 }
 0x615   : > { %v7139_v1 = vpop.f32.mrf.mxu3  ;;  %v7151_v30 = vadd.f32 %v7150_v22, %v7138_v51 }
 0x618   : > { %v7126_v56 = vpop.f32.mrf.mxu2 }
 0x625   : > { %v7163_v32 = vpop.f32.mrf.mxu1 }
 0x626   : > { %v7164_v3 = vadd.f32 %v7163_v32, %v7151_v30 }
 0x62d   : > { %v7165_v45 = vpop.f32.mrf.mxu1 }
 0x630   : > { %v7176_v49 = vpop.f32.mrf.mxu2 }
 0x631   : > { %v7177_v63 = vadd.f32 %v7176_v49, %v7164_v3 }
 0x633   : > { %v7219_v10 = vmul.f32 %v7195_v46, %v7177_v63 }
 0x635   : > { %v7259_v25 = vadd.f32 %v7235_v8, %v7219_v10 }
 0x637   : > { %8336 = vtanh.f32 %v7259_v25 }
 0x638   : > { %v7178_v5 = vpop.f32.mrf.mxu2 }
 0x63d   : > { %v8337_v37 = vpop.eup %8336 }
 0x63e   : > { %7283 = vst [vmem:[%s9629_s3 + $0x58] sm:$0xff] %v8337_v37 }
 0x63f PF: > { %s10512_s15 = sld [smem:[#allocation24_spill]]  ;;  %p27_p3 = scmp.ge.s32.totalorder %s8825_s30, 4  }
 0x640   : > { %s10513_s27 = sld [smem:[#allocation25_spill]]  ;;  %s10514_s13 = smov %s8691_s14 }
 0x641   : > { %s10517_s16 = smov %s8825_s30 }
 0x642   :  { %29 = sbr.rel (!%p27_p3) target bundleno = 14 (0xe), region = 153 }
 0x645   : > { %s10515_s14 = smov %s10512_s15 }
 0x646   : > { %s10516_s15 = smov %s10513_s27 }
 0x647   :  { %7306 = vsyncpa [#allocation3], 1 }
 0x648   :  { %7308 = vsyncpa [#allocation3 + $0x1], 1 }
 0x649   :  { %7309 = vsyncpa [#allocation5], 1 }
 0x64a   :  { %7310 = vsyncpa [#allocation8], 1 }
 0x64b   :  { %7311 = vsyncpa [#allocation11], 1 }
 0x64c   :  { %7312 = vsyncpa [#allocation14], 1 }
 0x64d   :  { %7314 = vsyncpa [#allocation14 + $0x1], 1 }
 0x64e   :  { %7315 = vsyncpa [#allocation17], 1 }
 0x64f   :  { %7317 = vsyncpa [#allocation17 + $0x1], 1 }

</bundles_post_ra>
